<compile_context>
chip_gen: v7x
topology: tpu7x:2x2x1
jax: 0.10.0
libtpu: 0.0.40
codegen_flags: <defaults>
</compile_context>

<pallas_src>
import functools

import jax
import jax.numpy as jnp
import numpy as np
from jax import lax
from jax.experimental import pallas as pl
from jax.experimental.pallas import tpu as pltpu


def _frame_encoder_kernel(
    x_ref, ln_a_ref, ln_b2_ref, ln_bias_ref,
    w1_ref, b1_ref, w2_ref, b2_ref, wi_ref, bi_ref,
    m1_ref, m2_ref,
    o_ref,
    p1, p2,
    *, H, W, Cin, Cout, sh, pad, eps, compute_dtype):
  f32 = jnp.float32
  P = H * W
  Ho = H // sh
  Po = W * Ho
  C2i = 2 * Cin
  C2o = 2 * Cout
  Ppad = P + 2 * pad
  taps = [(dy, dx) for dy in (-1, 0, 1) for dx in (-1, 0, 1)]

  # ---- MultichannelLayerNorm over the feature (H) axis, per (w, c) ----------
  # rows are flat p = w*H + h, lanes are [re | im] channels, so the per-(w, c)
  # reduction over h is a contiguous H-row block reduce (layout no-op reshape).
  x = x_ref[...]                                            # (P, 2Cin)
  x3 = x.reshape(W, H, C2i)
  mu = jnp.mean(x3, axis=1, keepdims=True)                  # complex mean (per part)
  d = x3 - mu
  sq = d * d
  var = jnp.mean(sq[..., :Cin] + sq[..., Cin:], axis=1, keepdims=True)
  inv = lax.rsqrt(var + eps)                                # (W, 1, Cin)
  n = d * jnp.concatenate([inv, inv], axis=-1)
  n_sw = jnp.concatenate([n[..., Cin:], n[..., :Cin]], axis=-1)   # [im | re]
  y3 = (n * ln_a_ref[...][None, :, :]
        + n_sw * ln_b2_ref[...][None, :, :]
        + ln_bias_ref[...][None, :, :])
  y = y3.reshape(P, C2i)

  # ---- 3x3 complex conv: 9 shifted windows -> lane-concat im2col -> 1 matmul
  def conv3x3(src, m_ref, w_ref, b_ref, rows, stride):
    wins = []
    for dy, dx in taps:
      s = pad + dy + dx * H                                 # static start
      if stride == 1:
        win = src[pl.ds(s, rows), :]
      else:
        win = src[pl.ds(s, rows, stride=stride), :]         # strided row read
      if dy == -1:                                          # h-boundary masks
        win = win * m_ref[:, 0:1]
      elif dy == 1:
        win = win * m_ref[:, 1:2]
      wins.append(win)
    col = jnp.concatenate(wins, axis=-1)                    # (rows, 9 * Csrc)
    acc = jnp.dot(col.astype(compute_dtype), w_ref[...].astype(compute_dtype),
                  preferred_element_type=f32)
    return acc + b_ref[...]

  # conv1 (stride 1) over the LayerNorm output.
  zi = jnp.zeros((pad, C2i), f32)
  p1[0:pad, :] = zi                    # pad rows only; interior fully overwritten.
  p1[pad + P:Ppad, :] = zi             # redone each step: scratch is per-core under
  p1[pad:pad + P, :] = y               # "parallel" megacore sharding.
  h1 = conv3x3(p1, m1_ref, w1_ref, b1_ref, P, 1)            # (P, 2Cout)
  a1 = jnp.maximum(h1, 0.0)                                 # CReLU on packed re|im

  # conv2 (stride (sh, 1)) evaluated only at the kept output rows.
  zo = jnp.zeros((pad, C2o), f32)
  p2[0:pad, :] = zo
  p2[pad + P:Ppad, :] = zo
  p2[pad:pad + P, :] = a1
  h2 = conv3x3(p2, m2_ref, w2_ref, b2_ref, Po, sh)          # (Po, 2Cout)

  # 1x1 strided identity conv on raw x (kept rows only).
  xs = x if sh == 1 else x_ref[pl.ds(0, Po, stride=sh), :]  # (Po, 2Cin)
  ident = jnp.dot(xs.astype(compute_dtype), wi_ref[...].astype(compute_dtype),
                  preferred_element_type=f32) + bi_ref[...]

  out = h2 + ident                                          # (Po, 2Cout)
  o_ref[...] = out.T                                        # (2Cout, Po) lane-dense


def frame_encoder_pallas(x_c, params, *, stride=(2, 1), eps=1e-8,
                         compute_dtype=jnp.float32):
  """x_c: (B, Cin, H, W) complex64 (NCHW, like the PyTorch module)."""
  B, Cin, H, W = x_c.shape
  Cout = params['w1'].shape[0]
  sh, sw = stride
  # TODO(synk): strided fast path assumes the module defaults (sw == 1, H % sh == 0);
  # general strides would need a gather-based downsample.
  assert sw == 1 and H % sh == 0
  P = H * W
  Ho = H // sh
  Po = W * Ho
  C2i, C2o = 2 * Cin, 2 * Cout
  pad = ((H + 1 + 7) // 8) * 8               # >= H+1 and 8-sublane aligned
  f32 = jnp.float32

  # ---- pack activations: column-major spatial (p = w*H + h), lanes [re|im] --
  def flat(v):                               # (B, C, H, W) -> (B, P, C)
    return jnp.transpose(v, (0, 3, 2, 1)).reshape(B, P, Cin)

  x_pack = jnp.concatenate(
      [flat(jnp.real(x_c).astype(f32)), flat(jnp.imag(x_c).astype(f32))], axis=-1)

  # ---- LayerNorm affine, compact (H, 2Cin); complex mul via half-swap trick -
  lw_r = jnp.real(params['ln_w']).astype(f32).T             # (H, Cin)
  lw_i = jnp.imag(params['ln_w']).astype(f32).T
  lb_r = jnp.real(params['ln_b']).astype(f32).T
  lb_i = jnp.imag(params['ln_b']).astype(f32).T
  ln_a = jnp.concatenate([lw_r, lw_r], axis=1)              # (H, 2Cin)
  ln_b2 = jnp.concatenate([-lw_i, lw_i], axis=1)
  ln_bias = jnp.concatenate([lb_r, lb_i], axis=1)

  # ---- conv weights packed as real block matrices [[wr, wi], [-wi, wr]] -----
  def pack_conv3x3(w):                       # (Co, Ci, 3, 3) cplx -> (9*2Ci, 2Co)
    co, ci = w.shape[0], w.shape[1]
    wr = jnp.transpose(jnp.real(w).astype(f32), (2, 3, 1, 0)).reshape(9, ci, co)
    wi = jnp.transpose(jnp.imag(w).astype(f32), (2, 3, 1, 0)).reshape(9, ci, co)
    top = jnp.concatenate([wr, wi], axis=2)                 # (9, ci, 2co)
    bot = jnp.concatenate([-wi, wr], axis=2)
    return jnp.concatenate([top, bot], axis=1).reshape(9 * 2 * ci, 2 * co)

  def pack_1x1(w):                           # (Co, Ci, 1, 1) cplx -> (2Ci, 2Co)
    wr = jnp.real(w).astype(f32)[:, :, 0, 0].T              # (Ci, Co)
    wi = jnp.imag(w).astype(f32)[:, :, 0, 0].T
    return jnp.concatenate([jnp.concatenate([wr, wi], axis=1),
                            jnp.concatenate([-wi, wr], axis=1)], axis=0)

  def pack_bias(b):                          # (Co,) cplx -> (1, 2Co)
    return jnp.concatenate([jnp.real(b), jnp.imag(b)]).astype(f32).reshape(1, -1)

  w1p = pack_conv3x3(params['w1'])
  w2p = pack_conv3x3(params['w2'])
  wip = pack_1x1(params['wi'])
  b1p = pack_bias(params['b1'])
  b2p = pack_bias(params['b2'])
  bip = pack_bias(params['bi'])

  # ---- host-precomputed h-boundary masks (no in-kernel iota work) -----------
  h_of_p = np.arange(P) % H
  m1 = jnp.asarray(np.stack([h_of_p > 0, h_of_p < H - 1], axis=1), f32)   # (P, 2)
  h_of_q = (sh * np.arange(Po)) % H
  m2 = jnp.asarray(np.stack([h_of_q > 0, h_of_q < H - 1], axis=1), f32)   # (Po, 2)

  kernel = functools.partial(
      _frame_encoder_kernel, H=H, W=W, Cin=Cin, Cout=Cout, sh=sh, pad=pad,
      eps=eps, compute_dtype=compute_dtype)

  def fixed(shape):
    return pl.BlockSpec(shape, lambda b: (0,) * len(shape))

  grid_spec = pltpu.PrefetchScalarGridSpec(
      num_scalar_prefetch=0,
      grid=(B,),
      in_specs=[
          pl.BlockSpec((None, P, C2i), lambda b: (b, 0, 0)),      # x (batch block)
          fixed((H, C2i)), fixed((H, C2i)), fixed((H, C2i)),      # LN affine
          fixed((9 * C2i, C2o)), fixed((1, C2o)),                 # conv1 w/b
          fixed((9 * C2o, C2o)), fixed((1, C2o)),                 # conv2 w/b
          fixed((C2i, C2o)), fixed((1, C2o)),                     # identity w/b
          fixed((P, 2)), fixed((Po, 2)),                          # edge masks
      ],
      out_specs=pl.BlockSpec((None, C2o, Po), lambda b: (b, 0, 0)),
      scratch_shapes=[pltpu.VMEM((P + 2 * pad, C2i), f32),
                      pltpu.VMEM((P + 2 * pad, C2o), f32)],
  )

  out = pl.pallas_call(
      kernel,
      out_shape=jax.ShapeDtypeStruct((B, C2o, Po), f32),
      grid_spec=grid_spec,
      compiler_params=pltpu.CompilerParams(
          dimension_semantics=("parallel",),     # batch is independent -> megacore
          vmem_limit_bytes=32 * 1024 * 1024),
  )(x_pack, ln_a, ln_b2, ln_bias, w1p, b1p, w2p, b2p, wip, bip, m1, m2)

  out_c = lax.complex(out[:, :Cout, :], out[:, Cout:, :])         # (B, Cout, Po)
  return out_c.reshape(B, Cout, W, Ho).transpose(0, 1, 3, 2)      # NCHW complex64


def frame_encoder_ref(x_c, params, *, stride=(2, 1), eps=1e-8):
  """Pure-JAX reference (same math, XLA convs) for validation."""
  sh, sw = stride

  xt = jnp.swapaxes(x_c, 2, 3)                                    # (B, C, W, H)
  mu = jnp.mean(xt, axis=-1, keepdims=True)
  d = xt - mu
  var = jnp.mean(jnp.real(d) ** 2 + jnp.imag(d) ** 2, axis=-1, keepdims=True)
  nh = d / jnp.sqrt(var + eps)
  y = jnp.swapaxes(nh * params['ln_w'][None, :, None, :]
                   + params['ln_b'][None, :, None, :], 2, 3)

  def rconv(x, w, strides, padding):
    return lax.conv_general_dilated(x, w, window_strides=strides, padding=padding,
                                    dimension_numbers=('NCHW', 'OIHW', 'NCHW'))

  def cconv(x, w, b, strides, padding):
    xr, xi = jnp.real(x).astype(jnp.float32), jnp.imag(x).astype(jnp.float32)
    wr, wi = jnp.real(w).astype(jnp.float32), jnp.imag(w).astype(jnp.float32)
    ore = rconv(xr, wr, strides, padding) - rconv(xi, wi, strides, padding)
    oim = rconv(xr, wi, strides, padding) + rconv(xi, wr, strides, padding)
    br = jnp.real(b).astype(jnp.float32).reshape(1, -1, 1, 1)
    bi = jnp.imag(b).astype(jnp.float32).reshape(1, -1, 1, 1)
    return lax.complex(ore + br, oim + bi)

  h = cconv(y, params['w1'], params['b1'], (1, 1), [(1, 1), (1, 1)])
  h = lax.complex(jnp.maximum(jnp.real(h), 0.0), jnp.maximum(jnp.imag(h), 0.0))
  h = cconv(h, params['w2'], params['b2'], (sh, sw), [(1, 1), (1, 1)])
  idn = cconv(x_c, params['wi'], params['bi'], (sh, sw), [(0, 0), (0, 0)])
  return idn + h


def init_params(key, cin, cout, features):
  ks = jax.random.split(key, 16)

  def cplx(kr, ki, shape, scale):
    return (scale * jax.random.normal(kr, shape, jnp.float32)
            + 1j * scale * jax.random.normal(ki, shape, jnp.float32)).astype(jnp.complex64)

  # Module init is ln_w = 1, ln_b = 0; perturb slightly so the complex affine
  # path is actually exercised by the correctness check.
  ln_w = jnp.ones((cin, features), jnp.complex64) + cplx(ks[12], ks[13], (cin, features), 0.1)
  ln_b = cplx(ks[14], ks[15], (cin, features), 0.1)
  return dict(
      ln_w=ln_w, ln_b=ln_b,
      w1=cplx(ks[0], ks[1], (cout, cin, 3, 3), 0.1),
      b1=cplx(ks[2], ks[3], (cout,), 0.05),
      w2=cplx(ks[4], ks[5], (cout, cout, 3, 3), 0.1),
      b2=cplx(ks[6], ks[7], (cout,), 0.05),
      wi=cplx(ks[8], ks[9], (cout, cin, 1, 1), 0.1),
      bi=cplx(ks[10], ks[11], (cout,), 0.05),
  )


if __name__ == "__main__":
  B, Cin, Cout, H, W = 2, 4, 8, 16, 16     # features == H
  key = jax.random.PRNGKey(0)
  k_xr, k_xi, k_p = jax.random.split(key, 3)
  x = (jax.random.normal(k_xr, (B, Cin, H, W), jnp.float32)
       + 1j * jax.random.normal(k_xi, (B, Cin, H, W), jnp.float32)).astype(jnp.complex64)
  params = init_params(k_p, Cin, Cout, H)

  out = jax.block_until_ready(frame_encoder_pallas(x, params, stride=(2, 1)))
  ref = jax.block_until_ready(frame_encoder_ref(x, params, stride=(2, 1)))
  np.testing.assert_allclose(np.asarray(out), np.asarray(ref), rtol=1e-2, atol=1e-2)
  assert out.shape == (B, Cout, H // 2, W) and out.dtype == jnp.complex64
  print("KERNEL_OK")
</pallas_src>

<mosaic_0001>
module attributes {stable_mosaic.version = 11 : i64} {
  func.func @_frame_encoder_kernel(%arg0: i32, %arg1: memref<1x256x8xf32, #tpu.memory_space<vmem>>, %arg2: memref<16x8xf32, #tpu.memory_space<vmem>>, %arg3: memref<16x8xf32, #tpu.memory_space<vmem>>, %arg4: memref<16x8xf32, #tpu.memory_space<vmem>>, %arg5: memref<72x16xf32, #tpu.memory_space<vmem>>, %arg6: memref<1x16xf32, #tpu.memory_space<vmem>>, %arg7: memref<144x16xf32, #tpu.memory_space<vmem>>, %arg8: memref<1x16xf32, #tpu.memory_space<vmem>>, %arg9: memref<8x16xf32, #tpu.memory_space<vmem>>, %arg10: memref<1x16xf32, #tpu.memory_space<vmem>>, %arg11: memref<256x2xf32, #tpu.memory_space<vmem>>, %arg12: memref<128x2xf32, #tpu.memory_space<vmem>>, %arg13: memref<1x16x128xf32, #tpu.memory_space<vmem>>, %arg14: memref<304x8xf32, #tpu.memory_space<vmem>>, %arg15: memref<304x16xf32, #tpu.memory_space<vmem>>) attributes {dimension_semantics = [#tpu.dimension_semantics<parallel>], iteration_bounds = array<i64: 2>, scalar_prefetch = 0 : i64, scratch_operands = 2 : i64, tpu.core_type = #tpu.core_type<tc>, window_params = [{transform_indices = @transform_0, window_bounds = array<i64: 1, 256, 8>}, {pipeline_mode = #tpu.pipeline_mode<synchronous>, transform_indices = @transform_1, window_bounds = array<i64: 16, 8>}, {pipeline_mode = #tpu.pipeline_mode<synchronous>, transform_indices = @transform_2, window_bounds = array<i64: 16, 8>}, {pipeline_mode = #tpu.pipeline_mode<synchronous>, transform_indices = @transform_3, window_bounds = array<i64: 16, 8>}, {pipeline_mode = #tpu.pipeline_mode<synchronous>, transform_indices = @transform_4, window_bounds = array<i64: 72, 16>}, {pipeline_mode = #tpu.pipeline_mode<synchronous>, transform_indices = @transform_5, window_bounds = array<i64: 1, 16>}, {pipeline_mode = #tpu.pipeline_mode<synchronous>, transform_indices = @transform_6, window_bounds = array<i64: 144, 16>}, {pipeline_mode = #tpu.pipeline_mode<synchronous>, transform_indices = @transform_7, window_bounds = array<i64: 1, 16>}, {pipeline_mode = #tpu.pipeline_mode<synchronous>, transform_indices = @transform_8, window_bounds = array<i64: 8, 16>}, {pipeline_mode = #tpu.pipeline_mode<synchronous>, transform_indices = @transform_9, window_bounds = array<i64: 1, 16>}, {pipeline_mode = #tpu.pipeline_mode<synchronous>, transform_indices = @transform_10, window_bounds = array<i64: 256, 2>}, {pipeline_mode = #tpu.pipeline_mode<synchronous>, transform_indices = @transform_11, window_bounds = array<i64: 128, 2>}, {transform_indices = @transform_12, window_bounds = array<i64: 1, 16, 128>}]} {
    %c0 = arith.constant 0 : index
    %c0_0 = arith.constant 0 : index
    %c0_1 = arith.constant 0 : index
    %0 = vector.load %arg1[%c0, %c0_0, %c0_1] : memref<1x256x8xf32, #tpu.memory_space<vmem>>, vector<1x256x8xf32>
    %1 = vector.shape_cast %0 : vector<1x256x8xf32> to vector<256x8xf32>
    %2 = vector.shape_cast %1 : vector<256x8xf32> to vector<16x16x8xf32>
    %cst = arith.constant dense<0.000000e+00> : vector<16x8xf32>
    %3 = vector.multi_reduction <add>, %2, %cst [1] : vector<16x16x8xf32> to vector<16x8xf32>
    %4 = vector.shape_cast %3 : vector<16x8xf32> to vector<16x1x8xf32>
    %cst_2 = arith.constant 1.600000e+01 : f32
    %5 = vector.broadcast %cst_2 : f32 to vector<16x1x8xf32>
    %6 = arith.divf %4, %5 : vector<16x1x8xf32>
    %7 = vector.broadcast %6 : vector<16x1x8xf32> to vector<16x16x8xf32>
    %8 = arith.subf %2, %7 : vector<16x16x8xf32>
    %9 = arith.mulf %8, %8 : vector<16x16x8xf32>
    %10 = vector.extract_strided_slice %9 {offsets = [0, 0, 0], sizes = [16, 16, 4], strides = [1, 1, 1]} : vector<16x16x8xf32> to vector<16x16x4xf32>
    %11 = vector.extract_strided_slice %9 {offsets = [0, 0, 4], sizes = [16, 16, 4], strides = [1, 1, 1]} : vector<16x16x8xf32> to vector<16x16x4xf32>
    %12 = arith.addf %10, %11 : vector<16x16x4xf32>
    %cst_3 = arith.constant dense<0.000000e+00> : vector<16x4xf32>
    %13 = vector.multi_reduction <add>, %12, %cst_3 [1] : vector<16x16x4xf32> to vector<16x4xf32>
    %14 = vector.shape_cast %13 : vector<16x4xf32> to vector<16x1x4xf32>
    %cst_4 = arith.constant 1.600000e+01 : f32
    %15 = vector.broadcast %cst_4 : f32 to vector<16x1x4xf32>
    %16 = arith.divf %14, %15 : vector<16x1x4xf32>
    %cst_5 = arith.constant 9.99999993E-9 : f32
    %17 = vector.broadcast %cst_5 : f32 to vector<16x1x4xf32>
    %18 = arith.addf %16, %17 : vector<16x1x4xf32>
    %19 = math.rsqrt %18 : vector<16x1x4xf32>
    %20 = tpu.concatenate %19, %19 in 2 : vector<16x1x4xf32>, vector<16x1x4xf32> -> vector<16x1x8xf32>
    %21 = vector.broadcast %20 : vector<16x1x8xf32> to vector<16x16x8xf32>
    %22 = arith.mulf %8, %21 : vector<16x16x8xf32>
    %23 = vector.extract_strided_slice %22 {offsets = [0, 0, 4], sizes = [16, 16, 4], strides = [1, 1, 1]} : vector<16x16x8xf32> to vector<16x16x4xf32>
    %24 = vector.extract_strided_slice %22 {offsets = [0, 0, 0], sizes = [16, 16, 4], strides = [1, 1, 1]} : vector<16x16x8xf32> to vector<16x16x4xf32>
    %25 = tpu.concatenate %23, %24 in 2 : vector<16x16x4xf32>, vector<16x16x4xf32> -> vector<16x16x8xf32>
    %c0_6 = arith.constant 0 : index
    %c0_7 = arith.constant 0 : index
    %26 = vector.load %arg2[%c0_6, %c0_7] : memref<16x8xf32, #tpu.memory_space<vmem>>, vector<16x8xf32>
    %27 = vector.shape_cast %26 : vector<16x8xf32> to vector<1x16x8xf32>
    %28 = vector.broadcast %27 : vector<1x16x8xf32> to vector<16x16x8xf32>
    %29 = arith.mulf %22, %28 : vector<16x16x8xf32>
    %c0_8 = arith.constant 0 : index
    %c0_9 = arith.constant 0 : index
    %30 = vector.load %arg3[%c0_8, %c0_9] : memref<16x8xf32, #tpu.memory_space<vmem>>, vector<16x8xf32>
    %31 = vector.shape_cast %30 : vector<16x8xf32> to vector<1x16x8xf32>
    %32 = vector.broadcast %31 : vector<1x16x8xf32> to vector<16x16x8xf32>
    %33 = arith.mulf %25, %32 : vector<16x16x8xf32>
    %34 = arith.addf %29, %33 : vector<16x16x8xf32>
    %c0_10 = arith.constant 0 : index
    %c0_11 = arith.constant 0 : index
    %35 = vector.load %arg4[%c0_10, %c0_11] : memref<16x8xf32, #tpu.memory_space<vmem>>, vector<16x8xf32>
    %36 = vector.shape_cast %35 : vector<16x8xf32> to vector<1x16x8xf32>
    %37 = vector.broadcast %36 : vector<1x16x8xf32> to vector<16x16x8xf32>
    %38 = arith.addf %34, %37 : vector<16x16x8xf32>
    %39 = vector.shape_cast %38 : vector<16x16x8xf32> to vector<256x8xf32>
    %cst_12 = arith.constant 0.000000e+00 : f32
    %40 = vector.broadcast %cst_12 : f32 to vector<24x8xf32>
    %c0_13 = arith.constant 0 : index
    %c0_14 = arith.constant 0 : index
    %41 = vector.load %arg14[%c0_13, %c0_14] : memref<304x8xf32, #tpu.memory_space<vmem>>, vector<24x8xf32>
    tpu.vector_store %arg14[%c0_13, %c0_14], %40 {strides = array<i32>} : memref<304x8xf32, #tpu.memory_space<vmem>>, vector<24x8xf32>,
    %c280 = arith.constant 280 : index
    %c0_15 = arith.constant 0 : index
    %42 = vector.load %arg14[%c280, %c0_15] : memref<304x8xf32, #tpu.memory_space<vmem>>, vector<24x8xf32>
    tpu.vector_store %arg14[%c280, %c0_15], %40 {strides = array<i32>} : memref<304x8xf32, #tpu.memory_space<vmem>>, vector<24x8xf32>,
    %c24 = arith.constant 24 : index
    %c0_16 = arith.constant 0 : index
    %43 = vector.load %arg14[%c24, %c0_16] : memref<304x8xf32, #tpu.memory_space<vmem>>, vector<256x8xf32>
    tpu.vector_store %arg14[%c24, %c0_16], %39 {strides = array<i32>} : memref<304x8xf32, #tpu.memory_space<vmem>>, vector<256x8xf32>,
    %c7 = arith.constant 7 : index
    %c0_17 = arith.constant 0 : index
    %44 = vector.load %arg14[%c7, %c0_17] : memref<304x8xf32, #tpu.memory_space<vmem>>, vector<256x8xf32>
    %c0_18 = arith.constant 0 : index
    %c0_19 = arith.constant 0 : index
    %45 = vector.load %arg11[%c0_18, %c0_19] : memref<256x2xf32, #tpu.memory_space<vmem>>, vector<256x1xf32>
    %46 = vector.broadcast %45 : vector<256x1xf32> to vector<256x8xf32>
    %47 = arith.mulf %44, %46 : vector<256x8xf32>
    %c23 = arith.constant 23 : index
    %c0_20 = arith.constant 0 : index
    %48 = vector.load %arg14[%c23, %c0_20] : memref<304x8xf32, #tpu.memory_space<vmem>>, vector<256x8xf32>
    %c0_21 = arith.constant 0 : index
    %c0_22 = arith.constant 0 : index
    %49 = vector.load %arg11[%c0_21, %c0_22] : memref<256x2xf32, #tpu.memory_space<vmem>>, vector<256x1xf32>
    %50 = vector.broadcast %49 : vector<256x1xf32> to vector<256x8xf32>
    %51 = arith.mulf %48, %50 : vector<256x8xf32>
    %c39 = arith.constant 39 : index
    %c0_23 = arith.constant 0 : index
    %52 = vector.load %arg14[%c39, %c0_23] : memref<304x8xf32, #tpu.memory_space<vmem>>, vector<256x8xf32>
    %c0_24 = arith.constant 0 : index
    %c0_25 = arith.constant 0 : index
    %53 = vector.load %arg11[%c0_24, %c0_25] : memref<256x2xf32, #tpu.memory_space<vmem>>, vector<256x1xf32>
    %54 = vector.broadcast %53 : vector<256x1xf32> to vector<256x8xf32>
    %55 = arith.mulf %52, %54 : vector<256x8xf32>
    %c8 = arith.constant 8 : index
    %c0_26 = arith.constant 0 : index
    %56 = vector.load %arg14[%c8, %c0_26] : memref<304x8xf32, #tpu.memory_space<vmem>>, vector<256x8xf32>
    %c24_27 = arith.constant 24 : index
    %c0_28 = arith.constant 0 : index
    %57 = vector.load %arg14[%c24_27, %c0_28] : memref<304x8xf32, #tpu.memory_space<vmem>>, vector<256x8xf32>
    %c40 = arith.constant 40 : index
    %c0_29 = arith.constant 0 : index
    %58 = vector.load %arg14[%c40, %c0_29] : memref<304x8xf32, #tpu.memory_space<vmem>>, vector<256x8xf32>
    %c9 = arith.constant 9 : index
    %c0_30 = arith.constant 0 : index
    %59 = vector.load %arg14[%c9, %c0_30] : memref<304x8xf32, #tpu.memory_space<vmem>>, vector<256x8xf32>
    %c0_31 = arith.constant 0 : index
    %c1 = arith.constant 1 : index
    %60 = vector.load %arg11[%c0_31, %c1] : memref<256x2xf32, #tpu.memory_space<vmem>>, vector<256x1xf32>
    %61 = vector.broadcast %60 : vector<256x1xf32> to vector<256x8xf32>
    %62 = arith.mulf %59, %61 : vector<256x8xf32>
    %c25 = arith.constant 25 : index
    %c0_32 = arith.constant 0 : index
    %63 = vector.load %arg14[%c25, %c0_32] : memref<304x8xf32, #tpu.memory_space<vmem>>, vector<256x8xf32>
    %c0_33 = arith.constant 0 : index
    %c1_34 = arith.constant 1 : index
    %64 = vector.load %arg11[%c0_33, %c1_34] : memref<256x2xf32, #tpu.memory_space<vmem>>, vector<256x1xf32>
    %65 = vector.broadcast %64 : vector<256x1xf32> to vector<256x8xf32>
    %66 = arith.mulf %63, %65 : vector<256x8xf32>
    %c41 = arith.constant 41 : index
    %c0_35 = arith.constant 0 : index
    %67 = vector.load %arg14[%c41, %c0_35] : memref<304x8xf32, #tpu.memory_space<vmem>>, vector<256x8xf32>
    %c0_36 = arith.constant 0 : index
    %c1_37 = arith.constant 1 : index
    %68 = vector.load %arg11[%c0_36, %c1_37] : memref<256x2xf32, #tpu.memory_space<vmem>>, vector<256x1xf32>
    %69 = vector.broadcast %68 : vector<256x1xf32> to vector<256x8xf32>
    %70 = arith.mulf %67, %69 : vector<256x8xf32>
    %71 = tpu.concatenate %47, %51, %55, %56, %57, %58, %62, %66, %70 in 1 : vector<256x8xf32>, vector<256x8xf32>, vector<256x8xf32>, vector<256x8xf32>, vector<256x8xf32>, vector<256x8xf32>, vector<256x8xf32>, vector<256x8xf32>, vector<256x8xf32> -> vector<256x72xf32>
    %c0_38 = arith.constant 0 : index
    %c0_39 = arith.constant 0 : index
    %72 = vector.load %arg5[%c0_38, %c0_39] : memref<72x16xf32, #tpu.memory_space<vmem>>, vector<72x16xf32>
    %cst_40 = arith.constant dense<0.000000e+00> : vector<256x16xf32>
    %73 = tpu.matmul %71, %72, %cst_40 {dimension_numbers = #tpu.dot_dimension_numbers<[1], [0], [0], [1], [0, 0, 1, 1], [], []>} : vector<256x72xf32>, vector<72x16xf32>, vector<256x16xf32> -> vector<256x16xf32>
    %c0_41 = arith.constant 0 : index
    %c0_42 = arith.constant 0 : index
    %74 = vector.load %arg6[%c0_41, %c0_42] : memref<1x16xf32, #tpu.memory_space<vmem>>, vector<1x16xf32>
    %75 = vector.broadcast %74 : vector<1x16xf32> to vector<256x16xf32>
    %76 = arith.addf %73, %75 : vector<256x16xf32>
    %cst_43 = arith.constant 0.000000e+00 : f32
    %77 = vector.broadcast %cst_43 : f32 to vector<256x16xf32>
    %78 = arith.maximumf %76, %77 : vector<256x16xf32>
    %cst_44 = arith.constant 0.000000e+00 : f32
    %79 = vector.broadcast %cst_44 : f32 to vector<24x16xf32>
    %c0_45 = arith.constant 0 : index
    %c0_46 = arith.constant 0 : index
    %80 = vector.load %arg15[%c0_45, %c0_46] : memref<304x16xf32, #tpu.memory_space<vmem>>, vector<24x16xf32>
    tpu.vector_store %arg15[%c0_45, %c0_46], %79 {strides = array<i32>} : memref<304x16xf32, #tpu.memory_space<vmem>>, vector<24x16xf32>,
    %c280_47 = arith.constant 280 : index
    %c0_48 = arith.constant 0 : index
    %81 = vector.load %arg15[%c280_47, %c0_48] : memref<304x16xf32, #tpu.memory_space<vmem>>, vector<24x16xf32>
    tpu.vector_store %arg15[%c280_47, %c0_48], %79 {strides = array<i32>} : memref<304x16xf32, #tpu.memory_space<vmem>>, vector<24x16xf32>,
    %c24_49 = arith.constant 24 : index
    %c0_50 = arith.constant 0 : index
    %82 = vector.load %arg15[%c24_49, %c0_50] : memref<304x16xf32, #tpu.memory_space<vmem>>, vector<256x16xf32>
    tpu.vector_store %arg15[%c24_49, %c0_50], %78 {strides = array<i32>} : memref<304x16xf32, #tpu.memory_space<vmem>>, vector<256x16xf32>,
    %c7_51 = arith.constant 7 : index
    %c0_52 = arith.constant 0 : index
    %83 = tpu.strided_load %arg15[%c7_51, %c0_52] {strides = array<i32: 2, 1>} : memref<304x16xf32, #tpu.memory_space<vmem>>, vector<128x16xf32>
    %c0_53 = arith.constant 0 : index
    %c0_54 = arith.constant 0 : index
    %84 = vector.load %arg12[%c0_53, %c0_54] : memref<128x2xf32, #tpu.memory_space<vmem>>, vector<128x1xf32>
    %85 = vector.broadcast %84 : vector<128x1xf32> to vector<128x16xf32>
    %86 = arith.mulf %83, %85 : vector<128x16xf32>
    %c23_55 = arith.constant 23 : index
    %c0_56 = arith.constant 0 : index
    %87 = tpu.strided_load %arg15[%c23_55, %c0_56] {strides = array<i32: 2, 1>} : memref<304x16xf32, #tpu.memory_space<vmem>>, vector<128x16xf32>
    %c0_57 = arith.constant 0 : index
    %c0_58 = arith.constant 0 : index
    %88 = vector.load %arg12[%c0_57, %c0_58] : memref<128x2xf32, #tpu.memory_space<vmem>>, vector<128x1xf32>
    %89 = vector.broadcast %88 : vector<128x1xf32> to vector<128x16xf32>
    %90 = arith.mulf %87, %89 : vector<128x16xf32>
    %c39_59 = arith.constant 39 : index
    %c0_60 = arith.constant 0 : index
    %91 = tpu.strided_load %arg15[%c39_59, %c0_60] {strides = array<i32: 2, 1>} : memref<304x16xf32, #tpu.memory_space<vmem>>, vector<128x16xf32>
    %c0_61 = arith.constant 0 : index
    %c0_62 = arith.constant 0 : index
    %92 = vector.load %arg12[%c0_61, %c0_62] : memref<128x2xf32, #tpu.memory_space<vmem>>, vector<128x1xf32>
    %93 = vector.broadcast %92 : vector<128x1xf32> to vector<128x16xf32>
    %94 = arith.mulf %91, %93 : vector<128x16xf32>
    %c8_63 = arith.constant 8 : index
    %c0_64 = arith.constant 0 : index
    %95 = tpu.strided_load %arg15[%c8_63, %c0_64] {strides = array<i32: 2, 1>} : memref<304x16xf32, #tpu.memory_space<vmem>>, vector<128x16xf32>
    %c24_65 = arith.constant 24 : index
    %c0_66 = arith.constant 0 : index
    %96 = tpu.strided_load %arg15[%c24_65, %c0_66] {strides = array<i32: 2, 1>} : memref<304x16xf32, #tpu.memory_space<vmem>>, vector<128x16xf32>
    %c40_67 = arith.constant 40 : index
    %c0_68 = arith.constant 0 : index
    %97 = tpu.strided_load %arg15[%c40_67, %c0_68] {strides = array<i32: 2, 1>} : memref<304x16xf32, #tpu.memory_space<vmem>>, vector<128x16xf32>
    %c9_69 = arith.constant 9 : index
    %c0_70 = arith.constant 0 : index
    %98 = tpu.strided_load %arg15[%c9_69, %c0_70] {strides = array<i32: 2, 1>} : memref<304x16xf32, #tpu.memory_space<vmem>>, vector<128x16xf32>
    %c0_71 = arith.constant 0 : index
    %c1_72 = arith.constant 1 : index
    %99 = vector.load %arg12[%c0_71, %c1_72] : memref<128x2xf32, #tpu.memory_space<vmem>>, vector<128x1xf32>
    %100 = vector.broadcast %99 : vector<128x1xf32> to vector<128x16xf32>
    %101 = arith.mulf %98, %100 : vector<128x16xf32>
    %c25_73 = arith.constant 25 : index
    %c0_74 = arith.constant 0 : index
    %102 = tpu.strided_load %arg15[%c25_73, %c0_74] {strides = array<i32: 2, 1>} : memref<304x16xf32, #tpu.memory_space<vmem>>, vector<128x16xf32>
    %c0_75 = arith.constant 0 : index
    %c1_76 = arith.constant 1 : index
    %103 = vector.load %arg12[%c0_75, %c1_76] : memref<128x2xf32, #tpu.memory_space<vmem>>, vector<128x1xf32>
    %104 = vector.broadcast %103 : vector<128x1xf32> to vector<128x16xf32>
    %105 = arith.mulf %102, %104 : vector<128x16xf32>
    %c41_77 = arith.constant 41 : index
    %c0_78 = arith.constant 0 : index
    %106 = tpu.strided_load %arg15[%c41_77, %c0_78] {strides = array<i32: 2, 1>} : memref<304x16xf32, #tpu.memory_space<vmem>>, vector<128x16xf32>
    %c0_79 = arith.constant 0 : index
    %c1_80 = arith.constant 1 : index
    %107 = vector.load %arg12[%c0_79, %c1_80] : memref<128x2xf32, #tpu.memory_space<vmem>>, vector<128x1xf32>
    %108 = vector.broadcast %107 : vector<128x1xf32> to vector<128x16xf32>
    %109 = arith.mulf %106, %108 : vector<128x16xf32>
    %110 = tpu.concatenate %86, %90, %94, %95, %96, %97, %101, %105, %109 in 1 : vector<128x16xf32>, vector<128x16xf32>, vector<128x16xf32>, vector<128x16xf32>, vector<128x16xf32>, vector<128x16xf32>, vector<128x16xf32>, vector<128x16xf32>, vector<128x16xf32> -> vector<128x144xf32>
    %c0_81 = arith.constant 0 : index
    %c0_82 = arith.constant 0 : index
    %111 = vector.load %arg7[%c0_81, %c0_82] : memref<144x16xf32, #tpu.memory_space<vmem>>, vector<144x16xf32>
    %cst_83 = arith.constant dense<0.000000e+00> : vector<128x16xf32>
    %112 = tpu.matmul %110, %111, %cst_83 {dimension_numbers = #tpu.dot_dimension_numbers<[1], [0], [0], [1], [0, 0, 1, 1], [], []>} : vector<128x144xf32>, vector<144x16xf32>, vector<128x16xf32> -> vector<128x16xf32>
    %c0_84 = arith.constant 0 : index
    %c0_85 = arith.constant 0 : index
    %113 = vector.load %arg8[%c0_84, %c0_85] : memref<1x16xf32, #tpu.memory_space<vmem>>, vector<1x16xf32>
    %114 = vector.broadcast %113 : vector<1x16xf32> to vector<128x16xf32>
    %115 = arith.addf %112, %114 : vector<128x16xf32>
    %c0_86 = arith.constant 0 : index
    %c0_87 = arith.constant 0 : index
    %c0_88 = arith.constant 0 : index
    %116 = tpu.strided_load %arg1[%c0_86, %c0_87, %c0_88] {strides = array<i32: 1, 2, 1>} : memref<1x256x8xf32, #tpu.memory_space<vmem>>, vector<1x128x8xf32>
    %117 = vector.shape_cast %116 : vector<1x128x8xf32> to vector<128x8xf32>
    %c0_89 = arith.constant 0 : index
    %c0_90 = arith.constant 0 : index
    %118 = vector.load %arg9[%c0_89, %c0_90] : memref<8x16xf32, #tpu.memory_space<vmem>>, vector<8x16xf32>
    %cst_91 = arith.constant dense<0.000000e+00> : vector<128x16xf32>
    %119 = tpu.matmul %117, %118, %cst_91 {dimension_numbers = #tpu.dot_dimension_numbers<[1], [0], [0], [1], [0, 0, 1, 1], [], []>} : vector<128x8xf32>, vector<8x16xf32>, vector<128x16xf32> -> vector<128x16xf32>
    %c0_92 = arith.constant 0 : index
    %c0_93 = arith.constant 0 : index
    %120 = vector.load %arg10[%c0_92, %c0_93] : memref<1x16xf32, #tpu.memory_space<vmem>>, vector<1x16xf32>
    %121 = vector.broadcast %120 : vector<1x16xf32> to vector<128x16xf32>
    %122 = arith.addf %119, %121 : vector<128x16xf32>
    %123 = arith.addf %115, %122 : vector<128x16xf32>
    %124 = tpu.transpose %123, [1, 0] : vector<128x16xf32> -> vector<16x128xf32>
    %c0_94 = arith.constant 0 : index
    %c0_95 = arith.constant 0 : index
    %c0_96 = arith.constant 0 : index
    %125 = vector.load %arg13[%c0_94, %c0_95, %c0_96] : memref<1x16x128xf32, #tpu.memory_space<vmem>>, vector<1x16x128xf32>
    %126 = vector.shape_cast %125 : vector<1x16x128xf32> to vector<16x128xf32>
    %127 = vector.shape_cast %124 : vector<16x128xf32> to vector<1x16x128xf32>
    tpu.vector_store %arg13[%c0_94, %c0_95, %c0_96], %127 {strides = array<i32>} : memref<1x16x128xf32, #tpu.memory_space<vmem>>, vector<1x16x128xf32>,
    return
  }
  func.func @transform_0(%arg0: i32) -> (i32, i32, i32) {
    %c0_i32 = arith.constant 0 : i32
    %c0_i32_0 = arith.constant 0 : i32
    %c0_i32_1 = arith.constant 0 : i32
    return %arg0, %c0_i32, %c0_i32_0 : i32, i32, i32
  }
  func.func @transform_1(%arg0: i32) -> (i32, i32) {
    %c0_i32 = arith.constant 0 : i32
    %c0_i32_0 = arith.constant 0 : i32
    %c0_i32_1 = arith.constant 0 : i32
    return %c0_i32, %c0_i32_0 : i32, i32
  }
  func.func @transform_2(%arg0: i32) -> (i32, i32) {
    %c0_i32 = arith.constant 0 : i32
    %c0_i32_0 = arith.constant 0 : i32
    %c0_i32_1 = arith.constant 0 : i32
    return %c0_i32, %c0_i32_0 : i32, i32
  }
  func.func @transform_3(%arg0: i32) -> (i32, i32) {
    %c0_i32 = arith.constant 0 : i32
    %c0_i32_0 = arith.constant 0 : i32
    %c0_i32_1 = arith.constant 0 : i32
    return %c0_i32, %c0_i32_0 : i32, i32
  }
  func.func @transform_4(%arg0: i32) -> (i32, i32) {
    %c0_i32 = arith.constant 0 : i32
    %c0_i32_0 = arith.constant 0 : i32
    %c0_i32_1 = arith.constant 0 : i32
    return %c0_i32, %c0_i32_0 : i32, i32
  }
  func.func @transform_5(%arg0: i32) -> (i32, i32) {
    %c0_i32 = arith.constant 0 : i32
    %c0_i32_0 = arith.constant 0 : i32
    %c0_i32_1 = arith.constant 0 : i32
    return %c0_i32, %c0_i32_0 : i32, i32
  }
  func.func @transform_6(%arg0: i32) -> (i32, i32) {
    %c0_i32 = arith.constant 0 : i32
    %c0_i32_0 = arith.constant 0 : i32
    %c0_i32_1 = arith.constant 0 : i32
    return %c0_i32, %c0_i32_0 : i32, i32
  }
  func.func @transform_7(%arg0: i32) -> (i32, i32) {
    %c0_i32 = arith.constant 0 : i32
    %c0_i32_0 = arith.constant 0 : i32
    %c0_i32_1 = arith.constant 0 : i32
    return %c0_i32, %c0_i32_0 : i32, i32
  }
  func.func @transform_8(%arg0: i32) -> (i32, i32) {
    %c0_i32 = arith.constant 0 : i32
    %c0_i32_0 = arith.constant 0 : i32
    %c0_i32_1 = arith.constant 0 : i32
    return %c0_i32, %c0_i32_0 : i32, i32
  }
  func.func @transform_9(%arg0: i32) -> (i32, i32) {
    %c0_i32 = arith.constant 0 : i32
    %c0_i32_0 = arith.constant 0 : i32
    %c0_i32_1 = arith.constant 0 : i32
    return %c0_i32, %c0_i32_0 : i32, i32
  }
  func.func @transform_10(%arg0: i32) -> (i32, i32) {
    %c0_i32 = arith.constant 0 : i32
    %c0_i32_0 = arith.constant 0 : i32
    %c0_i32_1 = arith.constant 0 : i32
    return %c0_i32, %c0_i32_0 : i32, i32
  }
  func.func @transform_11(%arg0: i32) -> (i32, i32) {
    %c0_i32 = arith.constant 0 : i32
    %c0_i32_0 = arith.constant 0 : i32
    %c0_i32_1 = arith.constant 0 : i32
    return %c0_i32, %c0_i32_0 : i32, i32
  }
  func.func @transform_12(%arg0: i32) -> (i32, i32, i32) {
    %c0_i32 = arith.constant 0 : i32
    %c0_i32_0 = arith.constant 0 : i32
    %c0_i32_1 = arith.constant 0 : i32
    return %arg0, %c0_i32, %c0_i32_0 : i32, i32, i32
  }
}

</mosaic_0001>

<bundles_post_ra>
// kernel: tpu_custom_call.1
= control target key start
LH: loop header
LB: loop body
LE: loop exit
PB: predicated region body
PF: predicated region fallthrough
CT: control target
= control target key end

     0   :  { %s10097_s0 = inlined_call_operand.vmem [shape: f32[2,256,8], index: 0, kind: input, shape index: {}]   ;;  %s10098_s1 = inlined_call_operand.vmem [shape: f32[16,8], index: 1, kind: input, shape index: {}]   ;;  %s10099_s2 = inlined_call_operand.vmem [shape: f32[16,8], index: 2, kind: input, shape index: {}]   ;;  %s10100_s3 = inlined_call_operand.vmem [shape: f32[16,8], index: 3, kind: input, shape index: {}]   ;;  %s10101_s4 = inlined_call_operand.vmem [shape: f32[72,16], index: 4, kind: input, shape index: {}]   ;;  %s10102_s5 = inlined_call_operand.vmem [shape: f32[1,16], index: 5, kind: input, shape index: {}]   ;;  %s10103_s6 = inlined_call_operand.vmem [shape: f32[144,16], index: 6, kind: input, shape index: {}]   ;;  %s10104_s7 = inlined_call_operand.vmem [shape: f32[1,16], index: 7, kind: input, shape index: {}]   ;;  %s10105_s8 = inlined_call_operand.vmem [shape: f32[8,16], index: 8, kind: input, shape index: {}]   ;;  %s10106_s9 = inlined_call_operand.vmem [shape: f32[1,16], index: 9, kind: input, shape index: {}]   ;;  %s10107_s10 = inlined_call_operand.vmem [shape: f32[256,2], index: 10, kind: input, shape index: {}]   ;;  %s10108_s11 = inlined_call_operand.vmem [shape: f32[128,2], index: 11, kind: input, shape index: {}]   ;;  %s10109_s12 = inlined_call_operand.hbm [shape: f32[2,16,128], index: 12, kind: output, shape index: {}]  }
   0x1   :  { %10266 = sst [smem:[#allocation129_spill]] %s10097_s0 }
   0x2   :  { %17 = vsyncpa [#allocation5], 0 }
   0x3   :  { %19 = vsyncpa [#allocation5 + $0x1], 0  ;;  %s6270_s21 = smov 0   ;;  %s6272_s22 = smov 0  }
   0x4   :  { %s6274_s23 = smov 0   ;;  %s6276_s24 = smov 0  }
   0x5 LB: > { %s6291_s25 = sadd.s32 4294967295, %s6184_s24   ;;  %s5445_s26 = sadd.s32 4294967294, %s6184_s24   ;;  %s6184_s24 = sphi %s6276_s24, %s10675_s24   ;;  %s6180_s23 = sphi %s6274_s23, %s10674_s23   ;;  %s6176_s22 = sphi %s6272_s22, %s10673_s22   ;;  %s6172_s21 = sphi %s6270_s21, %s10672_s21  }
   0x6   : > { %s6295_s27 = sadd.s32 1, %s6184_s24   ;;  %s289_s28 = sadd.s32 1, %s6180_s23 }
   0x7   : > { %s286_s29 = ssub.s32 %s6184_s24, %s6295_s27  ;;  %p299_p0 = scmp.ne.s32.totalorder %s6180_s23, %s6176_s22 }
   0x8   : > { %p287_p1 = scmp.eq.s32.totalorder %s286_s29, 0  ;;  %p300_p2 = scmp.eq.s32.totalorder %s6291_s25, 1 }
   0x9   : > { %p305_p3 = scmp.ne.s32.totalorder %s6176_s22, %s6172_s21  ;;  %p306_p4 = scmp.eq.s32.totalorder %s5445_s26, 1 }
   0xa   : > { %s6306_s30 = scalar_select %p287_p1, %s6180_s23, %s289_s28  }
   0xb   : > { %p6308_p5 = por %p300_p2, %p299_p0  ;;  %p6312_p6 = por %p306_p4, %p305_p3 }
   0xc   : > { %10267 = sst [smem:[#allocation7_spill]] %s6306_s30  ;;  %p5448_p7 = scmp.ge.s32.totalorder %s6184_s24, 1 }
   0xd   : > { %p365_p8 = scmp.lt.s32.totalorder %s6184_s24, 3 }
   0xf   : > { %p366_p9 = pnand %p5448_p7, %p365_p8 }
  0x11   : > { %369 = sbr.rel (%p366_p9) target bundleno = 1942 (0x796), region = 68 }
  0x18   : > { %p407_p10 = scmp.lt.s32.totalorder %s6291_s25, 1  ;;  %v10110_v0 = vmov 0   ;;  %vm444_vm0 = vcmask 64512   ;;  %s10270_s0 = sld [smem:[#allocation129_spill]]  ;;  %vm830_vm1 = vcmask 31744   ;;  %vm3303_vm2 = vcmask 130048  }
  0x19   : > { %5793 = vset.pattern.permute.xlu1 %v10110_v0  ;;  %s10123_s20 = smov 124   ;;  %s6190_s26 = smov 4   ;;  %vm3336_vm3 = vcmask 195584   ;;  %vm3369_vm4 = vcmask 261120   ;;  %vm3402_vm5 = vcmask 326656   ;;  %vm3435_vm6 = vcmask 392192  }
  0x1a   : > { %s408_s15 = scalar_select %p407_p10, %s6291_s25, 1  ;;  %vm3468_vm7 = vcmask 457728   ;;  %vm3501_vm8 = vcmask 523264   ;;  %vm3550_vm9 = vcmask 588800   ;;  %vm4818_vm10 = vcmask 654336  }
  0x1b   : > { %s10313_s28 = smov 124   ;;  %s6194_s30 = smov 32   ;;  %vm4835_vm11 = vcmask 785408   ;;  %vm4852_vm12 = vcmask 916480  }
  0x1c   : > { %s5539_s16 = sshll.u32 %s408_s15, 8  ;;  %s10259_s15 = smov 8  }
  0x1d   : > { %s10262_s29 = smov 48   ;;  %s10264_s17 = smov 64  }
  0x1e   : > { %s6324_s19 = scalar_lea.vmem %s10270_s0, %s5539_s16  ;;  %s6192_s16 = smov 16  }
  0x1f   : > { %v6327_v1 = vld [vmem:[%s6324_s19 + $0x10] sm:$0xff]  ;;  %v6330_v2 = vld [vmem:[%s6324_s19 + $0x18] sm:$0xff]  ;;  %v6333_v3 = vld [vmem:[%s6324_s19] sm:$0xff]  ;;  %s6193_s0 = smov 24   ;;  %s10669_s18 = smov 80  }
  0x20   : > { %v454_v4 = vsel %vm444_vm0, %v6327_v1, 0.0  ;;  %v455_v5 = vsel %vm444_vm0, %v6330_v2, 0.0  ;;  %v6340_v6 = vld [vmem:[%s6324_s19 + $0x8] sm:$0xff]  ;;  %v445_v7 = vsel %vm444_vm0, %v6333_v3, 0.0  ;;  %v6345_v8 = vld [vmem:[%s6324_s19 + $0x20] sm:$0xff]  ;;  %v6357_v14 = vld [vmem:[%s6324_s19 + $0x30] sm:$0xff] }
  0x21   : > { %v6348_v9 = vld [vmem:[%s6324_s19 + $0x28] sm:$0xff]  ;;  %v456_v10 = vadd.f32 %v455_v5, %v454_v4  ;;  %v446_v11 = vsel %vm444_vm0, %v6340_v6, 0.0  ;;  %v463_v12 = vsel %vm444_vm0, %v6345_v8, 0.0  ;;  %v6360_v15 = vld [vmem:[%s6324_s19 + $0x38] sm:$0xff]  ;;  %v6363_v16 = vld [vmem:[%s6324_s19 + $0x40] sm:$0xff]  ;;  %v472_v19 = vsel %vm444_vm0, %v6357_v14, 0.0 }
  0x22   : > { %v464_v13 = vsel %vm444_vm0, %v6348_v9, 0.0  ;;  %v447_v17 = vadd.f32 %v446_v11, %v445_v7  ;;  %v473_v20 = vsel %vm444_vm0, %v6360_v15, 0.0  ;;  %v6370_v21 = vld [vmem:[%s6324_s19 + $0x48] sm:$0xff]  ;;  %v6373_v22 = vld [vmem:[%s6324_s19 + $0x50] sm:$0xff]  ;;  %v6376_v23 = vld [vmem:[%s6324_s19 + $0x58] sm:$0xff]  ;;  %v481_v26 = vsel %vm444_vm0, %v6363_v16, 0.0 }
  0x23   : > { %v465_v18 = vadd.f32 %v464_v13, %v463_v12  ;;  %v457_v24 = vrot.slane %v456_v10, 4  ;;  %v474_v25 = vadd.f32 %v473_v20, %v472_v19  ;;  %v482_v27 = vsel %vm444_vm0, %v6370_v21, 0.0  ;;  %v6383_v28 = vld [vmem:[%s6324_s19 + $0x60] sm:$0xff]  ;;  %v6388_v33 = vld [vmem:[%s6324_s19 + $0x68] sm:$0xff]  ;;  %v6391_v34 = vld [vmem:[%s6324_s19 + $0x70] sm:$0xff] }
  0x24   : > { %v448_v29 = vrot.slane %v447_v17, 4  ;;  %v483_v31 = vadd.f32 %v482_v27, %v481_v26  ;;  %v490_v32 = vsel %vm444_vm0, %v6373_v22, 0.0  ;;  %v491_v37 = vsel %vm444_vm0, %v6376_v23, 0.0  ;;  %v6398_v43 = vld [vmem:[%s6324_s19 + $0x78] sm:$0xff] }
  0x25   : > { %v466_v30 = vrot.slane %v465_v18, 4  ;;  %v458_v35 = vadd.f32 %v457_v24, %v456_v10  ;;  %v475_v36 = vrot.slane %v474_v25, 4  ;;  %v499_v38 = vsel %vm444_vm0, %v6383_v28, 0.0 }
  0x26   : > { %v449_v39 = vadd.f32 %v448_v29, %v447_v17  ;;  %v484_v41 = vrot.slane %v483_v31, 4  ;;  %v492_v42 = vadd.f32 %v491_v37, %v490_v32  ;;  %v500_v46 = vsel %vm444_vm0, %v6388_v33, 0.0 }
  0x27   : > { %v467_v40 = vadd.f32 %v466_v30, %v465_v18  ;;  %v459_v44 = vrot.slane %v458_v35, 2  ;;  %v476_v45 = vadd.f32 %v475_v36, %v474_v25  ;;  %v508_v47 = vsel %vm444_vm0, %v6391_v34, 0.0 }
  0x28   : > { %v450_v48 = vrot.slane %v449_v39, 2  ;;  %v485_v50 = vadd.f32 %v484_v41, %v483_v31  ;;  %v493_v51 = vrot.slane %v492_v42, 4  ;;  %v501_v54 = vadd.f32 %v500_v46, %v499_v38 }
  0x29   : > { %v468_v49 = vrot.slane %v467_v40, 2  ;;  %v460_v52 = vadd.f32 %v459_v44, %v458_v35  ;;  %v477_v53 = vrot.slane %v476_v45, 2  ;;  %v509_v55 = vsel %vm444_vm0, %v6398_v43, 0.0 }
  0x2a   : > { %v451_v56 = vadd.f32 %v450_v48, %v449_v39  ;;  %v486_v58 = vrot.slane %v485_v50, 2  ;;  %v494_v59 = vadd.f32 %v493_v51, %v492_v42  ;;  %v502_v62 = vrot.slane %v501_v54, 4  ;;  %v6423_v42 = vld [vmem:[%s6324_s19 + $0x80] sm:$0xff] }
  0x2b   : > { %v469_v57 = vadd.f32 %v468_v49, %v467_v40  ;;  %v461_v60 = vrot.slane %v460_v52, 1  ;;  %v478_v61 = vadd.f32 %v477_v53, %v476_v45  ;;  %v510_v63 = vadd.f32 %v509_v55, %v508_v47 }
  0x2c   : > { %v452_v4 = vrot.slane %v451_v56, 1  ;;  %v487_v7 = vadd.f32 %v486_v58, %v485_v50  ;;  %v495_v10 = vrot.slane %v494_v59, 2  ;;  %v503_v13 = vadd.f32 %v502_v62, %v501_v54 }
  0x2d   : > { %v470_v5 = vrot.slane %v469_v57, 1  ;;  %v462_v11 = vadd.f32 %v461_v60, %v460_v52  ;;  %v479_v12 = vrot.slane %v478_v61, 1  ;;  %v511_v17 = vrot.slane %v510_v63, 4 }
  0x2e   : > { %v453_v18 = vadd.f32 %v452_v4, %v451_v56  ;;  %v488_v20 = vrot.slane %v487_v7, 1  ;;  %v496_v24 = vadd.f32 %v495_v10, %v494_v59  ;;  %v504_v27 = vrot.slane %v503_v13, 2  ;;  %v6495_v10 = vld [vmem:[%s6324_s19 + $0xb0] sm:$0xff] }
  0x2f   : > { %v471_v19 = vadd.f32 %v470_v5, %v469_v57  ;;  %v591_v25 = vmul.f32 0.0625, %v462_v11  ;;  %v480_v26 = vadd.f32 %v479_v12, %v478_v61  ;;  %v512_v40 = vadd.f32 %v511_v17, %v510_v63  ;;  %v6474_v61 = vld [vmem:[%s6324_s19 + $0xa0] sm:$0xff]  ;;  %v6498_v11 = vld [vmem:[%s6324_s19 + $0xb8] sm:$0xff] }
  0x30   : > { %v590_v29 = vmul.f32 0.0625, %v453_v18  ;;  %v489_v35 = vadd.f32 %v488_v20, %v487_v7  ;;  %v497_v36 = vrot.slane %v496_v24, 1  ;;  %v505_v39 = vadd.f32 %v504_v27, %v503_v13 }
  0x31   : > { %v592_v30 = vmul.f32 0.0625, %v471_v19  ;;  %v6407_v31 = vsub.f32 %v6327_v1, %v591_v25  ;;  %v6410_v32 = vsub.f32 %v6330_v2, %v591_v25  ;;  %v593_v1 = vmul.f32 0.0625, %v480_v26  ;;  %v6426_v2 = vld [vmem:[%s6324_s19 + $0x88] sm:$0xff] }
  0x32   : > { %v6413_v37 = vsub.f32 %v6333_v3, %v590_v29  ;;  %v6416_v38 = vsub.f32 %v6340_v6, %v590_v29  ;;  %v594_v47 = vmul.f32 0.0625, %v489_v35  ;;  %v498_v48 = vadd.f32 %v497_v36, %v496_v24  ;;  %v6520_v24 = vld [vmem:[%s6324_s19 + $0xc0] sm:$0xff] }
  0x33   : > { %v6420_v41 = vmul.f32 %v6407_v31, %v6407_v31  ;;  %v6433_v6 = vsub.f32 %v6348_v9, %v592_v30  ;;  %v6436_v44 = vsub.f32 %v6345_v8, %v592_v30  ;;  %v6442_v45 = vmul.f32 %v6410_v32, %v6410_v32  ;;  %v6449_v9 = vld [vmem:[%s6324_s19 + $0x90] sm:$0xff]  ;;  %v6452_v8 = vld [vmem:[%s6324_s19 + $0x98] sm:$0xff]  ;;  %v6529_v30 = vld [vmem:[%s6324_s19 + $0xc8] sm:$0xff] }
  0x34   : > { %v6430_v3 = vmul.f32 %v6413_v37, %v6413_v37  ;;  %v6446_v46 = vmul.f32 %v6416_v38, %v6416_v38  ;;  %v506_v49 = vrot.slane %v505_v39, 1  ;;  %v513_v50 = vrot.slane %v512_v40, 2 }
  0x35   : > { %706 = vrot.lane.b32.xlu1 %v6420_v41, %s10123_s20  ;;  %v517_v51 = vsel %vm444_vm0, %v6423_v42, 0.0  ;;  %v518_v52 = vsel %vm444_vm0, %v6426_v2, 0.0  ;;  %v6461_v53 = vsub.f32 %v6360_v15, %v593_v1  ;;  %v6464_v54 = vsub.f32 %v6357_v14, %v593_v1  ;;  %v6477_v15 = vld [vmem:[%s6324_s19 + $0xa8] sm:$0xff] }
  0x36   : > { %702 = vrot.lane.b32.xlu0 %v6430_v3, %s10123_s20  ;;  %v6467_v55 = vsub.f32 %v6370_v21, %v594_v47  ;;  %v519_v56 = vadd.f32 %v518_v52, %v517_v51  ;;  %v595_v57 = vmul.f32 0.0625, %v498_v48  ;;  %v514_v58 = vadd.f32 %v513_v50, %v512_v40 }
  0x37   : > { %v526_v59 = vsel %vm444_vm0, %v6449_v9, 0.0  ;;  %v527_v60 = vsel %vm444_vm0, %v6452_v8, 0.0  ;;  %v6483_v14 = vmul.f32 %v6433_v6, %v6433_v6  ;;  %v6487_v21 = vmul.f32 %v6436_v44, %v6436_v44 }
  0x38   : > { %v6490_v62 = vsub.f32 %v6363_v16, %v594_v47  ;;  %v507_v63 = vadd.f32 %v506_v49, %v505_v39  ;;  %v515_v4 = vrot.slane %v514_v58, 1  ;;  %v520_v5 = vrot.slane %v519_v56, 4  ;;  %v6540_v49 = vld [vmem:[%s6324_s19 + $0xd0] sm:$0xff] }
  0x39   : > { %708 = vrot.lane.b32.xlu1 %v6442_v45, %s10123_s20  ;;  %v528_v7 = vadd.f32 %v527_v60, %v526_v59  ;;  %v6502_v12 = vmul.f32 %v6461_v53, %v6461_v53  ;;  %v535_v16 = vsel %vm444_vm0, %v6474_v61, 0.0  ;;  %v536_v13 = vsel %vm444_vm0, %v6477_v15, 0.0 }
  0x3a   : > { %10271 = vst [vmem:[#allocation8_spill] sm:$0xff] %v6490_v62  ;;  %704 = vrot.lane.b32.xlu0 %v6446_v46, %s10123_s20  ;;  %v6510_v17 = vmul.f32 %v6464_v54, %v6464_v54  ;;  %v6514_v18 = vmul.f32 %v6467_v55, %v6467_v55  ;;  %v6517_v19 = vsub.f32 %v6376_v23, %v595_v57  ;;  %v544_v27 = vsel %vm444_vm0, %v6495_v10, 0.0 }
  0x3b   : > { %v521_v20 = vadd.f32 %v520_v5, %v519_v56  ;;  %v529_v25 = vrot.slane %v528_v7, 4  ;;  %v537_v26 = vadd.f32 %v536_v13, %v535_v16  ;;  %v545_v29 = vsel %vm444_vm0, %v6498_v11, 0.0  ;;  %v6557_v5 = vld [vmem:[%s6324_s19 + $0xe0] sm:$0xff] }
  0x3c   : > { %10272 = vst [vmem:[#allocation9_spill] sm:$0xff] %v6517_v19  ;;  %v6535_v23 = vmul.f32 %v6490_v62, %v6490_v62  ;;  %v596_v35 = vmul.f32 0.0625, %v507_v63  ;;  %v516_v36 = vadd.f32 %v515_v4, %v514_v58  ;;  %v546_v47 = vadd.f32 %v545_v29, %v544_v27  ;;  %v6554_v4 = vld [vmem:[%s6324_s19 + $0xd8] sm:$0xff] }
  0x3d   : > { %712 = vrot.lane.b32.xlu1 %v6483_v14, %s10123_s20  ;;  %v522_v39 = vrot.slane %v521_v20, 2  ;;  %v530_v40 = vadd.f32 %v529_v25, %v528_v7  ;;  %v538_v1 = vrot.slane %v537_v26, 4  ;;  %v553_v48 = vsel %vm444_vm0, %v6520_v24, 0.0  ;;  %v6560_v7 = vld [vmem:[%s6324_s19 + $0xe8] sm:$0xff] }
  0x3e   : > { %710 = vrot.lane.b32.xlu0 %v6487_v21, %s10123_s20  ;;  %v6544_v50 = vmul.f32 %v6517_v19, %v6517_v19  ;;  %v6547_v51 = vsub.f32 %v6373_v22, %v595_v57  ;;  %v554_v56 = vsel %vm444_vm0, %v6529_v30, 0.0  ;;  %v547_v60 = vrot.slane %v546_v47, 4 }
  0x3f   : > { %v523_v52 = vadd.f32 %v522_v39, %v521_v20  ;;  %v531_v58 = vrot.slane %v530_v40, 2  ;;  %v539_v59 = vadd.f32 %v538_v1, %v537_v26  ;;  %v555_v63 = vadd.f32 %v554_v56, %v553_v48 }
  0x40   : > { %v6565_v22 = vsub.f32 %v6388_v33, %v596_v35  ;;  %v597_v57 = vmul.f32 0.0625, %v516_v36  ;;  %v562_v13 = vsel %vm444_vm0, %v6540_v49, 0.0  ;;  %v548_v26 = vadd.f32 %v547_v60, %v546_v47 }
  0x41   : > { %716 = vrot.lane.b32.xlu1 %v6502_v12, %s10123_s20  ;;  %v524_v16 = vrot.slane %v523_v52, 1  ;;  %v532_v20 = vadd.f32 %v531_v58, %v530_v40  ;;  %v540_v25 = vrot.slane %v539_v59, 2  ;;  %v556_v27 = vrot.slane %v555_v63, 4 }
  0x42   : > { %714 = vrot.lane.b32.xlu0 %v6510_v17, %s10123_s20  ;;  %v563_v39 = vsel %vm444_vm0, %v6554_v4, 0.0  ;;  %v571_v1 = vsel %vm444_vm0, %v6557_v5, 0.0  ;;  %v572_v33 = vsel %vm444_vm0, %v6560_v7, 0.0  ;;  %v549_v40 = vrot.slane %v548_v26, 2 }
  0x43   : > { %v525_v29 = vadd.f32 %v524_v16, %v523_v52  ;;  %v533_v36 = vrot.slane %v532_v20, 1  ;;  %v541_v48 = vadd.f32 %v540_v25, %v539_v59  ;;  %v557_v56 = vadd.f32 %v556_v27, %v555_v63  ;;  %v6587_v25 = vld [vmem:[%s6324_s19 + $0xf0] sm:$0xff] }
  0x44   : > { %v6581_v47 = vmul.f32 %v6547_v51, %v6547_v51  ;;  %v6584_v52 = vsub.f32 %v6383_v28, %v596_v35  ;;  %v564_v58 = vadd.f32 %v563_v39, %v562_v13  ;;  %v573_v60 = vadd.f32 %v572_v33, %v571_v1  ;;  %v6599_v13 = vld [vmem:[%s6324_s19 + $0xf8] sm:$0xff] }
  0x45   : > { %720 = vrot.lane.b32.xlu1 %v6514_v18, %s10123_s20  ;;  %v598_v16 = vmul.f32 0.0625, %v525_v29  ;;  %v534_v0 = vadd.f32 %v533_v36, %v532_v20  ;;  %v542_v19 = vrot.slane %v541_v48, 1  ;;  %v550_v62 = vadd.f32 %v549_v40, %v548_v26 }
  0x46   : > { %718 = vrot.lane.b32.xlu0 %v6535_v23, %s10123_s20  ;;  %10273 = vst [vmem:[#allocation10_spill] sm:$0xff] %v6584_v52  ;;  %v565_v59 = vrot.slane %v564_v58, 4  ;;  %v6593_v63 = vmul.f32 %v6565_v22, %v6565_v22  ;;  %v6596_v27 = vsub.f32 %v6398_v43, %v597_v57  ;;  %v558_v28 = vrot.slane %v557_v56, 2 }
  0x47   : > { %v574_v35 = vrot.slane %v573_v60, 4  ;;  %v6605_v20 = vmul.f32 %v6584_v52, %v6584_v52  ;;  %v6608_v26 = vsub.f32 %v6391_v34, %v597_v57  ;;  %v6611_v39 = vsub.f32 %v6426_v2, %v598_v16 }
  0x48   : > { %10274 = vst [vmem:[#allocation11_spill] sm:$0xff] %v6596_v27  ;;  %v566_v29 = vadd.f32 %v565_v59, %v564_v58  ;;  %v580_v43 = vsel %vm444_vm0, %v6587_v25, 0.0  ;;  %v599_v1 = vmul.f32 0.0625, %v534_v0  ;;  %v543_v33 = vadd.f32 %v542_v19, %v541_v48 }
  0x49   : > { %724 = vrot.lane.b32.xlu1 %v6544_v50, %s10123_s20  ;;  %10275 = vst [vmem:[#allocation12_spill] sm:$0xff] %v6608_v26  ;;  %v551_v36 = vrot.slane %v550_v62, 1  ;;  %v581_v40 = vsel %vm444_vm0, %v6599_v13, 0.0  ;;  %v6621_v34 = vmul.f32 %v6596_v27, %v6596_v27  ;;  %v559_v57 = vadd.f32 %v558_v28, %v557_v56 }
  0x4a   : > { %722 = vrot.lane.b32.xlu0 %v6581_v47, %s10123_s20  ;;  %v567_v58 = vrot.slane %v566_v29, 2  ;;  %v575_v2 = vadd.f32 %v574_v35, %v573_v60  ;;  %v6627_v0 = vmul.f32 %v6608_v26, %v6608_v26  ;;  %v6630_v19 = vsub.f32 %v6423_v42, %v598_v16 }
  0x4b   : > { %v582_v48 = vadd.f32 %v581_v40, %v580_v43  ;;  %v6634_v59 = vmul.f32 %v6611_v39, %v6611_v39  ;;  %v6637_v27 = vsub.f32 %v6452_v8, %v599_v1  ;;  %v600_v56 = vmul.f32 0.0625, %v543_v33 }
  0x4c   : > { %v552_v60 = vadd.f32 %v551_v36, %v550_v62  ;;  %v560_v28 = vrot.slane %v559_v57, 1  ;;  %v568_v35 = vadd.f32 %v567_v58, %v566_v29  ;;  %v576_v26 = vrot.slane %v575_v2, 2 }
  0x4d   : > { %728 = vrot.lane.b32.xlu1 %v6593_v63, %s10123_s20  ;;  %v583_v52 = vrot.slane %v582_v48, 4  ;;  %v6645_v42 = vmul.f32 %v6630_v19, %v6630_v19  ;;  %v6648_v16 = vsub.f32 %v6449_v9, %v599_v1  ;;  %v10119_v43 = vmov 1  }
  0x4e   : > { %726 = vrot.lane.b32.xlu0 %v6605_v20, %s10123_s20  ;;  %v6653_v62 = vmul.f32 %v6637_v27, %v6637_v27  ;;  %v6656_v29 = vsub.f32 %v6477_v15, %v600_v56  ;;  %v601_v33 = vmul.f32 0.0625, %v552_v60  ;;  %v561_v36 = vadd.f32 %v560_v28, %v559_v57 }
  0x4f   : > { %v584_v8 = vadd.f32 %v583_v52, %v582_v48  ;;  %5795 = vset.pattern.permute.xlu0 %v10119_v43  ;;  %v569_v40 = vrot.slane %v568_v35, 1  ;;  %v577_v58 = vadd.f32 %v576_v26, %v575_v2  ;;  %v6664_v52 = vmul.f32 %v6648_v16, %v6648_v16  ;;  %v6817_v43 = vld [vmem:[%s10107_s10 + $0x50] sm:$0xff] }
  0x50   : > { %10276 = vst [vmem:[#allocation13_spill] sm:$0xff] %v6656_v29  ;;  %v6667_v1 = vsub.f32 %v6474_v61, %v600_v56  ;;  %v6671_v15 = vmul.f32 %v6656_v29, %v6656_v29  ;;  %v6674_v48 = vsub.f32 %v6498_v11, %v601_v33  ;;  %v602_v26 = vmul.f32 0.0625, %v561_v36  ;;  %10291 = vst [vmem:[#allocation28_spill] sm:$0xff] %v6817_v43 }
  0x51   : > { %732 = vrot.lane.b32.xlu1 %v6621_v34, %s10123_s20  ;;  %v585_v9 = vrot.slane %v584_v8, 2  ;;  %v570_v57 = vadd.f32 %v569_v40, %v568_v35  ;;  %v578_v2 = vrot.slane %v577_v58, 1  ;;  %v6685_v56 = vsub.f32 %v6495_v10, %v601_v33 }
  0x52   : > { %730 = vrot.lane.b32.xlu0 %v6627_v0, %s10123_s20  ;;  %10277 = vst [vmem:[#allocation14_spill] sm:$0xff] %v6667_v1  ;;  %10278 = vst [vmem:[#allocation15_spill] sm:$0xff] %v6674_v48  ;;  %v6682_v61 = vmul.f32 %v6667_v1, %v6667_v1  ;;  %v6689_v11 = vmul.f32 %v6674_v48, %v6674_v48  ;;  %v6694_v28 = vsub.f32 %v6529_v30, %v602_v26 }
  0x53   : > { %v586_v60 = vadd.f32 %v585_v9, %v584_v8  ;;  %10279 = vst [vmem:[#allocation16_spill] sm:$0xff] %v6685_v56  ;;  %v603_v35 = vmul.f32 0.0625, %v570_v57  ;;  %v579_v8 = vadd.f32 %v578_v2, %v577_v58  ;;  %v6700_v10 = vmul.f32 %v6685_v56, %v6685_v56 }
  0x54   : > { %10280 = vst [vmem:[#allocation17_spill] sm:$0xff] %v6694_v28  ;;  %v6703_v33 = vsub.f32 %v6520_v24, %v602_v26  ;;  %v6709_v30 = vmul.f32 %v6694_v28, %v6694_v28 }
  0x55   : > { %736 = vrot.lane.b32.xlu1 %v6634_v59, %s10123_s20  ;;  %v587_v36 = vrot.slane %v586_v60, 1  ;;  %v6712_v40 = vsub.f32 %v6554_v4, %v603_v35  ;;  %v604_v58 = vmul.f32 0.0625, %v579_v8  ;;  %v6721_v24 = vsub.f32 %v6540_v49, %v603_v35 }
  0x56   : > { %734 = vrot.lane.b32.xlu0 %v6645_v42, %s10123_s20  ;;  %10281 = vst [vmem:[#allocation18_spill] sm:$0xff] %v6703_v33  ;;  %v6718_v57 = vmul.f32 %v6703_v33, %v6703_v33 }
  0x57   : > { %10282 = vst [vmem:[#allocation19_spill] sm:$0xff] %v6712_v40  ;;  %v588_v9 = vadd.f32 %v587_v36, %v586_v60  ;;  %10283 = vst [vmem:[#allocation20_spill] sm:$0xff] %v6721_v24  ;;  %v6727_v26 = vmul.f32 %v6712_v40, %v6712_v40  ;;  %v6730_v4 = vsub.f32 %v6560_v7, %v604_v58 }
  0x58   : > { %v6736_v60 = vmul.f32 %v6721_v24, %v6721_v24  ;;  %v6739_v49 = vsub.f32 %v6557_v5, %v604_v58  ;;  %v10117_v58 = vmov 0.0  }
  0x59   : > { %740 = vrot.lane.b32.xlu1 %v6653_v62, %s10123_s20  ;;  %10284 = vst [vmem:[#allocation21_spill] sm:$0xff] %v6730_v4  ;;  %v605_v2 = vmul.f32 0.0625, %v588_v9  ;;  %v6745_v35 = vmul.f32 %v6730_v4, %v6730_v4  ;;  %1590 = vst.msk [vmem:[#allocation2 + $0x8] sm:$0xff] %vm444_vm0, %v10117_v58  ;;  %v6793_v9 = vld [vmem:[%s10107_s10 + $0x10] sm:$0xff] }
  0x5a   : > { %738 = vrot.lane.b32.xlu0 %v6664_v52, %s10123_s20  ;;  %10285 = vst [vmem:[#allocation22_spill] sm:$0xff] %v6739_v49  ;;  %v6754_v8 = vmul.f32 %v6739_v49, %v6739_v49  ;;  %1591 = vst.msk [vmem:[#allocation2 + $0x10] sm:$0xff] %vm444_vm0, %v10117_v58 }
  0x5b   : > { %v6748_v7 = vsub.f32 %v6599_v13, %v605_v2  ;;  %v6757_v5 = vsub.f32 %v6587_v25, %v605_v2  ;;  %v1660_v25 = vld [vmem:[%s10107_s10 + $0x8] sm:$0xff]  ;;  %1589 = vst.msk [vmem:[#allocation2] sm:$0xff] %vm444_vm0, %v10117_v58  ;;  %1592 = vst.msk [vmem:[#allocation2 + $0x118] sm:$0xff] %vm444_vm0, %v10117_v58  ;;  %v6799_v2 = vld [vmem:[%s10107_s10 + $0x20] sm:$0xff] }
  0x5c   : > { %1593 = vst.msk [vmem:[#allocation2 + $0x120] sm:$0xff] %vm444_vm0, %v10117_v58  ;;  %1594 = vst.msk [vmem:[#allocation2 + $0x128] sm:$0xff] %vm444_vm0, %v10117_v58  ;;  %v6805_v58 = vld [vmem:[%s10107_s10 + $0x30] sm:$0xff] }
  0x5d   : > { %744 = vrot.lane.b32.xlu1 %v6671_v15, %s10123_s20  ;;  %10286 = vst [vmem:[#allocation23_spill] sm:$0xff] %v6748_v7  ;;  %10287 = vst [vmem:[#allocation24_spill] sm:$0xff] %v6757_v5  ;;  %v6763_v36 = vmul.f32 %v6748_v7, %v6748_v7  ;;  %v6769_v13 = vmul.f32 %v6757_v5, %v6757_v5  ;;  %v1679_v5 = vld [vmem:[%s10107_s10 + $0xa0] sm:$0xff] }
  0x5e   : > { %742 = vrot.lane.b32.xlu0 %v6682_v61, %s10123_s20  ;;  %10288 = vst [vmem:[#allocation25_spill] sm:$0xff] %v6799_v2  ;;  %10289 = vst [vmem:[#allocation26_spill] sm:$0xff] %v6805_v58 }
  0x61   : > { %748 = vrot.lane.b32.xlu1 %v6689_v11, %s10123_s20 }
  0x62   : > { %746 = vrot.lane.b32.xlu0 %v6700_v10, %s10123_s20 }
  0x65   : > { %752 = vrot.lane.b32.xlu1 %v6709_v30, %s10123_s20 }
  0x66   : > { %750 = vrot.lane.b32.xlu0 %v6718_v57, %s10123_s20 }
  0x69   : > { %756 = vrot.lane.b32.xlu1 %v6727_v26, %s10123_s20 }
  0x6a   : > { %754 = vrot.lane.b32.xlu0 %v6736_v60, %s10123_s20 }
  0x6d   : > { %760 = vrot.lane.b32.xlu1 %v6745_v35, %s10123_s20 }
  0x6e   : > { %758 = vrot.lane.b32.xlu0 %v6754_v8, %s10123_s20 }
  0x71   : > { %764 = vrot.lane.b32.xlu1 %v6763_v36, %s10123_s20 }
  0x72   : > { %762 = vrot.lane.b32.xlu0 %v6769_v13, %s10123_s20  ;;  %s10260_s20 = smov 80  }
  0x75   : > { %1698 = vperm.xlu1 %5793, %v1660_v25  }
  0x76   : > { %2054 = vperm.xlu0 %5795, %v1660_v25   ;;  %v6811_v25 = vld [vmem:[%s10107_s10 + $0x40] sm:$0xff] }
  0x77   : > { %10290 = vst [vmem:[#allocation27_spill] sm:$0xff] %v6811_v25 }
  0x79   : > { %1703 = vperm.xlu1 %5793, %v6793_v9  }
  0x7d   : > { %1713 = vperm.xlu1 %5793, %v6799_v2   ;;  %v6823_v2 = vld [vmem:[%s10107_s10 + $0x60] sm:$0xff] }
  0x7e   : > { %10292 = vst [vmem:[#allocation29_spill] sm:$0xff] %v6823_v2 }
  0x81   : > { %1723 = vperm.xlu1 %5793, %v6805_v58   ;;  %v1673_v58 = vld [vmem:[%s10107_s10 + $0x70] sm:$0xff] }
  0x85   : > { %1733 = vperm.xlu1 %5793, %v6811_v25   ;;  %v1675_v25 = vld [vmem:[%s10107_s10 + $0x80] sm:$0xff] }
  0x89   : > { %1743 = vperm.xlu1 %5793, %v6817_v43   ;;  %v1677_v43 = vld [vmem:[%s10107_s10 + $0x90] sm:$0xff] }
  0x8d   : > { %1753 = vperm.xlu1 %5793, %v6823_v2   ;;  %v1681_v2 = vld [vmem:[%s10107_s10 + $0xb0] sm:$0xff] }
  0x91   : > { %1763 = vperm.xlu1 %5793, %v1673_v58   ;;  %v1683_v58 = vld [vmem:[%s10107_s10 + $0xc0] sm:$0xff] }
  0x95   : > { %1773 = vperm.xlu1 %5793, %v1675_v25   ;;  %v1685_v25 = vld [vmem:[%s10107_s10 + $0xd0] sm:$0xff] }
  0x99   : > { %1783 = vperm.xlu1 %5793, %v1677_v43  }
  0x9d   : > { %1793 = vperm.xlu1 %5793, %v1679_v5   ;;  %v1687_v5 = vld [vmem:[%s10107_s10 + $0xe0] sm:$0xff] }
  0xa1   : > { %1803 = vperm.xlu1 %5793, %v1681_v2  }
  0xa5   : > { %1813 = vperm.xlu1 %5793, %v1683_v58  }
  0xa7   : > { %v707_v43 = vpop.permute.xlu1 %706 }
  0xa8   : > { %v800_v7 = vadd.f32 %v707_v43, %v6420_v41  ;;  %v703_v49 = vpop.permute.xlu0 %702 }
  0xa9   : > { %1823 = vperm.xlu1 %5793, %v1685_v25   ;;  %v798_v2 = vadd.f32 %v703_v49, %v6430_v3  ;;  %v1689_v25 = vld [vmem:[%s10107_s10 + $0xf0] sm:$0xff] }
  0xaa   : > { %v840_v24 = vsel %vm830_vm1, %v800_v7, 0.0 }
  0xab   : > { %v709_v4 = vpop.permute.xlu1 %708  ;;  %v831_v43 = vsel %vm830_vm1, %v798_v2, 0.0 }
  0xac   : > { %v801_v58 = vadd.f32 %v709_v4, %v6442_v45  ;;  %v705_v40 = vpop.permute.xlu0 %704 }
  0xad   : > { %v799_v33 = vadd.f32 %v705_v40, %v6446_v46  ;;  %1833 = vperm.xlu1 %5793, %v1687_v5  }
  0xae   : > { %v841_v41 = vsel %vm830_vm1, %v801_v58, 0.0 }
  0xaf   : > { %v842_v28 = vadd.f32 %v841_v41, %v840_v24  ;;  %v832_v3 = vsel %vm830_vm1, %v799_v33, 0.0  ;;  %v713_v49 = vpop.permute.xlu1 %712  ;;  %v1659_v33 = vld [vmem:[%s10107_s10] sm:$0xff] }
  0xb0   : > { %v833_v56 = vadd.f32 %v832_v3, %v831_v43  ;;  %v803_v7 = vadd.f32 %v713_v49, %v6483_v14  ;;  %v711_v45 = vpop.permute.xlu0 %710 }
  0xb1   : > { %v843_v4 = vrot.slane %v842_v28, 4  ;;  %v802_v46 = vadd.f32 %v711_v45, %v6487_v21  ;;  %1843 = vperm.xlu1 %5793, %v1689_v25   ;;  %v10293_v25 = vmov 1  }
  0xb2   : > { %v834_v40 = vrot.slane %v833_v56, 4  ;;  %v850_v5 = vsel %vm830_vm1, %v803_v7, 0.0 }
  0xb3   : > { %v844_v58 = vadd.f32 %v843_v4, %v842_v28  ;;  %v849_v48 = vsel %vm830_vm1, %v802_v46, 0.0  ;;  %v717_v1 = vpop.permute.xlu1 %716 }
  0xb4   : > { %v835_v24 = vadd.f32 %v834_v40, %v833_v56  ;;  %v851_v2 = vadd.f32 %v850_v5, %v849_v48  ;;  %v805_v14 = vadd.f32 %v717_v1, %v6502_v12  ;;  %v715_v41 = vpop.permute.xlu0 %714 }
  0xb5   : > { %v845_v43 = vrot.slane %v844_v58, 2  ;;  %v804_v21 = vadd.f32 %v715_v41, %v6510_v17  ;;  %5794 = vset.pattern.permute.xlu1 %v10293_v25 }
  0xb6   : > { %v836_v3 = vrot.slane %v835_v24, 2  ;;  %v852_v49 = vrot.slane %v851_v2, 4  ;;  %v859_v28 = vsel %vm830_vm1, %v805_v14, 0.0  ;;  %2050 = vperm.xlu1 %5794, %v1659_v33  }
  0xb7   : > { %v846_v7 = vadd.f32 %v845_v43, %v844_v58  ;;  %v858_v45 = vsel %vm830_vm1, %v804_v21, 0.0  ;;  %v721_v4 = vpop.permute.xlu1 %720 }
  0xb8   : > { %v837_v46 = vadd.f32 %v836_v3, %v835_v24  ;;  %v853_v56 = vadd.f32 %v852_v49, %v851_v2  ;;  %v860_v48 = vadd.f32 %v859_v28, %v858_v45  ;;  %v807_v12 = vadd.f32 %v721_v4, %v6514_v18  ;;  %v719_v1 = vpop.permute.xlu0 %718 }
  0xb9   : > { %v847_v40 = vrot.slane %v846_v7, 1  ;;  %v806_v17 = vadd.f32 %v719_v1, %v6535_v23 }
  0xba   : > { %v838_v5 = vrot.slane %v837_v46, 1  ;;  %v854_v41 = vrot.slane %v853_v56, 2  ;;  %v861_v25 = vrot.slane %v860_v48, 4  ;;  %v868_v29 = vsel %vm830_vm1, %v807_v12, 0.0  ;;  %2058 = vperm.xlu1 %5794, %v6793_v9  }
  0xbb   : > { %v848_v58 = vadd.f32 %v847_v40, %v846_v7  ;;  %v867_v33 = vsel %vm830_vm1, %v806_v17, 0.0  ;;  %v725_v14 = vpop.permute.xlu1 %724 }
  0xbc   : > { %v839_v24 = vadd.f32 %v838_v5, %v837_v46  ;;  %v855_v2 = vadd.f32 %v854_v41, %v853_v56  ;;  %v862_v43 = vadd.f32 %v861_v25, %v860_v48  ;;  %v869_v21 = vadd.f32 %v868_v29, %v867_v33  ;;  %v723_v18 = vpop.permute.xlu0 %722 }
  0xbd   : > { %v976_v3 = vmul.f32 0.0625, %v848_v58  ;;  %v809_v49 = vadd.f32 %v725_v14, %v6544_v50  ;;  %v808_v23 = vadd.f32 %v723_v18, %v6581_v47 }
  0xbe   : > { %v975_v28 = vmul.f32 0.0625, %v839_v24  ;;  %v856_v45 = vrot.slane %v855_v2, 1  ;;  %v863_v4 = vrot.slane %v862_v43, 2  ;;  %v870_v12 = vrot.slane %v869_v21, 4 }
  0xbf   : > { %v992_v1 = vadd.f32 1e-08, %v976_v3  ;;  %v877_v9 = vsel %vm830_vm1, %v809_v49, 0.0  ;;  %v876_v7 = vsel %vm830_vm1, %v808_v23, 0.0  ;;  %v729_v40 = vpop.permute.xlu1 %728 }
  0xc0   : > { %v991_v46 = vadd.f32 1e-08, %v975_v28  ;;  %v857_v56 = vadd.f32 %v856_v45, %v855_v2  ;;  %v864_v25 = vadd.f32 %v863_v4, %v862_v43  ;;  %v871_v29 = vadd.f32 %v870_v12, %v869_v21  ;;  %v727_v48 = vpop.permute.xlu0 %726 }
  0xc1   : > { %6065 = vrsqrt.f32 %v992_v1  ;;  %v878_v17 = vadd.f32 %v877_v9, %v876_v7  ;;  %v811_v50 = vadd.f32 %v729_v40, %v6593_v63  ;;  %v810_v47 = vadd.f32 %v727_v48, %v6605_v20 }
  0xc2   : > { %6067 = vrsqrt.f32 %v991_v46  ;;  %v977_v5 = vmul.f32 0.0625, %v857_v56  ;;  %v865_v41 = vrot.slane %v864_v25, 1  ;;  %v872_v58 = vrot.slane %v871_v29, 2 }
  0xc3   : > { %v879_v33 = vrot.slane %v878_v17, 4  ;;  %v886_v14 = vsel %vm830_vm1, %v811_v50, 0.0  ;;  %v885_v24 = vsel %vm830_vm1, %v810_v47, 0.0  ;;  %v733_v18 = vpop.permute.xlu1 %732 }
  0xc4   : > { %v993_v2 = vadd.f32 1e-08, %v977_v5  ;;  %v866_v43 = vadd.f32 %v865_v41, %v864_v25  ;;  %v873_v21 = vadd.f32 %v872_v58, %v871_v29  ;;  %v887_v3 = vadd.f32 %v886_v14, %v885_v24  ;;  %v731_v49 = vpop.permute.xlu0 %730 }
  0xc5   : > { %v880_v23 = vadd.f32 %v879_v33, %v878_v17  ;;  %v813_v63 = vadd.f32 %v733_v18, %v6621_v34  ;;  %v812_v20 = vadd.f32 %v731_v49, %v6627_v0 }
  0xc6   : > { %6069 = vrsqrt.f32 %v993_v2  ;;  %v978_v28 = vmul.f32 0.0625, %v866_v43  ;;  %v874_v45 = vrot.slane %v873_v21, 1  ;;  %v888_v4 = vrot.slane %v887_v3, 4 }
  0xc7   : > { %v881_v12 = vrot.slane %v880_v23, 2  ;;  %v895_v1 = vsel %vm830_vm1, %v813_v63, 0.0  ;;  %v894_v9 = vsel %vm830_vm1, %v812_v20, 0.0  ;;  %v737_v7 = vpop.permute.xlu1 %736 }
  0xc8   : > { %v994_v40 = vadd.f32 1e-08, %v978_v28  ;;  %v875_v46 = vadd.f32 %v874_v45, %v873_v21  ;;  %v889_v56 = vadd.f32 %v888_v4, %v887_v3  ;;  %v896_v25 = vadd.f32 %v895_v1, %v894_v9  ;;  %v735_v29 = vpop.permute.xlu0 %734 }
  0xc9   : > { %v882_v48 = vadd.f32 %v881_v12, %v880_v23  ;;  %v815_v34 = vadd.f32 %v737_v7, %v6634_v59  ;;  %v814_v0 = vadd.f32 %v735_v29, %v6645_v42 }
  0xca   : > { %6071 = vrsqrt.f32 %v994_v40  ;;  %v979_v17 = vmul.f32 0.0625, %v875_v46  ;;  %v890_v50 = vrot.slane %v889_v56, 2  ;;  %v897_v47 = vrot.slane %v896_v25, 4 }
  0xcb   : > { %v6892_v5 = vpop.eup %6065  ;;  %v883_v41 = vrot.slane %v882_v48, 1  ;;  %v904_v58 = vsel %vm830_vm1, %v815_v34, 0.0  ;;  %v903_v33 = vsel %vm830_vm1, %v814_v0, 0.0  ;;  %v741_v14 = vpop.permute.xlu1 %740 }
  0xcc   : > { %v6896_v24 = vpop.eup %6067  ;;  %v995_v18 = vadd.f32 1e-08, %v979_v17  ;;  %v891_v2 = vadd.f32 %v890_v50, %v889_v56  ;;  %v898_v43 = vadd.f32 %v897_v47, %v896_v25  ;;  %v905_v59 = vadd.f32 %v904_v58, %v903_v33  ;;  %v739_v21 = vpop.permute.xlu0 %738  ;;  %1041 = vrot.lane.b32.xlu1 %v6892_v5, %s6190_s26 }
  0xcd   : > { %v884_v42 = vadd.f32 %v883_v41, %v882_v48  ;;  %v817_v3 = vadd.f32 %v741_v14, %v6653_v62  ;;  %v816_v49 = vadd.f32 %v739_v21, %v6664_v52  ;;  %1039 = vrot.lane.b32.xlu0 %v6896_v24, %s6190_s26 }
  0xce   : > { %6073 = vrsqrt.f32 %v995_v18  ;;  %v892_v23 = vrot.slane %v891_v2, 1  ;;  %v899_v63 = vrot.slane %v898_v43, 2  ;;  %v906_v20 = vrot.slane %v905_v59, 4 }
  0xcf   : > { %v980_v28 = vmul.f32 0.0625, %v884_v42  ;;  %v913_v45 = vsel %vm830_vm1, %v817_v3, 0.0  ;;  %v912_v4 = vsel %vm830_vm1, %v816_v49, 0.0  ;;  %v745_v12 = vpop.permute.xlu1 %744 }
  0xd0   : > { %v6906_v1 = vpop.eup %6069  ;;  %v893_v9 = vadd.f32 %v892_v23, %v891_v2  ;;  %v900_v7 = vadd.f32 %v899_v63, %v898_v43  ;;  %v907_v62 = vadd.f32 %v906_v20, %v905_v59  ;;  %v914_v40 = vadd.f32 %v913_v45, %v912_v4  ;;  %v743_v52 = vpop.permute.xlu0 %742 }
  0xd1   : > { %v996_v46 = vadd.f32 1e-08, %v980_v28  ;;  %v819_v56 = vadd.f32 %v745_v12, %v6671_v15  ;;  %v818_v25 = vadd.f32 %v743_v52, %v6682_v61  ;;  %1043 = vrot.lane.b32.xlu0 %v6906_v1, %s6190_s26 }
  0xd2   : > { %v981_v29 = vmul.f32 0.0625, %v893_v9  ;;  %v901_v48 = vrot.slane %v900_v7, 1  ;;  %v908_v34 = vrot.slane %v907_v62, 2  ;;  %v915_v0 = vrot.slane %v914_v40, 4 }
  0xd3   : > { %6075 = vrsqrt.f32 %v996_v46  ;;  %v922_v17 = vsel %vm830_vm1, %v819_v56, 0.0  ;;  %v921_v50 = vsel %vm830_vm1, %v818_v25, 0.0  ;;  %v749_v47 = vpop.permute.xlu1 %748 }
  0xd4   : > { %v6914_v41 = vpop.eup %6071  ;;  %v997_v58 = vadd.f32 1e-08, %v981_v29  ;;  %v902_v33 = vadd.f32 %v901_v48, %v900_v7  ;;  %v909_v15 = vadd.f32 %v908_v34, %v907_v62  ;;  %v916_v14 = vadd.f32 %v915_v0, %v914_v40  ;;  %v747_v61 = vpop.permute.xlu0 %746 }
  0xd5   : > { %v923_v18 = vadd.f32 %v922_v17, %v921_v50  ;;  %v821_v2 = vadd.f32 %v749_v47, %v6689_v11  ;;  %v820_v43 = vadd.f32 %v747_v61, %v6700_v10  ;;  %1045 = vrot.lane.b32.xlu1 %v6914_v41, %s6190_s26 }
  0xd6   : > { %6077 = vrsqrt.f32 %v997_v58  ;;  %v982_v59 = vmul.f32 0.0625, %v902_v33  ;;  %v910_v21 = vrot.slane %v909_v15, 1  ;;  %v917_v42 = vrot.slane %v916_v14, 2 }
  0xd7   : > { %v924_v3 = vrot.slane %v923_v18, 4  ;;  %v931_v49 = vsel %vm830_vm1, %v821_v2, 0.0  ;;  %v930_v23 = vsel %vm830_vm1, %v820_v43, 0.0  ;;  %v753_v63 = vpop.permute.xlu1 %752 }
  0xd8   : > { %v6922_v20 = vpop.eup %6073  ;;  %v998_v28 = vadd.f32 1e-08, %v982_v59  ;;  %v911_v45 = vadd.f32 %v910_v21, %v909_v15  ;;  %v918_v11 = vadd.f32 %v917_v42, %v916_v14  ;;  %v932_v4 = vadd.f32 %v931_v49, %v930_v23  ;;  %v751_v10 = vpop.permute.xlu0 %750 }
  0xd9   : > { %v925_v12 = vadd.f32 %v924_v3, %v923_v18  ;;  %v823_v9 = vadd.f32 %v753_v63, %v6709_v30  ;;  %v822_v7 = vadd.f32 %v751_v10, %v6718_v57  ;;  %1047 = vrot.lane.b32.xlu0 %v6922_v20, %s6190_s26 }
  0xda   : > { %6079 = vrsqrt.f32 %v998_v28  ;;  %v983_v62 = vmul.f32 0.0625, %v911_v45  ;;  %v919_v40 = vrot.slane %v918_v11, 1  ;;  %v933_v52 = vrot.slane %v932_v4, 4 }
  0xdb   : > { %v926_v46 = vrot.slane %v925_v12, 2  ;;  %v940_v56 = vsel %vm830_vm1, %v823_v9, 0.0  ;;  %v939_v25 = vsel %vm830_vm1, %v822_v7, 0.0  ;;  %v757_v29 = vpop.permute.xlu1 %756 }
  0xdc   : > { %v999_v48 = vadd.f32 1e-08, %v983_v62  ;;  %v920_v34 = vadd.f32 %v919_v40, %v918_v11  ;;  %v934_v0 = vadd.f32 %v933_v52, %v932_v4  ;;  %v941_v17 = vadd.f32 %v940_v56, %v939_v25  ;;  %v755_v30 = vpop.permute.xlu0 %754 }
  0xdd   : > { %v6930_v50 = vpop.eup %6075  ;;  %v927_v57 = vadd.f32 %v926_v46, %v925_v12  ;;  %v825_v47 = vadd.f32 %v757_v29, %v6727_v26  ;;  %v824_v58 = vadd.f32 %v755_v30, %v6736_v60 }
  0xde   : > { %6081 = vrsqrt.f32 %v999_v48  ;;  %v984_v33 = vmul.f32 0.0625, %v920_v34  ;;  %v935_v15 = vrot.slane %v934_v0, 2  ;;  %v942_v14 = vrot.slane %v941_v17, 4  ;;  %1049 = vrot.lane.b32.xlu1 %v6930_v50, %s6190_s26 }
  0xdf   : > { %v928_v61 = vrot.slane %v927_v57, 1  ;;  %v949_v18 = vsel %vm830_vm1, %v825_v47, 0.0  ;;  %v948_v2 = vsel %vm830_vm1, %v824_v58, 0.0  ;;  %v761_v43 = vpop.permute.xlu1 %760 }
  0xe0   : > { %v6938_v59 = vpop.eup %6077  ;;  %v1000_v21 = vadd.f32 1e-08, %v984_v33  ;;  %v936_v42 = vadd.f32 %v935_v15, %v934_v0  ;;  %v943_v26 = vadd.f32 %v942_v14, %v941_v17  ;;  %v950_v3 = vadd.f32 %v949_v18, %v948_v2  ;;  %v759_v60 = vpop.permute.xlu0 %758 }
  0xe1   : > { %v929_v49 = vadd.f32 %v928_v61, %v927_v57  ;;  %v827_v23 = vadd.f32 %v761_v43, %v6745_v35  ;;  %v826_v63 = vadd.f32 %v759_v60, %v6754_v8  ;;  %1051 = vrot.lane.b32.xlu0 %v6938_v59, %s6190_s26 }
  0xe2   : > { %6083 = vrsqrt.f32 %v1000_v21  ;;  %v937_v28 = vrot.slane %v936_v42, 1  ;;  %v944_v45 = vrot.slane %v943_v26, 2  ;;  %v951_v11 = vrot.slane %v950_v3, 4 }
  0xe3   : > { %v985_v4 = vmul.f32 0.0625, %v929_v49  ;;  %v958_v10 = vsel %vm830_vm1, %v827_v23, 0.0  ;;  %v957_v12 = vsel %vm830_vm1, %v826_v63, 0.0  ;;  %v765_v9 = vpop.permute.xlu1 %764 }
  0xe4   : > { %v6946_v7 = vpop.eup %6079  ;;  %v938_v62 = vadd.f32 %v937_v28, %v936_v42  ;;  %v945_v40 = vadd.f32 %v944_v45, %v943_v26  ;;  %v952_v35 = vadd.f32 %v951_v11, %v950_v3  ;;  %v959_v52 = vadd.f32 %v958_v10, %v957_v12  ;;  %v763_v8 = vpop.permute.xlu0 %762 }
  0xe5   : > { %v1001_v46 = vadd.f32 1e-08, %v985_v4  ;;  %v829_v56 = vadd.f32 %v765_v9, %v6763_v36  ;;  %v828_v25 = vadd.f32 %v763_v8, %v6769_v13  ;;  %1053 = vrot.lane.b32.xlu1 %v6946_v7, %s6190_s26 }
  0xe6   : > { %v986_v29 = vmul.f32 0.0625, %v938_v62  ;;  %v946_v48 = vrot.slane %v945_v40, 1  ;;  %v953_v34 = vrot.slane %v952_v35, 2  ;;  %v960_v0 = vrot.slane %v959_v52, 4 }
  0xe7   : > { %6085 = vrsqrt.f32 %v1001_v46  ;;  %v967_v17 = vsel %vm830_vm1, %v829_v56, 0.0  ;;  %v966_v30 = vsel %vm830_vm1, %v828_v25, 0.0 }
  0xe8   : > { %v6954_v57 = vpop.eup %6081  ;;  %v1002_v47 = vadd.f32 1e-08, %v986_v29  ;;  %v947_v58 = vadd.f32 %v946_v48, %v945_v40  ;;  %v954_v33 = vadd.f32 %v953_v34, %v952_v35  ;;  %v961_v36 = vadd.f32 %v960_v0, %v959_v52 }
  0xe9   : > { %v968_v15 = vadd.f32 %v967_v17, %v966_v30  ;;  %1055 = vrot.lane.b32.xlu0 %v6954_v57, %s6190_s26 }
  0xea   : > { %6087 = vrsqrt.f32 %v1002_v47  ;;  %v987_v13 = vmul.f32 0.0625, %v947_v58  ;;  %v955_v14 = vrot.slane %v954_v33, 1  ;;  %v962_v61 = vrot.slane %v961_v36, 2 }
  0xeb   : > { %v969_v18 = vrot.slane %v968_v15, 4 }
  0xec   : > { %v6958_v2 = vpop.eup %6083  ;;  %v1003_v43 = vadd.f32 1e-08, %v987_v13  ;;  %v956_v21 = vadd.f32 %v955_v14, %v954_v33  ;;  %v963_v42 = vadd.f32 %v962_v61, %v961_v36 }
  0xed   : > { %v970_v26 = vadd.f32 %v969_v18, %v968_v15  ;;  %1057 = vrot.lane.b32.xlu1 %v6958_v2, %s6190_s26 }
  0xee   : > { %6089 = vrsqrt.f32 %v1003_v43  ;;  %v988_v3 = vmul.f32 0.0625, %v956_v21  ;;  %v964_v60 = vrot.slane %v963_v42, 1  ;;  %v1103_v43 = vlaneseq }
  0xef   : > { %v971_v49 = vrot.slane %v970_v26, 2 }
  0xf0   : > { %v1004_v23 = vadd.f32 1e-08, %v988_v3  ;;  %v965_v63 = vadd.f32 %v964_v60, %v963_v42 }
  0xf1   : > { %v6962_v28 = vpop.eup %6085  ;;  %v972_v45 = vadd.f32 %v971_v49, %v970_v26  ;;  %v1104_v26 = vshrl.u32 %v1103_v43, 7 }
  0xf2   : > { %6091 = vrsqrt.f32 %v1004_v23  ;;  %v989_v11 = vmul.f32 0.0625, %v965_v63  ;;  %1059 = vrot.lane.b32.xlu0 %v6962_v28, %s6190_s26 }
  0xf3   : > { %v973_v4 = vrot.slane %v972_v45, 1  ;;  %v7024_v3 = vsub.s32 0, %v1104_v26 }
  0xf4   : > { %v6966_v10 = vpop.eup %6087  ;;  %v1005_v12 = vadd.f32 1e-08, %v989_v11  ;;  %v6968_v9 = vpop.permute.xlu1 %1698 }
  0xf5   : > { %10294 = vst [vmem:[#allocation30_spill] sm:$0xff] %v6968_v9  ;;  %v974_v62 = vadd.f32 %v973_v4, %v972_v45  ;;  %1061 = vrot.lane.b32.xlu1 %v6966_v10, %s6190_s26  ;;  %v7022_v42 = vpop.permute.xlu0 %2054 }
  0xf6   : > { %6093 = vrsqrt.f32 %v1005_v12  ;;  %10312 = vst [vmem:[#allocation48_spill] sm:$0xff] %v7022_v42  ;;  %v7335_v42 = vld [vmem:[%s10107_s10 + $0x38] sm:$0xff] }
  0xf7   : > { %v990_v40 = vmul.f32 0.0625, %v974_v62 }
  0xf8   : > { %v6972_v35 = vpop.eup %6089  ;;  %v6974_v52 = vpop.permute.xlu1 %1703 }
  0xf9   : > { %10295 = vst [vmem:[#allocation31_spill] sm:$0xff] %v6974_v52  ;;  %v1006_v8 = vadd.f32 1e-08, %v990_v40  ;;  %1063 = vrot.lane.b32.xlu0 %v6972_v35, %s6190_s26 }
  0xfb   : > { %6095 = vrsqrt.f32 %v1006_v8 }
  0xfc   : > { %v6978_v46 = vpop.eup %6091  ;;  %v6980_v56 = vpop.permute.xlu1 %1713 }
  0xfd   : > { %10296 = vst [vmem:[#allocation32_spill] sm:$0xff] %v6980_v56  ;;  %1065 = vrot.lane.b32.xlu1 %v6978_v46, %s6190_s26 }
 0x100   : > { %v6984_v25 = vpop.eup %6093  ;;  %v6986_v29 = vpop.permute.xlu1 %1723 }
 0x101   : > { %10297 = vst [vmem:[#allocation33_spill] sm:$0xff] %v6986_v29  ;;  %1067 = vrot.lane.b32.xlu0 %v6984_v25, %s6190_s26  ;;  %v6098_v29 = vld [vmem:[%s10107_s10 + $0x80] sm:$0xff] }
 0x104   : > { %v6990_v48 = vpop.permute.xlu1 %1733 }
 0x105   : > { %10298 = vst [vmem:[#allocation34_spill] sm:$0xff] %v6990_v48  ;;  %v6992_v34 = vpop.eup %6095 }
 0x106   : > { %1069 = vrot.lane.b32.xlu1 %v6992_v34, %s6190_s26 }
 0x108   : > { %v6996_v0 = vpop.permute.xlu1 %1743 }
 0x109   : > { %10299 = vst [vmem:[#allocation35_spill] sm:$0xff] %v6996_v0 }
 0x10c   : > { %v6998_v17 = vpop.permute.xlu1 %1753 }
 0x10d   : > { %10300 = vst [vmem:[#allocation36_spill] sm:$0xff] %v6998_v17  ;;  %v6097_v17 = vld [vmem:[%s10107_s10 + $0x70] sm:$0xff] }
 0x110   : > { %v7000_v30 = vpop.permute.xlu1 %1763 }
 0x111   : > { %10301 = vst [vmem:[#allocation37_spill] sm:$0xff] %v7000_v30 }
 0x114   : > { %v7002_v47 = vpop.permute.xlu1 %1773 }
 0x115   : > { %10302 = vst [vmem:[#allocation38_spill] sm:$0xff] %v7002_v47  ;;  %v7368_v47 = vld [vmem:[%s10107_s10 + $0x68] sm:$0xff] }
 0x118   : > { %v7004_v58 = vpop.permute.xlu1 %1783 }
 0x119   : > { %10303 = vst [vmem:[#allocation39_spill] sm:$0xff] %v7004_v58  ;;  %v10347_v58 = vld [vmem:[#allocation29_spill] sm:$0xff] }
 0x11c   : > { %v7006_v33 = vpop.permute.xlu1 %1793 }
 0x11d   : > { %10304 = vst [vmem:[#allocation40_spill] sm:$0xff] %v7006_v33 }
 0x120   : > { %v7008_v36 = vpop.permute.xlu1 %1803 }
 0x121   : > { %10305 = vst [vmem:[#allocation41_spill] sm:$0xff] %v7008_v36  ;;  %v7357_v36 = vld [vmem:[%s10107_s10 + $0x58] sm:$0xff] }
 0x124   : > { %v7010_v15 = vpop.permute.xlu1 %1813 }
 0x125   : > { %10306 = vst [vmem:[#allocation42_spill] sm:$0xff] %v7010_v15  ;;  %v10346_v15 = vld [vmem:[#allocation28_spill] sm:$0xff] }
 0x128   : > { %v7012_v13 = vpop.permute.xlu1 %1823 }
 0x129   : > { %10307 = vst [vmem:[#allocation43_spill] sm:$0xff] %v7012_v13 }
 0x12c   : > { %v7014_v14 = vpop.permute.xlu1 %1833 }
 0x12d   : > { %10308 = vst [vmem:[#allocation44_spill] sm:$0xff] %v7014_v14  ;;  %v7346_v14 = vld [vmem:[%s10107_s10 + $0x48] sm:$0xff] }
 0x130   : > { %v7016_v61 = vpop.permute.xlu1 %1843 }
 0x131   : > { %10309 = vst [vmem:[#allocation45_spill] sm:$0xff] %v7016_v61  ;;  %v10345_v61 = vld [vmem:[#allocation27_spill] sm:$0xff] }
 0x135   : > { %v7018_v18 = vpop.permute.xlu1 %2050 }
 0x136   : > { %10310 = vst [vmem:[#allocation46_spill] sm:$0xff] %v7018_v18 }
 0x139   : > { %v7020_v21 = vpop.permute.xlu1 %2058 }
 0x13a   : > { %10311 = vst [vmem:[#allocation47_spill] sm:$0xff] %v7020_v21  ;;  %v10344_v21 = vld [vmem:[#allocation26_spill] sm:$0xff] }
 0x13e   : > { %v1042_v60 = vpop.permute.xlu1 %1041 }
 0x13f   : > { %v1040_v49 = vpop.permute.xlu0 %1039  ;;  %v1088_v23 = vsel %vm830_vm1, %v6892_v5, %v1042_v60 }
 0x140   : > { %v1087_v63 = vsel %vm830_vm1, %v6896_v24, %v1040_v49  ;;  %v1110_v11 = vrot.slane %v1088_v23, %v7024_v3 }
 0x141   : > { %v1106_v45 = vrot.slane %v1087_v63, %v7024_v3 }
 0x142   : > { %v7046_v8 = vmul.f32 %v1110_v11, %v6410_v32 }
 0x143   : > { %v1044_v4 = vpop.permute.xlu0 %1043  ;;  %v7033_v12 = vmul.f32 %v1106_v45, %v6416_v38  ;;  %v7036_v62 = vmul.f32 %v1106_v45, %v6413_v37  ;;  %v7049_v38 = vmul.f32 %v1110_v11, %v6407_v31 }
 0x144   : > { %v1089_v40 = vsel %vm830_vm1, %v6906_v1, %v1044_v4  ;;  %v10315_v4 = vld [vmem:[#allocation9_spill] sm:$0xff] }
 0x145   : > { %1233 = vrot.lane.b32.xlu1 %v7033_v12, %s10313_s28  ;;  %1231 = vrot.lane.b32.xlu0 %v7036_v62, %s10313_s28  ;;  %v1114_v5 = vrot.slane %v1089_v40, %v7024_v3 }
 0x147   : > { %v1046_v24 = vpop.permute.xlu1 %1045  ;;  %v7059_v26 = vmul.f32 %v1114_v5, %v6433_v6  ;;  %v7062_v32 = vmul.f32 %v1114_v5, %v6436_v44 }
 0x148   : > { %v1090_v37 = vsel %vm830_vm1, %v6914_v41, %v1046_v24 }
 0x149   : > { %1237 = vrot.lane.b32.xlu1 %v7046_v8, %s10313_s28  ;;  %1235 = vrot.lane.b32.xlu0 %v7049_v38, %s10313_s28  ;;  %v1118_v1 = vrot.slane %v1090_v37, %v7024_v3 }
 0x14b   : > { %v1048_v43 = vpop.permute.xlu0 %1047  ;;  %v7072_v60 = vmul.f32 %v1118_v1, %v6461_v53  ;;  %v7075_v6 = vmul.f32 %v1118_v1, %v6464_v54  ;;  %v10314_v53 = vld [vmem:[#allocation8_spill] sm:$0xff]  ;;  %v10316_v1 = vld [vmem:[#allocation10_spill] sm:$0xff] }
 0x14c   : > { %v1091_v31 = vsel %vm830_vm1, %v6922_v20, %v1048_v43 }
 0x14d   : > { %1241 = vrot.lane.b32.xlu1 %v7059_v26, %s10313_s28  ;;  %1239 = vrot.lane.b32.xlu0 %v7062_v32, %s10313_s28  ;;  %v1122_v41 = vrot.slane %v1091_v31, %v7024_v3 }
 0x14f   : > { %v7085_v63 = vmul.f32 %v1122_v41, %v6467_v55  ;;  %v7088_v45 = vmul.f32 %v1122_v41, %v10314_v53 }
 0x150   : > { %v1050_v49 = vpop.permute.xlu1 %1049 }
 0x151   : > { %v1092_v44 = vsel %vm830_vm1, %v6930_v50, %v1050_v49  ;;  %1245 = vrot.lane.b32.xlu1 %v7072_v60, %s10313_s28  ;;  %1243 = vrot.lane.b32.xlu0 %v7075_v6, %s10313_s28 }
 0x152   : > { %v1126_v20 = vrot.slane %v1092_v44, %v7024_v3 }
 0x153   : > { %v1052_v23 = vpop.permute.xlu0 %1051 }
 0x154   : > { %v1093_v54 = vsel %vm830_vm1, %v6938_v59, %v1052_v23  ;;  %v7098_v40 = vmul.f32 %v1126_v20, %v10315_v4  ;;  %v7101_v55 = vmul.f32 %v1126_v20, %v6547_v51 }
 0x155   : > { %1249 = vrot.lane.b32.xlu1 %v7085_v63, %s10313_s28  ;;  %1247 = vrot.lane.b32.xlu0 %v7088_v45, %s10313_s28  ;;  %v1130_v50 = vrot.slane %v1093_v54, %v7024_v3 }
 0x157   : > { %v1054_v11 = vpop.permute.xlu1 %1053  ;;  %v7111_v37 = vmul.f32 %v1130_v50, %v6565_v22  ;;  %v7114_v43 = vmul.f32 %v1130_v50, %v10316_v1  ;;  %v10318_v22 = vld [vmem:[#allocation12_spill] sm:$0xff] }
 0x158   : > { %v1094_v5 = vsel %vm830_vm1, %v6946_v7, %v1054_v11  ;;  %v10317_v7 = vld [vmem:[#allocation11_spill] sm:$0xff] }
 0x159   : > { %1253 = vrot.lane.b32.xlu1 %v7098_v40, %s10313_s28  ;;  %1251 = vrot.lane.b32.xlu0 %v7101_v55, %s10313_s28  ;;  %v1134_v59 = vrot.slane %v1094_v5, %v7024_v3 }
 0x15b   : > { %v1056_v24 = vpop.permute.xlu0 %1055  ;;  %v7123_v31 = vmul.f32 %v1134_v59, %v10317_v7  ;;  %v7127_v44 = vmul.f32 %v1134_v59, %v10318_v22 }
 0x15c   : > { %v1095_v51 = vsel %vm830_vm1, %v6954_v57, %v1056_v24  ;;  %v10321_v24 = vld [vmem:[#allocation14_spill] sm:$0xff] }
 0x15d   : > { %1257 = vrot.lane.b32.xlu1 %v7111_v37, %s10313_s28  ;;  %1255 = vrot.lane.b32.xlu0 %v7114_v43, %s10313_s28  ;;  %v1138_v41 = vrot.slane %v1095_v51, %v7024_v3 }
 0x15f   : > { %v1058_v49 = vpop.permute.xlu1 %1057  ;;  %v7136_v57 = vmul.f32 %v1138_v41, %v6611_v39  ;;  %v7140_v53 = vmul.f32 %v1138_v41, %v6630_v19 }
 0x160   : > { %v1096_v20 = vsel %vm830_vm1, %v6958_v2, %v1058_v49  ;;  %v10325_v49 = vld [vmem:[#allocation16_spill] sm:$0xff] }
 0x161   : > { %1261 = vrot.lane.b32.xlu1 %v7123_v31, %s10313_s28  ;;  %1259 = vrot.lane.b32.xlu0 %v7127_v44, %s10313_s28  ;;  %v1142_v23 = vrot.slane %v1096_v20, %v7024_v3 }
 0x163   : > { %v7149_v2 = vmul.f32 %v1142_v23, %v6637_v27  ;;  %v7153_v4 = vmul.f32 %v1142_v23, %v6648_v16 }
 0x164   : > { %v1060_v54 = vpop.permute.xlu0 %1059 }
 0x165   : > { %v1097_v50 = vsel %vm830_vm1, %v6962_v28, %v1060_v54  ;;  %1265 = vrot.lane.b32.xlu1 %v7136_v57, %s10313_s28  ;;  %1263 = vrot.lane.b32.xlu0 %v7140_v53, %s10313_s28  ;;  %v10319_v28 = vld [vmem:[#allocation13_spill] sm:$0xff] }
 0x166   : > { %v1146_v39 = vrot.slane %v1097_v50, %v7024_v3 }
 0x167   : > { %v1062_v11 = vpop.permute.xlu1 %1061 }
 0x168   : > { %v1098_v19 = vsel %vm830_vm1, %v6966_v10, %v1062_v11  ;;  %v7162_v5 = vmul.f32 %v1146_v39, %v10319_v28  ;;  %v7166_v1 = vmul.f32 %v1146_v39, %v10321_v24  ;;  %v10323_v10 = vld [vmem:[#allocation15_spill] sm:$0xff]  ;;  %v10329_v39 = vld [vmem:[#allocation18_spill] sm:$0xff] }
 0x169   : > { %1269 = vrot.lane.b32.xlu1 %v7149_v2, %s10313_s28  ;;  %1267 = vrot.lane.b32.xlu0 %v7153_v4, %s10313_s28  ;;  %v1150_v27 = vrot.slane %v1098_v19, %v7024_v3 }
 0x16a   : > { %10320 = vst [vmem:[#allocation8_spill] sm:$0xff] %v7162_v5  ;;  %10322 = vst [vmem:[#allocation9_spill] sm:$0xff] %v7166_v1 }
 0x16b   : > { %v1064_v59 = vpop.permute.xlu0 %1063  ;;  %v7175_v51 = vmul.f32 %v1150_v27, %v10323_v10  ;;  %v7179_v22 = vmul.f32 %v1150_v27, %v10325_v49  ;;  %v10337_v49 = vld [vmem:[#allocation22_spill] sm:$0xff] }
 0x16c   : > { %v1099_v16 = vsel %vm830_vm1, %v6972_v35, %v1064_v59  ;;  %v10327_v35 = vld [vmem:[#allocation17_spill] sm:$0xff]  ;;  %v10333_v59 = vld [vmem:[#allocation20_spill] sm:$0xff] }
 0x16d   : > { %1273 = vrot.lane.b32.xlu1 %v7162_v5, %s10313_s28  ;;  %1271 = vrot.lane.b32.xlu0 %v7166_v1, %s10313_s28  ;;  %10324 = vst [vmem:[#allocation10_spill] sm:$0xff] %v7175_v51  ;;  %v1154_v7 = vrot.slane %v1099_v16, %v7024_v3  ;;  %10326 = vst [vmem:[#allocation11_spill] sm:$0xff] %v7179_v22 }
 0x16f   : > { %v1066_v41 = vpop.permute.xlu1 %1065  ;;  %v7188_v23 = vmul.f32 %v1154_v7, %v10327_v35  ;;  %v7192_v11 = vmul.f32 %v1154_v7, %v10329_v39 }
 0x170   : > { %v1100_v20 = vsel %vm830_vm1, %v6978_v46, %v1066_v41  ;;  %v10331_v46 = vld [vmem:[#allocation19_spill] sm:$0xff] }
 0x171   : > { %1277 = vrot.lane.b32.xlu1 %v7175_v51, %s10313_s28  ;;  %1275 = vrot.lane.b32.xlu0 %v7179_v22, %s10313_s28  ;;  %10328 = vst [vmem:[#allocation12_spill] sm:$0xff] %v7188_v23  ;;  %v1158_v54 = vrot.slane %v1100_v20, %v7024_v3  ;;  %10330 = vst [vmem:[#allocation13_spill] sm:$0xff] %v7192_v11 }
 0x173   : > { %v1068_v50 = vpop.permute.xlu0 %1067  ;;  %v7201_v28 = vmul.f32 %v1158_v54, %v10331_v46  ;;  %v7205_v24 = vmul.f32 %v1158_v54, %v10333_v59  ;;  %v10341_v54 = vld [vmem:[#allocation24_spill] sm:$0xff] }
 0x174   : > { %v1101_v19 = vsel %vm830_vm1, %v6984_v25, %v1068_v50  ;;  %v10335_v25 = vld [vmem:[#allocation21_spill] sm:$0xff] }
 0x175   : > { %1281 = vrot.lane.b32.xlu1 %v7188_v23, %s10313_s28  ;;  %1279 = vrot.lane.b32.xlu0 %v7192_v11, %s10313_s28  ;;  %10332 = vst [vmem:[#allocation14_spill] sm:$0xff] %v7201_v28  ;;  %v1162_v27 = vrot.slane %v1101_v19, %v7024_v3  ;;  %10334 = vst [vmem:[#allocation15_spill] sm:$0xff] %v7205_v24 }
 0x177   : > { %v7214_v7 = vmul.f32 %v1162_v27, %v10335_v25  ;;  %v7218_v20 = vmul.f32 %v1162_v27, %v10337_v49  ;;  %v7324_v49 = vld [vmem:[%s10107_s10 + $0x28] sm:$0xff] }
 0x178   : > { %v1070_v16 = vpop.permute.xlu1 %1069 }
 0x179   : > { %v1102_v10 = vsel %vm830_vm1, %v6992_v34, %v1070_v16  ;;  %1285 = vrot.lane.b32.xlu1 %v7201_v28, %s10313_s28  ;;  %1283 = vrot.lane.b32.xlu0 %v7205_v24, %s10313_s28  ;;  %10336 = vst [vmem:[#allocation16_spill] sm:$0xff] %v7214_v7  ;;  %10338 = vst [vmem:[#allocation17_spill] sm:$0xff] %v7218_v20  ;;  %v10339_v34 = vld [vmem:[#allocation23_spill] sm:$0xff] }
 0x17a   : > { %v1166_v41 = vrot.slane %v1102_v10, %v7024_v3  ;;  %v7313_v16 = vld [vmem:[%s10107_s10 + $0x18] sm:$0xff] }
 0x17c   : > { %v7225_v35 = vmul.f32 %v1166_v41, %v10339_v34  ;;  %v7228_v50 = vmul.f32 %v1166_v41, %v10341_v54  ;;  %v10343_v41 = vld [vmem:[#allocation25_spill] sm:$0xff] }
 0x17d   : > { %1289 = vrot.lane.b32.xlu1 %v7214_v7, %s10313_s28  ;;  %1287 = vrot.lane.b32.xlu0 %v7218_v20, %s10313_s28 }
 0x17e   : > { %10340 = vst [vmem:[#allocation18_spill] sm:$0xff] %v7225_v35  ;;  %10342 = vst [vmem:[#allocation19_spill] sm:$0xff] %v7228_v50 }
 0x181   : > { %1293 = vrot.lane.b32.xlu1 %v7225_v35, %s10313_s28  ;;  %1291 = vrot.lane.b32.xlu0 %v7228_v50, %s10313_s28  ;;  %s6202_s28 = smov 96  }
 0x185   : > { %1329 = vrot.lane.b32.xlu1 %v7033_v12, %s6190_s26  ;;  %1327 = vrot.lane.b32.xlu0 %v7036_v62, %s6190_s26 }
 0x189   : > { %1333 = vrot.lane.b32.xlu1 %v7046_v8, %s6190_s26  ;;  %1331 = vrot.lane.b32.xlu0 %v7049_v38, %s6190_s26 }
 0x18d   : > { %1337 = vrot.lane.b32.xlu1 %v7059_v26, %s6190_s26  ;;  %1335 = vrot.lane.b32.xlu0 %v7062_v32, %s6190_s26 }
 0x191   : > { %1341 = vrot.lane.b32.xlu1 %v7072_v60, %s6190_s26  ;;  %1339 = vrot.lane.b32.xlu0 %v7075_v6, %s6190_s26 }
 0x195   : > { %1345 = vrot.lane.b32.xlu1 %v7085_v63, %s6190_s26  ;;  %1343 = vrot.lane.b32.xlu0 %v7088_v45, %s6190_s26 }
 0x199   : > { %1349 = vrot.lane.b32.xlu1 %v7098_v40, %s6190_s26  ;;  %1347 = vrot.lane.b32.xlu0 %v7101_v55, %s6190_s26 }
 0x19d   : > { %1353 = vrot.lane.b32.xlu1 %v7111_v37, %s6190_s26  ;;  %1351 = vrot.lane.b32.xlu0 %v7114_v43, %s6190_s26 }
 0x1a1   : > { %1357 = vrot.lane.b32.xlu1 %v7123_v31, %s6190_s26  ;;  %1355 = vrot.lane.b32.xlu0 %v7127_v44, %s6190_s26 }
 0x1a5   : > { %1361 = vrot.lane.b32.xlu1 %v7136_v57, %s6190_s26  ;;  %1359 = vrot.lane.b32.xlu0 %v7140_v53, %s6190_s26 }
 0x1a9   : > { %1365 = vrot.lane.b32.xlu1 %v7149_v2, %s6190_s26  ;;  %1363 = vrot.lane.b32.xlu0 %v7153_v4, %s6190_s26 }
 0x1ad   : > { %1369 = vrot.lane.b32.xlu1 %v7162_v5, %s6190_s26  ;;  %1367 = vrot.lane.b32.xlu0 %v7166_v1, %s6190_s26 }
 0x1b1   : > { %1373 = vrot.lane.b32.xlu1 %v7175_v51, %s6190_s26  ;;  %1371 = vrot.lane.b32.xlu0 %v7179_v22, %s6190_s26 }
 0x1b5   : > { %1377 = vrot.lane.b32.xlu1 %v7188_v23, %s6190_s26  ;;  %1375 = vrot.lane.b32.xlu0 %v7192_v11, %s6190_s26  ;;  %v6101_v11 = vld [vmem:[%s10107_s10 + $0xb0] sm:$0xff] }
 0x1b7   : > { %v7286_v3 = vpop.permute.xlu1 %1233  ;;  %v7288_v39 = vpop.permute.xlu0 %1231 }
 0x1b9   : > { %1381 = vrot.lane.b32.xlu1 %v7201_v28, %s6190_s26  ;;  %1379 = vrot.lane.b32.xlu0 %v7205_v24, %s6190_s26 }
 0x1bb   : > { %v7294_v19 = vpop.permute.xlu1 %1237  ;;  %v7296_v46 = vpop.permute.xlu0 %1235 }
 0x1bd   : > { %1385 = vrot.lane.b32.xlu1 %v7214_v7, %s6190_s26  ;;  %1383 = vrot.lane.b32.xlu0 %v7218_v20, %s6190_s26  ;;  %v6100_v7 = vld [vmem:[%s10107_s10 + $0xa0] sm:$0xff] }
 0x1bf   : > { %v7302_v27 = vpop.permute.xlu1 %1241  ;;  %v7304_v59 = vpop.permute.xlu0 %1239 }
 0x1c1   : > { %1389 = vrot.lane.b32.xlu1 %v7225_v35, %s6190_s26  ;;  %1387 = vrot.lane.b32.xlu0 %v7228_v50, %s6190_s26  ;;  %v6099_v50 = vld [vmem:[%s10107_s10 + $0x90] sm:$0xff]  ;;  %s6195_s26 = smov 40  }
 0x1c3   : > { %v7315_v10 = vpop.permute.xlu1 %1245  ;;  %v7317_v25 = vpop.permute.xlu0 %1243 }
 0x1c5   : > { %2062 = vperm.xlu1 %5794, %v7313_v16   ;;  %2066 = vperm.xlu0 %5795, %v10343_v41  }
 0x1c7   : > { %v7326_v34 = vpop.permute.xlu1 %1249  ;;  %v7328_v54 = vpop.permute.xlu0 %1247 }
 0x1c9   : > { %2070 = vperm.xlu1 %5794, %v7324_v49   ;;  %2074 = vperm.xlu0 %5795, %v10344_v21  }
 0x1cb   : > { %v7337_v18 = vpop.permute.xlu1 %1253  ;;  %v7339_v41 = vpop.permute.xlu0 %1251 }
 0x1cd   : > { %2078 = vperm.xlu1 %5794, %v7335_v42   ;;  %2082 = vperm.xlu0 %5795, %v10345_v61  }
 0x1cf   : > { %v7348_v13 = vpop.permute.xlu1 %1257  ;;  %v7350_v21 = vpop.permute.xlu0 %1255 }
 0x1d1   : > { %2086 = vperm.xlu1 %5794, %v7346_v14   ;;  %2090 = vperm.xlu0 %5795, %v10346_v15  }
 0x1d3   : > { %v7359_v33 = vpop.permute.xlu1 %1261  ;;  %v7361_v61 = vpop.permute.xlu0 %1259 }
 0x1d5   : > { %2094 = vperm.xlu1 %5794, %v7357_v36   ;;  %2098 = vperm.xlu0 %5795, %v10347_v58   ;;  %v7381_v58 = vld [vmem:[%s10107_s10 + $0x78] sm:$0xff] }
 0x1d7   : > { %v7370_v30 = vpop.permute.xlu1 %1265  ;;  %v7372_v15 = vpop.permute.xlu0 %1263 }
 0x1d9   : > { %2102 = vperm.xlu1 %5794, %v7368_v47   ;;  %2106 = vperm.xlu0 %5795, %v6097_v17   ;;  %v7394_v17 = vld [vmem:[%s10107_s10 + $0x88] sm:$0xff] }
 0x1da   : > { %10349 = vst [vmem:[#allocation21_spill] sm:$0xff] %v7394_v17 }
 0x1db   : > { %v7383_v0 = vpop.permute.xlu1 %1269  ;;  %v7385_v48 = vpop.permute.xlu0 %1267 }
 0x1dc   : > { %10348 = vst [vmem:[#allocation20_spill] sm:$0xff] %v7385_v48 }
 0x1dd   : > { %2110 = vperm.xlu1 %5794, %v7381_v58   ;;  %2114 = vperm.xlu0 %5795, %v6098_v29   ;;  %v7407_v29 = vld [vmem:[%s10107_s10 + $0x98] sm:$0xff] }
 0x1de   : > { %10352 = vst [vmem:[#allocation24_spill] sm:$0xff] %v7407_v29 }
 0x1df   : > { %v7396_v56 = vpop.permute.xlu1 %1273  ;;  %v7398_v52 = vpop.permute.xlu0 %1271 }
 0x1e0   : > { %10350 = vst [vmem:[#allocation22_spill] sm:$0xff] %v7396_v56  ;;  %10351 = vst [vmem:[#allocation23_spill] sm:$0xff] %v7398_v52  ;;  %v6105_v56 = vld [vmem:[%s10107_s10 + $0xf0] sm:$0xff] }
 0x1e1   : > { %2118 = vperm.xlu1 %5794, %v7394_v17   ;;  %2122 = vperm.xlu0 %5795, %v6099_v50   ;;  %v7420_v50 = vld [vmem:[%s10107_s10 + $0xa8] sm:$0xff] }
 0x1e2   : > { %10355 = vst [vmem:[#allocation27_spill] sm:$0xff] %v7420_v50 }
 0x1e3   : > { %v7409_v35 = vpop.permute.xlu1 %1277  ;;  %v7411_v20 = vpop.permute.xlu0 %1275 }
 0x1e4   : > { %10353 = vst [vmem:[#allocation25_spill] sm:$0xff] %v7409_v35  ;;  %10354 = vst [vmem:[#allocation26_spill] sm:$0xff] %v7411_v20 }
 0x1e5   : > { %2126 = vperm.xlu1 %5794, %v7407_v29   ;;  %2130 = vperm.xlu0 %5795, %v6100_v7   ;;  %v7433_v7 = vld [vmem:[%s10107_s10 + $0xb8] sm:$0xff] }
 0x1e6   : > { %10358 = vst [vmem:[#allocation49_spill] sm:$0xff] %v7433_v7 }
 0x1e7   : > { %v7422_v24 = vpop.permute.xlu1 %1281  ;;  %v7424_v28 = vpop.permute.xlu0 %1279 }
 0x1e8   : > { %10356 = vst [vmem:[#allocation28_spill] sm:$0xff] %v7422_v24  ;;  %10357 = vst [vmem:[#allocation29_spill] sm:$0xff] %v7424_v28  ;;  %v6102_v28 = vld [vmem:[%s10107_s10 + $0xc0] sm:$0xff] }
 0x1e9   : > { %2134 = vperm.xlu1 %5794, %v7420_v50   ;;  %2138 = vperm.xlu0 %5795, %v6101_v11   ;;  %v7446_v11 = vld [vmem:[%s10107_s10 + $0xc8] sm:$0xff] }
 0x1ea   : > { %10361 = vst [vmem:[#allocation52_spill] sm:$0xff] %v7446_v11 }
 0x1eb   : > { %v7435_v23 = vpop.permute.xlu1 %1285  ;;  %v7437_v20 = vpop.permute.xlu0 %1283 }
 0x1ec   : > { %10359 = vst [vmem:[#allocation50_spill] sm:$0xff] %v7435_v23  ;;  %10360 = vst [vmem:[#allocation51_spill] sm:$0xff] %v7437_v20  ;;  %v6103_v20 = vld [vmem:[%s10107_s10 + $0xd0] sm:$0xff] }
 0x1ed   : > { %2142 = vperm.xlu1 %5794, %v7433_v7   ;;  %2146 = vperm.xlu0 %5795, %v6102_v28   ;;  %v7459_v28 = vld [vmem:[%s10107_s10 + $0xd8] sm:$0xff] }
 0x1ee   : > { %10364 = vst [vmem:[#allocation55_spill] sm:$0xff] %v7459_v28 }
 0x1ef   : > { %v7448_v24 = vpop.permute.xlu1 %1289  ;;  %v7450_v50 = vpop.permute.xlu0 %1287 }
 0x1f0   : > { %10362 = vst [vmem:[#allocation53_spill] sm:$0xff] %v7448_v24  ;;  %10363 = vst [vmem:[#allocation54_spill] sm:$0xff] %v7450_v50  ;;  %v6104_v50 = vld [vmem:[%s10107_s10 + $0xe0] sm:$0xff] }
 0x1f1   : > { %2150 = vperm.xlu1 %5794, %v7446_v11   ;;  %2154 = vperm.xlu0 %5795, %v6103_v20   ;;  %v7472_v20 = vld [vmem:[%s10098_s1 + $0x8] sm:$0xff]  ;;  %v7477_v24 = vld [vmem:[%s10098_s1] sm:$0xff] }
 0x1f2   : > { %v1458_v22 = vmul.f32 %v7472_v20, %v7033_v12  ;;  %v1457_v52 = vmul.f32 %v7477_v24, %v7036_v62  ;;  %v7511_v12 = vld [vmem:[%s10100_s3 + $0x8] sm:$0xff]  ;;  %v7521_v62 = vld [vmem:[%s10107_s10 + $0xf8] sm:$0xff] }
 0x1f3   : > { %v7461_v23 = vpop.permute.xlu1 %1293  ;;  %v7463_v7 = vpop.permute.xlu0 %1291 }
 0x1f4   : > { %10365 = vst [vmem:[#allocation56_spill] sm:$0xff] %v7461_v23  ;;  %10366 = vst [vmem:[#allocation57_spill] sm:$0xff] %v7463_v7  ;;  %v7482_v7 = vld [vmem:[%s10099_s2 + $0x8] sm:$0xff]  ;;  %v7487_v23 = vld [vmem:[%s10099_s2] sm:$0xff] }
 0x1f5   : > { %2158 = vperm.xlu1 %5794, %v7459_v28   ;;  %2162 = vperm.xlu0 %5795, %v6104_v50   ;;  %v7492_v50 = vld [vmem:[%s10107_s10 + $0xe8] sm:$0xff] }
 0x1f6   : > { %10367 = vst [vmem:[#allocation58_spill] sm:$0xff] %v7492_v50 }
 0x1f7   : > { %v1330_v28 = vpop.permute.xlu1 %1329  ;;  %v1328_v11 = vpop.permute.xlu0 %1327 }
 0x1f8   : > { %v1424_v35 = vsel %vm830_vm1, %v7286_v3, %v1330_v28  ;;  %v1423_v51 = vsel %vm830_vm1, %v7288_v39, %v1328_v11 }
 0x1f9   : > { %v1492_v29 = vmul.f32 %v7482_v7, %v1424_v35  ;;  %v1491_v1 = vmul.f32 %v7487_v23, %v1423_v51  ;;  %2166 = vperm.xlu1 %5794, %v7492_v50   ;;  %2170 = vperm.xlu0 %5795, %v6105_v56   ;;  %v7516_v35 = vld [vmem:[%s10100_s3] sm:$0xff]  ;;  %v1460_v56 = vmul.f32 %v7472_v20, %v7046_v8  ;;  %v10368_v8 = vmov 0  }
 0x1fa   : > { %v1459_v50 = vmul.f32 %v7477_v24, %v7049_v38 }
 0x1fb   : > { %v1524_v51 = vadd.f32 %v1492_v29, %v1458_v22  ;;  %v1523_v3 = vadd.f32 %v1491_v1, %v1457_v52  ;;  %v1334_v39 = vpop.permute.xlu1 %1333  ;;  %v1332_v11 = vpop.permute.xlu0 %1331 }
 0x1fc   : > { %v1426_v28 = vsel %vm830_vm1, %v7294_v19, %v1334_v39  ;;  %v1425_v5 = vsel %vm830_vm1, %v7296_v46, %v1332_v11  ;;  %v6106_v19 = vld [vmem:[%s10107_s10] sm:$0xff] }
 0x1fd   : > { %v1558_v17 = vadd.f32 %v7511_v12, %v1524_v51  ;;  %v1557_v48 = vadd.f32 %v7516_v35, %v1523_v3  ;;  %v1494_v52 = vmul.f32 %v7482_v7, %v1426_v28  ;;  %v1493_v1 = vmul.f32 %v7487_v23, %v1425_v5  ;;  %2174 = vperm.xlu1 %5794, %v7521_v62  }
 0x1fe   : > { %5796 = vset.pattern.permute.xlu0 %v10368_v8  ;;  %v1462_v5 = vmul.f32 %v7472_v20, %v7059_v26 }
 0x1ff   : > { %1596 = vst.msk [vmem:[#allocation2 + $0x20] sm:$0xff] %vm444_vm0, %v1558_v17  ;;  %1595 = vst.msk [vmem:[#allocation2 + $0x18] sm:$0xff] %vm444_vm0, %v1557_v48  ;;  %v1526_v38 = vadd.f32 %v1494_v52, %v1460_v56  ;;  %v1525_v22 = vadd.f32 %v1493_v1, %v1459_v50  ;;  %1693 = vperm.xlu0 %5796, %v6106_v19   ;;  %v1338_v46 = vpop.permute.xlu1 %1337  ;;  %v1336_v29 = vpop.permute.xlu0 %1335  ;;  %v1461_v17 = vmul.f32 %v7477_v24, %v7062_v32 }
 0x200   : > { %v1428_v51 = vsel %vm830_vm1, %v7302_v27, %v1338_v46  ;;  %v1427_v48 = vsel %vm830_vm1, %v7304_v59, %v1336_v29  ;;  %v1464_v56 = vmul.f32 %v7472_v20, %v7072_v60  ;;  %v1463_v52 = vmul.f32 %v7477_v24, %v7075_v6 }
 0x201   : > { %v1560_v50 = vadd.f32 %v7511_v12, %v1526_v38  ;;  %v1559_v3 = vadd.f32 %v7516_v35, %v1525_v22  ;;  %v1496_v39 = vmul.f32 %v7482_v7, %v1428_v51  ;;  %v1495_v11 = vmul.f32 %v7487_v23, %v1427_v48  ;;  %5797 = vset.pattern.permute.xlu1 %v10368_v8 }
 0x202   : > { %v1466_v29 = vmul.f32 %v7472_v20, %v7085_v63  ;;  %v1465_v51 = vmul.f32 %v7477_v24, %v7088_v45 }
 0x203   : > { %1598 = vst.msk [vmem:[#allocation2 + $0x30] sm:$0xff] %vm444_vm0, %v1560_v50  ;;  %1597 = vst.msk [vmem:[#allocation2 + $0x28] sm:$0xff] %vm444_vm0, %v1559_v3  ;;  %v1528_v26 = vadd.f32 %v1496_v39, %v1462_v5  ;;  %v1527_v27 = vadd.f32 %v1495_v11, %v1461_v17  ;;  %1708 = vperm.xlu0 %5796, %v7313_v16   ;;  %v1342_v32 = vpop.permute.xlu1 %1341  ;;  %v1340_v59 = vpop.permute.xlu0 %1339  ;;  %v1468_v39 = vmul.f32 %v7472_v20, %v7098_v40 }
 0x204   : > { %v1430_v28 = vsel %vm830_vm1, %v7315_v10, %v1342_v32  ;;  %v1429_v1 = vsel %vm830_vm1, %v7317_v25, %v1340_v59 }
 0x205   : > { %v1562_v8 = vadd.f32 %v7511_v12, %v1528_v26  ;;  %v1561_v38 = vadd.f32 %v7516_v35, %v1527_v27  ;;  %v1498_v16 = vmul.f32 %v7482_v7, %v1430_v28  ;;  %v1497_v22 = vmul.f32 %v7487_v23, %v1429_v1 }
 0x206   : > { %v1884_v19 = vld [vmem:[#allocation2 + $0x1f] sm:$0xff]  ;;  %v1467_v26 = vmul.f32 %v7477_v24, %v7101_v55  ;;  %v1469_v1 = vmul.f32 %v7477_v24, %v7114_v43 }
 0x207   : > { %1600 = vst.msk [vmem:[#allocation2 + $0x40] sm:$0xff] %vm444_vm0, %v1562_v8  ;;  %1599 = vst.msk [vmem:[#allocation2 + $0x38] sm:$0xff] %vm444_vm0, %v1561_v38  ;;  %v1530_v60 = vadd.f32 %v1498_v16, %v1464_v56  ;;  %v1529_v10 = vadd.f32 %v1497_v22, %v1463_v52  ;;  %1718 = vperm.xlu0 %5796, %v7324_v49   ;;  %v1346_v6 = vpop.permute.xlu1 %1345  ;;  %v1344_v46 = vpop.permute.xlu0 %1343  ;;  %v1916_v25 = vmul.f32 %v1884_v19, %v6968_v9 }
 0x208   : > { %v1432_v5 = vsel %vm830_vm1, %v7326_v34, %v1346_v6  ;;  %v1431_v17 = vsel %vm830_vm1, %v7328_v54, %v1344_v46 }
 0x209   : > { %v1564_v48 = vadd.f32 %v7511_v12, %v1530_v60  ;;  %v1563_v49 = vadd.f32 %v7516_v35, %v1529_v10  ;;  %v1500_v50 = vmul.f32 %v7482_v7, %v1432_v5  ;;  %v1499_v3 = vmul.f32 %v7487_v23, %v1431_v17  ;;  %2341 = vrot.lane.b32.xlu1 %v1916_v25, %s10259_s15 }
 0x20a   : > { %v1471_v10 = vmul.f32 %v7477_v24, %v7127_v44  ;;  %v1473_v17 = vmul.f32 %v7477_v24, %v7140_v53 }
 0x20b   : > { %1602 = vst.msk [vmem:[#allocation2 + $0x50] sm:$0xff] %vm444_vm0, %v1564_v48  ;;  %1601 = vst.msk [vmem:[#allocation2 + $0x48] sm:$0xff] %vm444_vm0, %v1563_v49  ;;  %v1532_v63 = vadd.f32 %v1500_v50, %v1466_v29  ;;  %v1531_v45 = vadd.f32 %v1499_v3, %v1465_v51  ;;  %1728 = vperm.xlu0 %5796, %v7335_v42   ;;  %v1350_v34 = vpop.permute.xlu1 %1349  ;;  %v1348_v54 = vpop.permute.xlu0 %1347 }
 0x20c   : > { %v1434_v11 = vsel %vm830_vm1, %v7337_v18, %v1350_v34  ;;  %v1433_v27 = vsel %vm830_vm1, %v7339_v41, %v1348_v54  ;;  %v1470_v41 = vmul.f32 %v7472_v20, %v7111_v37  ;;  %v1475_v34 = vmul.f32 %v7477_v24, %v7153_v4  ;;  %v10369_v54 = vld [vmem:[#allocation20_spill] sm:$0xff] }
 0x20d   : > { %v1566_v32 = vadd.f32 %v7511_v12, %v1532_v63  ;;  %v1565_v59 = vadd.f32 %v7516_v35, %v1531_v45  ;;  %v1502_v42 = vmul.f32 %v7482_v7, %v1434_v11  ;;  %v1501_v56 = vmul.f32 %v7487_v23, %v1433_v27 }
 0x20f   : > { %1604 = vst.msk [vmem:[#allocation2 + $0x60] sm:$0xff] %vm444_vm0, %v1566_v32  ;;  %1603 = vst.msk [vmem:[#allocation2 + $0x58] sm:$0xff] %vm444_vm0, %v1565_v59  ;;  %v1534_v40 = vadd.f32 %v1502_v42, %v1468_v39  ;;  %v1533_v18 = vadd.f32 %v1501_v56, %v1467_v26  ;;  %1738 = vperm.xlu0 %5796, %v7346_v14   ;;  %v1354_v55 = vpop.permute.xlu1 %1353  ;;  %v1352_v28 = vpop.permute.xlu0 %1351  ;;  %v10370_v32 = vld [vmem:[#allocation21_spill] sm:$0xff]  ;;  %v10371_v42 = vld [vmem:[#allocation8_spill] sm:$0xff] }
 0x210   : > { %v1436_v52 = vsel %vm830_vm1, %v7348_v13, %v1354_v55  ;;  %v1435_v8 = vsel %vm830_vm1, %v7350_v21, %v1352_v28  ;;  %v1472_v21 = vmul.f32 %v7472_v20, %v7123_v31  ;;  %v1478_v56 = vmul.f32 %v7472_v20, %v10371_v42  ;;  %v10373_v55 = vld [vmem:[#allocation9_spill] sm:$0xff] }
 0x211   : > { %v1568_v38 = vadd.f32 %v7511_v12, %v1534_v40  ;;  %v1567_v16 = vadd.f32 %v7516_v35, %v1533_v18  ;;  %v1504_v14 = vmul.f32 %v7482_v7, %v1436_v52  ;;  %v1503_v22 = vmul.f32 %v7487_v23, %v1435_v8  ;;  %v10372_v40 = vld [vmem:[#allocation22_spill] sm:$0xff] }
 0x212   : > { %v1477_v28 = vmul.f32 %v7477_v24, %v10373_v55 }
 0x213   : > { %1606 = vst.msk [vmem:[#allocation2 + $0x70] sm:$0xff] %vm444_vm0, %v1568_v38  ;;  %1605 = vst.msk [vmem:[#allocation2 + $0x68] sm:$0xff] %vm444_vm0, %v1567_v16  ;;  %v1536_v37 = vadd.f32 %v1504_v14, %v1470_v41  ;;  %v1535_v13 = vadd.f32 %v1503_v22, %v1469_v1  ;;  %1748 = vperm.xlu0 %5796, %v7357_v36   ;;  %v1358_v43 = vpop.permute.xlu1 %1357  ;;  %v1356_v19 = vpop.permute.xlu0 %1355  ;;  %v10374_v41 = vld [vmem:[#allocation23_spill] sm:$0xff] }
 0x214   : > { %v1438_v60 = vsel %vm830_vm1, %v7359_v33, %v1358_v43  ;;  %v1437_v6 = vsel %vm830_vm1, %v7361_v61, %v1356_v19  ;;  %v1474_v61 = vmul.f32 %v7472_v20, %v7136_v57  ;;  %v10376_v19 = vld [vmem:[#allocation10_spill] sm:$0xff] }
 0x215   : > { %v1570_v46 = vadd.f32 %v7511_v12, %v1536_v37  ;;  %v1569_v25 = vadd.f32 %v7516_v35, %v1535_v13  ;;  %v1506_v36 = vmul.f32 %v7482_v7, %v1438_v60  ;;  %v1505_v29 = vmul.f32 %v7487_v23, %v1437_v6  ;;  %v10375_v37 = vld [vmem:[#allocation24_spill] sm:$0xff]  ;;  %v10377_v60 = vld [vmem:[#allocation25_spill] sm:$0xff]  ;;  %v10378_v6 = vld [vmem:[#allocation11_spill] sm:$0xff] }
 0x217   : > { %1608 = vst.msk [vmem:[#allocation2 + $0x80] sm:$0xff] %vm444_vm0, %v1570_v46  ;;  %1607 = vst.msk [vmem:[#allocation2 + $0x78] sm:$0xff] %vm444_vm0, %v1569_v25  ;;  %v1538_v31 = vadd.f32 %v1506_v36, %v1472_v21  ;;  %v1537_v33 = vadd.f32 %v1505_v29, %v1471_v10  ;;  %1758 = vperm.xlu0 %5796, %v7368_v47   ;;  %v1362_v44 = vpop.permute.xlu1 %1361  ;;  %v1360_v5 = vpop.permute.xlu0 %1359  ;;  %v1480_v21 = vmul.f32 %v7472_v20, %v10376_v19  ;;  %v10379_v25 = vld [vmem:[#allocation26_spill] sm:$0xff] }
 0x218   : > { %v1440_v51 = vsel %vm830_vm1, %v7370_v30, %v1362_v44  ;;  %v1439_v48 = vsel %vm830_vm1, %v7372_v15, %v1360_v5  ;;  %v1476_v15 = vmul.f32 %v7472_v20, %v7149_v2  ;;  %v1479_v46 = vmul.f32 %v7477_v24, %v10378_v6 }
 0x219   : > { %v1572_v49 = vadd.f32 %v7511_v12, %v1538_v31  ;;  %v1571_v50 = vadd.f32 %v7516_v35, %v1537_v33  ;;  %v1508_v47 = vmul.f32 %v7482_v7, %v1440_v51  ;;  %v1507_v3 = vmul.f32 %v7487_v23, %v1439_v48  ;;  %v10380_v51 = vld [vmem:[#allocation27_spill] sm:$0xff] }
 0x21b   : > { %1610 = vst.msk [vmem:[#allocation2 + $0x90] sm:$0xff] %vm444_vm0, %v1572_v49  ;;  %1609 = vst.msk [vmem:[#allocation2 + $0x88] sm:$0xff] %vm444_vm0, %v1571_v50  ;;  %v1540_v57 = vadd.f32 %v1508_v47, %v1474_v61  ;;  %v1539_v30 = vadd.f32 %v1507_v3, %v1473_v17  ;;  %1768 = vperm.xlu0 %5796, %v7381_v58   ;;  %v1366_v53 = vpop.permute.xlu1 %1365  ;;  %v1364_v63 = vpop.permute.xlu0 %1363  ;;  %v10381_v49 = vld [vmem:[#allocation12_spill] sm:$0xff] }
 0x21c   : > { %v1442_v45 = vsel %vm830_vm1, %v7383_v0, %v1366_v53  ;;  %v1441_v39 = vsel %vm830_vm1, %v10369_v54, %v1364_v63  ;;  %v1482_v50 = vmul.f32 %v7472_v20, %v10381_v49  ;;  %v10382_v47 = vld [vmem:[#allocation28_spill] sm:$0xff]  ;;  %v10384_v53 = vld [vmem:[#allocation29_spill] sm:$0xff] }
 0x21d   : > { %v1574_v11 = vadd.f32 %v7511_v12, %v1540_v57  ;;  %v1573_v26 = vadd.f32 %v7516_v35, %v1539_v30  ;;  %v1510_v58 = vmul.f32 %v7482_v7, %v1442_v45  ;;  %v1509_v27 = vmul.f32 %v7487_v23, %v1441_v39  ;;  %v10383_v57 = vld [vmem:[#allocation13_spill] sm:$0xff] }
 0x21e   : > { %v1481_v30 = vmul.f32 %v7477_v24, %v10383_v57 }
 0x21f   : > { %1612 = vst.msk [vmem:[#allocation2 + $0xa0] sm:$0xff] %vm444_vm0, %v1574_v11  ;;  %1611 = vst.msk [vmem:[#allocation2 + $0x98] sm:$0xff] %vm444_vm0, %v1573_v26  ;;  %v1542_v2 = vadd.f32 %v1510_v58, %v1476_v15  ;;  %v1541_v0 = vadd.f32 %v1509_v27, %v1475_v34  ;;  %1778 = vperm.xlu0 %5796, %v10370_v32   ;;  %v1370_v4 = vpop.permute.xlu1 %1369  ;;  %v1368_v59 = vpop.permute.xlu0 %1367  ;;  %v10385_v26 = vld [vmem:[#allocation49_spill] sm:$0xff]  ;;  %v10387_v32 = vld [vmem:[#allocation50_spill] sm:$0xff] }
 0x220   : > { %v1444_v18 = vsel %vm830_vm1, %v10372_v40, %v1370_v4  ;;  %v1443_v52 = vsel %vm830_vm1, %v10374_v41, %v1368_v59  ;;  %v10388_v59 = vld [vmem:[#allocation15_spill] sm:$0xff] }
 0x221   : > { %v1576_v1 = vadd.f32 %v7511_v12, %v1542_v2  ;;  %v1575_v8 = vadd.f32 %v7516_v35, %v1541_v0  ;;  %v1512_v38 = vmul.f32 %v7482_v7, %v1444_v18  ;;  %v1511_v16 = vmul.f32 %v7487_v23, %v1443_v52  ;;  %v10386_v2 = vld [vmem:[#allocation14_spill] sm:$0xff] }
 0x222   : > { %v1484_v0 = vmul.f32 %v7472_v20, %v10386_v2  ;;  %v1483_v42 = vmul.f32 %v7477_v24, %v10388_v59 }
 0x223   : > { %1614 = vst.msk [vmem:[#allocation2 + $0xb0] sm:$0xff] %vm444_vm0, %v1576_v1  ;;  %1613 = vst.msk [vmem:[#allocation2 + $0xa8] sm:$0xff] %vm444_vm0, %v1575_v8  ;;  %v1544_v14 = vadd.f32 %v1512_v38, %v1478_v56  ;;  %v1543_v22 = vadd.f32 %v1511_v16, %v1477_v28  ;;  %1788 = vperm.xlu0 %5796, %v10375_v37   ;;  %v1374_v13 = vpop.permute.xlu1 %1373  ;;  %v1372_v43 = vpop.permute.xlu0 %1371  ;;  %v10389_v56 = vld [vmem:[#allocation51_spill] sm:$0xff]  ;;  %v10390_v8 = vld [vmem:[#allocation52_spill] sm:$0xff] }
 0x224   : > { %v1446_v10 = vsel %vm830_vm1, %v10377_v60, %v1374_v13  ;;  %v1445_v36 = vsel %vm830_vm1, %v10379_v25, %v1372_v43  ;;  %v10392_v37 = vld [vmem:[#allocation16_spill] sm:$0xff]  ;;  %v10393_v43 = vld [vmem:[#allocation17_spill] sm:$0xff] }
 0x225   : > { %v1578_v29 = vadd.f32 %v7511_v12, %v1544_v14  ;;  %v1577_v31 = vadd.f32 %v7516_v35, %v1543_v22  ;;  %v1514_v33 = vmul.f32 %v7482_v7, %v1446_v10  ;;  %v1513_v44 = vmul.f32 %v7487_v23, %v1445_v36  ;;  %v10391_v14 = vld [vmem:[#allocation53_spill] sm:$0xff] }
 0x226   : > { %v1486_v13 = vmul.f32 %v7472_v20, %v10392_v37  ;;  %v1485_v19 = vmul.f32 %v7477_v24, %v10393_v43  ;;  %v10421_v43 = vld [vmem:[#allocation33_spill] sm:$0xff] }
 0x227   : > { %1616 = vst.msk [vmem:[#allocation2 + $0xc0] sm:$0xff] %vm444_vm0, %v1578_v29  ;;  %1615 = vst.msk [vmem:[#allocation2 + $0xb8] sm:$0xff] %vm444_vm0, %v1577_v31  ;;  %v1546_v5 = vadd.f32 %v1514_v33, %v1480_v21  ;;  %v1545_v61 = vadd.f32 %v1513_v44, %v1479_v46  ;;  %1798 = vperm.xlu0 %5796, %v10380_v51   ;;  %v1378_v17 = vpop.permute.xlu1 %1377  ;;  %v1376_v48 = vpop.permute.xlu0 %1375  ;;  %v10394_v21 = vld [vmem:[#allocation54_spill] sm:$0xff]  ;;  %v10395_v31 = vld [vmem:[#allocation55_spill] sm:$0xff] }
 0x228   : > { %v1448_v3 = vsel %vm830_vm1, %v10382_v47, %v1378_v17  ;;  %v1447_v63 = vsel %vm830_vm1, %v10384_v53, %v1376_v48  ;;  %v10397_v51 = vld [vmem:[#allocation56_spill] sm:$0xff]  ;;  %v10398_v48 = vld [vmem:[#allocation19_spill] sm:$0xff] }
 0x229   : > { %v1580_v15 = vadd.f32 %v7511_v12, %v1546_v5  ;;  %v1579_v45 = vadd.f32 %v7516_v35, %v1545_v61  ;;  %v1516_v34 = vmul.f32 %v7482_v7, %v1448_v3  ;;  %v1515_v54 = vmul.f32 %v7487_v23, %v1447_v63  ;;  %v10396_v5 = vld [vmem:[#allocation18_spill] sm:$0xff] }
 0x22a   : > { %v1488_v61 = vmul.f32 %v7472_v20, %v10396_v5  ;;  %v1487_v49 = vmul.f32 %v7477_v24, %v10398_v48 }
 0x22b   : > { %1618 = vst.msk [vmem:[#allocation2 + $0xd0] sm:$0xff] %vm444_vm0, %v1580_v15  ;;  %1617 = vst.msk [vmem:[#allocation2 + $0xc8] sm:$0xff] %vm444_vm0, %v1579_v45  ;;  %v1548_v39 = vadd.f32 %v1516_v34, %v1482_v50  ;;  %v1547_v11 = vadd.f32 %v1515_v54, %v1481_v30  ;;  %1808 = vperm.xlu0 %5796, %v10385_v26   ;;  %v1382_v58 = vpop.permute.xlu1 %1381  ;;  %v1380_v27 = vpop.permute.xlu0 %1379  ;;  %v10399_v50 = vld [vmem:[#allocation57_spill] sm:$0xff]  ;;  %v10400_v15 = vld [vmem:[#allocation58_spill] sm:$0xff] }
 0x22c   : > { %v1450_v4 = vsel %vm830_vm1, %v10387_v32, %v1382_v58  ;;  %v1449_v40 = vsel %vm830_vm1, %v10389_v56, %v1380_v27  ;;  %v1883_v32 = vld [vmem:[#allocation2 + $0x17] sm:$0xff]  ;;  %v7794_v56 = vld [vmem:[#allocation2 + $0x2f] sm:$0xff] }
 0x22d   : > { %v1582_v18 = vadd.f32 %v7511_v12, %v1548_v39  ;;  %v1581_v55 = vadd.f32 %v7516_v35, %v1547_v11  ;;  %v1518_v28 = vmul.f32 %v7482_v7, %v1450_v4  ;;  %v1517_v41 = vmul.f32 %v7487_v23, %v1449_v40 }
 0x22f   : > { %1620 = vst.msk [vmem:[#allocation2 + $0xe0] sm:$0xff] %vm444_vm0, %v1582_v18  ;;  %1619 = vst.msk [vmem:[#allocation2 + $0xd8] sm:$0xff] %vm444_vm0, %v1581_v55  ;;  %v1550_v52 = vadd.f32 %v1518_v28, %v1484_v0  ;;  %v1549_v1 = vadd.f32 %v1517_v41, %v1483_v42  ;;  %1818 = vperm.xlu0 %5796, %v10390_v8   ;;  %v1386_v38 = vpop.permute.xlu1 %1385  ;;  %v1384_v16 = vpop.permute.xlu0 %1383  ;;  %v7791_v42 = vld [vmem:[#allocation2 + $0x27] sm:$0xff]  ;;  %v10417_v55 = vld [vmem:[#allocation31_spill] sm:$0xff] }
 0x230   : > { %v1452_v22 = vsel %vm830_vm1, %v10391_v14, %v1386_v38  ;;  %v1451_v60 = vsel %vm830_vm1, %v10394_v21, %v1384_v16  ;;  %v1917_v28 = vmul.f32 %v7791_v42, %v10417_v55  ;;  %v7802_v41 = vld [vmem:[#allocation2 + $0x37] sm:$0xff]  ;;  %v10419_v38 = vld [vmem:[#allocation32_spill] sm:$0xff] }
 0x231   : > { %v1584_v10 = vadd.f32 %v7511_v12, %v1550_v52  ;;  %v1583_v6 = vadd.f32 %v7516_v35, %v1549_v1  ;;  %v1520_v46 = vmul.f32 %v7482_v7, %v1452_v22  ;;  %v1519_v25 = vmul.f32 %v7487_v23, %v1451_v60  ;;  %v7806_v52 = vld [vmem:[#allocation2 + $0x3f] sm:$0xff]  ;;  %v7814_v14 = vld [vmem:[#allocation2 + $0x47] sm:$0xff]  ;;  %v7818_v22 = vld [vmem:[#allocation2 + $0x4f] sm:$0xff] }
 0x232   : > { %v1919_v16 = vmul.f32 %v7802_v41, %v10419_v38  ;;  %v7826_v21 = vld [vmem:[#allocation2 + $0x57] sm:$0xff]  ;;  %v7830_v60 = vld [vmem:[#allocation2 + $0x5f] sm:$0xff] }
 0x233   : > { %1622 = vst.msk [vmem:[#allocation2 + $0xf0] sm:$0xff] %vm444_vm0, %v1584_v10  ;;  %1621 = vst.msk [vmem:[#allocation2 + $0xe8] sm:$0xff] %vm444_vm0, %v1583_v6  ;;  %v1552_v36 = vadd.f32 %v1520_v46, %v1486_v13  ;;  %v1551_v29 = vadd.f32 %v1519_v25, %v1485_v19  ;;  %1828 = vperm.xlu0 %5796, %v10395_v31   ;;  %v1390_v33 = vpop.permute.xlu1 %1389  ;;  %v1388_v44 = vpop.permute.xlu0 %1387  ;;  %v1921_v19 = vmul.f32 %v7814_v14, %v10421_v43  ;;  %v10422_v46 = vld [vmem:[#allocation34_spill] sm:$0xff] }
 0x234   : > { %v1454_v17 = vsel %vm830_vm1, %v10397_v51, %v1390_v33  ;;  %v1453_v47 = vsel %vm830_vm1, %v10399_v50, %v1388_v44  ;;  %v1923_v25 = vmul.f32 %v7826_v21, %v10422_v46  ;;  %v10423_v44 = vld [vmem:[#allocation35_spill] sm:$0xff] }
 0x235   : > { %v1586_v3 = vadd.f32 %v7511_v12, %v1552_v36  ;;  %v1585_v57 = vadd.f32 %v7516_v35, %v1551_v29  ;;  %v1522_v30 = vmul.f32 %v7482_v7, %v1454_v17  ;;  %v1521_v53 = vmul.f32 %v7487_v23, %v1453_v47  ;;  %v7838_v36 = vld [vmem:[#allocation2 + $0x67] sm:$0xff]  ;;  %v7842_v29 = vld [vmem:[#allocation2 + $0x6f] sm:$0xff]  ;;  %v7854_v51 = vld [vmem:[#allocation2 + $0x7f] sm:$0xff] }
 0x236   : > { %v1925_v5 = vmul.f32 %v7838_v36, %v10423_v44  ;;  %v7862_v47 = vld [vmem:[#allocation2 + $0x87] sm:$0xff] }
 0x237   : > { %1624 = vst.msk [vmem:[#allocation2 + $0x100] sm:$0xff] %vm444_vm0, %v1586_v3  ;;  %1623 = vst.msk [vmem:[#allocation2 + $0xf8] sm:$0xff] %vm444_vm0, %v1585_v57  ;;  %v1554_v20 = vadd.f32 %v1522_v30, %v1488_v61  ;;  %v1553_v63 = vadd.f32 %v1521_v53, %v1487_v49  ;;  %1838 = vperm.xlu0 %5796, %v10400_v15   ;;  %v7850_v61 = vld [vmem:[#allocation2 + $0x77] sm:$0xff]  ;;  %v10424_v49 = vld [vmem:[#allocation36_spill] sm:$0xff] }
 0x238   : > { %v1927_v50 = vmul.f32 %v7850_v61, %v10424_v49  ;;  %v7868_v57 = vld [vmem:[#allocation2 + $0x8f] sm:$0xff]  ;;  %v7876_v15 = vld [vmem:[#allocation2 + $0x97] sm:$0xff] }
 0x239   : > { %v1588_v24 = vadd.f32 %v7511_v12, %v1554_v20  ;;  %v1587_v45 = vadd.f32 %v7516_v35, %v1553_v63  ;;  %v10426_v20 = vld [vmem:[#allocation37_spill] sm:$0xff] }
 0x23a   : > { %v1929_v63 = vmul.f32 %v7862_v47, %v10426_v20 }
 0x23b   : > { %1626 = vst.msk [vmem:[#allocation2 + $0x110] sm:$0xff] %vm444_vm0, %v1588_v24  ;;  %1625 = vst.msk [vmem:[#allocation2 + $0x108] sm:$0xff] %vm444_vm0, %v1587_v45  ;;  %1848 = vperm.xlu0 %5796, %v7521_v62   ;;  %v7880_v24 = vld [vmem:[#allocation2 + $0x9f] sm:$0xff] }
 0x244   : > { %v7760_v7 = vpop.permute.xlu0 %2066  ;;  %v7864_v3 = vpop.permute.xlu1 %2062 }
 0x245   : > { %10401 = vst [vmem:[#allocation20_spill] sm:$0xff] %v7760_v7  ;;  %10425 = vst [vmem:[#allocation50_spill] sm:$0xff] %v7864_v3  ;;  %v7980_v3 = vld [vmem:[#allocation2 + $0x107] sm:$0xff] }
 0x248   : > { %v7762_v23 = vpop.permute.xlu0 %2074 }
 0x249   : > { %10402 = vst [vmem:[#allocation21_spill] sm:$0xff] %v7762_v23 }
 0x24c   : > { %v7764_v34 = vpop.permute.xlu0 %2082 }
 0x24d   : > { %10403 = vst [vmem:[#allocation8_spill] sm:$0xff] %v7764_v34  ;;  %v7970_v34 = vld [vmem:[#allocation2 + $0xff] sm:$0xff] }
 0x24e   : > { %10453 = vst [vmem:[#allocation59_spill] sm:$0xff] %v7970_v34 }
 0x250   : > { %v7766_v54 = vpop.permute.xlu0 %2090 }
 0x251   : > { %10404 = vst [vmem:[#allocation22_spill] sm:$0xff] %v7766_v54  ;;  %v10450_v54 = vmov 0.0  }
 0x252   : > { %3904 = vst.msk [vmem:[#allocation3] sm:$0xff] %vm3303_vm2, %v10450_v54  ;;  %3905 = vst.msk [vmem:[#allocation3 + $0x8] sm:$0xff] %vm3303_vm2, %v10450_v54 }
 0x253   : > { %3906 = vst.msk [vmem:[#allocation3 + $0x10] sm:$0xff] %vm3303_vm2, %v10450_v54  ;;  %3907 = vst.msk [vmem:[#allocation3 + $0x118] sm:$0xff] %vm3303_vm2, %v10450_v54 }
 0x254   : > { %v7768_v39 = vpop.permute.xlu0 %2098  ;;  %3908 = vst.msk [vmem:[#allocation3 + $0x120] sm:$0xff] %vm3303_vm2, %v10450_v54 }
 0x255   : > { %10405 = vst [vmem:[#allocation9_spill] sm:$0xff] %v7768_v39 }
 0x258   : > { %v7770_v11 = vpop.permute.xlu0 %2106 }
 0x259   : > { %10406 = vst [vmem:[#allocation23_spill] sm:$0xff] %v7770_v11  ;;  %v7942_v11 = vld [vmem:[#allocation2 + $0xe7] sm:$0xff] }
 0x25a   : > { %10446 = vst [vmem:[#allocation35_spill] sm:$0xff] %v7942_v11 }
 0x25c   : > { %v7772_v12 = vpop.permute.xlu0 %2114 }
 0x25d   : > { %10407 = vst [vmem:[#allocation24_spill] sm:$0xff] %v7772_v12 }
 0x260   : > { %v7774_v35 = vpop.permute.xlu0 %2122 }
 0x261   : > { %10408 = vst [vmem:[#allocation10_spill] sm:$0xff] %v7774_v35  ;;  %v10445_v35 = vld [vmem:[#allocation42_spill] sm:$0xff] }
 0x264   : > { %v7776_v26 = vpop.permute.xlu0 %2130 }
 0x265   : > { %10409 = vst [vmem:[#allocation25_spill] sm:$0xff] %v7776_v26 }
 0x268   : > { %v7778_v58 = vpop.permute.xlu0 %2138 }
 0x269   : > { %10410 = vst [vmem:[#allocation11_spill] sm:$0xff] %v7778_v58  ;;  %v7930_v58 = vld [vmem:[#allocation2 + $0xd7] sm:$0xff] }
 0x26a   : > { %10442 = vst [vmem:[#allocation57_spill] sm:$0xff] %v7930_v58  ;;  %v1939_v12 = vmul.f32 %v7930_v58, %v10445_v35 }
 0x26c   : > { %v7780_v62 = vpop.permute.xlu0 %2146 }
 0x26d   : > { %10411 = vst [vmem:[#allocation26_spill] sm:$0xff] %v7780_v62 }
 0x270   : > { %v7782_v27 = vpop.permute.xlu0 %2154 }
 0x271   : > { %10412 = vst [vmem:[#allocation27_spill] sm:$0xff] %v7782_v27  ;;  %v10441_v27 = vld [vmem:[#allocation41_spill] sm:$0xff] }
 0x274   : > { %v7784_v2 = vpop.permute.xlu0 %2162 }
 0x275   : > { %10413 = vst [vmem:[#allocation12_spill] sm:$0xff] %v7784_v2 }
 0x278   : > { %v7786_v0 = vpop.permute.xlu0 %2170 }
 0x279   : > { %10414 = vst [vmem:[#allocation28_spill] sm:$0xff] %v7786_v0  ;;  %v7920_v0 = vld [vmem:[#allocation2 + $0xcf] sm:$0xff] }
 0x27a   : > { %10438 = vst [vmem:[#allocation18_spill] sm:$0xff] %v7920_v0 }
 0x27e   : > { %v7788_v4 = vpop.permute.xlu0 %1693 }
 0x27f   : > { %10415 = vst [vmem:[#allocation13_spill] sm:$0xff] %v7788_v4  ;;  %v1915_v59 = vmul.f32 %v1883_v32, %v7788_v4  ;;  %v7884_v32 = vpop.permute.xlu1 %2070 }
 0x280   : > { %10427 = vst [vmem:[#allocation15_spill] sm:$0xff] %v7884_v32  ;;  %v10456_v32 = vld [vmem:[#allocation44_spill] sm:$0xff] }
 0x281   : > { %2339 = vrot.lane.b32.xlu0 %v1915_v59, %s10259_s15 }
 0x282   : > { %v7796_v40 = vpop.permute.xlu0 %1708 }
 0x283   : > { %10416 = vst [vmem:[#allocation29_spill] sm:$0xff] %v7796_v40  ;;  %v1918_v18 = vmul.f32 %v7794_v56, %v7796_v40 }
 0x285   : > { %2343 = vrot.lane.b32.xlu0 %v1917_v28, %s10259_s15  ;;  %2345 = vrot.lane.b32.xlu1 %v1918_v18, %s10259_s15  ;;  %v10428_v18 = vld [vmem:[#allocation38_spill] sm:$0xff] }
 0x286   : > { %v7808_v1 = vpop.permute.xlu0 %1718  ;;  %v1931_v28 = vmul.f32 %v7876_v15, %v10428_v18 }
 0x287   : > { %10418 = vst [vmem:[#allocation49_spill] sm:$0xff] %v7808_v1  ;;  %v1920_v8 = vmul.f32 %v7806_v52, %v7808_v1 }
 0x289   : > { %2347 = vrot.lane.b32.xlu0 %v1919_v16, %s10259_s15  ;;  %2349 = vrot.lane.b32.xlu1 %v1920_v8, %s10259_s15  ;;  %v7890_v8 = vld [vmem:[#allocation2 + $0xa7] sm:$0xff]  ;;  %v7894_v16 = vld [vmem:[#allocation2 + $0xaf] sm:$0xff] }
 0x28a   : > { %v7820_v37 = vpop.permute.xlu0 %1728  ;;  %10429 = vst [vmem:[#allocation51_spill] sm:$0xff] %v7890_v8  ;;  %10430 = vst [vmem:[#allocation52_spill] sm:$0xff] %v7894_v16 }
 0x28b   : > { %10420 = vst [vmem:[#allocation14_spill] sm:$0xff] %v7820_v37  ;;  %v1922_v13 = vmul.f32 %v7818_v22, %v7820_v37 }
 0x28d   : > { %2351 = vrot.lane.b32.xlu0 %v1921_v19, %s10259_s15  ;;  %2353 = vrot.lane.b32.xlu1 %v1922_v13, %s10259_s15 }
 0x28e   : > { %v7832_v10 = vpop.permute.xlu0 %1738 }
 0x28f   : > { %v1924_v6 = vmul.f32 %v7830_v60, %v7832_v10 }
 0x291   : > { %2355 = vrot.lane.b32.xlu0 %v1923_v25, %s10259_s15  ;;  %2357 = vrot.lane.b32.xlu1 %v1924_v6, %s10259_s15  ;;  %v10431_v6 = vld [vmem:[#allocation39_spill] sm:$0xff] }
 0x292   : > { %v7844_v31 = vpop.permute.xlu0 %1748  ;;  %v1933_v25 = vmul.f32 %v7890_v8, %v10431_v6 }
 0x293   : > { %v1926_v33 = vmul.f32 %v7842_v29, %v7844_v31 }
 0x295   : > { %2359 = vrot.lane.b32.xlu0 %v1925_v5, %s10259_s15  ;;  %2361 = vrot.lane.b32.xlu1 %v1926_v33, %s10259_s15  ;;  %v7902_v33 = vld [vmem:[#allocation2 + $0xb7] sm:$0xff]  ;;  %v7904_v5 = vpop.permute.xlu1 %2078 }
 0x296   : > { %v7856_v17 = vpop.permute.xlu0 %1758  ;;  %10432 = vst [vmem:[#allocation53_spill] sm:$0xff] %v7902_v33  ;;  %10433 = vst [vmem:[#allocation16_spill] sm:$0xff] %v7904_v5 }
 0x297   : > { %v1928_v48 = vmul.f32 %v7854_v51, %v7856_v17 }
 0x299   : > { %2363 = vrot.lane.b32.xlu0 %v1927_v50, %s10259_s15  ;;  %2365 = vrot.lane.b32.xlu1 %v1928_v48, %s10259_s15  ;;  %v7908_v48 = vld [vmem:[#allocation2 + $0xbf] sm:$0xff] }
 0x29a   : > { %v7870_v30 = vpop.permute.xlu0 %1768  ;;  %10434 = vst [vmem:[#allocation17_spill] sm:$0xff] %v7908_v48 }
 0x29b   : > { %v1930_v53 = vmul.f32 %v7868_v57, %v7870_v30 }
 0x29d   : > { %2367 = vrot.lane.b32.xlu0 %v1929_v63, %s10259_s15  ;;  %2369 = vrot.lane.b32.xlu1 %v1930_v53, %s10259_s15  ;;  %v10436_v63 = vld [vmem:[#allocation40_spill] sm:$0xff] }
 0x29e   : > { %v7882_v45 = vpop.permute.xlu0 %1778 }
 0x29f   : > { %v1932_v59 = vmul.f32 %v7880_v24, %v7882_v45 }
 0x2a1   : > { %2371 = vrot.lane.b32.xlu0 %v1931_v28, %s10259_s15  ;;  %2373 = vrot.lane.b32.xlu1 %v1932_v59, %s10259_s15  ;;  %v1935_v59 = vmul.f32 %v7902_v33, %v10436_v63  ;;  %v7916_v28 = vld [vmem:[#allocation2 + $0xc7] sm:$0xff] }
 0x2a2   : > { %v7896_v13 = vpop.permute.xlu0 %1788  ;;  %10437 = vst [vmem:[#allocation55_spill] sm:$0xff] %v7916_v28  ;;  %v1937_v62 = vmul.f32 %v7916_v28, %v10441_v27 }
 0x2a3   : > { %v1934_v19 = vmul.f32 %v7894_v16, %v7896_v13 }
 0x2a5   : > { %2375 = vrot.lane.b32.xlu0 %v1933_v25, %s10259_s15  ;;  %2377 = vrot.lane.b32.xlu1 %v1934_v19, %s10259_s15  ;;  %v7924_v19 = vpop.permute.xlu1 %2086 }
 0x2a6   : > { %v7910_v50 = vpop.permute.xlu0 %1798  ;;  %10440 = vst [vmem:[#allocation19_spill] sm:$0xff] %v7924_v19  ;;  %v7966_v19 = vld [vmem:[#allocation2 + $0xf7] sm:$0xff] }
 0x2a7   : > { %10435 = vst [vmem:[#allocation54_spill] sm:$0xff] %v7910_v50  ;;  %v1936_v53 = vmul.f32 %v7908_v48, %v7910_v50  ;;  %10452 = vst [vmem:[#allocation39_spill] sm:$0xff] %v7966_v19  ;;  %v1943_v7 = vmul.f32 %v7966_v19, %v10456_v32 }
 0x2a9   : > { %2379 = vrot.lane.b32.xlu0 %v1935_v59, %s10259_s15  ;;  %2381 = vrot.lane.b32.xlu1 %v1936_v53, %s10259_s15  ;;  %v7934_v59 = vld [vmem:[#allocation2 + $0xdf] sm:$0xff]  ;;  %v7944_v39 = vpop.permute.xlu1 %2094 }
 0x2aa   : > { %v7922_v25 = vpop.permute.xlu0 %1808  ;;  %10443 = vst [vmem:[#allocation58_spill] sm:$0xff] %v7934_v59  ;;  %10447 = vst [vmem:[#allocation36_spill] sm:$0xff] %v7944_v39 }
 0x2ab   : > { %10439 = vst [vmem:[#allocation56_spill] sm:$0xff] %v7922_v25  ;;  %v1938_v2 = vmul.f32 %v7920_v0, %v7922_v25 }
 0x2ad   : > { %2383 = vrot.lane.b32.xlu0 %v1937_v62, %s10259_s15  ;;  %2385 = vrot.lane.b32.xlu1 %v1938_v2, %s10259_s15  ;;  %v7948_v62 = vld [vmem:[#allocation2 + $0xef] sm:$0xff]  ;;  %v7974_v23 = vpop.permute.xlu1 %2102 }
 0x2ae   : > { %v7936_v53 = vpop.permute.xlu0 %1818  ;;  %10448 = vst [vmem:[#allocation37_spill] sm:$0xff] %v7948_v62  ;;  %10455 = vst [vmem:[#allocation61_spill] sm:$0xff] %v7974_v23  ;;  %v10458_v23 = vld [vmem:[#allocation45_spill] sm:$0xff] }
 0x2af   : > { %10444 = vst [vmem:[#allocation34_spill] sm:$0xff] %v7936_v53  ;;  %v1940_v26 = vmul.f32 %v7934_v59, %v7936_v53 }
 0x2b1   : > { %2387 = vrot.lane.b32.xlu0 %v1939_v12, %s10259_s15  ;;  %2389 = vrot.lane.b32.xlu1 %v1940_v26, %s10259_s15  ;;  %v10451_v26 = vld [vmem:[#allocation43_spill] sm:$0xff] }
 0x2b2   : > { %v7950_v2 = vpop.permute.xlu0 %1828  ;;  %v1941_v39 = vmul.f32 %v7942_v11, %v10451_v26 }
 0x2b3   : > { %10449 = vst [vmem:[#allocation38_spill] sm:$0xff] %v7950_v2  ;;  %v1942_v12 = vmul.f32 %v7948_v62, %v7950_v2  ;;  %v1945_v2 = vmul.f32 %v7980_v3, %v10458_v23 }
 0x2b5   : > { %2391 = vrot.lane.b32.xlu0 %v1941_v39, %s10259_s15  ;;  %2393 = vrot.lane.b32.xlu1 %v1942_v12, %s10259_s15  ;;  %v7984_v39 = vld [vmem:[#allocation2 + $0x10f] sm:$0xff] }
 0x2b6   : > { %v7972_v5 = vpop.permute.xlu0 %1838 }
 0x2b7   : > { %10454 = vst [vmem:[#allocation60_spill] sm:$0xff] %v7972_v5  ;;  %v1944_v54 = vmul.f32 %v7970_v34, %v7972_v5  ;;  %v7992_v5 = vpop.permute.xlu1 %2110 }
 0x2b8   : > { %10459 = vst [vmem:[#allocation63_spill] sm:$0xff] %v7992_v5  ;;  %v1952_v5 = vmul.f32 %v7806_v52, %v7796_v40  ;;  %v1956_v52 = vmul.f32 %v7830_v60, %v7820_v37 }
 0x2b9   : > { %2395 = vrot.lane.b32.xlu0 %v1943_v7, %s10259_s15  ;;  %2397 = vrot.lane.b32.xlu1 %v1944_v54, %s10259_s15  ;;  %v1949_v7 = vmul.f32 %v7791_v42, %v7788_v4  ;;  %v1950_v54 = vmul.f32 %v7794_v56, %v6968_v9  ;;  %v1954_v42 = vmul.f32 %v7818_v22, %v7808_v1  ;;  %v8166_v4 = vld [vmem:[#allocation2 + $0x50] sm:$0xff] }
 0x2ba   : > { %v7986_v12 = vpop.permute.xlu0 %1848  ;;  %v1953_v56 = vmul.f32 %v7814_v14, %v10419_v38  ;;  %v1977_v1 = vmul.f32 %v7980_v3, %v10456_v32  ;;  %v1948_v38 = vld [vmem:[#allocation2 + $0x11f] sm:$0xff]  ;;  %v1982_v3 = vld [vmem:[#allocation2 + $0x10] sm:$0xff] }
 0x2bb   : > { %10457 = vst [vmem:[#allocation62_spill] sm:$0xff] %v7986_v12  ;;  %v1946_v26 = vmul.f32 %v7984_v39, %v7986_v12  ;;  %v8002_v12 = vpop.permute.xlu1 %2118 }
 0x2bc   : > { %10460 = vst [vmem:[#allocation64_spill] sm:$0xff] %v8002_v12 }
 0x2bd   : > { %2399 = vrot.lane.b32.xlu0 %v1945_v2, %s10259_s15  ;;  %2401 = vrot.lane.b32.xlu1 %v1946_v26, %s10259_s15  ;;  %v1951_v2 = vmul.f32 %v7802_v41, %v10417_v55  ;;  %v1955_v41 = vmul.f32 %v7826_v21, %v10421_v43 }
 0x2bf   : > { %v8014_v26 = vpop.permute.xlu1 %2126 }
 0x2c0   : > { %10461 = vst [vmem:[#allocation65_spill] sm:$0xff] %v8014_v26  ;;  %v1947_v26 = vld [vmem:[#allocation2 + $0x117] sm:$0xff] }
 0x2c1   : > { %2467 = vrot.lane.b32.xlu0 %v1949_v7, %s6192_s16  ;;  %2469 = vrot.lane.b32.xlu1 %v1950_v54, %s6192_s16  ;;  %v1958_v7 = vmul.f32 %v7842_v29, %v7832_v10  ;;  %v1957_v54 = vmul.f32 %v7838_v36, %v10422_v46 }
 0x2c2   : > { %v10475_v40 = vld [vmem:[#allocation62_spill] sm:$0xff] }
 0x2c5   : > { %2471 = vrot.lane.b32.xlu0 %v1951_v2, %s6192_s16  ;;  %2473 = vrot.lane.b32.xlu1 %v1952_v5, %s6192_s16  ;;  %v8024_v5 = vpop.permute.xlu1 %2134  ;;  %v1960_v2 = vmul.f32 %v7854_v51, %v7844_v31 }
 0x2c6   : > { %10462 = vst [vmem:[#allocation66_spill] sm:$0xff] %v8024_v5  ;;  %v10472_v5 = vld [vmem:[#allocation60_spill] sm:$0xff] }
 0x2c7   : > { %v1978_v43 = vmul.f32 %v7984_v39, %v10472_v5  ;;  %v1979_v39 = vmul.f32 %v1947_v26, %v10458_v23  ;;  %v8130_v26 = vld [vmem:[#allocation2 + $0x20] sm:$0xff]  ;;  %v8190_v5 = vld [vmem:[#allocation2 + $0x70] sm:$0xff] }
 0x2c8   : > { %10485 = vst [vmem:[#allocation85_spill] sm:$0xff] %v8190_v5 }
 0x2c9   : > { %2475 = vrot.lane.b32.xlu0 %v1953_v56, %s6192_s16  ;;  %2477 = vrot.lane.b32.xlu1 %v1954_v42, %s6192_s16  ;;  %v1959_v42 = vmul.f32 %v7850_v61, %v10423_v44  ;;  %v8036_v56 = vpop.permute.xlu1 %2142 }
 0x2ca   : > { %10463 = vst [vmem:[#allocation67_spill] sm:$0xff] %v8036_v56 }
 0x2cd   : > { %2479 = vrot.lane.b32.xlu0 %v1955_v41, %s6192_s16  ;;  %2481 = vrot.lane.b32.xlu1 %v1956_v52, %s6192_s16  ;;  %v1962_v52 = vmul.f32 %v7868_v57, %v7856_v17  ;;  %v1961_v41 = vmul.f32 %v7862_v47, %v10424_v49 }
 0x2d1   : > { %2483 = vrot.lane.b32.xlu0 %v1957_v54, %s6192_s16  ;;  %2485 = vrot.lane.b32.xlu1 %v1958_v7, %s6192_s16  ;;  %v8046_v7 = vpop.permute.xlu1 %2150  ;;  %v1964_v54 = vmul.f32 %v7880_v24, %v7870_v30 }
 0x2d2   : > { %10464 = vst [vmem:[#allocation68_spill] sm:$0xff] %v8046_v7  ;;  %v1970_v7 = vmul.f32 %v7920_v0, %v7910_v50  ;;  %v8212_v0 = vld [vmem:[#allocation2 + $0x88] sm:$0xff] }
 0x2d3   : > { %10492 = vst [vmem:[#allocation92_spill] sm:$0xff] %v8212_v0  ;;  %v2009_v50 = vld [vmem:[#allocation2 + $0xe8] sm:$0xff] }
 0x2d5   : > { %2487 = vrot.lane.b32.xlu0 %v1959_v42, %s6192_s16  ;;  %2489 = vrot.lane.b32.xlu1 %v1960_v2, %s6192_s16  ;;  %v1963_v42 = vmul.f32 %v7876_v15, %v10426_v20  ;;  %v1966_v2 = vmul.f32 %v7894_v16, %v7882_v45  ;;  %v8058_v56 = vpop.permute.xlu1 %2158  ;;  %v8260_v16 = vld [vmem:[#allocation2 + $0xc8] sm:$0xff] }
 0x2d6   : > { %10465 = vst [vmem:[#allocation69_spill] sm:$0xff] %v8058_v56  ;;  %10508 = vst [vmem:[#allocation108_spill] sm:$0xff] %v8260_v16 }
 0x2d9   : > { %2491 = vrot.lane.b32.xlu0 %v1961_v41, %s6192_s16  ;;  %2493 = vrot.lane.b32.xlu1 %v1962_v52, %s6192_s16  ;;  %v1965_v41 = vmul.f32 %v7890_v8, %v10428_v18  ;;  %v1968_v52 = vmul.f32 %v7908_v48, %v7896_v13  ;;  %v8224_v48 = vld [vmem:[#allocation2 + $0x98] sm:$0xff] }
 0x2da   : > { %10496 = vst [vmem:[#allocation96_spill] sm:$0xff] %v8224_v48  ;;  %v8248_v8 = vld [vmem:[#allocation2 + $0xb8] sm:$0xff] }
 0x2db   : > { %10504 = vst [vmem:[#allocation104_spill] sm:$0xff] %v8248_v8 }
 0x2dd   : > { %2495 = vrot.lane.b32.xlu0 %v1963_v42, %s6192_s16  ;;  %2497 = vrot.lane.b32.xlu1 %v1964_v54, %s6192_s16  ;;  %v1967_v42 = vmul.f32 %v7902_v33, %v10431_v6  ;;  %v8068_v54 = vpop.permute.xlu1 %2166 }
 0x2de   : > { %10466 = vst [vmem:[#allocation70_spill] sm:$0xff] %v8068_v54  ;;  %v10469_v54 = vld [vmem:[#allocation38_spill] sm:$0xff] }
 0x2df   : > { %v1976_v37 = vmul.f32 %v7970_v34, %v10469_v54  ;;  %v8176_v34 = vld [vmem:[#allocation2 + $0x58] sm:$0xff]  ;;  %v8202_v54 = vld [vmem:[#allocation2 + $0x80] sm:$0xff] }
 0x2e0   : > { %10480 = vst [vmem:[#allocation80_spill] sm:$0xff] %v8176_v34  ;;  %10489 = vst [vmem:[#allocation89_spill] sm:$0xff] %v8202_v54 }
 0x2e1   : > { %2499 = vrot.lane.b32.xlu0 %v1965_v41, %s6192_s16  ;;  %2501 = vrot.lane.b32.xlu1 %v1966_v2, %s6192_s16  ;;  %v1969_v41 = vmul.f32 %v7916_v28, %v10436_v63  ;;  %v1972_v2 = vmul.f32 %v7934_v59, %v7922_v25  ;;  %v8080_v56 = vpop.permute.xlu1 %2174  ;;  %v8200_v59 = vld [vmem:[#allocation2 + $0x78] sm:$0xff]  ;;  %v8226_v25 = vld [vmem:[#allocation2 + $0xa0] sm:$0xff] }
 0x2e2   : > { %10467 = vst [vmem:[#allocation71_spill] sm:$0xff] %v8080_v56  ;;  %10488 = vst [vmem:[#allocation88_spill] sm:$0xff] %v8200_v59  ;;  %v8250_v63 = vld [vmem:[#allocation2 + $0xc0] sm:$0xff] }
 0x2e3   : > { %10497 = vst [vmem:[#allocation97_spill] sm:$0xff] %v8226_v25  ;;  %10505 = vst [vmem:[#allocation105_spill] sm:$0xff] %v8250_v63 }
 0x2e5   : > { %2503 = vrot.lane.b32.xlu0 %v1967_v42, %s6192_s16  ;;  %2505 = vrot.lane.b32.xlu1 %v1968_v52, %s6192_s16  ;;  %v1971_v42 = vmul.f32 %v7930_v58, %v10441_v27  ;;  %v1974_v52 = vmul.f32 %v7948_v62, %v7936_v53  ;;  %v8188_v62 = vld [vmem:[#allocation2 + $0x68] sm:$0xff]  ;;  %v8214_v53 = vld [vmem:[#allocation2 + $0x90] sm:$0xff] }
 0x2e6   : > { %10484 = vst [vmem:[#allocation84_spill] sm:$0xff] %v8188_v62  ;;  %10493 = vst [vmem:[#allocation93_spill] sm:$0xff] %v8214_v53 }
 0x2e9   : > { %2507 = vrot.lane.b32.xlu0 %v1969_v41, %s6192_s16  ;;  %2509 = vrot.lane.b32.xlu1 %v1970_v7, %s6192_s16  ;;  %v1973_v41 = vmul.f32 %v7942_v11, %v10445_v35  ;;  %v8090_v7 = vpop.permute.xlu1 %2341 }
 0x2ea   : > { %10468 = vst [vmem:[#allocation72_spill] sm:$0xff] %v8090_v7 }
 0x2ed   : > { %2511 = vrot.lane.b32.xlu0 %v1971_v42, %s6192_s16  ;;  %2513 = vrot.lane.b32.xlu1 %v1972_v2, %s6192_s16  ;;  %v10471_v42 = vld [vmem:[#allocation43_spill] sm:$0xff] }
 0x2ee   : > { %v1975_v2 = vmul.f32 %v7966_v19, %v10471_v42 }
 0x2f1   : > { %2515 = vrot.lane.b32.xlu0 %v1973_v41, %s6192_s16  ;;  %2517 = vrot.lane.b32.xlu1 %v1974_v52, %s6192_s16 }
 0x2f3   : > { %v8094_v56 = vpop.permute.xlu0 %2339 }
 0x2f4   : > { %10470 = vst [vmem:[#allocation73_spill] sm:$0xff] %v8094_v56  ;;  %v8164_v56 = vld [vmem:[#allocation2 + $0x48] sm:$0xff] }
 0x2f5   : > { %2519 = vrot.lane.b32.xlu0 %v1975_v2, %s6192_s16  ;;  %2521 = vrot.lane.b32.xlu1 %v1976_v37, %s6192_s16  ;;  %v1980_v2 = vmul.f32 %v1948_v38, %v10475_v40  ;;  %v8178_v40 = vld [vmem:[#allocation2 + $0x60] sm:$0xff] }
 0x2f6   : > { %10481 = vst [vmem:[#allocation81_spill] sm:$0xff] %v8178_v40 }
 0x2f7   : > { %v8102_v41 = vpop.permute.xlu1 %2345  ;;  %v8104_v52 = vpop.permute.xlu0 %2343 }
 0x2f8   : > { %10473 = vst [vmem:[#allocation74_spill] sm:$0xff] %v8102_v41  ;;  %10474 = vst [vmem:[#allocation75_spill] sm:$0xff] %v8104_v52  ;;  %v1981_v41 = vld [vmem:[#allocation2 + $0x8] sm:$0xff] }
 0x2f9   : > { %2523 = vrot.lane.b32.xlu0 %v1977_v1, %s6192_s16  ;;  %2525 = vrot.lane.b32.xlu1 %v1978_v43, %s6192_s16  ;;  %v8128_v43 = vld [vmem:[#allocation2 + $0x18] sm:$0xff] }
 0x2fb   : > { %v8111_v55 = vpop.permute.xlu1 %2349  ;;  %v8113_v37 = vpop.permute.xlu0 %2347 }
 0x2fc   : > { %10476 = vst [vmem:[#allocation76_spill] sm:$0xff] %v8111_v55  ;;  %10477 = vst [vmem:[#allocation77_spill] sm:$0xff] %v8113_v37  ;;  %v8152_v55 = vld [vmem:[#allocation2 + $0x38] sm:$0xff]  ;;  %v8154_v37 = vld [vmem:[#allocation2 + $0x40] sm:$0xff] }
 0x2fd   : > { %2527 = vrot.lane.b32.xlu0 %v1979_v39, %s6192_s16  ;;  %2529 = vrot.lane.b32.xlu1 %v1980_v2, %s6192_s16 }
 0x2ff   : > { %v8118_v52 = vpop.permute.xlu1 %2353  ;;  %v8120_v12 = vpop.permute.xlu0 %2351 }
 0x300   : > { %10478 = vst [vmem:[#allocation78_spill] sm:$0xff] %v8118_v52  ;;  %10479 = vst [vmem:[#allocation79_spill] sm:$0xff] %v8120_v12 }
 0x301   : > { %2595 = vrot.lane.b32.xlu0 %v1981_v41, %s6193_s0  ;;  %2597 = vrot.lane.b32.xlu1 %v1982_v3, %s6193_s0  ;;  %v8140_v41 = vld [vmem:[#allocation2 + $0x28] sm:$0xff]  ;;  %v8142_v3 = vld [vmem:[#allocation2 + $0x30] sm:$0xff] }
 0x303   : > { %v8124_v1 = vpop.permute.xlu1 %2357  ;;  %v8126_v38 = vpop.permute.xlu0 %2355 }
 0x305   : > { %2599 = vrot.lane.b32.xlu0 %v8128_v43, %s6193_s0  ;;  %2601 = vrot.lane.b32.xlu1 %v8130_v26, %s6193_s0 }
 0x307   : > { %v8136_v2 = vpop.permute.xlu1 %2361  ;;  %v8138_v39 = vpop.permute.xlu0 %2359 }
 0x309   : > { %2603 = vrot.lane.b32.xlu0 %v8140_v41, %s6193_s0  ;;  %2605 = vrot.lane.b32.xlu1 %v8142_v3, %s6193_s0 }
 0x30b   : > { %v8148_v52 = vpop.permute.xlu1 %2365  ;;  %v8150_v12 = vpop.permute.xlu0 %2363 }
 0x30d   : > { %2607 = vrot.lane.b32.xlu0 %v8152_v55, %s6193_s0  ;;  %2609 = vrot.lane.b32.xlu1 %v8154_v37, %s6193_s0 }
 0x30f   : > { %v8160_v7 = vpop.permute.xlu1 %2369  ;;  %v8162_v9 = vpop.permute.xlu0 %2367 }
 0x311   : > { %2611 = vrot.lane.b32.xlu0 %v8164_v56, %s6193_s0  ;;  %2613 = vrot.lane.b32.xlu1 %v8166_v4, %s6193_s0 }
 0x313   : > { %v8172_v19 = vpop.permute.xlu1 %2373  ;;  %v8174_v23 = vpop.permute.xlu0 %2371 }
 0x315   : > { %2615 = vrot.lane.b32.xlu0 %v8176_v34, %s6193_s0  ;;  %2617 = vrot.lane.b32.xlu1 %v8178_v40, %s6193_s0 }
 0x317   : > { %v8184_v11 = vpop.permute.xlu1 %2377  ;;  %v8186_v32 = vpop.permute.xlu0 %2375 }
 0x318   : > { %10482 = vst [vmem:[#allocation82_spill] sm:$0xff] %v8184_v11  ;;  %10483 = vst [vmem:[#allocation83_spill] sm:$0xff] %v8186_v32  ;;  %v2010_v32 = vld [vmem:[#allocation2 + $0xf0] sm:$0xff] }
 0x319   : > { %2619 = vrot.lane.b32.xlu0 %v8188_v62, %s6193_s0  ;;  %2621 = vrot.lane.b32.xlu1 %v8190_v5, %s6193_s0 }
 0x31b   : > { %v8196_v58 = vpop.permute.xlu1 %2381  ;;  %v8198_v42 = vpop.permute.xlu0 %2379 }
 0x31c   : > { %10486 = vst [vmem:[#allocation86_spill] sm:$0xff] %v8196_v58  ;;  %10487 = vst [vmem:[#allocation87_spill] sm:$0xff] %v8198_v42  ;;  %v8236_v42 = vld [vmem:[#allocation2 + $0xa8] sm:$0xff]  ;;  %v8238_v58 = vld [vmem:[#allocation2 + $0xb0] sm:$0xff] }
 0x31d   : > { %2623 = vrot.lane.b32.xlu0 %v8200_v59, %s6193_s0  ;;  %2625 = vrot.lane.b32.xlu1 %v8202_v54, %s6193_s0  ;;  %10500 = vst [vmem:[#allocation100_spill] sm:$0xff] %v8236_v42  ;;  %10501 = vst [vmem:[#allocation101_spill] sm:$0xff] %v8238_v58 }
 0x31f   : > { %v8208_v28 = vpop.permute.xlu1 %2385  ;;  %v8210_v35 = vpop.permute.xlu0 %2383 }
 0x320   : > { %10490 = vst [vmem:[#allocation90_spill] sm:$0xff] %v8208_v28  ;;  %10491 = vst [vmem:[#allocation91_spill] sm:$0xff] %v8210_v35 }
 0x321   : > { %2627 = vrot.lane.b32.xlu0 %v8212_v0, %s6193_s0  ;;  %2629 = vrot.lane.b32.xlu1 %v8214_v53, %s6193_s0 }
 0x323   : > { %v8220_v33 = vpop.permute.xlu1 %2389  ;;  %v8222_v27 = vpop.permute.xlu0 %2387 }
 0x324   : > { %10494 = vst [vmem:[#allocation94_spill] sm:$0xff] %v8220_v33  ;;  %10495 = vst [vmem:[#allocation95_spill] sm:$0xff] %v8222_v27 }
 0x325   : > { %2631 = vrot.lane.b32.xlu0 %v8224_v48, %s6193_s0  ;;  %2633 = vrot.lane.b32.xlu1 %v8226_v25, %s6193_s0 }
 0x327   : > { %v8232_v35 = vpop.permute.xlu1 %2393  ;;  %v8234_v28 = vpop.permute.xlu0 %2391 }
 0x328   : > { %10498 = vst [vmem:[#allocation98_spill] sm:$0xff] %v8232_v35  ;;  %10499 = vst [vmem:[#allocation99_spill] sm:$0xff] %v8234_v28 }
 0x329   : > { %2635 = vrot.lane.b32.xlu0 %v8236_v42, %s6193_s0  ;;  %2637 = vrot.lane.b32.xlu1 %v8238_v58, %s6193_s0  ;;  %v8262_v58 = vld [vmem:[#allocation2 + $0xd0] sm:$0xff] }
 0x32a   : > { %10509 = vst [vmem:[#allocation109_spill] sm:$0xff] %v8262_v58 }
 0x32b   : > { %v8244_v27 = vpop.permute.xlu1 %2397  ;;  %v8246_v33 = vpop.permute.xlu0 %2395 }
 0x32c   : > { %10502 = vst [vmem:[#allocation102_spill] sm:$0xff] %v8244_v27  ;;  %10503 = vst [vmem:[#allocation103_spill] sm:$0xff] %v8246_v33  ;;  %v2007_v27 = vld [vmem:[#allocation2 + $0xd8] sm:$0xff] }
 0x32d   : > { %2639 = vrot.lane.b32.xlu0 %v8248_v8, %s6193_s0  ;;  %2641 = vrot.lane.b32.xlu1 %v8250_v63, %s6193_s0  ;;  %v2008_v63 = vld [vmem:[#allocation2 + $0xe0] sm:$0xff] }
 0x32f   : > { %v8256_v28 = vpop.permute.xlu1 %2401  ;;  %v8258_v35 = vpop.permute.xlu0 %2399 }
 0x330   : > { %10506 = vst [vmem:[#allocation106_spill] sm:$0xff] %v8256_v28  ;;  %10507 = vst [vmem:[#allocation107_spill] sm:$0xff] %v8258_v35 }
 0x331   : > { %2643 = vrot.lane.b32.xlu0 %v8260_v16, %s6193_s0  ;;  %2645 = vrot.lane.b32.xlu1 %v8262_v58, %s6193_s0 }
 0x333   : > { %v8268_v33 = vpop.permute.xlu1 %2469  ;;  %v8270_v8 = vpop.permute.xlu0 %2467 }
 0x334   : > { %10510 = vst [vmem:[#allocation110_spill] sm:$0xff] %v8268_v33  ;;  %10511 = vst [vmem:[#allocation111_spill] sm:$0xff] %v8270_v8  ;;  %v2011_v33 = vld [vmem:[#allocation2 + $0xf8] sm:$0xff]  ;;  %v2012_v8 = vld [vmem:[#allocation2 + $0x100] sm:$0xff] }
 0x335   : > { %2647 = vrot.lane.b32.xlu0 %v2007_v27, %s6193_s0  ;;  %2649 = vrot.lane.b32.xlu1 %v2008_v63, %s6193_s0 }
 0x337   : > { %v8274_v35 = vpop.permute.xlu1 %2473  ;;  %v8276_v28 = vpop.permute.xlu0 %2471 }
 0x338   : > { %10512 = vst [vmem:[#allocation112_spill] sm:$0xff] %v8274_v35  ;;  %10513 = vst [vmem:[#allocation113_spill] sm:$0xff] %v8276_v28  ;;  %v3534_v35 = vld [vmem:[%s10101_s4] sm:$0xff]  ;;  %v3535_v28 = vld [vmem:[%s10101_s4 + $0x8] sm:$0xff] }
 0x339   : > { %2651 = vrot.lane.b32.xlu0 %v2009_v50, %s6193_s0  ;;  %2653 = vrot.lane.b32.xlu1 %v2010_v32, %s6193_s0 }
 0x33b   : > { %v8280_v58 = vpop.permute.xlu1 %2477  ;;  %v8282_v16 = vpop.permute.xlu0 %2475 }
 0x33c   : > { %10514 = vst [vmem:[#allocation114_spill] sm:$0xff] %v8280_v58  ;;  %10515 = vst [vmem:[#allocation115_spill] sm:$0xff] %v8282_v16 }
 0x33d   : > { %2655 = vrot.lane.b32.xlu0 %v2011_v33, %s6193_s0  ;;  %2657 = vrot.lane.b32.xlu1 %v2012_v8, %s6193_s0  ;;  %s6197_s0 = smov 56  }
 0x33f   : > { %v8286_v27 = vpop.permute.xlu1 %2481  ;;  %v8288_v63 = vpop.permute.xlu0 %2479 }
 0x340   : > { %10516 = vst [vmem:[#allocation116_spill] sm:$0xff] %v8286_v27  ;;  %10517 = vst [vmem:[#allocation117_spill] sm:$0xff] %v8288_v63 }
 0x341   : > { %2695 = vrot.lane.b32.xlu1 %v8130_v26, %s6194_s30  ;;  %2693 = vrot.lane.b32.xlu0 %v8128_v43, %s6194_s30 }
 0x343   : > { %v8294_v32 = vpop.permute.xlu1 %2485  ;;  %v8296_v50 = vpop.permute.xlu0 %2483 }
 0x345   : > { %2699 = vrot.lane.b32.xlu1 %v8142_v3, %s6194_s30  ;;  %2697 = vrot.lane.b32.xlu0 %v8140_v41, %s6194_s30 }
 0x347   : > { %v8302_v8 = vpop.permute.xlu1 %2489  ;;  %v8304_v33 = vpop.permute.xlu0 %2487 }
 0x349   : > { %2703 = vrot.lane.b32.xlu1 %v8154_v37, %s6194_s30  ;;  %2701 = vrot.lane.b32.xlu0 %v8152_v55, %s6194_s30 }
 0x34b   : > { %v8310_v43 = vpop.permute.xlu1 %2493  ;;  %v8312_v26 = vpop.permute.xlu0 %2491 }
 0x34d   : > { %2707 = vrot.lane.b32.xlu1 %v8166_v4, %s6194_s30  ;;  %2705 = vrot.lane.b32.xlu0 %v8164_v56, %s6194_s30 }
 0x34f   : > { %v8318_v27 = vpop.permute.xlu1 %2497  ;;  %v8320_v63 = vpop.permute.xlu0 %2495 }
 0x351   : > { %2711 = vrot.lane.b32.xlu1 %v8178_v40, %s6194_s30  ;;  %2709 = vrot.lane.b32.xlu0 %v8176_v34, %s6194_s30  ;;  %v5691_v40 = vpack.c.bf16 %v3535_v28, %v3534_v35 }
 0x353   : > { %v8326_v58 = vpop.permute.xlu1 %2501  ;;  %v8328_v16 = vpop.permute.xlu0 %2499  ;;  %5692 = vmatprep.subr.bf16.mxu0 %v5691_v40 }
 0x354   : > { %5694 = vmatpush3.bf16.msra.mxu0 %v5691_v40  ;;  %v3539_v40 = vld [vmem:[%s10101_s4 + $0x28] sm:$0xff] }
 0x355   : > { %2715 = vrot.lane.b32.xlu1 %v8190_v5, %s6194_s30  ;;  %2713 = vrot.lane.b32.xlu0 %v8188_v62, %s6194_s30  ;;  %v3536_v5 = vld [vmem:[%s10101_s4 + $0x10] sm:$0xff]  ;;  %v3537_v62 = vld [vmem:[%s10101_s4 + $0x18] sm:$0xff] }
 0x356   : > { %v5695_v35 = vpack.c.bf16 %v3537_v62, %v3536_v5 }
 0x357   : > { %v8340_v11 = vpop.permute.xlu1 %2505  ;;  %v8342_v34 = vpop.permute.xlu0 %2503 }
 0x358   : > { %10518 = vst [vmem:[#allocation118_spill] sm:$0xff] %v8342_v34  ;;  %5696 = vmatprep.subr.bf16.mxu0 %v5695_v35 }
 0x359   : > { %2719 = vrot.lane.b32.xlu1 %v8202_v54, %s6194_s30  ;;  %2717 = vrot.lane.b32.xlu0 %v8200_v59, %s6194_s30  ;;  %v3538_v54 = vld [vmem:[%s10101_s4 + $0x20] sm:$0xff] }
 0x35a   : > { %5698 = vmatpush3.bf16.msra.mxu0 %v5695_v35  ;;  %v5699_v62 = vpack.c.bf16 %v3539_v40, %v3538_v54  ;;  %v3541_v35 = vld [vmem:[%s10101_s4 + $0x38] sm:$0xff] }
 0x35b   : > { %v8354_v28 = vpop.permute.xlu1 %2509  ;;  %v8356_v34 = vpop.permute.xlu0 %2507 }
 0x35c   : > { %10519 = vst [vmem:[#allocation119_spill] sm:$0xff] %v8356_v34  ;;  %5700 = vmatprep.subr.bf16.mxu0 %v5699_v62 }
 0x35d   : > { %2723 = vrot.lane.b32.xlu1 %v8214_v53, %s6194_s30  ;;  %2721 = vrot.lane.b32.xlu0 %v8212_v0, %s6194_s30  ;;  %v3540_v53 = vld [vmem:[%s10101_s4 + $0x30] sm:$0xff] }
 0x35e   : > { %5702 = vmatpush3.bf16.msra.mxu0 %v5699_v62  ;;  %v5703_v54 = vpack.c.bf16 %v3541_v35, %v3540_v53  ;;  %v10524_v62 = vld [vmem:[#allocation46_spill] sm:$0xff] }
 0x35f   : > { %v8368_v5 = vpop.permute.xlu1 %2513  ;;  %v8370_v59 = vpop.permute.xlu0 %2511 }
 0x360   : > { %10520 = vst [vmem:[#allocation120_spill] sm:$0xff] %v8368_v5  ;;  %10521 = vst [vmem:[#allocation121_spill] sm:$0xff] %v8370_v59  ;;  %v2017_v59 = vld [vmem:[#allocation2 + $0x9] sm:$0xff]  ;;  %5704 = vmatprep.subr.bf16.mxu0 %v5703_v54 }
 0x361   : > { %2727 = vrot.lane.b32.xlu1 %v8226_v25, %s6194_s30  ;;  %2725 = vrot.lane.b32.xlu0 %v8224_v48, %s6194_s30  ;;  %v3542_v25 = vld [vmem:[%s10101_s4 + $0x40] sm:$0xff]  ;;  %v2177_v53 = vmul.f32 %v10524_v62, %v2017_v59  ;;  %v2211_v5 = vld [vmem:[#allocation2 + $0x29] sm:$0xff] }
 0x362   : > { %5706 = vmatpush3.bf16.msra.mxu0 %v5703_v54 }
 0x363   : > { %v8382_v40 = vpop.permute.xlu1 %2517  ;;  %v8384_v0 = vpop.permute.xlu0 %2515  ;;  %5615 = vmatprep.subr.mxu0 %v3542_v25 }
 0x364   : > { %10522 = vst [vmem:[#allocation122_spill] sm:$0xff] %v8382_v40  ;;  %10523 = vst [vmem:[#allocation123_spill] sm:$0xff] %v8384_v0  ;;  %v2209_v0 = vld [vmem:[#allocation2 + $0x19] sm:$0xff]  ;;  %v2018_v40 = vld [vmem:[#allocation2 + $0x11] sm:$0xff] }
 0x365   : > { %2791 = vrot.lane.b32.xlu1 %v8140_v41, %s6195_s26  ;;  %2729 = vrot.lane.b32.xlu0 %v8236_v42, %s6194_s30  ;;  %v2241_v59 = vmul.f32 %v2209_v0, %v10524_v62  ;;  %v10529_v42 = vld [vmem:[#allocation48_spill] sm:$0xff] }
 0x366   : > { %5616 = vmatpush3.msra.mxu0 %v3542_v25  ;;  %v2275_v25 = vmul.f32 %v2211_v5, %v10524_v62 }
 0x367   : > { %v8394_v35 = vpop.permute.xlu1 %2521  ;;  %v8396_v48 = vpop.permute.xlu0 %2519 }
 0x368   : > { %10525 = vst [vmem:[#allocation46_spill] sm:$0xff] %v8394_v35  ;;  %10526 = vst [vmem:[#allocation124_spill] sm:$0xff] %v8396_v48  ;;  %v2178_v35 = vmul.f32 %v10529_v42, %v2018_v40  ;;  %v2210_v48 = vld [vmem:[#allocation2 + $0x21] sm:$0xff] }
 0x369   : > { %2919 = vrot.lane.b32.xlu1 %v2177_v53, %s10262_s29  ;;  %2793 = vrot.lane.b32.xlu0 %v8142_v3, %s6195_s26  ;;  %v2242_v3 = vmul.f32 %v2210_v48, %v10529_v42 }
 0x36b   : > { %v8401_v41 = vpop.permute.xlu1 %2525  ;;  %v8403_v54 = vpop.permute.xlu0 %2523 }
 0x36c   : > { %10527 = vst [vmem:[#allocation125_spill] sm:$0xff] %v8401_v41  ;;  %10528 = vst [vmem:[#allocation126_spill] sm:$0xff] %v8403_v54  ;;  %v2212_v54 = vld [vmem:[#allocation2 + $0x31] sm:$0xff] }
 0x36d   : > { %3047 = vrot.lane.b32.xlu1 %v2241_v59, %s6197_s0  ;;  %2921 = vrot.lane.b32.xlu0 %v2178_v35, %s10262_s29  ;;  %v2276_v35 = vmul.f32 %v2212_v54, %v10529_v42  ;;  %v10533_v59 = vld [vmem:[#allocation47_spill] sm:$0xff] }
 0x36f   : > { %v8409_v53 = vpop.permute.xlu1 %2529  ;;  %v8411_v34 = vpop.permute.xlu0 %2527 }
 0x370   : > { %10530 = vst [vmem:[#allocation48_spill] sm:$0xff] %v8411_v34  ;;  %v2179_v34 = vmul.f32 %v2209_v0, %v10533_v59 }
 0x371   : > { %3175 = vrot.lane.b32.xlu1 %v2275_v25, %s10264_s17  ;;  %3049 = vrot.lane.b32.xlu0 %v2242_v3, %s6197_s0  ;;  %v2020_v25 = vld [vmem:[#allocation2 + $0x21] sm:$0xff]  ;;  %v10534_v3 = vld [vmem:[#allocation50_spill] sm:$0xff] }
 0x373   : > { %v8417_v40 = vpop.permute.xlu1 %2597  ;;  %v8419_v41 = vpop.permute.xlu0 %2595 }
 0x374   : > { %10531 = vst [vmem:[#allocation127_spill] sm:$0xff] %v8417_v40  ;;  %10532 = vst [vmem:[#allocation128_spill] sm:$0xff] %v8419_v41  ;;  %v2180_v40 = vmul.f32 %v10534_v3, %v2020_v25  ;;  %v8439_v41 = vld [vmem:[#allocation2 + $0x39] sm:$0xff] }
 0x375   : > { %3177 = vrot.lane.b32.xlu1 %v2276_v35, %s10264_s17  ;;  %2795 = vrot.lane.b32.xlu0 %v8152_v55, %s6195_s26  ;;  %v2243_v55 = vmul.f32 %v2211_v5, %v10533_v59  ;;  %v2277_v25 = vmul.f32 %v8439_v41, %v10533_v59  ;;  %v1859_v5 = vmul.f32 %v7814_v14, %v10422_v46 }
 0x377   : > { %v8425_v62 = vpop.permute.xlu1 %2601  ;;  %v8427_v48 = vpop.permute.xlu0 %2599 }
 0x379   : > { %2923 = vrot.lane.b32.xlu1 %v2179_v34, %s10262_s29  ;;  %2797 = vrot.lane.b32.xlu0 %v8154_v37, %s6195_s26  ;;  %v2244_v34 = vmul.f32 %v2212_v54, %v10534_v3 }
 0x37b   : > { %v8434_v42 = vpop.permute.xlu1 %2605  ;;  %v8436_v35 = vpop.permute.xlu0 %2603 }
 0x37c   : > { %10535 = vst [vmem:[#allocation47_spill] sm:$0xff] %v8434_v42  ;;  %v1860_v42 = vmul.f32 %v7818_v22, %v7832_v10 }
 0x37d   : > { %3051 = vrot.lane.b32.xlu1 %v2243_v55, %s6197_s0  ;;  %2925 = vrot.lane.b32.xlu0 %v2180_v40, %s10262_s29  ;;  %v8456_v40 = vld [vmem:[#allocation2 + $0x41] sm:$0xff] }
 0x37e   : > { %v3280_v55 = vsel %vm444_vm0, %v1860_v42, %v8124_v1  ;;  %v2278_v59 = vmul.f32 %v8456_v40, %v10534_v3  ;;  %v1861_v1 = vmul.f32 %v7826_v21, %v10423_v44 }
 0x37f   : > { %v8444_v0 = vpop.permute.xlu1 %2609  ;;  %v8446_v37 = vpop.permute.xlu0 %2607  ;;  %v3313_v22 = vsel %vm3303_vm2, %v3280_v55, %v8294_v32  ;;  %v2021_v32 = vld [vmem:[#allocation2 + $0x29] sm:$0xff] }
 0x380   : > { %10536 = vst [vmem:[#allocation50_spill] sm:$0xff] %v8444_v0  ;;  %v3279_v0 = vsel %vm444_vm0, %v1859_v5, %v8126_v38  ;;  %v1863_v5 = vmul.f32 %v7838_v36, %v10424_v49 }
 0x381   : > { %3179 = vrot.lane.b32.xlu1 %v2277_v25, %s10264_s17  ;;  %3053 = vrot.lane.b32.xlu0 %v2244_v34, %s6197_s0  ;;  %v3312_v14 = vsel %vm3303_vm2, %v3279_v0, %v8296_v50  ;;  %v1862_v34 = vmul.f32 %v7830_v60, %v7844_v31  ;;  %v3281_v60 = vsel %vm444_vm0, %v1861_v1, %v8138_v39  ;;  %v10537_v31 = vld [vmem:[#allocation20_spill] sm:$0xff] }
 0x382   : > { %v2181_v21 = vmul.f32 %v10537_v31, %v2021_v32  ;;  %v3314_v42 = vsel %vm3303_vm2, %v3281_v60, %v8304_v33  ;;  %v2245_v36 = vmul.f32 %v8439_v41, %v10537_v31  ;;  %v1870_v60 = vmul.f32 %v7880_v24, %v7896_v13  ;;  %v10542_v13 = vld [vmem:[#allocation21_spill] sm:$0xff] }
 0x383   : > { %v2614_v10 = vpop.permute.xlu1 %2613  ;;  %v2612_v46 = vpop.permute.xlu0 %2611  ;;  %v3282_v50 = vsel %vm444_vm0, %v1862_v34, %v8136_v2 }
 0x384   : > { %v8473_v38 = vsel %vm3336_vm3, %v3313_v22, %v2614_v10  ;;  %v8476_v3 = vsel %vm3336_vm3, %v3312_v14, %v2612_v46  ;;  %v3315_v44 = vsel %vm3303_vm2, %v3282_v50, %v8302_v8 }
 0x385   : > { %3181 = vrot.lane.b32.xlu1 %v2278_v59, %s10264_s17  ;;  %2799 = vrot.lane.b32.xlu0 %v8164_v56, %s6195_s26  ;;  %v1864_v56 = vmul.f32 %v7842_v29, %v7856_v17  ;;  %v3283_v29 = vsel %vm444_vm0, %v1863_v5, %v8150_v12  ;;  %v10538_v17 = vld [vmem:[#allocation15_spill] sm:$0xff]  ;;  %v10544_v5 = vld [vmem:[#allocation54_spill] sm:$0xff] }
 0x386   : > { %v2182_v49 = vmul.f32 %v2212_v54, %v10538_v17  ;;  %v3316_v55 = vsel %vm3303_vm2, %v3283_v29, %v8312_v26 }
 0x387   : > { %v2618_v0 = vpop.permute.xlu1 %2617  ;;  %v2616_v25 = vpop.permute.xlu0 %2615  ;;  %v3284_v8 = vsel %vm444_vm0, %v1864_v56, %v8148_v52  ;;  %v1865_v52 = vmul.f32 %v7850_v61, %v10426_v20 }
 0x388   : > { %v8495_v2 = vsel %vm3336_vm3, %v3315_v44, %v2618_v0  ;;  %v8498_v39 = vsel %vm3336_vm3, %v3314_v42, %v2616_v25  ;;  %v3317_v33 = vsel %vm3303_vm2, %v3284_v8, %v8310_v43  ;;  %v8526_v43 = vld [vmem:[#allocation2 + $0x49] sm:$0xff]  ;;  %v10541_v44 = vld [vmem:[#allocation83_spill] sm:$0xff]  ;;  %v10545_v8 = vld [vmem:[#allocation52_spill] sm:$0xff] }
 0x389   : > { %2927 = vrot.lane.b32.xlu1 %v2181_v21, %s10262_s29  ;;  %2801 = vrot.lane.b32.xlu0 %v8166_v4, %s6195_s26  ;;  %v1866_v4 = vmul.f32 %v7854_v51, %v7870_v30  ;;  %v3285_v51 = vsel %vm444_vm0, %v1865_v52, %v8162_v9  ;;  %v2279_v61 = vmul.f32 %v8526_v43, %v10537_v31  ;;  %v10543_v42 = vld [vmem:[#allocation118_spill] sm:$0xff] }
 0x38a   : > { %v2246_v30 = vmul.f32 %v8456_v40, %v10538_v17  ;;  %v3318_v54 = vsel %vm3303_vm2, %v3285_v51, %v8320_v63  ;;  %v1867_v9 = vmul.f32 %v7862_v47, %v10428_v18  ;;  %v1872_v29 = vmul.f32 %v10545_v8, %v10544_v5  ;;  %v10564_v5 = vld [vmem:[#allocation55_spill] sm:$0xff] }
 0x38b   : > { %v2622_v59 = vpop.permute.xlu1 %2621  ;;  %v2620_v22 = vpop.permute.xlu0 %2619  ;;  %v3286_v26 = vsel %vm444_vm0, %v1866_v4, %v8160_v7  ;;  %v1868_v7 = vmul.f32 %v7868_v57, %v7882_v45  ;;  %v2247_v52 = vmul.f32 %v8526_v43, %v10542_v13 }
 0x38c   : > { %v8519_v12 = vsel %vm3336_vm3, %v3317_v33, %v2622_v59  ;;  %v8522_v14 = vsel %vm3336_vm3, %v3316_v55, %v2620_v22  ;;  %v3319_v20 = vsel %vm3303_vm2, %v3286_v26, %v8318_v27  ;;  %v8552_v27 = vld [vmem:[#allocation2 + $0x51] sm:$0xff]  ;;  %v3287_v57 = vsel %vm444_vm0, %v1867_v9, %v8174_v23  ;;  %v10551_v26 = vld [vmem:[#allocation16_spill] sm:$0xff] }
 0x38d   : > { %3055 = vrot.lane.b32.xlu1 %v2245_v36, %s6197_s0  ;;  %2929 = vrot.lane.b32.xlu0 %v2182_v49, %s10262_s29  ;;  %v3288_v63 = vsel %vm444_vm0, %v1868_v7, %v8172_v19  ;;  %v2280_v47 = vmul.f32 %v8552_v27, %v10538_v17  ;;  %v3320_v18 = vsel %vm3303_vm2, %v3287_v57, %v8328_v16  ;;  %v10540_v16 = vld [vmem:[#allocation82_spill] sm:$0xff]  ;;  %v10546_v36 = vld [vmem:[#allocation40_spill] sm:$0xff]  ;;  %v10547_v17 = vld [vmem:[#allocation51_spill] sm:$0xff] }
 0x38e   : > { %v3321_v45 = vsel %vm3303_vm2, %v3288_v63, %v8326_v58  ;;  %v1869_v19 = vmul.f32 %v7876_v15, %v10431_v6  ;;  %v10539_v58 = vld [vmem:[#allocation80_spill] sm:$0xff]  ;;  %v3290_v21 = vsel %vm444_vm0, %v1870_v60, %v10540_v16  ;;  %v2183_v15 = vmul.f32 %v8439_v41, %v10542_v13  ;;  %v10549_v41 = vld [vmem:[#allocation86_spill] sm:$0xff]  ;;  %v10550_v22 = vld [vmem:[#allocation87_spill] sm:$0xff] }
 0x38f   : > { %v2626_v10 = vpop.permute.xlu1 %2625  ;;  %v2624_v46 = vpop.permute.xlu0 %2623  ;;  %v3323_v6 = vsel %vm3303_vm2, %v3290_v21, %v8340_v11  ;;  %v1871_v49 = vmul.f32 %v10547_v17, %v10546_v36  ;;  %v10548_v11 = vld [vmem:[#allocation81_spill] sm:$0xff]  ;;  %v3292_v59 = vsel %vm444_vm0, %v1872_v29, %v10549_v41  ;;  %v2184_v51 = vmul.f32 %v8456_v40, %v10551_v26  ;;  %v10557_v40 = vld [vmem:[#allocation90_spill] sm:$0xff]  ;;  %v10559_v16 = vld [vmem:[#allocation120_spill] sm:$0xff] }
 0x390   : > { %v8545_v34 = vsel %vm3336_vm3, %v3319_v20, %v2626_v10  ;;  %v8548_v1 = vsel %vm3336_vm3, %v3318_v54, %v2624_v46  ;;  %v3289_v24 = vsel %vm444_vm0, %v1869_v19, %v10541_v44  ;;  %v10553_v46 = vld [vmem:[#allocation56_spill] sm:$0xff]  ;;  %v10554_v7 = vld [vmem:[#allocation17_spill] sm:$0xff]  ;;  %v10565_v17 = vld [vmem:[#allocation94_spill] sm:$0xff] }
 0x391   : > { %3183 = vrot.lane.b32.xlu1 %v2279_v61, %s10264_s17  ;;  %3057 = vrot.lane.b32.xlu0 %v2246_v30, %s6197_s0  ;;  %v3322_v0 = vsel %vm3303_vm2, %v3289_v24, %v10543_v42  ;;  %v3291_v4 = vsel %vm444_vm0, %v1871_v49, %v10550_v22  ;;  %v3325_v61 = vsel %vm3303_vm2, %v3292_v59, %v8354_v28  ;;  %v10552_v30 = vld [vmem:[#allocation119_spill] sm:$0xff]  ;;  %v10555_v63 = vld [vmem:[#allocation41_spill] sm:$0xff]  ;;  %v10561_v42 = vld [vmem:[#allocation34_spill] sm:$0xff] }
 0x392   : > { %v3324_v20 = vsel %vm3303_vm2, %v3291_v4, %v10552_v30  ;;  %v1874_v9 = vmul.f32 %v10554_v7, %v10553_v46  ;;  %v10556_v57 = vld [vmem:[#allocation53_spill] sm:$0xff]  ;;  %v8624_v28 = vld [vmem:[#allocation2 + $0x59] sm:$0xff]  ;;  %v10567_v22 = vld [vmem:[#allocation122_spill] sm:$0xff] }
 0x393   : > { %v2630_v32 = vpop.permute.xlu1 %2629  ;;  %v2628_v50 = vpop.permute.xlu0 %2627  ;;  %v2281_v19 = vmul.f32 %v8624_v28, %v10542_v13  ;;  %v10560_v44 = vld [vmem:[#allocation121_spill] sm:$0xff]  ;;  %v10571_v46 = vld [vmem:[#allocation43_spill] sm:$0xff] }
 0x394   : > { %v8569_v31 = vsel %vm3336_vm3, %v3321_v45, %v2630_v32  ;;  %v8572_v23 = vsel %vm3336_vm3, %v3320_v18, %v2628_v50  ;;  %v3294_v32 = vsel %vm444_vm0, %v1874_v9, %v10557_v40  ;;  %v10558_v50 = vld [vmem:[#allocation91_spill] sm:$0xff]  ;;  %v8650_v36 = vld [vmem:[#allocation2 + $0x61] sm:$0xff] }
 0x395   : > { %3185 = vrot.lane.b32.xlu1 %v2280_v47, %s10264_s17  ;;  %2803 = vrot.lane.b32.xlu0 %v10539_v58, %s6195_s26  ;;  %v1873_v47 = vmul.f32 %v10556_v57, %v10555_v63  ;;  %v2248_v58 = vmul.f32 %v8552_v27, %v10551_v26  ;;  %v3327_v21 = vsel %vm3303_vm2, %v3294_v32, %v10559_v16  ;;  %v10572_v7 = vld [vmem:[#allocation57_spill] sm:$0xff]  ;;  %v10575_v32 = vld [vmem:[#allocation99_spill] sm:$0xff] }
 0x396   : > { %v2282_v59 = vmul.f32 %v8650_v36, %v10551_v26  ;;  %v1877_v9 = vmul.f32 %v10572_v7, %v10571_v46  ;;  %v10573_v26 = vld [vmem:[#allocation84_spill] sm:$0xff]  ;;  %v10589_v46 = vld [vmem:[#allocation62_spill] sm:$0xff]  ;;  %v10590_v7 = vld [vmem:[#allocation59_spill] sm:$0xff] }
 0x397   : > { %v2634_v25 = vpop.permute.xlu1 %2633  ;;  %v2632_v56 = vpop.permute.xlu0 %2631  ;;  %v3293_v60 = vsel %vm444_vm0, %v1873_v47, %v10558_v50  ;;  %v10574_v47 = vld [vmem:[#allocation98_spill] sm:$0xff] }
 0x398   : > { %v8592_v33 = vsel %vm3336_vm3, %v3323_v6, %v2634_v25  ;;  %v8595_v55 = vsel %vm3336_vm3, %v3322_v0, %v2632_v56  ;;  %v3326_v24 = vsel %vm3303_vm2, %v3293_v60, %v10560_v44  ;;  %v10562_v0 = vld [vmem:[#allocation18_spill] sm:$0xff]  ;;  %v3297_v50 = vsel %vm444_vm0, %v1877_v9, %v10575_v32  ;;  %v10576_v60 = vld [vmem:[#allocation8_spill] sm:$0xff] }
 0x399   : > { %2931 = vrot.lane.b32.xlu1 %v2183_v15, %s10262_s29  ;;  %2805 = vrot.lane.b32.xlu0 %v10548_v11, %s6195_s26  ;;  %v1876_v25 = vmul.f32 %v10562_v0, %v10561_v42  ;;  %v10563_v56 = vld [vmem:[#allocation42_spill] sm:$0xff]  ;;  %v10566_v11 = vld [vmem:[#allocation95_spill] sm:$0xff]  ;;  %v10580_v42 = vld [vmem:[#allocation37_spill] sm:$0xff]  ;;  %v1882_v9 = vmul.f32 %v10590_v7, %v10589_v46 }
 0x39a   : > { %v1875_v8 = vmul.f32 %v10564_v5, %v10563_v56  ;;  %v10582_v56 = vld [vmem:[#allocation35_spill] sm:$0xff] }
 0x39b   : > { %v2638_v54 = vpop.permute.xlu1 %2637  ;;  %v2636_v10 = vpop.permute.xlu0 %2635  ;;  %v3296_v49 = vsel %vm444_vm0, %v1876_v25, %v10565_v17  ;;  %v10581_v25 = vld [vmem:[#allocation44_spill] sm:$0xff] }
 0x39c   : > { %v8617_v45 = vsel %vm3336_vm3, %v3325_v61, %v2638_v54  ;;  %v8620_v18 = vsel %vm3336_vm3, %v3324_v20, %v2636_v10  ;;  %v3295_v41 = vsel %vm444_vm0, %v1875_v8, %v10566_v11  ;;  %v3329_v4 = vsel %vm3303_vm2, %v3296_v49, %v10567_v22  ;;  %v10569_v20 = vld [vmem:[#allocation38_spill] sm:$0xff] }
 0x39d   : > { %3059 = vrot.lane.b32.xlu1 %v2247_v52, %s6197_s0  ;;  %2933 = vrot.lane.b32.xlu0 %v2184_v51, %s10262_s29  ;;  %v10568_v52 = vld [vmem:[#allocation123_spill] sm:$0xff]  ;;  %v10570_v54 = vld [vmem:[#allocation58_spill] sm:$0xff]  ;;  %v1879_v5 = vmul.f32 %v10582_v56, %v10581_v25  ;;  %v2249_v22 = vmul.f32 %v8624_v28, %v10576_v60 }
 0x39e   : > { %v3328_v51 = vsel %vm3303_vm2, %v3295_v41, %v10568_v52  ;;  %v1878_v10 = vmul.f32 %v10570_v54, %v10569_v20  ;;  %v10584_v49 = vld [vmem:[#allocation102_spill] sm:$0xff]  ;;  %v10585_v41 = vld [vmem:[#allocation103_spill] sm:$0xff] }
 0x39f   : > { %v2642_v15 = vpop.permute.xlu1 %2641  ;;  %v2640_v6 = vpop.permute.xlu0 %2639 }
 0x3a0   : > { %v8643_v29 = vsel %vm3336_vm3, %v3327_v21, %v2642_v15  ;;  %v8646_v13 = vsel %vm3336_vm3, %v3326_v24, %v2640_v6  ;;  %v3298_v40 = vsel %vm444_vm0, %v1878_v10, %v10574_v47  ;;  %v10578_v21 = vld [vmem:[#allocation124_spill] sm:$0xff]  ;;  %v10592_v47 = vld [vmem:[#allocation39_spill] sm:$0xff] }
 0x3a1   : > { %3187 = vrot.lane.b32.xlu1 %v2281_v19, %s10264_s17  ;;  %3061 = vrot.lane.b32.xlu0 %v2248_v58, %s6197_s0  ;;  %v2185_v19 = vmul.f32 %v8526_v43, %v10576_v60  ;;  %v10577_v58 = vld [vmem:[#allocation46_spill] sm:$0xff]  ;;  %v3330_v44 = vsel %vm3303_vm2, %v3297_v50, %v10578_v21  ;;  %v10579_v6 = vld [vmem:[#allocation60_spill] sm:$0xff]  ;;  %v10583_v43 = vld [vmem:[#allocation85_spill] sm:$0xff] }
 0x3a2   : > { %v3331_v16 = vsel %vm3303_vm2, %v3298_v40, %v10577_v58  ;;  %v1880_v0 = vmul.f32 %v10580_v42, %v10579_v6  ;;  %v10597_v6 = vld [vmem:[#allocation48_spill] sm:$0xff] }
 0x3a3   : > { %v2646_v61 = vpop.permute.xlu1 %2645  ;;  %v2644_v30 = vpop.permute.xlu0 %2643 }
 0x3a4   : > { %v8667_v63 = vsel %vm3336_vm3, %v3329_v4, %v2646_v61  ;;  %v8670_v57 = vsel %vm3336_vm3, %v3328_v51, %v2644_v30  ;;  %v3300_v11 = vsel %vm444_vm0, %v1880_v0, %v10584_v49  ;;  %v10586_v4 = vld [vmem:[#allocation19_spill] sm:$0xff]  ;;  %v10587_v51 = vld [vmem:[#allocation125_spill] sm:$0xff]  ;;  %v10588_v30 = vld [vmem:[#allocation126_spill] sm:$0xff] }
 0x3a5   : > { %3189 = vrot.lane.b32.xlu1 %v2282_v59, %s10264_s17  ;;  %2807 = vrot.lane.b32.xlu0 %v10573_v26, %s6195_s26  ;;  %v3299_v59 = vsel %vm444_vm0, %v1879_v5, %v10585_v41  ;;  %v2186_v52 = vmul.f32 %v8552_v27, %v10586_v4  ;;  %v3333_v61 = vsel %vm3303_vm2, %v3300_v11, %v10587_v51  ;;  %v10591_v26 = vld [vmem:[#allocation45_spill] sm:$0xff]  ;;  %v10600_v11 = vld [vmem:[#allocation88_spill] sm:$0xff]  ;;  %v10601_v41 = vld [vmem:[#allocation22_spill] sm:$0xff] }
 0x3a6   : > { %v3332_v20 = vsel %vm3303_vm2, %v3299_v59, %v10588_v30  ;;  %v1881_v40 = vmul.f32 %v10592_v47, %v10591_v26  ;;  %v2219_v27 = vld [vmem:[#allocation2 + $0x69] sm:$0xff]  ;;  %v2187_v59 = vmul.f32 %v8624_v28, %v10601_v41  ;;  %v2221_v28 = vld [vmem:[#allocation2 + $0x79] sm:$0xff] }
 0x3a7   : > { %v2650_v24 = vpop.permute.xlu1 %2649  ;;  %v2648_v15 = vpop.permute.xlu0 %2647  ;;  %v2251_v51 = vmul.f32 %v2219_v27, %v10601_v41 }
 0x3a8   : > { %v8690_v8 = vsel %vm3336_vm3, %v3331_v16, %v2650_v24  ;;  %v8693_v17 = vsel %vm3336_vm3, %v3330_v44, %v2648_v15  ;;  %v10596_v16 = vld [vmem:[#allocation107_spill] sm:$0xff]  ;;  %v2283_v44 = vmul.f32 %v2219_v27, %v10576_v60  ;;  %v2250_v24 = vmul.f32 %v8650_v36, %v10586_v4 }
 0x3a9   : > { %2935 = vrot.lane.b32.xlu1 %v2185_v19, %s10262_s29  ;;  %2809 = vrot.lane.b32.xlu0 %v10583_v43, %s6195_s26  ;;  %v10595_v19 = vld [vmem:[#allocation106_spill] sm:$0xff]  ;;  %v3301_v21 = vsel %vm444_vm0, %v1881_v40, %v10596_v16 }
 0x3aa   : > { %v3302_v58 = vsel %vm444_vm0, %v1882_v9, %v10595_v19  ;;  %v3334_v42 = vsel %vm3303_vm2, %v3301_v21, %v10597_v6  ;;  %v2220_v60 = vld [vmem:[#allocation2 + $0x71] sm:$0xff]  ;;  %v10604_v19 = vld [vmem:[#allocation92_spill] sm:$0xff]  ;;  %v10607_v6 = vld [vmem:[#allocation61_spill] sm:$0xff] }
 0x3ab   : > { %v2654_v54 = vpop.permute.xlu1 %2653  ;;  %v2652_v10 = vpop.permute.xlu0 %2651  ;;  %v3335_v15 = vsel %vm3303_vm2, %v3302_v58, %v8409_v53  ;;  %v2284_v43 = vmul.f32 %v2220_v60, %v10586_v4  ;;  %v10602_v4 = vld [vmem:[#allocation89_spill] sm:$0xff] }
 0x3ac   : > { %v8715_v32 = vsel %vm3336_vm3, %v3333_v61, %v2654_v54  ;;  %v8718_v50 = vsel %vm3336_vm3, %v3332_v20, %v2652_v10  ;;  %v10603_v61 = vld [vmem:[#allocation36_spill] sm:$0xff]  ;;  %v2285_v10 = vmul.f32 %v2221_v28, %v10601_v41  ;;  %v10605_v58 = vld [vmem:[#allocation9_spill] sm:$0xff] }
 0x3ad   : > { %10593 = vst [vmem:[#allocation20_spill] sm:$0xff] %v8715_v32  ;;  %10594 = vst [vmem:[#allocation15_spill] sm:$0xff] %v8718_v50  ;;  %3063 = vrot.lane.b32.xlu1 %v2249_v22, %s6197_s0  ;;  %2937 = vrot.lane.b32.xlu0 %v2186_v52, %s10262_s29  ;;  %v2188_v30 = vmul.f32 %v8650_v36, %v10603_v61  ;;  %v2252_v46 = vmul.f32 %v2220_v60, %v10603_v61  ;;  %v2222_v36 = vld [vmem:[#allocation2 + $0x81] sm:$0xff]  ;;  %v10615_v32 = vld [vmem:[#allocation111_spill] sm:$0xff] }
 0x3ae   : > { %v2286_v26 = vmul.f32 %v2222_v36, %v10603_v61  ;;  %v2189_v16 = vmul.f32 %v2219_v27, %v10605_v58  ;;  %v2223_v27 = vld [vmem:[#allocation2 + $0x89] sm:$0xff] }
 0x3af   : > { %v2658_v0 = vpop.permute.xlu1 %2657  ;;  %v2656_v25 = vpop.permute.xlu0 %2655 }
 0x3b0   : > { %v8734_v56 = vsel %vm3336_vm3, %v3335_v15, %v2658_v0  ;;  %v8737_v5 = vsel %vm3336_vm3, %v3334_v42, %v2656_v25  ;;  %v2253_v15 = vmul.f32 %v2221_v28, %v10605_v58  ;;  %v2190_v42 = vmul.f32 %v2220_v60, %v10607_v6  ;;  %v8807_v60 = vld [vmem:[#allocation2 + $0x91] sm:$0xff] }
 0x3b1   : > { %10598 = vst [vmem:[#allocation80_spill] sm:$0xff] %v8734_v56  ;;  %10599 = vst [vmem:[#allocation82_spill] sm:$0xff] %v8737_v5  ;;  %3191 = vrot.lane.b32.xlu1 %v2283_v44, %s10264_s17  ;;  %3065 = vrot.lane.b32.xlu0 %v2250_v24, %s6197_s0  ;;  %v10606_v24 = vld [vmem:[#allocation93_spill] sm:$0xff] }
 0x3b2   : > { %v10613_v56 = vld [vmem:[#allocation73_spill] sm:$0xff] }
 0x3b3   : > { %v8742_v49 = vpop.permute.xlu1 %2695  ;;  %v8744_v53 = vpop.permute.xlu0 %2693 }
 0x3b5   : > { %3193 = vrot.lane.b32.xlu1 %v2284_v43, %s10264_s17  ;;  %2811 = vrot.lane.b32.xlu0 %v10600_v11, %s6195_s26  ;;  %v2287_v43 = vmul.f32 %v2223_v27, %v10605_v58  ;;  %v2254_v11 = vmul.f32 %v2222_v36, %v10607_v6  ;;  %v1627_v58 = vld [vmem:[#allocation2 + $0x7] sm:$0xff] }
 0x3b7   : > { %v8751_v22 = vpop.permute.xlu1 %2699  ;;  %v8753_v52 = vpop.permute.xlu0 %2697 }
 0x3b9   : > { %2939 = vrot.lane.b32.xlu1 %v2187_v59, %s10262_s29  ;;  %2813 = vrot.lane.b32.xlu0 %v10602_v4, %s6195_s26  ;;  %v2288_v4 = vmul.f32 %v8807_v60, %v10607_v6  ;;  %v10611_v6 = vld [vmem:[#allocation63_spill] sm:$0xff] }
 0x3bb   : > { %v8761_v20 = vpop.permute.xlu1 %2703  ;;  %v8763_v54 = vpop.permute.xlu0 %2701 }
 0x3bd   : > { %3067 = vrot.lane.b32.xlu1 %v2251_v51, %s6197_s0  ;;  %2941 = vrot.lane.b32.xlu0 %v2188_v30, %s10262_s29  ;;  %v10608_v30 = vld [vmem:[#allocation96_spill] sm:$0xff] }
 0x3bf   : > { %v8769_v7 = vpop.permute.xlu1 %2707  ;;  %v8771_v9 = vpop.permute.xlu0 %2705 }
 0x3c1   : > { %3195 = vrot.lane.b32.xlu1 %v2285_v10, %s10264_s17  ;;  %3069 = vrot.lane.b32.xlu0 %v2252_v46, %s6197_s0  ;;  %v10609_v10 = vld [vmem:[#allocation23_spill] sm:$0xff] }
 0x3c2   : > { %v2191_v46 = vmul.f32 %v2221_v28, %v10609_v10 }
 0x3c3   : > { %v8776_v47 = vpop.permute.xlu1 %2711  ;;  %v8778_v40 = vpop.permute.xlu0 %2709 }
 0x3c5   : > { %3197 = vrot.lane.b32.xlu1 %v2286_v26, %s10264_s17  ;;  %2815 = vrot.lane.b32.xlu0 %v10604_v19, %s6195_s26 }
 0x3c7   : > { %v8784_v21 = vpop.permute.xlu1 %2715  ;;  %v8786_v44 = vpop.permute.xlu0 %2713 }
 0x3c9   : > { %2943 = vrot.lane.b32.xlu1 %v2189_v16, %s10262_s29  ;;  %2817 = vrot.lane.b32.xlu0 %v10606_v24, %s6195_s26  ;;  %v10610_v16 = vld [vmem:[#allocation97_spill] sm:$0xff] }
 0x3ca   : > { %v1628_v24 = vld [vmem:[#allocation2 + $0xf] sm:$0xff] }
 0x3cb   : > { %v8793_v0 = vpop.permute.xlu1 %2719  ;;  %v8795_v25 = vpop.permute.xlu0 %2717 }
 0x3cd   : > { %3071 = vrot.lane.b32.xlu1 %v2253_v15, %s6197_s0  ;;  %2945 = vrot.lane.b32.xlu0 %v2190_v42, %s10262_s29  ;;  %v2255_v15 = vmul.f32 %v2223_v27, %v10609_v10  ;;  %v2192_v42 = vmul.f32 %v2222_v36, %v10611_v6 }
 0x3cf   : > { %v8801_v41 = vpop.permute.xlu1 %2723  ;;  %v8803_v59 = vpop.permute.xlu0 %2721 }
 0x3d1   : > { %3199 = vrot.lane.b32.xlu1 %v2287_v43, %s10264_s17  ;;  %3073 = vrot.lane.b32.xlu0 %v2254_v11, %s6197_s0  ;;  %v10612_v43 = vld [vmem:[#allocation13_spill] sm:$0xff] }
 0x3d2   : > { %v1851_v11 = vmul.f32 %v10612_v43, %v1627_v58  ;;  %v2256_v58 = vmul.f32 %v8807_v60, %v10611_v6 }
 0x3d3   : > { %v8811_v51 = vpop.permute.xlu1 %2727  ;;  %v8813_v61 = vpop.permute.xlu0 %2725 }
 0x3d4   : > { %v3271_v28 = vsel %vm444_vm0, %v1851_v11, %v10613_v56  ;;  %v10616_v56 = vld [vmem:[#allocation128_spill] sm:$0xff] }
 0x3d5   : > { %3201 = vrot.lane.b32.xlu1 %v2288_v4, %s10264_s17  ;;  %2819 = vrot.lane.b32.xlu0 %v10608_v30, %s6195_s26  ;;  %v3304_v50 = vsel %vm3303_vm2, %v3271_v28, %v10615_v32  ;;  %v10617_v11 = vld [vmem:[#allocation72_spill] sm:$0xff] }
 0x3d6   : > { %v3337_v43 = vsel %vm3336_vm3, %v3304_v50, %v10616_v56  ;;  %v10618_v50 = vld [vmem:[#allocation110_spill] sm:$0xff] }
 0x3d7   : > { %v2792_v26 = vpop.permute.xlu1 %2791  ;;  %v8819_v19 = vpop.permute.xlu0 %2729 }
 0x3d9   : > { %2947 = vrot.lane.b32.xlu1 %v2191_v46, %s10262_s29  ;;  %2821 = vrot.lane.b32.xlu0 %v10610_v16, %s6195_s26  ;;  %v10614_v46 = vld [vmem:[#allocation30_spill] sm:$0xff]  ;;  %v8832_v16 = vld [vmem:[#allocation2 + $0x99] sm:$0xff] }
 0x3da   : > { %v1852_v5 = vmul.f32 %v10614_v46, %v1628_v24  ;;  %v2289_v36 = vmul.f32 %v8832_v16, %v10609_v10  ;;  %v3370_v24 = vsel %vm3369_vm4, %v3337_v43, %v8744_v53  ;;  %v8849_v10 = vld [vmem:[#allocation2 + $0xa1] sm:$0xff]  ;;  %v10619_v43 = vld [vmem:[#allocation127_spill] sm:$0xff] }
 0x3db   : > { %v2920_v4 = vpop.permute.xlu1 %2919  ;;  %v2794_v30 = vpop.permute.xlu0 %2793  ;;  %v3403_v28 = vsel %vm3402_vm5, %v3370_v24, %v2792_v26  ;;  %v2290_v53 = vmul.f32 %v8849_v10, %v10611_v6 }
 0x3dc   : > { %v3272_v32 = vsel %vm444_vm0, %v1852_v5, %v10617_v11  ;;  %v3436_v56 = vsel %vm3435_vm6, %v3403_v28, %v2920_v4  ;;  %v10620_v4 = vld [vmem:[#allocation100_spill] sm:$0xff] }
 0x3dd   : > { %3075 = vrot.lane.b32.xlu1 %v2255_v15, %s6197_s0  ;;  %2949 = vrot.lane.b32.xlu0 %v2192_v42, %s10262_s29  ;;  %v3305_v46 = vsel %vm3303_vm2, %v3272_v32, %v10618_v50 }
 0x3de   : > { %v3338_v5 = vsel %vm3336_vm3, %v3305_v46, %v10619_v43 }
 0x3df   : > { %v3048_v15 = vpop.permute.xlu1 %3047  ;;  %v2922_v42 = vpop.permute.xlu0 %2921 }
 0x3e0   : > { %v3469_v26 = vsel %vm3468_vm7, %v3436_v56, %v3048_v15  ;;  %v10621_v15 = vld [vmem:[#allocation24_spill] sm:$0xff] }
 0x3e1   : > { %3203 = vrot.lane.b32.xlu1 %v2289_v36, %s10264_s17  ;;  %3077 = vrot.lane.b32.xlu0 %v2256_v58, %s6197_s0  ;;  %v3371_v58 = vsel %vm3369_vm4, %v3338_v5, %v8742_v49  ;;  %v2193_v28 = vmul.f32 %v2223_v27, %v10621_v15  ;;  %v6107_v27 = vld [vmem:[#allocation2 + $0x17] sm:$0xff] }
 0x3e2   : > { %v3404_v32 = vsel %vm3402_vm5, %v3371_v58, %v2794_v30  ;;  %v10622_v30 = vld [vmem:[#allocation101_spill] sm:$0xff]  ;;  %v10624_v5 = vld [vmem:[#allocation31_spill] sm:$0xff] }
 0x3e3   : > { %v3176_v24 = vpop.permute.xlu1 %3175  ;;  %v3050_v36 = vpop.permute.xlu0 %3049  ;;  %v3437_v6 = vsel %vm3435_vm6, %v3404_v32, %v2922_v42  ;;  %v2257_v42 = vmul.f32 %v8832_v16, %v10621_v15  ;;  %v10625_v58 = vld [vmem:[#allocation75_spill] sm:$0xff]  ;;  %v8884_v32 = vld [vmem:[#allocation2 + $0xa9] sm:$0xff] }
 0x3e4   : > { %v3502_v11 = vsel %vm3501_vm8, %v3469_v26, %v3176_v24  ;;  %v3470_v50 = vsel %vm3468_vm7, %v3437_v6, %v3050_v36  ;;  %v1853_v26 = vmul.f32 %v6107_v27, %v10624_v5 }
 0x3e5   : > { %3205 = vrot.lane.b32.xlu1 %v2290_v53, %s10264_s17  ;;  %2823 = vrot.lane.b32.xlu0 %v10620_v4, %s6195_s26  ;;  %v10623_v53 = vld [vmem:[#allocation64_spill] sm:$0xff]  ;;  %v10626_v4 = vld [vmem:[#allocation113_spill] sm:$0xff] }
 0x3e6   : > { %5617 = vmatprep.mubr.msk.f32.mxu0 %vm3550_vm9, %v3502_v11  ;;  %v2194_v43 = vmul.f32 %v8807_v60, %v10623_v53  ;;  %v3273_v11 = vsel %vm444_vm0, %v1853_v26, %v10625_v58  ;;  %v2291_v60 = vmul.f32 %v8884_v32, %v10621_v15  ;;  %v10628_v26 = vld [vmem:[#allocation74_spill] sm:$0xff]  ;;  %v10629_v15 = vld [vmem:[#allocation112_spill] sm:$0xff] }
 0x3e7   : > { %v3178_v46 = vpop.permute.xlu1 %3177  ;;  %v2796_v56 = vpop.permute.xlu0 %2795  ;;  %v3306_v6 = vsel %vm3303_vm2, %v3273_v11, %v10626_v4 }
 0x3e8   : > { %v3503_v49 = vsel %vm3501_vm8, %v3470_v50, %v3178_v46  ;;  %v6108_v50 = vld [vmem:[#allocation2 + $0x1f] sm:$0xff]  ;;  %v10627_v46 = vld [vmem:[#allocation29_spill] sm:$0xff]  ;;  %v3339_v27 = vsel %vm3336_vm3, %v3306_v6, %v8427_v48 }
 0x3e9   : > { %2951 = vrot.lane.b32.xlu1 %v2193_v28, %s10262_s29  ;;  %2825 = vrot.lane.b32.xlu0 %v10622_v30, %s6195_s26  ;;  %v2258_v28 = vmul.f32 %v8849_v10, %v10623_v53 }
 0x3ea   : > { %5618 = vmatmul.mubr.msk.f32.vlgmr.msra.gmra.mrb[0].mxu0 %vm3550_vm9, %v3503_v49  ;;  %v1854_v49 = vmul.f32 %v6108_v50, %v10627_v46 }
 0x3eb   : > { %v2924_v24 = vpop.permute.xlu1 %2923  ;;  %v2798_v36 = vpop.permute.xlu0 %2797 }
 0x3ec   : > { %v3274_v58 = vsel %vm444_vm0, %v1854_v49, %v10628_v26  ;;  %v10631_v26 = vld [vmem:[#allocation105_spill] sm:$0xff] }
 0x3ed   : > { %3079 = vrot.lane.b32.xlu1 %v2257_v42, %s6197_s0  ;;  %2953 = vrot.lane.b32.xlu0 %v2194_v43, %s10262_s29  ;;  %v3372_v43 = vsel %vm3369_vm4, %v3339_v27, %v8753_v52  ;;  %v3307_v4 = vsel %vm3303_vm2, %v3274_v58, %v10629_v15  ;;  %v10633_v58 = vld [vmem:[#allocation65_spill] sm:$0xff]  ;;  %v10634_v15 = vld [vmem:[#allocation32_spill] sm:$0xff] }
 0x3ee   : > { %v3405_v11 = vsel %vm3402_vm5, %v3372_v43, %v2796_v56  ;;  %v3340_v48 = vsel %vm3336_vm3, %v3307_v4, %v8425_v62 }
 0x3ef   : > { %v3052_v42 = vpop.permute.xlu1 %3051  ;;  %v2926_v5 = vpop.permute.xlu0 %2925  ;;  %v3438_v50 = vsel %vm3435_vm6, %v3405_v11, %v2924_v24  ;;  %v3373_v49 = vsel %vm3369_vm4, %v3340_v48, %v8751_v22  ;;  %v8916_v24 = vld [vmem:[#allocation2 + $0xb1] sm:$0xff]  ;;  %v2196_v11 = vmul.f32 %v8849_v10, %v10633_v58  ;;  %v10637_v10 = vld [vmem:[#allocation49_spill] sm:$0xff] }
 0x3f0   : > { %v3471_v6 = vsel %vm3468_vm7, %v3438_v50, %v3052_v42  ;;  %v2292_v27 = vmul.f32 %v8916_v24, %v10623_v53  ;;  %v6109_v53 = vld [vmem:[#allocation2 + $0x27] sm:$0xff] }
 0x3f1   : > { %3207 = vrot.lane.b32.xlu1 %v2291_v60, %s10264_s17  ;;  %3081 = vrot.lane.b32.xlu0 %v2258_v28, %s6197_s0  ;;  %v3406_v60 = vsel %vm3402_vm5, %v3373_v49, %v2798_v36  ;;  %v10630_v28 = vld [vmem:[#allocation104_spill] sm:$0xff]  ;;  %v1855_v4 = vmul.f32 %v6109_v53, %v10634_v15  ;;  %v10639_v15 = vld [vmem:[#allocation114_spill] sm:$0xff] }
 0x3f2   : > { %v3439_v62 = vsel %vm3435_vm6, %v3406_v60, %v2926_v5  ;;  %v8952_v53 = vld [vmem:[#allocation2 + $0xb9] sm:$0xff] }
 0x3f3   : > { %v3180_v52 = vpop.permute.xlu1 %3179  ;;  %v3054_v46 = vpop.permute.xlu0 %3053 }
 0x3f4   : > { %v3504_v56 = vsel %vm3501_vm8, %v3471_v6, %v3180_v52  ;;  %v3472_v22 = vsel %vm3468_vm7, %v3439_v62, %v3054_v46  ;;  %v10635_v6 = vld [vmem:[#allocation77_spill] sm:$0xff]  ;;  %v10636_v46 = vld [vmem:[#allocation115_spill] sm:$0xff] }
 0x3f5   : > { %2827 = vrot.lane.b32.xlu1 %v10630_v28, %s6195_s26  ;;  %2731 = vrot.lane.b32.xlu0 %v10622_v30, %s6194_s30  ;;  %v10632_v30 = vld [vmem:[#allocation10_spill] sm:$0xff]  ;;  %v3275_v52 = vsel %vm444_vm0, %v1855_v4, %v10635_v6  ;;  %v2260_v6 = vmul.f32 %v8916_v24, %v10633_v58 }
 0x3f6   : > { %5620 = vmatprep.mubr.msk.f32.mxu0 %vm3550_vm9, %v3504_v56  ;;  %v2195_v5 = vmul.f32 %v8832_v16, %v10632_v30  ;;  %v3308_v49 = vsel %vm3303_vm2, %v3275_v52, %v10636_v46  ;;  %v2259_v16 = vmul.f32 %v8884_v32, %v10632_v30  ;;  %v6110_v56 = vld [vmem:[#allocation2 + $0x2f] sm:$0xff]  ;;  %v10640_v52 = vld [vmem:[#allocation47_spill] sm:$0xff] }
 0x3f7   : > { %v3182_v42 = vpop.permute.xlu1 %3181  ;;  %v2800_v43 = vpop.permute.xlu0 %2799  ;;  %v1856_v60 = vmul.f32 %v6110_v56, %v10637_v10  ;;  %v3341_v62 = vsel %vm3336_vm3, %v3308_v49, %v8436_v35 }
 0x3f8   : > { %v3505_v36 = vsel %vm3501_vm8, %v3472_v22, %v3182_v42  ;;  %v3374_v42 = vsel %vm3369_vm4, %v3341_v62, %v8763_v54  ;;  %v2293_v54 = vmul.f32 %v8952_v53, %v10632_v30 }
 0x3f9   : > { %2829 = vrot.lane.b32.xlu1 %v10631_v26, %s6195_s26  ;;  %3209 = vrot.lane.b32.xlu0 %v2292_v27, %s10264_s17 }
 0x3fa   : > { %5621 = vmatmul.mubr.msk.f32.gmra.mrb[2].mxu0 %vm3550_vm9, %v3505_v36  ;;  %v10638_v36 = vld [vmem:[#allocation76_spill] sm:$0xff] }
 0x3fb   : > { %v2928_v50 = vpop.permute.xlu1 %2927  ;;  %v2802_v48 = vpop.permute.xlu0 %2801 }
 0x3fd   : > { %2957 = vrot.lane.b32.xlu1 %v2196_v11, %s10262_s29  ;;  %2955 = vrot.lane.b32.xlu0 %v2195_v5, %s10262_s29  ;;  %v3276_v5 = vsel %vm444_vm0, %v1856_v60, %v10638_v36  ;;  %v3407_v11 = vsel %vm3402_vm5, %v3374_v42, %v2800_v43  ;;  %v6111_v42 = vld [vmem:[#allocation2 + $0x37] sm:$0xff]  ;;  %v10642_v36 = vld [vmem:[#allocation33_spill] sm:$0xff] }
 0x3fe   : > { %v3309_v35 = vsel %vm3303_vm2, %v3276_v5, %v10639_v15  ;;  %v3440_v4 = vsel %vm3435_vm6, %v3407_v11, %v2928_v50  ;;  %v1857_v5 = vmul.f32 %v6111_v42, %v10642_v36  ;;  %v10651_v42 = vld [vmem:[#allocation50_spill] sm:$0xff] }
 0x3ff   : > { %v3056_v27 = vpop.permute.xlu1 %3055  ;;  %v2930_v22 = vpop.permute.xlu0 %2929  ;;  %v3342_v43 = vsel %vm3336_vm3, %v3309_v35, %v10640_v52  ;;  %v10643_v35 = vld [vmem:[#allocation79_spill] sm:$0xff]  ;;  %v10646_v52 = vld [vmem:[#allocation25_spill] sm:$0xff] }
 0x401   : > { %2733 = vrot.lane.b32.xlu1 %v10630_v28, %s6194_s30  ;;  %3083 = vrot.lane.b32.xlu0 %v2259_v16, %s6197_s0  ;;  %v3473_v28 = vsel %vm3468_vm7, %v3440_v4, %v3056_v27  ;;  %v3375_v16 = vsel %vm3369_vm4, %v3342_v43, %v8761_v20  ;;  %v10641_v20 = vld [vmem:[#allocation108_spill] sm:$0xff]  ;;  %v3277_v4 = vsel %vm444_vm0, %v1857_v5, %v10643_v35 }
 0x402   : > { %v3408_v50 = vsel %vm3402_vm5, %v3375_v16, %v2802_v48  ;;  %v8978_v48 = vld [vmem:[#allocation2 + $0xc1] sm:$0xff]  ;;  %v2197_v43 = vmul.f32 %v8884_v32, %v10646_v52 }
 0x403   : > { %v3184_v46 = vpop.permute.xlu1 %3183  ;;  %v3058_v49 = vpop.permute.xlu0 %3057  ;;  %v3441_v30 = vsel %vm3435_vm6, %v3408_v50, %v2930_v22  ;;  %v2294_v22 = vmul.f32 %v8978_v48, %v10633_v58  ;;  %v10647_v58 = vld [vmem:[#allocation66_spill] sm:$0xff]  ;;  %v10650_v32 = vld [vmem:[#allocation116_spill] sm:$0xff] }
 0x404   : > { %v3506_v56 = vsel %vm3501_vm8, %v3473_v28, %v3184_v46  ;;  %v3474_v10 = vsel %vm3468_vm7, %v3441_v30, %v3058_v49  ;;  %v2198_v28 = vmul.f32 %v8916_v24, %v10647_v58  ;;  %v6112_v46 = vld [vmem:[#allocation2 + $0x3f] sm:$0xff]  ;;  %v10648_v49 = vld [vmem:[#allocation14_spill] sm:$0xff] }
 0x405   : > { %3211 = vrot.lane.b32.xlu1 %v2293_v54, %s10264_s17  ;;  %3085 = vrot.lane.b32.xlu0 %v2260_v6, %s6197_s0  ;;  %v10644_v54 = vld [vmem:[#allocation109_spill] sm:$0xff]  ;;  %v1858_v16 = vmul.f32 %v6112_v46, %v10648_v49 }
 0x406   : > { %5623 = vmatprep.mubr.msk.f32.mxu0 %vm3550_vm9, %v3506_v56 }
 0x407   : > { %v3186_v60 = vpop.permute.xlu1 %3185  ;;  %v2804_v62 = vpop.permute.xlu0 %2803 }
 0x408   : > { %v3507_v27 = vsel %vm3501_vm8, %v3474_v10, %v3186_v60  ;;  %v10649_v60 = vld [vmem:[#allocation78_spill] sm:$0xff] }
 0x409   : > { %2831 = vrot.lane.b32.xlu1 %v10641_v20, %s6195_s26  ;;  %2735 = vrot.lane.b32.xlu0 %v10631_v26, %s6194_s30  ;;  %v10645_v26 = vld [vmem:[#allocation117_spill] sm:$0xff] }
 0x40a   : > { %5624 = vmatmul.mubr.msk.f32.gmra.mrb[4].mxu0 %vm3550_vm9, %v3507_v27  ;;  %v3310_v6 = vsel %vm3303_vm2, %v3277_v4, %v10645_v26  ;;  %v3278_v27 = vsel %vm444_vm0, %v1858_v16, %v10649_v60  ;;  %v6113_v26 = vld [vmem:[#allocation2 + $0xc8] sm:$0xff] }
 0x40b   : > { %v2932_v11 = vpop.permute.xlu1 %2931  ;;  %v2806_v15 = vpop.permute.xlu0 %2805  ;;  %v3343_v56 = vsel %vm3336_vm3, %v3310_v6, %v8446_v37  ;;  %v3311_v24 = vsel %vm3303_vm2, %v3278_v27, %v10650_v32  ;;  %v2261_v37 = vmul.f32 %v8952_v53, %v10646_v52 }
 0x40c   : > { %v3376_v10 = vsel %vm3369_vm4, %v3343_v56, %v8771_v9  ;;  %v3344_v9 = vsel %vm3336_vm3, %v3311_v24, %v10651_v42  ;;  %v6116_v24 = vld [vmem:[#allocation2 + $0xe0] sm:$0xff] }
 0x40d   : > { %2833 = vrot.lane.b32.xlu1 %v10644_v54, %s6195_s26  ;;  %3213 = vrot.lane.b32.xlu0 %v2294_v22, %s10264_s17  ;;  %v3409_v20 = vsel %vm3402_vm5, %v3376_v10, %v2804_v62  ;;  %v3377_v62 = vsel %vm3369_vm4, %v3344_v9, %v8769_v7  ;;  %v2262_v7 = vmul.f32 %v8978_v48, %v10647_v58  ;;  %v10653_v9 = vld [vmem:[#allocation67_spill] sm:$0xff] }
 0x40e   : > { %v3442_v22 = vsel %vm3435_vm6, %v3409_v20, %v2932_v11  ;;  %v3410_v54 = vsel %vm3402_vm5, %v3377_v62, %v2806_v15  ;;  %v9019_v11 = vld [vmem:[#allocation2 + $0xc9] sm:$0xff]  ;;  %v3378_v20 = vsel %vm3369_vm4, %v8476_v3, %v8778_v40  ;;  %v3379_v3 = vsel %vm3369_vm4, %v8473_v38, %v8776_v47  ;;  %v9062_v47 = vld [vmem:[#allocation2 + $0xd9] sm:$0xff] }
 0x40f   : > { %v3060_v50 = vpop.permute.xlu1 %3059  ;;  %v2934_v30 = vpop.permute.xlu0 %2933 }
 0x410   : > { %v3475_v36 = vsel %vm3468_vm7, %v3442_v22, %v3060_v50  ;;  %v3443_v6 = vsel %vm3435_vm6, %v3410_v54, %v2934_v30  ;;  %v6114_v50 = vld [vmem:[#allocation2 + $0xd8] sm:$0xff] }
 0x411   : > { %2961 = vrot.lane.b32.xlu1 %v2198_v28, %s10262_s29  ;;  %2959 = vrot.lane.b32.xlu0 %v2197_v43, %s10262_s29  ;;  %v2295_v43 = vmul.f32 %v9019_v11, %v10646_v52  ;;  %v6115_v52 = vld [vmem:[#allocation2 + $0xd0] sm:$0xff] }
 0x412   : > { %v2232_v30 = vld [vmem:[#allocation2 + $0xd1] sm:$0xff] }
 0x413   : > { %v3188_v5 = vpop.permute.xlu1 %3187  ;;  %v3062_v35 = vpop.permute.xlu0 %3061  ;;  %v2296_v10 = vmul.f32 %v2232_v30, %v10647_v58  ;;  %v2200_v58 = vmul.f32 %v8978_v48, %v10653_v9 }
 0x414   : > { %v3508_v4 = vsel %vm3501_vm8, %v3475_v36, %v3188_v5  ;;  %v3476_v28 = vsel %vm3468_vm7, %v3443_v6, %v3062_v35 }
 0x415   : > { %2737 = vrot.lane.b32.xlu1 %v6113_v26, %s6194_s30  ;;  %3087 = vrot.lane.b32.xlu0 %v2261_v37, %s6197_s0  ;;  %v10652_v37 = vld [vmem:[#allocation11_spill] sm:$0xff] }
 0x416   : > { %5626 = vmatprep.mubr.msk.f32.mxu0 %vm3550_vm9, %v3508_v4  ;;  %v2199_v42 = vmul.f32 %v8952_v53, %v10652_v37  ;;  %v2263_v48 = vmul.f32 %v9019_v11, %v10652_v37  ;;  %v2297_v6 = vmul.f32 %v9062_v47, %v10652_v37  ;;  %v10654_v37 = vld [vmem:[#allocation26_spill] sm:$0xff] }
 0x417   : > { %v3190_v15 = vpop.permute.xlu1 %3189  ;;  %v2808_v46 = vpop.permute.xlu0 %2807 }
 0x418   : > { %v3509_v49 = vsel %vm3501_vm8, %v3476_v28, %v3190_v15  ;;  %v3411_v32 = vsel %vm3402_vm5, %v3378_v20, %v2808_v46 }
 0x419   : > { %3215 = vrot.lane.b32.xlu1 %v2295_v43, %s10264_s17  ;;  %3089 = vrot.lane.b32.xlu0 %v2262_v7, %s6197_s0  ;;  %v2264_v43 = vmul.f32 %v2232_v30, %v10653_v9 }
 0x41a   : > { %5627 = vmatmul.mubr.msk.f32.gmra.mrb[6].mxu0 %vm3550_vm9, %v3509_v49  ;;  %v3380_v49 = vsel %vm3369_vm4, %v8498_v39, %v8786_v44  ;;  %v3381_v39 = vsel %vm3369_vm4, %v8495_v2, %v8784_v21 }
 0x41b   : > { %v2936_v16 = vpop.permute.xlu1 %2935  ;;  %v2810_v56 = vpop.permute.xlu0 %2809 }
 0x41c   : > { %v3444_v22 = vsel %vm3435_vm6, %v3411_v32, %v2936_v16  ;;  %v3412_v62 = vsel %vm3402_vm5, %v3379_v3, %v2810_v56  ;;  %v6117_v56 = vld [vmem:[#allocation2 + $0xe8] sm:$0xff] }
 0x41d   : > { %2835 = vrot.lane.b32.xlu1 %v6114_v50, %s6195_s26  ;;  %2739 = vrot.lane.b32.xlu0 %v6115_v52, %s6194_s30 }
 0x41f   : > { %v3064_v60 = vpop.permute.xlu1 %3063  ;;  %v2938_v27 = vpop.permute.xlu0 %2937 }
 0x420   : > { %v3477_v36 = vsel %vm3468_vm7, %v3444_v22, %v3064_v60  ;;  %v3445_v53 = vsel %vm3435_vm6, %v3412_v62, %v2938_v27  ;;  %v6118_v22 = vld [vmem:[#allocation2 + $0xf0] sm:$0xff] }
 0x421   : > { %2837 = vrot.lane.b32.xlu1 %v6116_v24, %s6195_s26  ;;  %3217 = vrot.lane.b32.xlu0 %v2296_v10, %s10264_s17 }
 0x423   : > { %v3192_v5 = vpop.permute.xlu1 %3191  ;;  %v3066_v35 = vpop.permute.xlu0 %3065 }
 0x424   : > { %v3510_v40 = vsel %vm3501_vm8, %v3477_v36, %v3192_v5  ;;  %v3478_v4 = vsel %vm3468_vm7, %v3445_v53, %v3066_v35  ;;  %v2265_v35 = vmul.f32 %v9062_v47, %v10654_v37 }
 0x425   : > { %2965 = vrot.lane.b32.xlu1 %v2200_v58, %s10262_s29  ;;  %2963 = vrot.lane.b32.xlu0 %v2199_v42, %s10262_s29  ;;  %v2201_v42 = vmul.f32 %v9019_v11, %v10654_v37  ;;  %v9100_v11 = vld [vmem:[#allocation2 + $0xe9] sm:$0xff] }
 0x426   : > { %5629 = vmatprep.mubr.msk.f32.mxu0 %vm3550_vm9, %v3510_v40 }
 0x427   : > { %v3194_v54 = vpop.permute.xlu1 %3193  ;;  %v2812_v26 = vpop.permute.xlu0 %2811 }
 0x428   : > { %v3511_v38 = vsel %vm3501_vm8, %v3478_v4, %v3194_v54  ;;  %v3413_v16 = vsel %vm3402_vm5, %v3380_v49, %v2812_v26  ;;  %v3382_v4 = vsel %vm3369_vm4, %v8522_v14, %v8795_v25  ;;  %v6119_v25 = vld [vmem:[#allocation2 + $0xf8] sm:$0xff] }
 0x429   : > { %2741 = vrot.lane.b32.xlu1 %v6114_v50, %s6194_s30  ;;  %3091 = vrot.lane.b32.xlu0 %v2263_v48, %s6197_s0  ;;  %v2234_v50 = vld [vmem:[#allocation2 + $0xe1] sm:$0xff] }
 0x42a   : > { %5630 = vmatmul.mubr.msk.f32.gmra.mrb[8].mxu0 %vm3550_vm9, %v3511_v38  ;;  %v2298_v10 = vmul.f32 %v2234_v50, %v10653_v9  ;;  %v10655_v9 = vld [vmem:[#allocation68_spill] sm:$0xff] }
 0x42b   : > { %v2940_v7 = vpop.permute.xlu1 %2939  ;;  %v2814_v28 = vpop.permute.xlu0 %2813  ;;  %v2202_v58 = vmul.f32 %v2232_v30, %v10655_v9  ;;  %v2299_v30 = vmul.f32 %v9100_v11, %v10654_v37  ;;  %v2266_v62 = vmul.f32 %v2234_v50, %v10655_v9  ;;  %v3384_v37 = vsel %vm3369_vm4, %v8548_v1, %v8803_v59 }
 0x42c   : > { %v3446_v52 = vsel %vm3435_vm6, %v3413_v16, %v2940_v7  ;;  %v3414_v32 = vsel %vm3402_vm5, %v3381_v39, %v2814_v28  ;;  %v3383_v7 = vsel %vm3369_vm4, %v8519_v12, %v8793_v0  ;;  %v3385_v1 = vsel %vm3369_vm4, %v8545_v34, %v8801_v41  ;;  %v2238_v34 = vld [vmem:[#allocation2 + $0x101] sm:$0xff] }
 0x42d   : > { %3219 = vrot.lane.b32.xlu1 %v2297_v6, %s10264_s17  ;;  %3093 = vrot.lane.b32.xlu0 %v2264_v43, %s6197_s0 }
 0x42f   : > { %v3068_v15 = vpop.permute.xlu1 %3067  ;;  %v2942_v46 = vpop.permute.xlu0 %2941 }
 0x430   : > { %v3479_v60 = vsel %vm3468_vm7, %v3446_v52, %v3068_v15  ;;  %v2236_v15 = vld [vmem:[#allocation2 + $0xf1] sm:$0xff]  ;;  %v6120_v52 = vld [vmem:[#allocation2 + $0x100] sm:$0xff] }
 0x431   : > { %2839 = vrot.lane.b32.xlu1 %v6117_v56, %s6195_s26  ;;  %2743 = vrot.lane.b32.xlu0 %v6116_v24, %s6194_s30  ;;  %v3447_v24 = vsel %vm3435_vm6, %v3414_v32, %v2942_v46  ;;  %v2300_v49 = vmul.f32 %v2236_v15, %v10655_v9 }
 0x433   : > { %v3196_v27 = vpop.permute.xlu1 %3195  ;;  %v3070_v20 = vpop.permute.xlu0 %3069 }
 0x434   : > { %v3512_v44 = vsel %vm3501_vm8, %v3479_v60, %v3196_v27  ;;  %v3480_v2 = vsel %vm3468_vm7, %v3447_v24, %v3070_v20  ;;  %v10657_v27 = vld [vmem:[#allocation69_spill] sm:$0xff] }
 0x435   : > { %2841 = vrot.lane.b32.xlu1 %v6118_v22, %s6195_s26  ;;  %3221 = vrot.lane.b32.xlu0 %v2298_v10, %s10264_s17  ;;  %v10656_v10 = vld [vmem:[#allocation27_spill] sm:$0xff]  ;;  %v2204_v20 = vmul.f32 %v2234_v50, %v10657_v27  ;;  %v2302_v41 = vmul.f32 %v2238_v34, %v10657_v27 }
 0x436   : > { %5632 = vmatprep.mubr.msk.f32.mxu0 %vm3550_vm9, %v3512_v44  ;;  %v2203_v60 = vmul.f32 %v9062_v47, %v10656_v10  ;;  %v2267_v32 = vmul.f32 %v9100_v11, %v10656_v10  ;;  %v9141_v47 = vld [vmem:[#allocation2 + $0xf9] sm:$0xff] }
 0x437   : > { %v3198_v21 = vpop.permute.xlu1 %3197  ;;  %v2816_v36 = vpop.permute.xlu0 %2815  ;;  %v2301_v9 = vmul.f32 %v9141_v47, %v10656_v10  ;;  %v3387_v10 = vsel %vm3369_vm4, %v8569_v31, %v8811_v51  ;;  %v2240_v31 = vld [vmem:[#allocation2 + $0x111] sm:$0xff]  ;;  %v2016_v51 = vld [vmem:[#allocation2 + $0x120] sm:$0xff] }
 0x438   : > { %v3513_v5 = vsel %vm3501_vm8, %v3480_v2, %v3198_v21  ;;  %v3415_v54 = vsel %vm3402_vm5, %v3382_v4, %v2816_v36 }
 0x439   : > { %2969 = vrot.lane.b32.xlu1 %v2202_v58, %s10262_s29  ;;  %2967 = vrot.lane.b32.xlu0 %v2201_v42, %s10262_s29  ;;  %v2268_v58 = vmul.f32 %v2236_v15, %v10657_v27 }
 0x43a   : > { %5633 = vmatmul.mubr.msk.f32.gmra.mrb[10].mxu0 %vm3550_vm9, %v3513_v5 }
 0x43b   : > { %v2944_v3 = vpop.permute.xlu1 %2943  ;;  %v2818_v40 = vpop.permute.xlu0 %2817 }
 0x43c   : > { %v3448_v26 = vsel %vm3435_vm6, %v3415_v54, %v2944_v3  ;;  %v3416_v14 = vsel %vm3402_vm5, %v3383_v7, %v2818_v40  ;;  %v2014_v54 = vld [vmem:[#allocation2 + $0x110] sm:$0xff] }
 0x43d   : > { %2745 = vrot.lane.b32.xlu1 %v6117_v56, %s6194_s30  ;;  %3095 = vrot.lane.b32.xlu0 %v2265_v35, %s6197_s0 }
 0x43f   : > { %v3072_v53 = vpop.permute.xlu1 %3071  ;;  %v2946_v48 = vpop.permute.xlu0 %2945 }
 0x440   : > { %v3481_v38 = vsel %vm3468_vm7, %v3448_v26, %v3072_v53  ;;  %v3449_v46 = vsel %vm3435_vm6, %v3416_v14, %v2946_v48  ;;  %v2013_v53 = vld [vmem:[#allocation2 + $0x108] sm:$0xff]  ;;  %v10658_v26 = vld [vmem:[#allocation12_spill] sm:$0xff]  ;;  %v3386_v14 = vsel %vm3369_vm4, %v8572_v23, %v8813_v61 }
 0x441   : > { %3223 = vrot.lane.b32.xlu1 %v2299_v30, %s10264_s17  ;;  %3097 = vrot.lane.b32.xlu0 %v2266_v62, %s6197_s0  ;;  %v2239_v23 = vld [vmem:[#allocation2 + $0x109] sm:$0xff] }
 0x442   : > { %v2303_v61 = vmul.f32 %v2239_v23, %v10658_v26 }
 0x443   : > { %v3200_v6 = vpop.permute.xlu1 %3199  ;;  %v3074_v43 = vpop.permute.xlu0 %3073 }
 0x444   : > { %v3514_v28 = vsel %vm3501_vm8, %v3481_v38, %v3200_v6  ;;  %v3482_v16 = vsel %vm3468_vm7, %v3449_v46, %v3074_v43  ;;  %v2205_v38 = vmul.f32 %v9100_v11, %v10658_v26  ;;  %v10659_v6 = vld [vmem:[#allocation70_spill] sm:$0xff] }
 0x445   : > { %2843 = vrot.lane.b32.xlu1 %v6119_v25, %s6195_s26  ;;  %2747 = vrot.lane.b32.xlu0 %v6118_v22, %s6194_s30  ;;  %v2206_v43 = vmul.f32 %v2236_v15, %v10659_v6 }
 0x446   : > { %5635 = vmatprep.mubr.msk.f32.mxu0 %vm3550_vm9, %v3514_v28 }
 0x447   : > { %v3202_v56 = vpop.permute.xlu1 %3201  ;;  %v2820_v12 = vpop.permute.xlu0 %2819 }
 0x448   : > { %v3515_v0 = vsel %vm3501_vm8, %v3482_v16, %v3202_v56  ;;  %v3417_v42 = vsel %vm3402_vm5, %v3384_v37, %v2820_v12  ;;  %v2270_v12 = vmul.f32 %v2238_v34, %v10659_v6 }
 0x449   : > { %2845 = vrot.lane.b32.xlu1 %v6120_v52, %s6195_s26  ;;  %3225 = vrot.lane.b32.xlu0 %v2300_v49, %s10264_s17  ;;  %v2269_v49 = vmul.f32 %v9141_v47, %v10658_v26 }
 0x44a   : > { %5636 = vmatmul.mubr.msk.f32.gmra.mrb[12].mxu0 %vm3550_vm9, %v3515_v0 }
 0x44b   : > { %v2948_v39 = vpop.permute.xlu1 %2947  ;;  %v2822_v44 = vpop.permute.xlu0 %2821 }
 0x44c   : > { %v3450_v50 = vsel %vm3435_vm6, %v3417_v42, %v2948_v39  ;;  %v3418_v5 = vsel %vm3402_vm5, %v3385_v1, %v2822_v44  ;;  %v3388_v1 = vsel %vm3369_vm4, %v8595_v55, %v8819_v19 }
 0x44d   : > { %2973 = vrot.lane.b32.xlu1 %v2204_v20, %s10262_s29  ;;  %2971 = vrot.lane.b32.xlu0 %v2203_v60, %s10262_s29  ;;  %v2015_v20 = vld [vmem:[#allocation2 + $0x118] sm:$0xff] }
 0x44f   : > { %v3076_v22 = vpop.permute.xlu1 %3075  ;;  %v2950_v24 = vpop.permute.xlu0 %2949 }
 0x450   : > { %v3483_v2 = vsel %vm3468_vm7, %v3450_v50, %v3076_v22  ;;  %v3451_v35 = vsel %vm3435_vm6, %v3418_v5, %v2950_v24  ;;  %v2304_v24 = vmul.f32 %v2240_v31, %v10659_v6  ;;  %v10660_v50 = vld [vmem:[#allocation28_spill] sm:$0xff] }
 0x451   : > { %2749 = vrot.lane.b32.xlu1 %v6119_v25, %s6194_s30  ;;  %3099 = vrot.lane.b32.xlu0 %v2267_v32, %s6197_s0  ;;  %v3974_v6 = vld [vmem:[%s10108_s11] sm:$0xff] }
 0x453   : > { %v3204_v21 = vpop.permute.xlu1 %3203  ;;  %v3078_v36 = vpop.permute.xlu0 %3077 }
 0x454   : > { %v3516_v59 = vsel %vm3501_vm8, %v3483_v2, %v3204_v21  ;;  %v3484_v3 = vsel %vm3468_vm7, %v3451_v35, %v3078_v36  ;;  %v2271_v35 = vmul.f32 %v2239_v23, %v10660_v50 }
 0x455   : > { %3227 = vrot.lane.b32.xlu1 %v2301_v9, %s10264_s17  ;;  %3101 = vrot.lane.b32.xlu0 %v2268_v58, %s6197_s0  ;;  %v2207_v9 = vmul.f32 %v9141_v47, %v10660_v50  ;;  %v10661_v58 = vld [vmem:[#allocation71_spill] sm:$0xff] }
 0x456   : > { %5638 = vmatprep.mubr.msk.f32.mxu0 %vm3550_vm9, %v3516_v59  ;;  %v2208_v2 = vmul.f32 %v2238_v34, %v10661_v58  ;;  %v2272_v47 = vmul.f32 %v2240_v31, %v10661_v58 }
 0x457   : > { %v3206_v40 = vpop.permute.xlu1 %3205  ;;  %v2824_v30 = vpop.permute.xlu0 %2823 }
 0x458   : > { %v3517_v62 = vsel %vm3501_vm8, %v3484_v3, %v3206_v40  ;;  %v3419_v25 = vsel %vm3402_vm5, %v3386_v14, %v2824_v30  ;;  %v3976_v14 = vld [vmem:[%s10108_s11 + $0x10] sm:$0xff] }
 0x459   : > { %2847 = vrot.lane.b32.xlu1 %v2013_v53, %s6195_s26  ;;  %2751 = vrot.lane.b32.xlu0 %v6120_v52, %s6194_s30 }
 0x45a   : > { %5639 = vmatmul.mubr.msk.f32.gmra.mrb[14].mxu0 %vm3550_vm9, %v3517_v62  ;;  %v2273_v62 = vld [vmem:[#allocation2 + $0x119] sm:$0xff] }
 0x45b   : > { %v2952_v48 = vpop.permute.xlu1 %2951  ;;  %v2826_v4 = vpop.permute.xlu0 %2825  ;;  %v2305_v19 = vmul.f32 %v2273_v62, %v10660_v50 }
 0x45c   : > { %v3452_v46 = vsel %vm3435_vm6, %v3419_v25, %v2952_v48  ;;  %v3420_v60 = vsel %vm3402_vm5, %v3387_v10, %v2826_v4 }
 0x45d   : > { %2849 = vrot.lane.b32.xlu1 %v2014_v54, %s6195_s26  ;;  %3229 = vrot.lane.b32.xlu0 %v2302_v41, %s10264_s17 }
 0x45f   : > { %v3080_v7 = vpop.permute.xlu1 %3079  ;;  %v2954_v28 = vpop.permute.xlu0 %2953 }
 0x460   : > { %v3485_v11 = vsel %vm3468_vm7, %v3452_v46, %v3080_v7  ;;  %v3453_v27 = vsel %vm3435_vm6, %v3420_v60, %v2954_v28 }
 0x461   : > { %2977 = vrot.lane.b32.xlu1 %v2206_v43, %s10262_s29  ;;  %2975 = vrot.lane.b32.xlu0 %v2205_v38, %s10262_s29  ;;  %v3975_v38 = vld [vmem:[%s10108_s11 + $0x8] sm:$0xff] }
 0x463   : > { %v3208_v15 = vpop.permute.xlu1 %3207  ;;  %v3082_v16 = vpop.permute.xlu0 %3081 }
 0x464   : > { %v3518_v56 = vsel %vm3501_vm8, %v3485_v11, %v3208_v15  ;;  %v3486_v39 = vsel %vm3468_vm7, %v3453_v27, %v3082_v16  ;;  %v3977_v11 = vld [vmem:[%s10108_s11 + $0x18] sm:$0xff] }
 0x465   : > { %2753 = vrot.lane.b32.xlu1 %v2013_v53, %s6194_s30  ;;  %3103 = vrot.lane.b32.xlu0 %v2269_v49, %s6197_s0  ;;  %v2274_v53 = vld [vmem:[#allocation2 + $0x121] sm:$0xff]  ;;  %v10662_v49 = vmov 1  }
 0x466   : > { %5641 = vmatprep.mubr.msk.f32.mxu0 %vm3550_vm9, %v3518_v56  ;;  %v2306_v34 = vmul.f32 %v2274_v53, %v10661_v58 }
 0x467   : > { %v2828_v0 = vpop.permute.xlu1 %2827  ;;  %v2732_v52 = vpop.permute.xlu0 %2731 }
 0x468   : > { %v3421_v59 = vsel %vm3402_vm5, %v3388_v1, %v2828_v0  ;;  %v3389_v4 = vsel %vm3369_vm4, %v8592_v33, %v2732_v52 }
 0x469   : > { %3231 = vrot.lane.b32.xlu1 %v2303_v61, %s10264_s17  ;;  %3105 = vrot.lane.b32.xlu0 %v2270_v12, %s6197_s0  ;;  %v3978_v12 = vld [vmem:[%s10108_s11 + $0x20] sm:$0xff] }
 0x46b   : > { %v2830_v44 = vpop.permute.xlu1 %2829  ;;  %v3210_v32 = vpop.permute.xlu0 %3209 }
 0x46c   : > { %v3519_v22 = vsel %vm3501_vm8, %v3486_v39, %v3210_v32 }
 0x46d   : > { %2851 = vrot.lane.b32.xlu1 %v2015_v20, %s6195_s26  ;;  %2755 = vrot.lane.b32.xlu0 %v2014_v54, %s6194_s30  ;;  %v3422_v54 = vsel %vm3402_vm5, %v3389_v4, %v2830_v44 }
 0x46e   : > { %5642 = vmatmul.mubr.msk.f32.gmra.mrb[16].mxu0 %vm3550_vm9, %v3519_v22  ;;  %v3980_v22 = vld [vmem:[%s10108_s11 + $0x30] sm:$0xff] }
 0x46f   : > { %v2958_v37 = vpop.permute.xlu1 %2957  ;;  %v2956_v42 = vpop.permute.xlu0 %2955 }
 0x470   : > { %v3454_v5 = vsel %vm3435_vm6, %v3421_v59, %v2956_v42  ;;  %v3455_v26 = vsel %vm3435_vm6, %v3422_v54, %v2958_v37  ;;  %v3983_v59 = vld [vmem:[%s10108_s11 + $0x48] sm:$0xff] }
 0x471   : > { %2853 = vrot.lane.b32.xlu1 %v2016_v51, %s6195_s26  ;;  %3233 = vrot.lane.b32.xlu0 %v2304_v24, %s10264_s17 }
 0x473   : > { %v2734_v21 = vpop.permute.xlu1 %2733  ;;  %v3084_v36 = vpop.permute.xlu0 %3083 }
 0x474   : > { %v3487_v3 = vsel %vm3468_vm7, %v3454_v5, %v3084_v36  ;;  %v3390_v56 = vsel %vm3369_vm4, %v8620_v18, %v2734_v21  ;;  %v3979_v18 = vld [vmem:[%s10108_s11 + $0x28] sm:$0xff] }
 0x475   : > { %2981 = vrot.lane.b32.xlu1 %v2208_v2, %s10262_s29  ;;  %2979 = vrot.lane.b32.xlu0 %v2207_v9, %s10262_s29  ;;  %v3982_v9 = vld [vmem:[%s10108_s11 + $0x40] sm:$0xff] }
 0x477   : > { %v3212_v40 = vpop.permute.xlu1 %3211  ;;  %v3086_v30 = vpop.permute.xlu0 %3085 }
 0x478   : > { %v3520_v55 = vsel %vm3501_vm8, %v3487_v3, %v3212_v40  ;;  %v3488_v43 = vsel %vm3468_vm7, %v3455_v26, %v3086_v30 }
 0x479   : > { %3109 = vrot.lane.b32.xlu1 %v2272_v47, %s6197_s0  ;;  %3107 = vrot.lane.b32.xlu0 %v2271_v35, %s6197_s0  ;;  %s10668_s0 = smov 48  }
 0x47a   : > { %5644 = vmatprep.mubr.msk.f32.mxu0 %vm3550_vm9, %v3520_v55 }
 0x47b   : > { %v2832_v41 = vpop.permute.xlu1 %2831  ;;  %v2736_v48 = vpop.permute.xlu0 %2735 }
 0x47c   : > { %v3423_v23 = vsel %vm3402_vm5, %v3390_v56, %v2832_v41  ;;  %v3391_v39 = vsel %vm3369_vm4, %v8617_v45, %v2736_v48  ;;  %v3981_v45 = vld [vmem:[%s10108_s11 + $0x38] sm:$0xff] }
 0x47d   : > { %3237 = vrot.lane.b32.xlu1 %v2306_v34, %s10264_s17  ;;  %3235 = vrot.lane.b32.xlu0 %v2305_v19, %s10264_s17  ;;  %v3985_v19 = vld [vmem:[%s10108_s11 + $0x58] sm:$0xff]  ;;  %s6201_s17 = smov 112  }
 0x47f   : > { %v2834_v7 = vpop.permute.xlu1 %2833  ;;  %v3214_v33 = vpop.permute.xlu0 %3213 }
 0x480   : > { %v3521_v28 = vsel %vm3501_vm8, %v3488_v43, %v3214_v33  ;;  %v3424_v44 = vsel %vm3402_vm5, %v3391_v39, %v2834_v7 }
 0x481   : > { %3997 = vperm.xlu1 %5797, %v3975_v38   ;;  %3992 = vperm.xlu0 %5796, %v3974_v6  }
 0x482   : > { %5645 = vmatmul.mubr.msk.f32.gmra.mrb[18].mxu0 %vm3550_vm9, %v3521_v28 }
 0x483   : > { %v2962_v25 = vpop.permute.xlu1 %2961  ;;  %v2960_v46 = vpop.permute.xlu0 %2959 }
 0x484   : > { %v3456_v61 = vsel %vm3435_vm6, %v3423_v23, %v2960_v46  ;;  %v3457_v32 = vsel %vm3435_vm6, %v3424_v44, %v2962_v25 }
 0x485   : > { %5798 = vset.pattern.permute.xlu1 %v10662_v49  ;;  %4002 = vperm.xlu0 %5796, %v3976_v14  }
 0x486   : > { %4206 = vperm.xlu1 %5798, %v3974_v6  }
 0x487   : > { %v2738_v15 = vpop.permute.xlu1 %2737  ;;  %v3088_v16 = vpop.permute.xlu0 %3087 }
 0x488   : > { %v3489_v0 = vsel %vm3468_vm7, %v3456_v61, %v3088_v16  ;;  %v3392_v21 = vsel %vm3369_vm4, %v8646_v13, %v2738_v15  ;;  %v3984_v13 = vld [vmem:[%s10108_s11 + $0x50] sm:$0xff] }
 0x489   : > { %4007 = vperm.xlu0 %5796, %v3977_v11  }
 0x48a   : > { %4210 = vperm.xlu1 %5798, %v3975_v38   ;;  %v3987_v38 = vld [vmem:[%s10108_s11 + $0x68] sm:$0xff] }
 0x48b   : > { %v3216_v52 = vpop.permute.xlu1 %3215  ;;  %v3090_v10 = vpop.permute.xlu0 %3089 }
 0x48c   : > { %v3522_v60 = vsel %vm3501_vm8, %v3489_v0, %v3216_v52  ;;  %v3490_v31 = vsel %vm3468_vm7, %v3457_v32, %v3090_v10 }
 0x48d   : > { %4012 = vperm.xlu0 %5796, %v3978_v12   ;;  %5647 = vmatprep.mubr.msk.f32.mxu0 %vm3550_vm9, %v3522_v60  ;;  %v9319_v60 = vld [vmem:[%s10102_s5] ss:$0 sm:$0xff] }
 0x48e   : > { %4214 = vperm.xlu1 %5798, %v3976_v14   ;;  %v3988_v14 = vld [vmem:[%s10108_s11 + $0x70] sm:$0xff] }
 0x48f   : > { %v2836_v27 = vpop.permute.xlu1 %2835  ;;  %v2740_v20 = vpop.permute.xlu0 %2739 }
 0x490   : > { %v3425_v36 = vsel %vm3402_vm5, %v3392_v21, %v2836_v27  ;;  %v3393_v62 = vsel %vm3369_vm4, %v8643_v29, %v2740_v20  ;;  %v3986_v29 = vld [vmem:[%s10108_s11 + $0x60] sm:$0xff] }
 0x491   : > { %4017 = vperm.xlu0 %5796, %v3979_v18  }
 0x492   : > { %4218 = vperm.xlu1 %5798, %v3977_v11  }
 0x493   : > { %v2838_v51 = vpop.permute.xlu1 %2837  ;;  %v3218_v24 = vpop.permute.xlu0 %3217 }
 0x494   : > { %v3523_v37 = vsel %vm3501_vm8, %v3490_v31, %v3218_v24  ;;  %v3426_v53 = vsel %vm3402_vm5, %v3393_v62, %v2838_v51 }
 0x495   : > { %4022 = vperm.xlu0 %5796, %v3980_v22   ;;  %5648 = vmatmul.mubr.msk.f32.gmra.mrb[20].mxu0 %vm3550_vm9, %v3523_v37 }
 0x496   : > { %4222 = vperm.xlu1 %5798, %v3978_v12  }
 0x497   : > { %v2966_v42 = vpop.permute.xlu1 %2965  ;;  %v2964_v50 = vpop.permute.xlu0 %2963 }
 0x498   : > { %v3458_v1 = vsel %vm3435_vm6, %v3425_v36, %v2964_v50  ;;  %v3459_v55 = vsel %vm3435_vm6, %v3426_v53, %v2966_v42 }
 0x499   : > { %4027 = vperm.xlu0 %5796, %v3981_v45  }
 0x49a   : > { %4226 = vperm.xlu1 %5798, %v3979_v18  }
 0x49b   : > { %v2742_v58 = vpop.permute.xlu1 %2741  ;;  %v3092_v2 = vpop.permute.xlu0 %3091 }
 0x49c   : > { %v3491_v5 = vsel %vm3468_vm7, %v3458_v1, %v3092_v2  ;;  %v3394_v7 = vsel %vm3369_vm4, %v8670_v57, %v2742_v58  ;;  %v3989_v57 = vld [vmem:[%s10108_s11 + $0x78] sm:$0xff] }
 0x49d   : > { %4032 = vperm.xlu0 %5796, %v3982_v9   ;;  %v4138_v2 = vld [vmem:[#allocation3 + $0x8] ss:$2 sm:$0xff] }
 0x49e   : > { %4230 = vperm.xlu1 %5798, %v3980_v22  }
 0x49f   : > { %v3220_v35 = vpop.permute.xlu1 %3219  ;;  %v3094_v47 = vpop.permute.xlu0 %3093 }
 0x4a0   : > { %v3524_v3 = vsel %vm3501_vm8, %v3491_v5, %v3220_v35  ;;  %v3492_v34 = vsel %vm3468_vm7, %v3459_v55, %v3094_v47 }
 0x4a1   : > { %4037 = vperm.xlu0 %5796, %v3983_v59   ;;  %5650 = vmatprep.mubr.msk.f32.mxu0 %vm3550_vm9, %v3524_v3 }
 0x4a2   : > { %4234 = vperm.xlu1 %5798, %v3981_v45  }
 0x4a3   : > { %v2840_v40 = vpop.permute.xlu1 %2839  ;;  %v2744_v30 = vpop.permute.xlu0 %2743 }
 0x4a4   : > { %v3427_v33 = vsel %vm3402_vm5, %v3394_v7, %v2840_v40  ;;  %v3395_v23 = vsel %vm3369_vm4, %v8667_v63, %v2744_v30 }
 0x4a5   : > { %4042 = vperm.xlu0 %5796, %v3984_v13  }
 0x4a6   : > { %4238 = vperm.xlu1 %5798, %v3982_v9  }
 0x4a7   : > { %v2842_v41 = vpop.permute.xlu1 %2841  ;;  %v3222_v48 = vpop.permute.xlu0 %3221 }
 0x4a8   : > { %v3525_v4 = vsel %vm3501_vm8, %v3492_v34, %v3222_v48  ;;  %v3428_v61 = vsel %vm3402_vm5, %v3395_v23, %v2842_v41 }
 0x4a9   : > { %4047 = vperm.xlu0 %5796, %v3985_v19   ;;  %5651 = vmatmul.mubr.msk.f32.gmra.mrb[22].mxu0 %vm3550_vm9, %v3525_v4 }
 0x4aa   : > { %4242 = vperm.xlu1 %5798, %v3983_v59  }
 0x4ab   : > { %v2970_v54 = vpop.permute.xlu1 %2969  ;;  %v2968_v26 = vpop.permute.xlu0 %2967 }
 0x4ac   : > { %v3460_v28 = vsel %vm3435_vm6, %v3427_v33, %v2968_v26  ;;  %v3461_v12 = vsel %vm3435_vm6, %v3428_v61, %v2970_v54 }
 0x4ad   : > { %4052 = vperm.xlu0 %5796, %v3986_v29  }
 0x4ae   : > { %4246 = vperm.xlu1 %5798, %v3984_v13  }
 0x4af   : > { %v2746_v6 = vpop.permute.xlu1 %2745  ;;  %v3096_v43 = vpop.permute.xlu0 %3095 }
 0x4b0   : > { %v3493_v25 = vsel %vm3468_vm7, %v3460_v28, %v3096_v43 }
 0x4b1   : > { %4057 = vperm.xlu0 %5796, %v3987_v38  }
 0x4b2   : > { %4250 = vperm.xlu1 %5798, %v3985_v19  }
 0x4b3   : > { %v3224_v46 = vpop.permute.xlu1 %3223  ;;  %v3098_v11 = vpop.permute.xlu0 %3097 }
 0x4b4   : > { %v3526_v15 = vsel %vm3501_vm8, %v3493_v25, %v3224_v46  ;;  %v3494_v0 = vsel %vm3468_vm7, %v3461_v12, %v3098_v11 }
 0x4b5   : > { %4062 = vperm.xlu0 %5796, %v3988_v14   ;;  %5653 = vmatprep.mubr.msk.f32.mxu0 %vm3550_vm9, %v3526_v15 }
 0x4b6   : > { %4254 = vperm.xlu1 %5798, %v3986_v29   ;;  %v10663_v29 = vld [vmem:[#allocation15_spill] sm:$0xff] }
 0x4b7   : > { %v2844_v16 = vpop.permute.xlu1 %2843  ;;  %v2748_v56 = vpop.permute.xlu0 %2747 }
 0x4b9   : > { %4067 = vperm.xlu0 %5796, %v3989_v57  }
 0x4ba   : > { %4258 = vperm.xlu1 %5798, %v3987_v38  }
 0x4bb   : > { %v2846_v52 = vpop.permute.xlu1 %2845  ;;  %v3226_v10 = vpop.permute.xlu0 %3225 }
 0x4bc   : > { %v3527_v18 = vsel %vm3501_vm8, %v3494_v0, %v3226_v10 }
 0x4bd   : > { %v5619_v27 = vpop.f32.mrb[0].mxu0  ;;  %5799 = vset.pattern.permute.xlu0 %v10662_v49  ;;  %5654 = vmatmul.mubr.msk.f32.gmra.mrb[24].mxu0 %vm3550_vm9, %v3527_v18  ;;  %v3396_v49 = vsel %vm3369_vm4, %v8693_v17, %v2746_v6  ;;  %v3397_v17 = vsel %vm3369_vm4, %v8690_v8, %v2748_v56  ;;  %v4869_v18 = vld [vmem:[%s10103_s6] sm:$0xff] }
 0x4be   : > { %v3719_v63 = vadd.f32 %v5619_v27, %v9319_v60  ;;  %v3713_v20 = vpop.f32.mrb[1].mxu0  ;;  %4266 = vperm.xlu0 %5799, %v3989_v57   ;;  %4262 = vperm.xlu1 %5798, %v3988_v14   ;;  %v3429_v37 = vsel %vm3402_vm5, %v3396_v49, %v2844_v16  ;;  %v3430_v5 = vsel %vm3402_vm5, %v3397_v17, %v2846_v52  ;;  %v10664_v57 = vld [vmem:[#allocation20_spill] sm:$0xff]  ;;  %v4870_v27 = vld [vmem:[%s10103_s6 + $0x8] sm:$0xff] }
 0x4bf   : > { %v3714_v39 = vadd.f32 %v9319_v60, %v3713_v20  ;;  %v2974_v44 = vpop.permute.xlu1 %2973  ;;  %v2972_v32 = vpop.permute.xlu0 %2971  ;;  %v6199_v20 = vmov 0.0|0.0  }
 0x4c0   : > { %v3873_v22 = vmax.f32 %v3719_v63, 0.0  ;;  %v3462_v45 = vsel %vm3435_vm6, %v3429_v37, %v2972_v32  ;;  %v3463_v47 = vsel %vm3435_vm6, %v3430_v5, %v2974_v44  ;;  %5707 = vmatprep.subr.bf16.mxu1 %v6199_v20 }
 0x4c1   : > { %v3872_v31 = vmax.f32 %v3714_v39, 0.0  ;;  %v5708_v39 = vpack.c.bf16 %v4870_v27, %v4869_v18 }
 0x4c2   : > { %3911 = vst.msk [vmem:[#allocation3 + $0x20] sm:$0xff] %vm3303_vm2, %v3873_v22  ;;  %v4871_v22 = vld [vmem:[%s10103_s6 + $0x10] sm:$0xff] }
 0x4c3   : > { %3910 = vst.msk [vmem:[#allocation3 + $0x18] sm:$0xff] %vm3303_vm2, %v3872_v31  ;;  %v2750_v51 = vpop.permute.xlu1 %2749  ;;  %v3100_v24 = vpop.permute.xlu0 %3099  ;;  %5709 = vmatpush1.bf16.msra.mxu1 %v5708_v39  ;;  %v4872_v31 = vld [vmem:[%s10103_s6 + $0x18] sm:$0xff] }
 0x4c4   : > { %v3495_v42 = vsel %vm3468_vm7, %v3462_v45, %v3100_v24  ;;  %v3398_v54 = vsel %vm3369_vm4, %v10663_v29, %v2750_v51  ;;  %5710 = vmatprep.subr.bf16.mxu1 %v6199_v20  ;;  %v5711_v51 = vpack.c.bf16 %v4872_v31, %v4871_v22 }
 0x4c7   : > { %v3228_v50 = vpop.permute.xlu1 %3227  ;;  %v3102_v9 = vpop.permute.xlu0 %3101  ;;  %5712 = vmatpush1.bf16.msra.mxu1 %v5711_v51  ;;  %v4885_v51 = vld [vmem:[%s10103_s6 + $0x80] sm:$0xff] }
 0x4c8   : > { %v3528_v58 = vsel %vm3501_vm8, %v3495_v42, %v3228_v50  ;;  %v3496_v40 = vsel %vm3468_vm7, %v3463_v47, %v3102_v9  ;;  %v10665_v50 = vld [vmem:[#allocation82_spill] sm:$0xff]  ;;  %5713 = vmatprep.subr.bf16.mxu1 %v6199_v20 }
 0x4c9   : > { %5656 = vmatprep.mubr.msk.f32.mxu0 %vm3550_vm9, %v3528_v58  ;;  %v10666_v58 = vld [vmem:[#allocation80_spill] sm:$0xff] }
 0x4ca   : > { %v9335_v21 = vld [vmem:[#allocation3 + $0x18] ss:$2 sm:$0xff]  ;;  %v4086_v18 = vld [vmem:[#allocation3 + $0x17] ss:$2 sm:$0xff] }
 0x4cb   : > { %v2848_v36 = vpop.permute.xlu1 %2847  ;;  %v2752_v1 = vpop.permute.xlu0 %2751  ;;  %v5810_v59 = vpack.i.bf16 %v9335_v21, %v4138_v2 }
 0x4cc   : > { %v3431_v26 = vsel %vm3402_vm5, %v3398_v54, %v2848_v36  ;;  %v3399_v16 = vsel %vm3369_vm4, %v10664_v57, %v2752_v1  ;;  %v4873_v36 = vld [vmem:[%s10103_s6 + $0x20] sm:$0xff]  ;;  %v4874_v1 = vld [vmem:[%s10103_s6 + $0x28] sm:$0xff] }
 0x4cd   : > { %v5622_v35 = vpop.f32.mrb[2].mxu0  ;;  %5811 = vrot.lane.b32.xlu0 %v5810_v59, %s10262_s29  ;;  %v4877_v54 = vld [vmem:[%s10103_s6 + $0x40] sm:$0xff]  ;;  %s10667_s29 = smov 64  }
 0x4ce   : > { %v3729_v3 = vadd.f32 %v5622_v35, %v9319_v60  ;;  %v3723_v13 = vpop.f32.mrb[3].mxu0  ;;  %v5714_v35 = vpack.c.bf16 %v4874_v1, %v4873_v36  ;;  %v5087_v36 = vld [vmem:[%s6324_s19] ss:$2 sm:$0xff]  ;;  %v5502_v1 = vld [vmem:[%s6324_s19 + $0x10] ss:$2 sm:$0xff] }
 0x4cf   : > { %v3724_v30 = vadd.f32 %v9319_v60, %v3723_v13  ;;  %v2850_v62 = vpop.permute.xlu1 %2849  ;;  %v3230_v53 = vpop.permute.xlu0 %3229 }
 0x4d0   : > { %v3875_v55 = vmax.f32 %v3729_v3, 0.0  ;;  %v3529_v19 = vsel %vm3501_vm8, %v3496_v40, %v3230_v53  ;;  %v3432_v23 = vsel %vm3402_vm5, %v3399_v16, %v2850_v62  ;;  %v4876_v62 = vld [vmem:[%s10103_s6 + $0x38] sm:$0xff]  ;;  %5715 = vmatpush1.bf16.msra.mxu1 %v5714_v35 }
 0x4d1   : > { %v3874_v8 = vmax.f32 %v3724_v30, 0.0  ;;  %5657 = vmatmul.mubr.msk.f32.gmra.mrb[26].mxu0 %vm3550_vm9, %v3529_v19  ;;  %v4875_v30 = vld [vmem:[%s10103_s6 + $0x30] sm:$0xff]  ;;  %5716 = vmatprep.subr.bf16.mxu1 %v6199_v20 }
 0x4d2   : > { %3913 = vst.msk [vmem:[#allocation3 + $0x30] sm:$0xff] %vm3303_vm2, %v3875_v55 }
 0x4d3   : > { %3912 = vst.msk [vmem:[#allocation3 + $0x28] sm:$0xff] %vm3303_vm2, %v3874_v8  ;;  %v2978_v34 = vpop.permute.xlu1 %2977  ;;  %v2976_v41 = vpop.permute.xlu0 %2975 }
 0x4d4   : > { %v3464_v38 = vsel %vm3435_vm6, %v3431_v26, %v2976_v41  ;;  %v3465_v12 = vsel %vm3435_vm6, %v3432_v23, %v2978_v34  ;;  %v5717_v41 = vpack.c.bf16 %v4876_v62, %v4875_v30  ;;  %v4878_v26 = vld [vmem:[%s10103_s6 + $0x48] sm:$0xff] }
 0x4d5   : > { %v4176_v62 = vld [vmem:[#allocation3 + $0x19] ss:$2 sm:$0xff] }
 0x4d6   : > { %5718 = vmatpush1.bf16.msra.mxu1 %v5717_v41 }
 0x4d7   : > { %v2754_v48 = vpop.permute.xlu1 %2753  ;;  %v3104_v4 = vpop.permute.xlu0 %3103  ;;  %5719 = vmatprep.subr.bf16.mxu1 %v6199_v20 }
 0x4d8   : > { %v3497_v6 = vsel %vm3468_vm7, %v3464_v38, %v3104_v4  ;;  %v3400_v9 = vsel %vm3369_vm4, %v10665_v50, %v2754_v48 }
 0x4da   : > { %v9382_v24 = vld [vmem:[#allocation3 + $0x28] ss:$2 sm:$0xff]  ;;  %v4087_v23 = vld [vmem:[#allocation3 + $0x27] ss:$2 sm:$0xff] }
 0x4db   : > { %v3232_v43 = vpop.permute.xlu1 %3231  ;;  %v3106_v7 = vpop.permute.xlu0 %3105  ;;  %v4286_v50 = vld [vmem:[#allocation3 + $0x29] ss:$2 sm:$0xff] }
 0x4dc   : > { %v3530_v33 = vsel %vm3501_vm8, %v3497_v6, %v3232_v43  ;;  %v3498_v0 = vsel %vm3468_vm7, %v3465_v12, %v3106_v7  ;;  %v5720_v6 = vpack.c.bf16 %v4878_v26, %v4877_v54  ;;  %v4879_v43 = vld [vmem:[%s10103_s6 + $0x50] sm:$0xff]  ;;  %v4880_v7 = vld [vmem:[%s10103_s6 + $0x58] sm:$0xff] }
 0x4dd   : > { %v5625_v28 = vpop.f32.mrb[4].mxu0  ;;  %5659 = vmatprep.mubr.msk.f32.mxu0 %vm3550_vm9, %v3530_v33  ;;  %v5723_v33 = vpack.c.bf16 %v4880_v7, %v4879_v43  ;;  %v4883_v12 = vld [vmem:[%s10103_s6 + $0x70] sm:$0xff] }
 0x4de   : > { %v3739_v14 = vadd.f32 %v5625_v28, %v9319_v60  ;;  %v3733_v25 = vpop.f32.mrb[5].mxu0  ;;  %5721 = vmatpush1.bf16.msra.mxu1 %v5720_v6  ;;  %v4881_v28 = vld [vmem:[%s10103_s6 + $0x60] sm:$0xff] }
 0x4df   : > { %v3734_v46 = vadd.f32 %v9319_v60, %v3733_v25  ;;  %v2852_v11 = vpop.permute.xlu1 %2851  ;;  %v2756_v15 = vpop.permute.xlu0 %2755  ;;  %5722 = vmatprep.subr.bf16.mxu1 %v6199_v20 }
 0x4e0   : > { %v3877_v56 = vmax.f32 %v3739_v14, 0.0  ;;  %v3401_v2 = vsel %vm3369_vm4, %v10666_v58, %v2756_v15  ;;  %v3433_v59 = vsel %vm3402_vm5, %v3400_v9, %v2852_v11  ;;  %v4882_v14 = vld [vmem:[%s10103_s6 + $0x68] sm:$0xff] }
 0x4e1   : > { %v3876_v61 = vmax.f32 %v3734_v46, 0.0  ;;  %v5726_v46 = vpack.c.bf16 %v4882_v14, %v4881_v28 }
 0x4e2   : > { %3915 = vst.msk [vmem:[#allocation3 + $0x40] sm:$0xff] %vm3303_vm2, %v3877_v56  ;;  %5724 = vmatpush1.bf16.msra.mxu1 %v5723_v33 }
 0x4e3   : > { %3914 = vst.msk [vmem:[#allocation3 + $0x38] sm:$0xff] %vm3303_vm2, %v3876_v61  ;;  %v2854_v52 = vpop.permute.xlu1 %2853  ;;  %v3234_v10 = vpop.permute.xlu0 %3233  ;;  %5725 = vmatprep.subr.bf16.mxu1 %v6199_v20 }
 0x4e4   : > { %v3531_v63 = vsel %vm3501_vm8, %v3498_v0, %v3234_v10  ;;  %v3434_v17 = vsel %vm3402_vm5, %v3401_v2, %v2854_v52  ;;  %v4884_v0 = vld [vmem:[%s10103_s6 + $0x78] sm:$0xff]  ;;  %v9477_v2 = vld [vmem:[%s10105_s8] sm:$0xff] }
 0x4e5   : > { %5660 = vmatmul.mubr.msk.f32.gmra.mrb[28].mxu0 %vm3550_vm9, %v3531_v63  ;;  %v5729_v63 = vpack.c.bf16 %v4884_v0, %v4883_v12  ;;  %5665 = vmatprep.subr.mxu0 %v9477_v2 }
 0x4e6   : > { %5727 = vmatpush1.bf16.msra.mxu1 %v5726_v46  ;;  %5666 = vmatpush3.msra.mxu0 %v9477_v2 }
 0x4e7   : > { %v2982_v44 = vpop.permute.xlu1 %2981  ;;  %v2980_v32 = vpop.permute.xlu0 %2979  ;;  %5728 = vmatprep.subr.bf16.mxu1 %v6199_v20 }
 0x4e8   : > { %v3467_v47 = vsel %vm3435_vm6, %v3434_v17, %v2982_v44  ;;  %v3466_v3 = vsel %vm3435_vm6, %v3433_v59, %v2980_v32  ;;  %v4285_v17 = vld [vmem:[#allocation3 + $0x19] ss:$2 sm:$0xff] }
 0x4ea   : > { %v9384_v49 = vld [vmem:[#allocation3 + $0x38] ss:$2 sm:$0xff]  ;;  %v4088_v39 = vld [vmem:[#allocation3 + $0x37] ss:$2 sm:$0xff]  ;;  %5730 = vmatpush1.bf16.msra.mxu1 %v5729_v63 }
 0x4eb   : > { %v3110_v37 = vpop.permute.xlu1 %3109  ;;  %v3108_v45 = vpop.permute.xlu0 %3107  ;;  %v9388_v42 = vpack.i.bf16 %v9384_v49, %v9382_v24  ;;  %5731 = vmatprep.subr.bf16.mxu1 %v6199_v20  ;;  %v4174_v20 = vld [vmem:[#allocation3 + $0x9] ss:$2 sm:$0xff]  ;;  %v9484_v35 = vld [vmem:[#allocation3 + $0x39] ss:$2 sm:$0xff] }
 0x4ec   : > { %v3500_v53 = vsel %vm3468_vm7, %v3467_v47, %v3110_v37  ;;  %v3499_v55 = vsel %vm3468_vm7, %v3466_v3, %v3108_v45  ;;  %v4886_v37 = vld [vmem:[%s10103_s6 + $0x88] sm:$0xff] }
 0x4ed   : > { %v5628_v5 = vpop.f32.mrb[6].mxu0  ;;  %5821 = vrot.lane.b32.xlu0 %v9388_v42, %s10260_s20  ;;  %v5732_v9 = vpack.c.bf16 %v4886_v37, %v4885_v51 }
 0x4ee   : > { %v3749_v13 = vadd.f32 %v5628_v5, %v9319_v60  ;;  %v3743_v40 = vpop.f32.mrb[7].mxu0 }
 0x4ef   : > { %v3744_v19 = vadd.f32 %v9319_v60, %v3743_v40  ;;  %v3238_v8 = vpop.permute.xlu1 %3237  ;;  %v3236_v34 = vpop.permute.xlu0 %3235  ;;  %5733 = vmatpush1.bf16.msra.mxu1 %v5732_v9 }
 0x4f0   : > { %v3879_v48 = vmax.f32 %v3749_v13, 0.0  ;;  %v3533_v4 = vsel %vm3501_vm8, %v3500_v53, %v3238_v8  ;;  %v3532_v29 = vsel %vm3501_vm8, %v3499_v55, %v3236_v34  ;;  %5734 = vmatprep.subr.mxu1 %v9477_v2  ;;  %v5815_v8 = vpack.i.bf16 %v9382_v24, %v9335_v21 }
 0x4f1   : > { %v3878_v38 = vmax.f32 %v3744_v19, 0.0  ;;  %5662 = vmatprep.mubr.msk.f32.mxu0 %vm3550_vm9, %v3532_v29 }
 0x4f2   : > { %3917 = vst.msk [vmem:[#allocation3 + $0x50] sm:$0xff] %vm3303_vm2, %v3879_v48  ;;  %5663 = vmatmul.mubr.msk.f32.gmra.mrb[30].mxu0 %vm3550_vm9, %v3533_v4 }
 0x4f3   : > { %3916 = vst.msk [vmem:[#allocation3 + $0x48] sm:$0xff] %vm3303_vm2, %v3878_v38  ;;  %5667 = vmatprep.mubr.msk.f32.mxu0 %vm444_vm0, %v5087_v36 }
 0x4f6   : > { %5668 = vmatmul.mubr.msk.f32.vlgmr.msra.gmra.mrb[32].mxu0 %vm444_vm0, %v5502_v1 }
 0x4fa   : > { %v4288_v4 = vld [vmem:[#allocation3 + $0x49] ss:$2 sm:$0xff] }
 0x4fb   : > { %v4089_v29 = vld [vmem:[#allocation3 + $0x47] ss:$2 sm:$0xff] }
 0x4fd   : > { %v5631_v25 = vpop.f32.mrb[8].mxu0 }
 0x4fe   : > { %v3759_v11 = vadd.f32 %v5631_v25, %v9319_v60  ;;  %v3753_v15 = vpop.f32.mrb[9].mxu0 }
 0x4ff   : > { %v3754_v57 = vadd.f32 %v9319_v60, %v3753_v15  ;;  %v4146_v15 = vld [vmem:[#allocation3 + $0x48] ss:$2 sm:$0xff] }
 0x500   : > { %v3881_v16 = vmax.f32 %v3759_v11, 0.0  ;;  %v9447_v56 = vpop.permute.xlu1 %3997  ;;  %v9449_v61 = vpop.permute.xlu0 %3992  ;;  %v5850_v0 = vpack.i.bf16 %v4146_v15, %v9384_v49 }
 0x501   : > { %v3880_v52 = vmax.f32 %v3754_v57, 0.0  ;;  %v4104_v10 = vmul.f32 %v4087_v23, %v9447_v56  ;;  %v4103_v27 = vmul.f32 %v4086_v18, %v9449_v61  ;;  %v4122_v44 = vmul.f32 %v4088_v39, %v9447_v56  ;;  %v5504_v18 = vld [vmem:[%s6324_s19 + $0x30] ss:$2 sm:$0xff] }
 0x502   : > { %3919 = vst.msk [vmem:[#allocation3 + $0x60] sm:$0xff] %vm3303_vm2, %v3881_v16  ;;  %v4121_v32 = vmul.f32 %v4087_v23, %v9449_v61  ;;  %v4180_v23 = vld [vmem:[#allocation3 + $0x39] ss:$2 sm:$0xff] }
 0x503   : > { %3918 = vst.msk [vmem:[#allocation3 + $0x58] sm:$0xff] %vm3303_vm2, %v3880_v52  ;;  %v5800_v22 = vpack.i.bf16 %v4104_v10, %v4103_v27  ;;  %v4178_v52 = vld [vmem:[#allocation3 + $0x29] ss:$2 sm:$0xff]  ;;  %v5503_v10 = vld [vmem:[%s6324_s19 + $0x20] ss:$2 sm:$0xff] }
 0x504   : > { %v9464_v31 = vpop.permute.xlu0 %4002  ;;  %v5805_v59 = vpack.i.bf16 %v4122_v44, %v4121_v32  ;;  %5670 = vmatprep.mubr.msk.f32.mxu0 %vm444_vm0, %v5503_v10 }
 0x505   : > { %v4207_v45 = vpop.permute.xlu1 %4206  ;;  %5801 = vrot.lane.b32.xlu1 %v5800_v22, %s6192_s16  ;;  %v4123_v6 = vmul.f32 %v4089_v29, %v9464_v31  ;;  %v4105_v46 = vmul.f32 %v4088_v39, %v9464_v31  ;;  %5671 = vmatmul.mubr.msk.f32.gmra.mrb[34].mxu0 %vm444_vm0, %v5504_v18 }
 0x506   : > { %v4320_v58 = vmul.f32 %v4286_v50, %v4207_v45  ;;  %v4302_v47 = vmul.f32 %v4285_v17, %v4207_v45  ;;  %v4269_v53 = vmul.f32 %v4207_v45, %v4174_v20 }
 0x508   : > { %5486 = vmatprep.mubr.msk.f32.mxu1 %vm3303_vm2, %v4320_v58  ;;  %v9488_v13 = vpop.permute.xlu0 %4007 }
 0x509   : > { %v4211_v5 = vpop.permute.xlu1 %4210  ;;  %5806 = vrot.lane.b32.xlu1 %v5805_v59, %s6194_s30  ;;  %v4106_v21 = vmul.f32 %v4089_v29, %v9488_v13 }
 0x50a   : > { %v4090_v3 = vld [vmem:[#allocation3 + $0x57] ss:$2 sm:$0xff]  ;;  %v4303_v40 = vmul.f32 %v4286_v50, %v4211_v5  ;;  %v9491_v30 = vmul.f32 %v9484_v35, %v4211_v5  ;;  %v4270_v55 = vmul.f32 %v4211_v5, %v4176_v62  ;;  %v4148_v39 = vld [vmem:[#allocation3 + $0x58] ss:$2 sm:$0xff] }
 0x50b   : > { %v4124_v34 = vmul.f32 %v4090_v3, %v9488_v13  ;;  %v9506_v25 = vld [vmem:[#allocation3 + $0x59] ss:$2 sm:$0xff]  ;;  %v5835_v57 = vpack.i.bf16 %v4106_v21, %v4105_v46  ;;  %v5855_v9 = vpack.i.bf16 %v4148_v39, %v4146_v15  ;;  %v4182_v46 = vld [vmem:[#allocation3 + $0x49] ss:$2 sm:$0xff] }
 0x50c   : > { %v5830_v19 = vpack.i.bf16 %v4303_v40, %v4302_v47  ;;  %v5825_v24 = vpack.i.bf16 %v4270_v55, %v4269_v53  ;;  %v9516_v16 = vpop.permute.xlu0 %4012 }
 0x50d   : > { %v5634_v41 = vpop.f32.mrb[10].mxu0  ;;  %v4215_v48 = vpop.permute.xlu1 %4214  ;;  %5816 = vrot.lane.b32.xlu1 %v5815_v8, %s10667_s29  ;;  %v5840_v33 = vpack.i.bf16 %v4124_v34, %v4123_v6  ;;  %v4107_v49 = vmul.f32 %v4090_v3, %v9516_v16 }
 0x50e   : > { %v3769_v54 = vadd.f32 %v5634_v41, %v9319_v60  ;;  %v9499_v26 = vmul.f32 %v4288_v4, %v4215_v48  ;;  %v3763_v38 = vpop.f32.mrb[11].mxu0  ;;  %5831 = vrot.lane.b32.xlu0 %v5830_v19, %s6201_s17  ;;  %v4271_v27 = vmul.f32 %v4215_v48, %v4178_v52  ;;  %v4304_v1 = vmul.f32 %v9484_v35, %v4215_v48  ;;  %v5505_v41 = vld [vmem:[%s6324_s19 + $0x40] ss:$2 sm:$0xff]  ;;  %v5506_v48 = vld [vmem:[%s6324_s19 + $0x50] ss:$2 sm:$0xff] }
 0x50f   : > { %v3764_v43 = vadd.f32 %v9319_v60, %v3763_v38  ;;  %5673 = vmatprep.mubr.msk.f32.mxu0 %vm444_vm0, %v5505_v41 }
 0x510   : > { %v3883_v7 = vmax.f32 %v3769_v54, 0.0  ;;  %v9525_v32 = vpop.permute.xlu0 %4017  ;;  %5674 = vmatmul.mubr.msk.f32.gmra.mrb[36].mxu0 %vm444_vm0, %v5506_v48 }
 0x511   : > { %v3882_v28 = vmax.f32 %v3764_v43, 0.0  ;;  %v4219_v14 = vpop.permute.xlu1 %4218  ;;  %5826 = vrot.lane.b32.xlu1 %v5825_v24, %s6202_s28 }
 0x512   : > { %3921 = vst.msk [vmem:[#allocation3 + $0x70] sm:$0xff] %vm3303_vm2, %v3883_v7  ;;  %v9511_v11 = vmul.f32 %v9506_v25, %v4219_v14  ;;  %5841 = vrot.lane.b32.xlu0 %v5840_v33, %s6194_s30  ;;  %v4272_v12 = vmul.f32 %v4219_v14, %v4180_v23  ;;  %v4305_v50 = vmul.f32 %v4288_v4, %v4219_v14  ;;  %v4184_v7 = vld [vmem:[#allocation3 + $0x59] ss:$2 sm:$0xff] }
 0x513   : > { %3920 = vst.msk [vmem:[#allocation3 + $0x68] sm:$0xff] %vm3303_vm2, %v3882_v28 }
 0x514   : > { %v5860_v63 = vpack.i.bf16 %v4272_v12, %v4271_v27  ;;  %v5865_v17 = vpack.i.bf16 %v4305_v50, %v4304_v1 }
 0x515   : > { %5836 = vrot.lane.b32.xlu1 %v5835_v57, %s6192_s16  ;;  %v4223_v22 = vpop.permute.xlu1 %4222  ;;  %v9566_v57 = vpop.permute.xlu0 %4022 }
 0x516   : > { %5851 = vrot.lane.b32.xlu0 %v5850_v0, %s10667_s29  ;;  %v4306_v29 = vmul.f32 %v9506_v25, %v4223_v22  ;;  %v4273_v15 = vmul.f32 %v4223_v22, %v4182_v46 }
 0x519   : > { %5846 = vrot.lane.b32.xlu1 %v9388_v42, %s10668_s0  ;;  %v4227_v35 = vpop.permute.xlu1 %4226  ;;  %v9569_v12 = vpop.permute.xlu0 %4027 }
 0x51a   : > { %v4091_v44 = vld [vmem:[#allocation3 + $0x67] ss:$2 sm:$0xff]  ;;  %5861 = vrot.lane.b32.xlu0 %v5860_v63, %s6202_s28  ;;  %v4150_v3 = vld [vmem:[#allocation3 + $0x68] ss:$2 sm:$0xff]  ;;  %v4274_v28 = vmul.f32 %v4227_v35, %v4184_v7 }
 0x51b   : > { %v4290_v51 = vld [vmem:[#allocation3 + $0x69] ss:$2 sm:$0xff]  ;;  %v4108_v37 = vmul.f32 %v4091_v44, %v9525_v32  ;;  %v4125_v53 = vmul.f32 %v4091_v44, %v9516_v16  ;;  %v5885_v25 = vpack.i.bf16 %v4150_v3, %v4148_v39 }
 0x51c   : > { %v9531_v45 = vmul.f32 %v4290_v51, %v4223_v22  ;;  %v4307_v55 = vmul.f32 %v4290_v51, %v4227_v35  ;;  %v5895_v23 = vpack.i.bf16 %v4274_v28, %v4273_v15 }
 0x51d   : > { %v5870_v58 = vpack.i.bf16 %v4108_v37, %v4107_v49  ;;  %v5637_v36 = vpop.f32.mrb[12].mxu0  ;;  %5856 = vrot.lane.b32.xlu1 %v5855_v9, %s10669_s18  ;;  %v4231_v52 = vpop.permute.xlu1 %4230 }
 0x51e   : > { %v3779_v59 = vadd.f32 %v5637_v36, %v9319_v60  ;;  %v3773_v20 = vpop.f32.mrb[13].mxu0  ;;  %v5900_v21 = vpack.i.bf16 %v4307_v55, %v4306_v29  ;;  %v9577_v49 = vpop.permute.xlu0 %4032 }
 0x51f   : > { %v3774_v42 = vadd.f32 %v9319_v60, %v3773_v20  ;;  %5871 = vrot.lane.b32.xlu0 %v5870_v58, %s6192_s16 }
 0x520   : > { %v3885_v5 = vmax.f32 %v3779_v59, 0.0 }
 0x521   : > { %v3884_v47 = vmax.f32 %v3774_v42, 0.0  ;;  %5866 = vrot.lane.b32.xlu1 %v5865_v17, %s6201_s17  ;;  %v4235_v36 = vpop.permute.xlu1 %4234 }
 0x522   : > { %3923 = vst.msk [vmem:[#allocation3 + $0x80] sm:$0xff] %vm3303_vm2, %v3885_v5  ;;  %v9583_v58 = vpop.permute.xlu0 %4037 }
 0x523   : > { %3922 = vst.msk [vmem:[#allocation3 + $0x78] sm:$0xff] %vm3303_vm2, %v3884_v47  ;;  %5881 = vrot.lane.b32.xlu0 %v5855_v9, %s10668_s0 }
 0x525   : > { %v9604_v29 = vpop.permute.xlu1 %4238 }
 0x526   : > { %v9587_v42 = vpop.permute.xlu0 %4042 }
 0x529   : > { %v9613_v28 = vpop.permute.xlu1 %4242 }
 0x52a   : > { %v9543_v40 = vld [vmem:[#allocation3 + $0x78] ss:$2 sm:$0xff]  ;;  %v4092_v62 = vld [vmem:[#allocation3 + $0x77] ss:$2 sm:$0xff] }
 0x52b   : > { %v5890_v19 = vpack.i.bf16 %v9543_v40, %v4150_v3  ;;  %v4126_v8 = vmul.f32 %v4092_v62, %v9525_v32  ;;  %v9548_v34 = vld [vmem:[#allocation3 + $0x79] ss:$2 sm:$0xff]  ;;  %v4109_v10 = vmul.f32 %v4092_v62, %v9566_v57  ;;  %v5507_v62 = vld [vmem:[%s6324_s19 + $0x60] ss:$2 sm:$0xff] }
 0x52c   : > { %v9554_v4 = vmul.f32 %v9548_v34, %v4227_v35  ;;  %5676 = vmatprep.mubr.msk.f32.mxu0 %vm444_vm0, %v5507_v62  ;;  %v4188_v41 = vld [vmem:[#allocation3 + $0x79] ss:$2 sm:$0xff] }
 0x52d   : > { %v5640_v54 = vpop.f32.mrb[14].mxu0  ;;  %5891 = vrot.lane.b32.xlu0 %v5890_v19, %s10669_s18  ;;  %v5875_v38 = vpack.i.bf16 %v4126_v8, %v4125_v53  ;;  %v5508_v53 = vld [vmem:[%s6324_s19 + $0x70] ss:$2 sm:$0xff]  ;;  %v4308_v8 = vmul.f32 %v9548_v34, %v4231_v52 }
 0x52e   : > { %v3789_v6 = vadd.f32 %v5640_v54, %v9319_v60  ;;  %v3783_v43 = vpop.f32.mrb[15].mxu0  ;;  %5677 = vmatmul.mubr.msk.f32.gmra.mrb[38].mxu0 %vm444_vm0, %v5508_v53  ;;  %v9606_v54 = vpop.permute.xlu0 %4047 }
 0x52f   : > { %v3784_v24 = vadd.f32 %v9319_v60, %v3783_v43  ;;  %5876 = vrot.lane.b32.xlu1 %v5875_v38, %s6194_s30  ;;  %v4276_v38 = vmul.f32 %v4235_v36, %v4188_v41 }
 0x530   : > { %v3887_v33 = vmax.f32 %v3789_v6, 0.0 }
 0x531   : > { %v3886_v14 = vmax.f32 %v3784_v24, 0.0  ;;  %5901 = vrot.lane.b32.xlu0 %v5900_v21, %s6201_s17  ;;  %v4186_v21 = vld [vmem:[#allocation3 + $0x69] ss:$2 sm:$0xff] }
 0x532   : > { %3925 = vst.msk [vmem:[#allocation3 + $0x90] sm:$0xff] %vm3303_vm2, %v3887_v33  ;;  %v4275_v7 = vmul.f32 %v4231_v52, %v4186_v21  ;;  %v9616_v15 = vpop.permute.xlu0 %4052 }
 0x533   : > { %3924 = vst.msk [vmem:[#allocation3 + $0x88] sm:$0xff] %vm3303_vm2, %v3886_v14  ;;  %5886 = vrot.lane.b32.xlu1 %v5885_v25, %s10667_s29 }
 0x534   : > { %v5930_v25 = vpack.i.bf16 %v4276_v38, %v4275_v7  ;;  %v3943_v7 = vld [vmem:[#allocation3 + $0x7] ss:$2 sm:$0xff] }
 0x537   : > { %5896 = vrot.lane.b32.xlu1 %v5895_v23, %s6202_s28 }
 0x53a   : > { %v4093_v0 = vld [vmem:[#allocation3 + $0x87] ss:$2 sm:$0xff]  ;;  %v4154_v1 = vld [vmem:[#allocation3 + $0x88] ss:$2 sm:$0xff] }
 0x53b   : > { %v4110_v18 = vmul.f32 %v4093_v0, %v9569_v12  ;;  %v4292_v27 = vld [vmem:[#allocation3 + $0x89] ss:$2 sm:$0xff]  ;;  %v4127_v5 = vmul.f32 %v4093_v0, %v9566_v57  ;;  %v5920_v43 = vpack.i.bf16 %v4154_v1, %v9543_v40  ;;  %v9620_v40 = vpop.permute.xlu1 %4246  ;;  %v9624_v0 = vpop.permute.xlu0 %4057 }
 0x53c   : > { %v9573_v63 = vmul.f32 %v4292_v27, %v4231_v52  ;;  %v4309_v35 = vmul.f32 %v4292_v27, %v4235_v36 }
 0x53d   : > { %v5905_v39 = vpack.i.bf16 %v4110_v18, %v4109_v10 }
 0x53e   : > { %v5935_v48 = vpack.i.bf16 %v4309_v35, %v4308_v8 }
 0x53f   : > { %5906 = vrot.lane.b32.xlu1 %v5905_v39, %s6192_s16  ;;  %v9622_v23 = vpop.permute.xlu1 %4250 }
 0x541   : > { %v5643_v44 = vpop.f32.mrb[16].mxu0 }
 0x542   : > { %v3799_v22 = vadd.f32 %v5643_v44, %v9319_v60  ;;  %v3793_v51 = vpop.f32.mrb[17].mxu0 }
 0x543   : > { %v3794_v37 = vadd.f32 %v9319_v60, %v3793_v51  ;;  %5916 = vrot.lane.b32.xlu1 %v5890_v19, %s10668_s0  ;;  %v9633_v51 = vpop.permute.xlu0 %4062 }
 0x544   : > { %v3889_v50 = vmax.f32 %v3799_v22, 0.0  ;;  %v9631_v22 = vpop.permute.xlu1 %4254 }
 0x545   : > { %v3888_v9 = vmax.f32 %v3794_v37, 0.0 }
 0x546   : > { %3927 = vst.msk [vmem:[#allocation3 + $0xa0] sm:$0xff] %vm3303_vm2, %v3889_v50 }
 0x547   : > { %3926 = vst.msk [vmem:[#allocation3 + $0x98] sm:$0xff] %vm3303_vm2, %v3888_v9 }
 0x54e   : > { %v9585_v59 = vld [vmem:[#allocation3 + $0x98] ss:$2 sm:$0xff]  ;;  %v4094_v20 = vld [vmem:[#allocation3 + $0x97] ss:$2 sm:$0xff] }
 0x54f   : > { %v5925_v17 = vpack.i.bf16 %v9585_v59, %v4154_v1  ;;  %v4128_v47 = vmul.f32 %v4094_v20, %v9569_v12  ;;  %v9592_v3 = vld [vmem:[#allocation3 + $0x99] ss:$2 sm:$0xff]  ;;  %v4111_v10 = vmul.f32 %v4094_v20, %v9577_v49 }
 0x550   : > { %v9597_v55 = vmul.f32 %v9592_v3, %v4235_v36 }
 0x551   : > { %5926 = vrot.lane.b32.xlu1 %v5925_v17, %s10669_s18  ;;  %v5910_v19 = vpack.i.bf16 %v4128_v47, %v4127_v5  ;;  %v9639_v5 = vpop.permute.xlu1 %4258  ;;  %v9641_v47 = vpop.permute.xlu0 %4067 }
 0x553   : > { %5911 = vrot.lane.b32.xlu0 %v5910_v19, %s6194_s30 }
 0x555   : > { %v5646_v6 = vpop.f32.mrb[18].mxu0  ;;  %5936 = vrot.lane.b32.xlu1 %v5935_v48, %s6201_s17  ;;  %v9645_v35 = vpop.permute.xlu1 %4262 }
 0x556   : > { %v3809_v34 = vadd.f32 %v5646_v6, %v9319_v60  ;;  %v3803_v24 = vpop.f32.mrb[19].mxu0  ;;  %v9647_v62 = vpop.permute.xlu0 %4266  ;;  %v5509_v6 = vld [vmem:[%s6324_s19 + $0x80] ss:$2 sm:$0xff] }
 0x557   : > { %v3804_v33 = vadd.f32 %v9319_v60, %v3803_v24  ;;  %5921 = vrot.lane.b32.xlu0 %v5920_v43, %s10667_s29  ;;  %v5510_v43 = vld [vmem:[%s6324_s19 + $0x90] ss:$2 sm:$0xff]  ;;  %5679 = vmatprep.mubr.msk.f32.mxu0 %vm444_vm0, %v5509_v6  ;;  %v4310_v24 = vmul.f32 %v9592_v3, %v9604_v29 }
 0x558   : > { %v3891_v14 = vmax.f32 %v3809_v34, 0.0  ;;  %5680 = vmatmul.mubr.msk.f32.gmra.mrb[40].mxu0 %vm444_vm0, %v5510_v43 }
 0x559   : > { %v3890_v46 = vmax.f32 %v3804_v33, 0.0 }
 0x55a   : > { %3929 = vst.msk [vmem:[#allocation3 + $0xb0] sm:$0xff] %vm3303_vm2, %v3891_v14  ;;  %v5812_v33 = vpop.permute.xlu0 %5811  ;;  %v4192_v14 = vld [vmem:[#allocation3 + $0x99] ss:$2 sm:$0xff] }
 0x55b   : > { %3928 = vst.msk [vmem:[#allocation3 + $0xa8] sm:$0xff] %vm3303_vm2, %v3890_v46  ;;  %5931 = vrot.lane.b32.xlu0 %v5930_v25, %s6202_s28 }
 0x562   : > { %v4095_v52 = vld [vmem:[#allocation3 + $0xa7] ss:$2 sm:$0xff]  ;;  %v4158_v53 = vld [vmem:[#allocation3 + $0xa8] ss:$2 sm:$0xff] }
 0x563   : > { %v4112_v18 = vmul.f32 %v4095_v52, %v9583_v58  ;;  %v4294_v27 = vld [vmem:[#allocation3 + $0xa9] ss:$2 sm:$0xff]  ;;  %v4129_v41 = vmul.f32 %v4095_v52, %v9577_v49  ;;  %v5955_v3 = vpack.i.bf16 %v4158_v53, %v9585_v59 }
 0x564   : > { %v9629_v39 = vmul.f32 %v4294_v27, %v9604_v29  ;;  %v4311_v38 = vmul.f32 %v4294_v27, %v9613_v28  ;;  %v4190_v52 = vld [vmem:[#allocation3 + $0x89] ss:$2 sm:$0xff] }
 0x565   : > { %v5940_v44 = vpack.i.bf16 %v4112_v18, %v4111_v10  ;;  %v4070_v10 = vmul.f32 %v9449_v61, %v3943_v7  ;;  %v4278_v18 = vmul.f32 %v9613_v28, %v4192_v14  ;;  %v4277_v61 = vmul.f32 %v9604_v29, %v4190_v52 }
 0x566   : > { %v5970_v46 = vpack.i.bf16 %v4311_v38, %v4310_v24 }
 0x567   : > { %5941 = vrot.lane.b32.xlu0 %v5940_v44, %s6192_s16 }
 0x568   : > { %v5649_v37 = vpop.f32.mrb[20].mxu0 }
 0x569   : > { %v3819_v50 = vadd.f32 %v5649_v37, %v9319_v60  ;;  %v3813_v9 = vpop.f32.mrb[21].mxu0 }
 0x56a   : > { %v3814_v36 = vadd.f32 %v9319_v60, %v3813_v9  ;;  %v5822_v9 = vpop.permute.xlu0 %5821 }
 0x56b   : > { %v3893_v1 = vmax.f32 %v3819_v50, 0.0  ;;  %5951 = vrot.lane.b32.xlu0 %v5925_v17, %s10668_s0  ;;  %v3945_v50 = vld [vmem:[#allocation3 + $0x17] ss:$2 sm:$0xff] }
 0x56c   : > { %v3892_v20 = vmax.f32 %v3814_v36, 0.0 }
 0x56d   : > { %3931 = vst.msk [vmem:[#allocation3 + $0xc0] sm:$0xff] %vm3303_vm2, %v3893_v1 }
 0x56e   : > { %3930 = vst.msk [vmem:[#allocation3 + $0xb8] sm:$0xff] %vm3303_vm2, %v3892_v20 }
 0x575   : > { %v9649_v19 = vld [vmem:[#allocation3 + $0xb8] ss:$2 sm:$0xff]  ;;  %v9651_v8 = vld [vmem:[#allocation3 + $0xb7] ss:$2 sm:$0xff] }
 0x576   : > { %v9654_v17 = vpack.i.bf16 %v9649_v19, %v4158_v53  ;;  %v4130_v48 = vmul.f32 %v9651_v8, %v9583_v58  ;;  %v5813_v53 = vunpack.i.l.bf16 %v5812_v33 }
 0x577   : > { %v5802_v21 = vpop.permute.xlu1 %5801 }
 0x578   : > { %5961 = vrot.lane.b32.xlu0 %v9654_v17, %s10669_s18  ;;  %v5945_v34 = vpack.i.bf16 %v4130_v48, %v4129_v41  ;;  %v5803_v25 = vunpack.i.l.bf16 %v5802_v21  ;;  %v5804_v27 = vunpack.i.h.bf16 %v5802_v21  ;;  %v4071_v48 = vmul.f32 %v9447_v56, %v3945_v50 }
 0x579   : > { %v5965_v21 = vpack.i.bf16 %v4278_v18, %v4277_v61  ;;  %v5823_v18 = vunpack.i.l.bf16 %v5822_v9 }
 0x57a   : > { %5946 = vrot.lane.b32.xlu1 %v5945_v34, %s6194_s30  ;;  %v4754_v38 = vsel %vm3303_vm2, %v4070_v10, %v5803_v25  ;;  %v4755_v34 = vsel %vm3303_vm2, %v4071_v48, %v5804_v27  ;;  %v3947_v48 = vld [vmem:[#allocation3 + $0x27] ss:$2 sm:$0xff] }
 0x57b   : > { %v5807_v44 = vpop.permute.xlu1 %5806 }
 0x57c   : > { %v5652_v37 = vpop.f32.mrb[22].mxu0  ;;  %5971 = vrot.lane.b32.xlu0 %v5970_v46, %s6201_s17  ;;  %v5809_v36 = vunpack.i.h.bf16 %v5807_v44  ;;  %v5808_v1 = vunpack.i.l.bf16 %v5807_v44  ;;  %v5814_v46 = vunpack.i.h.bf16 %v5812_v33  ;;  %v5824_v33 = vunpack.i.h.bf16 %v5822_v9 }
 0x57d   : > { %v3829_v20 = vadd.f32 %v5652_v37, %v9319_v60  ;;  %v3823_v41 = vpop.f32.mrb[23].mxu0 }
 0x57e   : > { %v3824_v6 = vadd.f32 %v9319_v60, %v3823_v41  ;;  %5956 = vrot.lane.b32.xlu1 %v5955_v3, %s10667_s29  ;;  %v4770_v43 = vsel %vm3369_vm4, %v4754_v38, %v5808_v1  ;;  %v4771_v14 = vsel %vm3369_vm4, %v4755_v34, %v5809_v36  ;;  %v4113_v34 = vmul.f32 %v9651_v8, %v9587_v42 }
 0x57f   : > { %v3895_v59 = vmax.f32 %v3829_v20, 0.0  ;;  %v5817_v7 = vpop.permute.xlu1 %5816  ;;  %v4786_v52 = vsel %vm3435_vm6, %v4770_v43, %v5813_v53  ;;  %v4787_v27 = vsel %vm3435_vm6, %v4771_v14, %v5814_v46  ;;  %v4072_v43 = vmul.f32 %v9464_v31, %v3947_v48 }
 0x580   : > { %v3894_v24 = vmax.f32 %v3824_v6, 0.0  ;;  %v5819_v56 = vunpack.i.h.bf16 %v5817_v7  ;;  %v5818_v29 = vunpack.i.l.bf16 %v5817_v7  ;;  %v5832_v25 = vpop.permute.xlu0 %5831 }
 0x581   : > { %3933 = vst.msk [vmem:[#allocation3 + $0xd0] sm:$0xff] %vm3303_vm2, %v3895_v59  ;;  %v5833_v1 = vunpack.i.l.bf16 %v5832_v25  ;;  %v5834_v9 = vunpack.i.h.bf16 %v5832_v25 }
 0x582   : > { %3932 = vst.msk [vmem:[#allocation3 + $0xc8] sm:$0xff] %vm3303_vm2, %v3894_v24  ;;  %5966 = vrot.lane.b32.xlu1 %v5965_v21, %s6202_s28  ;;  %v4802_v10 = vsel %vm3501_vm8, %v4786_v52, %v5818_v29  ;;  %v4803_v37 = vsel %vm3501_vm8, %v4787_v27, %v5819_v56  ;;  %v3949_v56 = vld [vmem:[#allocation3 + $0x37] ss:$2 sm:$0xff] }
 0x583   : > { %v5827_v44 = vpop.permute.xlu1 %5826  ;;  %v4819_v20 = vsel %vm4818_vm10, %v4802_v10, %v5823_v18  ;;  %v4820_v6 = vsel %vm4818_vm10, %v4803_v37, %v5824_v33 }
 0x584   : > { %v5829_v3 = vunpack.i.h.bf16 %v5827_v44  ;;  %v5828_v50 = vunpack.i.l.bf16 %v5827_v44  ;;  %v5842_v36 = vpop.permute.xlu0 %5841 }
 0x585   : > { %v5843_v29 = vunpack.i.l.bf16 %v5842_v36  ;;  %v5844_v44 = vunpack.i.h.bf16 %v5842_v36 }
 0x586   : > { %v4836_v41 = vsel %vm4835_vm11, %v4819_v20, %v5828_v50  ;;  %v4837_v53 = vsel %vm4835_vm11, %v4820_v6, %v5829_v3 }
 0x587   : > { %v5837_v61 = vpop.permute.xlu1 %5836  ;;  %v4853_v38 = vsel %vm4852_vm12, %v4836_v41, %v5833_v1  ;;  %v4854_v25 = vsel %vm4852_vm12, %v4837_v53, %v5834_v9 }
 0x588   : > { %v5838_v59 = vunpack.i.l.bf16 %v5837_v61  ;;  %5007 = vmatmul.mubr.f32.vlgmr.msra.gmra.mrb[0].mxu1 %v4853_v38  ;;  %v5839_v7 = vunpack.i.h.bf16 %v5837_v61  ;;  %v5852_v14 = vpop.permute.xlu0 %5851 }
 0x589   : > { %v9695_v21 = vld [vmem:[#allocation3 + $0xc7] ss:$2 sm:$0xff]  ;;  %5487 = vmatprep.mubr.msk.f32.mxu1 %vm3303_vm2, %v9491_v30  ;;  %5735 = vmatpush3.msra.mxu1 %v9477_v2  ;;  %v4073_v30 = vmul.f32 %v9488_v13, %v3949_v56  ;;  %v5853_v37 = vunpack.i.l.bf16 %v5852_v14 }
 0x58a   : > { %v4114_v24 = vmul.f32 %v9695_v21, %v9606_v54  ;;  %v4756_v31 = vsel %vm3303_vm2, %v4072_v43, %v5838_v59  ;;  %v5854_v43 = vunpack.i.h.bf16 %v5852_v14 }
 0x58b   : > { %v5847_v46 = vpop.permute.xlu1 %5846  ;;  %v4772_v8 = vsel %vm3369_vm4, %v4756_v31, %v5843_v29  ;;  %v4757_v2 = vsel %vm3303_vm2, %v4073_v30, %v5839_v7  ;;  %v4162_v30 = vld [vmem:[#allocation3 + $0xc8] ss:$2 sm:$0xff] }
 0x58c   : > { %v5975_v52 = vpack.i.bf16 %v4114_v24, %v4113_v34  ;;  %v5848_v10 = vunpack.i.l.bf16 %v5847_v46  ;;  %5012 = vmatmul.mubr.f32.gmra.mrb[2].mxu1 %v4854_v25  ;;  %v5849_v18 = vunpack.i.h.bf16 %v5847_v46  ;;  %v5862_v33 = vpop.permute.xlu0 %5861  ;;  %v4773_v41 = vsel %vm3369_vm4, %v4757_v2, %v5844_v44  ;;  %v9731_v25 = vld [vmem:[#allocation3 + $0xc9] ss:$2 sm:$0xff] }
 0x58d   : > { %5488 = vmatprep.mubr.msk.f32.mxu1 %vm3303_vm2, %v9499_v26  ;;  %v5863_v59 = vunpack.i.l.bf16 %v5862_v33  ;;  %v5864_v56 = vunpack.i.h.bf16 %v5862_v33  ;;  %v4313_v44 = vmul.f32 %v9731_v25, %v9622_v23 }
 0x58e   : > { %5976 = vrot.lane.b32.xlu1 %v5975_v52, %s6192_s16  ;;  %v4788_v27 = vsel %vm3435_vm6, %v4772_v8, %v5848_v10  ;;  %v4789_v61 = vsel %vm3435_vm6, %v4773_v41, %v5849_v18  ;;  %v9733_v52 = vld [vmem:[#allocation3 + $0xb9] ss:$2 sm:$0xff]  ;;  %v4131_v18 = vmul.f32 %v9695_v21, %v9587_v42 }
 0x58f   : > { %v5857_v3 = vpop.permute.xlu1 %5856  ;;  %v4804_v48 = vsel %vm3501_vm8, %v4788_v27, %v5853_v37  ;;  %v5511_v37 = vld [vmem:[%s6324_s19 + $0xa0] ss:$2 sm:$0xff]  ;;  %v4196_v41 = vld [vmem:[#allocation3 + $0xb9] ss:$2 sm:$0xff] }
 0x590   : > { %v5655_v50 = vpop.f32.mrb[24].mxu0  ;;  %v5858_v13 = vunpack.i.l.bf16 %v5857_v3  ;;  %v5859_v36 = vunpack.i.h.bf16 %v5857_v3  ;;  %5682 = vmatprep.mubr.msk.f32.mxu0 %vm444_vm0, %v5511_v37 }
 0x591   : > { %v3839_v1 = vadd.f32 %v5655_v50, %v9319_v60  ;;  %v3833_v20 = vpop.f32.mrb[25].mxu0  ;;  %v5872_v29 = vpop.permute.xlu0 %5871  ;;  %v3951_v50 = vld [vmem:[#allocation3 + $0x47] ss:$2 sm:$0xff] }
 0x592   : > { %v3834_v26 = vadd.f32 %v9319_v60, %v3833_v20  ;;  %5986 = vrot.lane.b32.xlu1 %v9654_v17, %s10668_s0  ;;  %v4821_v6 = vsel %vm4818_vm10, %v4804_v48, %v5858_v13  ;;  %v4805_v17 = vsel %vm3501_vm8, %v4789_v61, %v5854_v43  ;;  %v5873_v3 = vunpack.i.l.bf16 %v5872_v29  ;;  %v4194_v48 = vld [vmem:[#allocation3 + $0xa9] ss:$2 sm:$0xff] }
 0x593   : > { %v3897_v38 = vmax.f32 %v3839_v1, 0.0  ;;  %v5867_v9 = vpop.permute.xlu1 %5866  ;;  %v4838_v60 = vsel %vm4835_vm11, %v4821_v6, %v5863_v59  ;;  %v4822_v31 = vsel %vm4818_vm10, %v4805_v17, %v5859_v36  ;;  %v4312_v13 = vmul.f32 %v9733_v52, %v9620_v40 }
 0x594   : > { %v3896_v53 = vmax.f32 %v3834_v26, 0.0  ;;  %v5868_v34 = vunpack.i.l.bf16 %v5867_v9  ;;  %v5869_v24 = vunpack.i.h.bf16 %v5867_v9  ;;  %v4839_v14 = vsel %vm4835_vm11, %v4822_v31, %v5864_v56  ;;  %v3953_v26 = vld [vmem:[#allocation3 + $0x57] ss:$2 sm:$0xff] }
 0x595   : > { %3935 = vst.msk [vmem:[#allocation3 + $0xe0] sm:$0xff] %vm3303_vm2, %v3897_v38  ;;  %v5882_v2 = vpop.permute.xlu0 %5881  ;;  %v4074_v21 = vmul.f32 %v9516_v16, %v3951_v50  ;;  %v5874_v1 = vunpack.i.h.bf16 %v5872_v29  ;;  %v6005_v6 = vpack.i.bf16 %v4313_v44, %v4312_v13  ;;  %v4075_v43 = vmul.f32 %v9525_v32, %v3953_v26  ;;  %v9771_v32 = vld [vmem:[%s10102_s5] ss:$0 sm:$0xff] }
 0x596   : > { %3934 = vst.msk [vmem:[#allocation3 + $0xd8] sm:$0xff] %vm3303_vm2, %v3896_v53  ;;  %v4855_v7 = vsel %vm4852_vm12, %v4838_v60, %v5868_v34  ;;  %v4856_v46 = vsel %vm4852_vm12, %v4839_v14, %v5869_v24  ;;  %v5990_v16 = vpack.i.bf16 %v4162_v30, %v9649_v19  ;;  %v4280_v34 = vmul.f32 %v9622_v23, %v4196_v41 }
 0x597   : > { %5017 = vmatmul.mubr.f32.gmra.mrb[4].mxu1 %v4855_v7  ;;  %v4758_v59 = vsel %vm3303_vm2, %v4074_v21, %v5873_v3  ;;  %v4279_v60 = vmul.f32 %v9620_v40, %v4194_v48  ;;  %v4759_v17 = vsel %vm3303_vm2, %v4075_v43, %v5874_v1  ;;  %v5883_v24 = vunpack.i.l.bf16 %v5882_v2 }
 0x598   : > { %5489 = vmatprep.mubr.msk.f32.mxu1 %vm3303_vm2, %v9511_v11 }
 0x599   : > { %v6000_v3 = vpack.i.bf16 %v4280_v34, %v4279_v60 }
 0x59b   : > { %5022 = vmatmul.mubr.f32.gmra.mrb[6].mxu1 %v4856_v46 }
 0x59c   : > { %5490 = vmatprep.mubr.msk.f32.mxu1 %vm3303_vm2, %v9531_v45  ;;  %v5512_v45 = vld [vmem:[%s6324_s19 + $0xb0] ss:$2 sm:$0xff] }
 0x59d   : > { %v9737_v10 = vld [vmem:[#allocation3 + $0xd8] ss:$2 sm:$0xff]  ;;  %v9739_v8 = vld [vmem:[#allocation3 + $0xd7] ss:$2 sm:$0xff]  ;;  %5683 = vmatmul.mubr.msk.f32.gmra.mrb[42].mxu0 %vm444_vm0, %v5512_v45 }
 0x59e   : > { %v9742_v11 = vpack.i.bf16 %v9737_v10, %v4162_v30  ;;  %v4132_v27 = vmul.f32 %v9739_v8, %v9606_v54  ;;  %v5884_v30 = vunpack.i.h.bf16 %v5882_v2 }
 0x59f   : > { %v5892_v61 = vpop.permute.xlu0 %5891 }
 0x5a0   : > { %5996 = vrot.lane.b32.xlu1 %v9742_v11, %s10669_s18  ;;  %v5980_v33 = vpack.i.bf16 %v4132_v27, %v4131_v18  ;;  %v5893_v50 = vunpack.i.l.bf16 %v5892_v61 }
 0x5a1   : > { %v5877_v20 = vpop.permute.xlu1 %5876 }
 0x5a2   : > { %v5879_v36 = vunpack.i.h.bf16 %v5877_v20  ;;  %v5878_v38 = vunpack.i.l.bf16 %v5877_v20  ;;  %5981 = vrot.lane.b32.xlu0 %v5980_v33, %s6194_s30  ;;  %v5894_v20 = vunpack.i.h.bf16 %v5892_v61  ;;  %v4115_v61 = vmul.f32 %v9739_v8, %v9616_v15 }
 0x5a3   : > { %v5902_v44 = vpop.permute.xlu0 %5901 }
 0x5a4   : > { %v4774_v53 = vsel %vm3369_vm4, %v4758_v59, %v5878_v38  ;;  %v5658_v9 = vpop.f32.mrb[26].mxu0  ;;  %6006 = vrot.lane.b32.xlu1 %v6005_v6, %s6201_s17  ;;  %v4775_v29 = vsel %vm3369_vm4, %v4759_v17, %v5879_v36  ;;  %v5903_v41 = vunpack.i.l.bf16 %v5902_v44  ;;  %v5904_v43 = vunpack.i.h.bf16 %v5902_v44 }
 0x5a5   : > { %v3849_v7 = vadd.f32 %v9771_v32, %v5658_v9  ;;  %v5887_v31 = vpop.permute.xlu1 %5886  ;;  %v3843_v56 = vpop.f32.mrb[27].mxu0  ;;  %v4790_v27 = vsel %vm3435_vm6, %v4774_v53, %v5883_v24  ;;  %v4791_v33 = vsel %vm3435_vm6, %v4775_v29, %v5884_v30 }
 0x5a6   : > { %v5889_v14 = vunpack.i.h.bf16 %v5887_v31  ;;  %v5888_v19 = vunpack.i.l.bf16 %v5887_v31  ;;  %v3844_v46 = vadd.f32 %v9771_v32, %v3843_v56  ;;  %5991 = vrot.lane.b32.xlu0 %v5990_v16, %s10667_s29  ;;  %v3957_v31 = vld [vmem:[#allocation3 + $0x77] ss:$2 sm:$0xff] }
 0x5a7   : > { %v3899_v18 = vmax.f32 %v3849_v7, 0.0 }
 0x5a8   : > { %v4806_v37 = vsel %vm3501_vm8, %v4790_v27, %v5888_v19  ;;  %v3898_v45 = vmax.f32 %v3844_v46, 0.0  ;;  %v4807_v21 = vsel %vm3501_vm8, %v4791_v33, %v5889_v14  ;;  %v9806_v46 = vld [vmem:[#allocation3 + $0xd9] ss:$2 sm:$0xff] }
 0x5a9   : > { %3937 = vst.msk [vmem:[#allocation3 + $0xf0] sm:$0xff] %vm3303_vm2, %v3899_v18  ;;  %v5897_v13 = vpop.permute.xlu1 %5896  ;;  %v4823_v26 = vsel %vm4818_vm10, %v4806_v37, %v5893_v50  ;;  %v4824_v38 = vsel %vm4818_vm10, %v4807_v21, %v5894_v20 }
 0x5aa   : > { %3936 = vst.msk [vmem:[#allocation3 + $0xe8] sm:$0xff] %vm3303_vm2, %v3898_v45  ;;  %v5899_v1 = vunpack.i.h.bf16 %v5897_v13  ;;  %v5898_v2 = vunpack.i.l.bf16 %v5897_v13  ;;  %6001 = vrot.lane.b32.xlu0 %v6000_v3, %s6202_s28 }
 0x5ac   : > { %v4840_v48 = vsel %vm4835_vm11, %v4823_v26, %v5898_v2  ;;  %v4841_v6 = vsel %vm4835_vm11, %v4824_v38, %v5899_v1  ;;  %v5513_v26 = vld [vmem:[%s6324_s19 + $0xc0] ss:$2 sm:$0xff] }
 0x5ad   : > { %v4857_v36 = vsel %vm4852_vm12, %v4840_v48, %v5903_v41  ;;  %v4858_v59 = vsel %vm4852_vm12, %v4841_v6, %v5904_v43  ;;  %v4314_v41 = vmul.f32 %v9806_v46, %v9631_v22  ;;  %v5514_v48 = vld [vmem:[%s6324_s19 + $0xd0] ss:$2 sm:$0xff]  ;;  %5685 = vmatprep.mubr.msk.f32.mxu0 %vm444_vm0, %v5513_v26 }
 0x5ae   : > { %5027 = vmatmul.mubr.f32.gmra.mrb[8].mxu1 %v4857_v36  ;;  %5686 = vmatmul.mubr.msk.f32.gmra.mrb[44].mxu0 %vm444_vm0, %v5514_v48 }
 0x5af   : > { %5491 = vmatprep.mubr.msk.f32.mxu1 %vm3303_vm2, %v9554_v4 }
 0x5b1   : > { %v4099_v53 = vld [vmem:[#allocation3 + $0xe7] ss:$2 sm:$0xff]  ;;  %v5907_v7 = vpop.permute.xlu1 %5906  ;;  %v4166_v19 = vld [vmem:[#allocation3 + $0xe8] ss:$2 sm:$0xff] }
 0x5b2   : > { %5032 = vmatmul.mubr.f32.gmra.mrb[10].mxu1 %v4858_v59  ;;  %v4116_v9 = vmul.f32 %v4099_v53, %v9624_v0  ;;  %v9804_v29 = vld [vmem:[#allocation3 + $0xe9] ss:$2 sm:$0xff]  ;;  %v5908_v14 = vunpack.i.l.bf16 %v5907_v7  ;;  %v5909_v18 = vunpack.i.h.bf16 %v5907_v7  ;;  %v4133_v6 = vmul.f32 %v4099_v53, %v9616_v15 }
 0x5b3   : > { %5492 = vmatprep.mubr.msk.f32.mxu1 %vm3303_vm2, %v9573_v63  ;;  %v3955_v63 = vld [vmem:[#allocation3 + $0x67] ss:$2 sm:$0xff]  ;;  %v4315_v3 = vmul.f32 %v9804_v29, %v9639_v5 }
 0x5b4   : > { %v6010_v16 = vpack.i.bf16 %v4116_v9, %v4115_v61  ;;  %v4076_v30 = vmul.f32 %v9566_v57, %v3955_v63 }
 0x5b5   : > { %v5917_v56 = vpop.permute.xlu1 %5916  ;;  %v6040_v9 = vpack.i.bf16 %v4315_v3, %v4314_v41 }
 0x5b6   : > { %6011 = vrot.lane.b32.xlu0 %v6010_v16, %s6192_s16  ;;  %v4760_v1 = vsel %vm3303_vm2, %v4076_v30, %v5908_v14  ;;  %v5918_v43 = vunpack.i.l.bf16 %v5917_v56  ;;  %v4198_v30 = vld [vmem:[#allocation3 + $0xc9] ss:$2 sm:$0xff] }
 0x5b8   : > { %v5661_v34 = vpop.f32.mrb[28].mxu0 }
 0x5b9   : > { %v3859_v60 = vadd.f32 %v9771_v32, %v5661_v34  ;;  %v3853_v17 = vpop.f32.mrb[29].mxu0 }
 0x5ba   : > { %v3854_v4 = vadd.f32 %v9771_v32, %v3853_v17  ;;  %6021 = vrot.lane.b32.xlu0 %v9742_v11, %s10668_s0  ;;  %v4077_v11 = vmul.f32 %v9569_v12, %v3957_v31 }
 0x5bb   : > { %v3901_v24 = vmax.f32 %v3859_v60, 0.0 }
 0x5bc   : > { %v3900_v8 = vmax.f32 %v3854_v4, 0.0  ;;  %v4200_v4 = vld [vmem:[#allocation3 + $0xd9] ss:$2 sm:$0xff] }
 0x5bd   : > { %3939 = vst.msk [vmem:[#allocation3 + $0x100] sm:$0xff] %vm3303_vm2, %v3901_v24  ;;  %v5919_v24 = vunpack.i.h.bf16 %v5917_v56 }
 0x5be   : > { %3938 = vst.msk [vmem:[#allocation3 + $0xf8] sm:$0xff] %vm3303_vm2, %v3900_v8 }
 0x5c3   : > { %v5927_v50 = vpop.permute.xlu1 %5926 }
 0x5c4   : > { %v5928_v63 = vunpack.i.l.bf16 %v5927_v50  ;;  %v5929_v3 = vunpack.i.h.bf16 %v5927_v50 }
 0x5c5   : > { %v5912_v27 = vpop.permute.xlu0 %5911  ;;  %v5664_v44 = vpop.f32.mrb[30].mxu0  ;;  %v9810_v37 = vld [vmem:[#allocation3 + $0xf8] ss:$2 sm:$0xff]  ;;  %v9812_v45 = vld [vmem:[#allocation3 + $0xf7] ss:$2 sm:$0xff] }
 0x5c6   : > { %v5914_v33 = vunpack.i.h.bf16 %v5912_v27  ;;  %v5913_v13 = vunpack.i.l.bf16 %v5912_v27  ;;  %v3869_v21 = vadd.f32 %v9771_v32, %v5664_v44  ;;  %v3863_v57 = vpop.f32.mrb[31].mxu0  ;;  %v9818_v12 = vpack.i.bf16 %v9810_v37, %v4166_v19 }
 0x5c7   : > { %v3864_v2 = vadd.f32 %v9771_v32, %v3863_v57  ;;  %v4134_v20 = vmul.f32 %v9812_v45, %v9624_v0  ;;  %v4761_v32 = vsel %vm3303_vm2, %v4077_v11, %v5909_v18  ;;  %v5937_v7 = vpop.permute.xlu1 %5936  ;;  %v4282_v11 = vmul.f32 %v9639_v5, %v4200_v4 }
 0x5c8   : > { %v4776_v36 = vsel %vm3369_vm4, %v4760_v1, %v5913_v13  ;;  %v3903_v38 = vmax.f32 %v3869_v21, 0.0  ;;  %6031 = vrot.lane.b32.xlu0 %v9818_v12, %s10669_s18  ;;  %v4777_v16 = vsel %vm3369_vm4, %v4761_v32, %v5914_v33  ;;  %v6025_v44 = vpack.i.bf16 %v4166_v19, %v9737_v10 }
 0x5c9   : > { %v3902_v59 = vmax.f32 %v3864_v2, 0.0  ;;  %v5922_v61 = vpop.permute.xlu0 %5921  ;;  %v6015_v17 = vpack.i.bf16 %v4134_v20, %v4133_v6  ;;  %v4792_v53 = vsel %vm3435_vm6, %v4776_v36, %v5918_v43  ;;  %v4793_v31 = vsel %vm3435_vm6, %v4777_v16, %v5919_v24 }
 0x5ca   : > { %3941 = vst.msk [vmem:[#allocation3 + $0x110] sm:$0xff] %vm3303_vm2, %v3903_v38  ;;  %v5924_v34 = vunpack.i.h.bf16 %v5922_v61  ;;  %v5923_v60 = vunpack.i.l.bf16 %v5922_v61  ;;  %v5938_v33 = vunpack.i.l.bf16 %v5937_v7  ;;  %v4281_v57 = vmul.f32 %v9631_v22, %v4198_v30 }
 0x5cb   : > { %3940 = vst.msk [vmem:[#allocation3 + $0x108] sm:$0xff] %vm3303_vm2, %v3902_v59  ;;  %6016 = vrot.lane.b32.xlu1 %v6015_v17, %s6194_s30  ;;  %v5939_v50 = vunpack.i.h.bf16 %v5937_v7  ;;  %v4117_v36 = vmul.f32 %v9812_v45, %v9633_v51  ;;  %v4202_v45 = vld [vmem:[#allocation3 + $0xe9] ss:$2 sm:$0xff] }
 0x5cc   : > { %v4808_v8 = vsel %vm3501_vm8, %v4792_v53, %v5923_v60  ;;  %6041 = vrot.lane.b32.xlu0 %v6040_v9, %s6201_s17  ;;  %v4809_v56 = vsel %vm3501_vm8, %v4793_v31, %v5924_v34  ;;  %v6035_v41 = vpack.i.bf16 %v4282_v11, %v4281_v57  ;;  %v4283_v61 = vmul.f32 %v9645_v35, %v4202_v45  ;;  %v9871_v9 = vpop.f32.mrb[32].mxu0  ;;  %v4172_v34 = vld [vmem:[#allocation3 + $0x118] ss:$2 sm:$0xff]  ;;  %v3959_v53 = vld [vmem:[#allocation3 + $0x87] ss:$2 sm:$0xff] }
 0x5cd   : > { %v5932_v14 = vpop.permute.xlu0 %5931  ;;  %v4825_v13 = vsel %vm4818_vm10, %v4808_v8, %v5928_v63  ;;  %v4826_v2 = vsel %vm4818_vm10, %v4809_v56, %v5929_v3  ;;  %v9873_v16 = vpop.f32.mrb[33].mxu0  ;;  %v3961_v63 = vld [vmem:[#allocation3 + $0x97] ss:$2 sm:$0xff] }
 0x5ce   : > { %v5934_v18 = vunpack.i.h.bf16 %v5932_v14  ;;  %v5933_v27 = vunpack.i.l.bf16 %v5932_v14  ;;  %v4078_v14 = vmul.f32 %v9577_v49, %v3959_v53  ;;  %v4079_v3 = vmul.f32 %v9583_v58, %v3961_v63  ;;  %v3965_v63 = vld [vmem:[#allocation3 + $0xb7] ss:$2 sm:$0xff] }
 0x5cf   : > { %6026 = vrot.lane.b32.xlu1 %v6025_v44, %s10667_s29 }
 0x5d0   : > { %v4842_v21 = vsel %vm4835_vm11, %v4825_v13, %v5933_v27  ;;  %v4843_v26 = vsel %vm4835_vm11, %v4826_v2, %v5934_v18 }
 0x5d1   : > { %v4859_v1 = vsel %vm4852_vm12, %v4842_v21, %v5938_v33  ;;  %v4120_v20 = vld [vmem:[#allocation3 + $0x117] ss:$2 sm:$0xff]  ;;  %v4860_v6 = vsel %vm4852_vm12, %v4843_v26, %v5939_v50 }
 0x5d2   : > { %5037 = vmatmul.mubr.f32.gmra.mrb[12].mxu1 %v4859_v1  ;;  %v4102_v10 = vld [vmem:[#allocation3 + $0x107] ss:$2 sm:$0xff]  ;;  %v4136_v19 = vmul.f32 %v4120_v20, %v9641_v47  ;;  %v4170_v59 = vld [vmem:[#allocation3 + $0x108] ss:$2 sm:$0xff] }
 0x5d3   : > { %5493 = vmatprep.mubr.msk.f32.mxu1 %vm3303_vm2, %v9597_v55  ;;  %v4135_v48 = vmul.f32 %v4102_v10, %v9633_v51  ;;  %v4118_v38 = vmul.f32 %v4102_v10, %v9641_v47  ;;  %6036 = vrot.lane.b32.xlu1 %v6035_v41, %s6202_s28  ;;  %v6060_v55 = vpack.i.bf16 %v4170_v59, %v9810_v37  ;;  %v9881_v60 = vld [vmem:[#allocation3 + $0x109] ss:$2 sm:$0xff] }
 0x5d4   : > { %v4317_v4 = vmul.f32 %v9881_v60, %v9647_v62 }
 0x5d5   : > { %v6050_v32 = vpack.i.bf16 %v4136_v19, %v4135_v48  ;;  %v6045_v43 = vpack.i.bf16 %v4118_v38, %v4117_v36 }
 0x5d6   : > { %5042 = vmatmul.mubr.f32.gmra.mrb[14].mxu1 %v4860_v6 }
 0x5d7   : > { %5494 = vmatprep.mubr.msk.f32.mxu1 %vm3303_vm2, %v9629_v39  ;;  %6051 = vrot.lane.b32.xlu0 %v6050_v32, %s6194_s30  ;;  %v9876_v39 = vld [vmem:[#allocation3 + $0xf9] ss:$2 sm:$0xff] }
 0x5d8   : > { %6046 = vrot.lane.b32.xlu1 %v6045_v43, %s6192_s16  ;;  %v4316_v37 = vmul.f32 %v9876_v39, %v9645_v35  ;;  %v9890_v31 = vpop.f32.mrb[34].mxu0 }
 0x5d9   : > { %v5942_v17 = vpop.permute.xlu0 %5941  ;;  %v9893_v56 = vpop.f32.mrb[35].mxu0 }
 0x5da   : > { %v5943_v8 = vunpack.i.l.bf16 %v5942_v17  ;;  %v5944_v30 = vunpack.i.h.bf16 %v5942_v17 }
 0x5db   : > { %6061 = vrot.lane.b32.xlu0 %v6060_v55, %s10667_s29 }
 0x5dc   : > { %6056 = vrot.lane.b32.xlu1 %v9818_v12, %s10668_s0  ;;  %v4204_v12 = vld [vmem:[#allocation3 + $0xf9] ss:$2 sm:$0xff]  ;;  %v4762_v33 = vsel %vm3303_vm2, %v4078_v14, %v5943_v8  ;;  %v4763_v21 = vsel %vm3303_vm2, %v4079_v3, %v5944_v30 }
 0x5dd   : > { %v4284_v24 = vmul.f32 %v9647_v62, %v4204_v12  ;;  %v5952_v7 = vpop.permute.xlu0 %5951 }
 0x5de   : > { %v5953_v57 = vunpack.i.l.bf16 %v5952_v7  ;;  %v5954_v41 = vunpack.i.h.bf16 %v5952_v7 }
 0x5df   : > { %4670 = vrot.lane.b32.xlu0 %v4283_v61, %s6202_s28  ;;  %v4329_v61 = vmul.f32 %v9733_v52, %v9613_v28  ;;  %v3963_v52 = vld [vmem:[#allocation3 + $0xa7] ss:$2 sm:$0xff] }
 0x5e0   : > { %4606 = vrot.lane.b32.xlu1 %v4170_v59, %s10669_s18  ;;  %v4080_v14 = vmul.f32 %v9587_v42, %v3963_v52 }
 0x5e3   : > { %4608 = vrot.lane.b32.xlu0 %v4172_v34, %s10669_s18  ;;  %s5540_s18 = sshll.u32 %s6291_s25, 8  ;;  %s6203_s25 = smov [#allocation4]  }
 0x5e4   : > { %4734 = vrot.lane.b32.xlu1 %v4316_v37, %s6201_s17  ;;  %s10053_s16 = scalar_lea.hbm %s10109_s12, %s5540_s18  ;;  %s6126_s29 = sshll.u32 %s6203_s25, 4  ;;  %s6127_s29 = int_to_ptr.vmem [resolvable:$false] %s6126_s29 }
 0x5e7   : > { %4736 = vrot.lane.b32.xlu0 %v4317_v4, %s6201_s17  ;;  %v4330_v4 = vmul.f32 %v9731_v25, %v9620_v40  ;;  %v4081_v40 = vmul.f32 %v9606_v54, %v3965_v63 }
 0x5e8   : > { %4672 = vrot.lane.b32.xlu1 %v4284_v24, %s6202_s28  ;;  %v9916_v24 = vpop.f32.mrb[36].mxu0 }
 0x5e9   : > { %v9918_v53 = vpop.f32.mrb[37].mxu0 }
 0x5ea   : > { %v5962_v18 = vpop.permute.xlu0 %5961 }
 0x5eb   : > { %v5963_v50 = vunpack.i.l.bf16 %v5962_v18  ;;  %v5964_v32 = vunpack.i.h.bf16 %v5962_v18 }
 0x5ec   : > { %v5947_v11 = vpop.permute.xlu1 %5946 }
 0x5ed   : > { %v5949_v27 = vunpack.i.h.bf16 %v5947_v11  ;;  %v5948_v44 = vunpack.i.l.bf16 %v5947_v11 }
 0x5ee   : > { %v5972_v10 = vpop.permute.xlu0 %5971 }
 0x5ef   : > { %v4778_v13 = vsel %vm3369_vm4, %v4762_v33, %v5948_v44  ;;  %v4779_v2 = vsel %vm3369_vm4, %v4763_v21, %v5949_v27  ;;  %v5973_v43 = vunpack.i.l.bf16 %v5972_v10  ;;  %v5974_v17 = vunpack.i.h.bf16 %v5972_v10 }
 0x5f0   : > { %v5957_v1 = vpop.permute.xlu1 %5956  ;;  %v4794_v26 = vsel %vm3435_vm6, %v4778_v13, %v5953_v57  ;;  %v4795_v58 = vsel %vm3435_vm6, %v4779_v2, %v5954_v41 }
 0x5f1   : > { %v5959_v49 = vunpack.i.h.bf16 %v5957_v1  ;;  %v5958_v20 = vunpack.i.l.bf16 %v5957_v1 }
 0x5f3   : > { %v4810_v19 = vsel %vm3501_vm8, %v4794_v26, %v5958_v20  ;;  %v4811_v36 = vsel %vm3501_vm8, %v4795_v58, %v5959_v49 }
 0x5f4   : > { %v5967_v48 = vpop.permute.xlu1 %5966  ;;  %v4827_v59 = vsel %vm4818_vm10, %v4810_v19, %v5963_v50  ;;  %v4828_v34 = vsel %vm4818_vm10, %v4811_v36, %v5964_v32 }
 0x5f5   : > { %v5969_v38 = vunpack.i.h.bf16 %v5967_v48  ;;  %v5968_v6 = vunpack.i.l.bf16 %v5967_v48 }
 0x5f7   : > { %v4844_v55 = vsel %vm4835_vm11, %v4827_v59, %v5968_v6  ;;  %v4845_v37 = vsel %vm4835_vm11, %v4828_v34, %v5969_v38  ;;  %v4332_v34 = vmul.f32 %v9804_v29, %v9631_v22 }
 0x5f8   : > { %v4861_v45 = vsel %vm4852_vm12, %v4844_v55, %v5973_v43  ;;  %v4862_v12 = vsel %vm4852_vm12, %v4845_v37, %v5974_v17  ;;  %v4331_v43 = vmul.f32 %v9806_v46, %v9622_v23  ;;  %v3967_v46 = vld [vmem:[#allocation3 + $0xc7] ss:$2 sm:$0xff] }
 0x5f9   : > { %5047 = vmatmul.mubr.f32.gmra.mrb[16].mxu1 %v4861_v45  ;;  %v4082_v52 = vmul.f32 %v9616_v15, %v3967_v46 }
 0x5fa   : > { %5495 = vmatprep.mubr.msk.f32.mxu1 %vm3303_vm2, %v4329_v61 }
 0x5fd   : > { %5052 = vmatmul.mubr.f32.gmra.mrb[18].mxu1 %v4862_v12 }
 0x5fe   : > { %5496 = vmatprep.mubr.msk.f32.mxu1 %vm3303_vm2, %v4330_v4 }
 0x600   : > { %v5977_v28 = vpop.permute.xlu1 %5976 }
 0x601   : > { %v5978_v8 = vunpack.i.l.bf16 %v5977_v28  ;;  %v5979_v30 = vunpack.i.h.bf16 %v5977_v28  ;;  %v9941_v37 = vpop.f32.mrb[38].mxu0  ;;  %v3969_v28 = vld [vmem:[#allocation3 + $0xd7] ss:$2 sm:$0xff] }
 0x602   : > { %v9944_v17 = vpop.f32.mrb[39].mxu0  ;;  %v4083_v22 = vmul.f32 %v9624_v0, %v3969_v28 }
 0x603   : > { %v4764_v25 = vsel %vm3303_vm2, %v4080_v14, %v5978_v8  ;;  %v4765_v33 = vsel %vm3303_vm2, %v4081_v40, %v5979_v30 }
 0x604   : > { %v5987_v7 = vpop.permute.xlu1 %5986 }
 0x605   : > { %v5988_v13 = vunpack.i.l.bf16 %v5987_v7  ;;  %v5989_v42 = vunpack.i.h.bf16 %v5987_v7 }
 0x612   : > { %v5997_v18 = vpop.permute.xlu1 %5996 }
 0x613   : > { %v5998_v26 = vunpack.i.l.bf16 %v5997_v18  ;;  %v5999_v48 = vunpack.i.h.bf16 %v5997_v18 }
 0x614   : > { %v5982_v11 = vpop.permute.xlu0 %5981 }
 0x615   : > { %v5984_v27 = vunpack.i.h.bf16 %v5982_v11  ;;  %v5983_v44 = vunpack.i.l.bf16 %v5982_v11 }
 0x616   : > { %v6007_v20 = vpop.permute.xlu1 %6006 }
 0x617   : > { %v4780_v3 = vsel %vm3369_vm4, %v4764_v25, %v5983_v44  ;;  %v4781_v57 = vsel %vm3369_vm4, %v4765_v33, %v5984_v27  ;;  %v6008_v36 = vunpack.i.l.bf16 %v6007_v20  ;;  %v6009_v45 = vunpack.i.h.bf16 %v6007_v20 }
 0x618   : > { %v5992_v21 = vpop.permute.xlu0 %5991  ;;  %v4796_v49 = vsel %vm3435_vm6, %v4780_v3, %v5988_v13  ;;  %v4797_v54 = vsel %vm3435_vm6, %v4781_v57, %v5989_v42 }
 0x619   : > { %v5994_v1 = vunpack.i.h.bf16 %v5992_v21  ;;  %v5993_v2 = vunpack.i.l.bf16 %v5992_v21 }
 0x61b   : > { %v4812_v41 = vsel %vm3501_vm8, %v4796_v49, %v5993_v2  ;;  %v4813_v19 = vsel %vm3501_vm8, %v4797_v54, %v5994_v1 }
 0x61c   : > { %v6002_v10 = vpop.permute.xlu0 %6001  ;;  %v4829_v38 = vsel %vm4818_vm10, %v4812_v41, %v5998_v26  ;;  %v4830_v59 = vsel %vm4818_vm10, %v4813_v19, %v5999_v48  ;;  %v3971_v26 = vld [vmem:[#allocation3 + $0xe7] ss:$2 sm:$0xff]  ;;  %v4333_v48 = vmul.f32 %v9876_v39, %v9639_v5 }
 0x61d   : > { %v6004_v50 = vunpack.i.h.bf16 %v6002_v10  ;;  %v6003_v58 = vunpack.i.l.bf16 %v6002_v10 }
 0x61f   : > { %v4846_v6 = vsel %vm4835_vm11, %v4829_v38, %v6003_v58  ;;  %v4847_v55 = vsel %vm4835_vm11, %v4830_v59, %v6004_v50  ;;  %v4084_v38 = vmul.f32 %v9633_v51, %v3971_v26  ;;  %v5516_v26 = vld [vmem:[%s6324_s19 + $0xf0] ss:$2 sm:$0xff] }
 0x620   : > { %v4863_v32 = vsel %vm4852_vm12, %v4846_v6, %v6008_v36  ;;  %v4864_v61 = vsel %vm4852_vm12, %v4847_v55, %v6009_v45  ;;  %v3973_v45 = vld [vmem:[#allocation3 + $0xf7] ss:$2 sm:$0xff] }
 0x621   : > { %5057 = vmatmul.mubr.f32.gmra.mrb[20].mxu1 %v4863_v32  ;;  %v4085_v28 = vmul.f32 %v9641_v47, %v3973_v45 }
 0x622   : > { %5497 = vmatprep.mubr.msk.f32.mxu1 %vm3303_vm2, %v4331_v43 }
 0x625   : > { %5062 = vmatmul.mubr.f32.gmra.mrb[22].mxu1 %v4864_v61 }
 0x626   : > { %5498 = vmatprep.mubr.msk.f32.mxu1 %vm3303_vm2, %v4332_v34 }
 0x628   : > { %v6012_v23 = vpop.permute.xlu0 %6011 }
 0x629   : > { %v6013_v4 = vunpack.i.l.bf16 %v6012_v23  ;;  %v6014_v7 = vunpack.i.h.bf16 %v6012_v23 }
 0x62b   : > { %v4766_v29 = vsel %vm3303_vm2, %v4082_v52, %v6013_v4  ;;  %v4767_v18 = vsel %vm3303_vm2, %v4083_v22, %v6014_v7  ;;  %v9964_v43 = vpop.f32.mrb[40].mxu0 }
 0x62c   : > { %v6022_v12 = vpop.permute.xlu0 %6021  ;;  %v9968_v23 = vpop.f32.mrb[41].mxu0 }
 0x62d   : > { %v6023_v27 = vunpack.i.l.bf16 %v6022_v12  ;;  %v6024_v15 = vunpack.i.h.bf16 %v6022_v12  ;;  %v4334_v12 = vmul.f32 %v9881_v60, %v9645_v35  ;;  %v4319_v60 = vld [vmem:[#allocation3 + $0x119] ss:$2 sm:$0xff] }
 0x63a   : > { %v6032_v63 = vpop.permute.xlu0 %6031 }
 0x63b   : > { %v6033_v57 = vunpack.i.l.bf16 %v6032_v63  ;;  %v6034_v20 = vunpack.i.h.bf16 %v6032_v63 }
 0x63d   : > { %v6017_v8 = vpop.permute.xlu1 %6016 }
 0x63e   : > { %v6019_v14 = vunpack.i.h.bf16 %v6017_v8  ;;  %v6018_v30 = vunpack.i.l.bf16 %v6017_v8  ;;  %v6042_v13 = vpop.permute.xlu0 %6041 }
 0x63f   : > { %v6043_v41 = vunpack.i.l.bf16 %v6042_v13  ;;  %v6044_v59 = vunpack.i.h.bf16 %v6042_v13 }
 0x640   : > { %v4782_v11 = vsel %vm3369_vm4, %v4766_v29, %v6018_v30  ;;  %v4783_v40 = vsel %vm3369_vm4, %v4767_v18, %v6019_v14 }
 0x641   : > { %v6027_v44 = vpop.permute.xlu1 %6026  ;;  %v4798_v33 = vsel %vm3435_vm6, %v4782_v11, %v6023_v27  ;;  %v4799_v0 = vsel %vm3435_vm6, %v4783_v40, %v6024_v15  ;;  %v9988_v15 = vld [vmem:[%s10106_s9] ss:$0 sm:$0xff] }
 0x642   : > { %v6029_v25 = vunpack.i.h.bf16 %v6027_v44  ;;  %v6028_v3 = vunpack.i.l.bf16 %v6027_v44 }
 0x644   : > { %v4814_v21 = vsel %vm3501_vm8, %v4798_v33, %v6028_v3  ;;  %v4815_v2 = vsel %vm3501_vm8, %v4799_v0, %v6029_v25  ;;  %v4335_v25 = vmul.f32 %v4319_v60, %v9647_v62  ;;  %v9996_v62 = vld [vmem:[%s10104_s7] ss:$0 sm:$0xff] }
 0x645   : > { %v6037_v1 = vpop.permute.xlu1 %6036  ;;  %v4831_v54 = vsel %vm4818_vm10, %v4814_v21, %v6033_v57  ;;  %v4832_v36 = vsel %vm4818_vm10, %v4815_v2, %v6034_v20  ;;  %v5515_v2 = vld [vmem:[%s6324_s19 + $0xe0] ss:$2 sm:$0xff]  ;;  %s404_s19 = sand.u32 1, %s6176_s22  }
 0x646   : > { %v6039_v42 = vunpack.i.h.bf16 %v6037_v1  ;;  %v6038_v49 = vunpack.i.l.bf16 %v6037_v1  ;;  %v5241_v1 = vadd.f32 %v9988_v15, %v9873_v16  ;;  %s5449_s17 = sshll.u32 %s404_s19, 4  ;;  %s10055_s30 = scalar_lea.sflag [#allocation5], %s404_s19 }
 0x647   : > { %s406_s28 = scalar_lea.vmem [#allocation4], %s5449_s17  ;;  %s6128_s17 = scalar_lea.vmem %s6127_s29, 512 }
 0x648   : > { %v4848_v19 = vsel %vm4835_vm11, %v4831_v54, %v6038_v49  ;;  %v4849_v32 = vsel %vm4835_vm11, %v4832_v36, %v6039_v42  ;;  %v5246_v54 = vadd.f32 %v9871_v9, %v9988_v15  ;;  %v5256_v9 = vadd.f32 %v9890_v31, %v9988_v15  ;;  %s5383_s0 = sshll.u32 %s406_s28, 4  ;;  %s10048_s0 = int_to_ptr.vmem [resolvable:$true] %s5383_s0 }
 0x649   : > { %v6052_v10 = vpop.permute.xlu0 %6051  ;;  %v4865_v58 = vsel %vm4852_vm12, %v4848_v19, %v6043_v41  ;;  %v4866_v51 = vsel %vm4852_vm12, %v4849_v32, %v6044_v59  ;;  %v5266_v31 = vadd.f32 %v9916_v24, %v9988_v15  ;;  %v5276_v24 = vadd.f32 %v9941_v37, %v9988_v15  ;;  %s6122_s15 = scalar_lea.vmem %s10048_s0, 256  ;;  %p6129_p0 = scmp.lt.s32.totalorder %s10048_s0, %s6127_s29 }
 0x64a   : > { %v6047_v50 = vpop.permute.xlu1 %6046  ;;  %5067 = vmatmul.mubr.f32.gmra.mrb[24].mxu1 %v4865_v58  ;;  %v6053_v55 = vunpack.i.l.bf16 %v6052_v10  ;;  %v6054_v7 = vunpack.i.h.bf16 %v6052_v10  ;;  %p6123_p11 = scmp.ne.s32.totalorder %s10048_s0, %s6122_s15  ;;  %p6130_p1 = scmp.lt.s32.totalorder %s6128_s17, %s6122_s15 }
 0x64b   : > { %v6048_v6 = vunpack.i.l.bf16 %v6047_v50  ;;  %5499 = vmatprep.mubr.msk.f32.mxu1 %vm3303_vm2, %v4333_v48  ;;  %v6049_v5 = vunpack.i.h.bf16 %v6047_v50  ;;  %v5251_v48 = vadd.f32 %v9988_v15, %v9893_v56  ;;  %v5261_v56 = vadd.f32 %v9988_v15, %v9918_v53 }
 0x64c   : > { %v5271_v53 = vadd.f32 %v9988_v15, %v9944_v17  ;;  %p6124_p12 = pnand %p6123_p11, %p6308_p5  ;;  %p6131_p2 = por %p6130_p1, %p6129_p0 }
 0x64d   : > { %v4768_v61 = vsel %vm3303_vm2, %v4084_v38, %v6048_v6  ;;  %v6062_v34 = vpop.permute.xlu0 %6061  ;;  %v4769_v14 = vsel %vm3303_vm2, %v4085_v28, %v6049_v5 }
 0x64e   : > { %v6057_v39 = vpop.permute.xlu1 %6056  ;;  %v6063_v46 = vunpack.i.l.bf16 %v6062_v34  ;;  %5072 = vmatmul.mubr.f32.gmra.mrb[26].mxu1 %v4866_v51  ;;  %v4784_v52 = vsel %vm3369_vm4, %v4768_v61, %v6053_v55  ;;  %v4785_v11 = vsel %vm3369_vm4, %v4769_v14, %v6054_v7  ;;  %v6064_v47 = vunpack.i.h.bf16 %v6062_v34  ;;  %p6125_p13 = pneg %p6124_p12 }
 0x64f   : > { %v6058_v4 = vunpack.i.l.bf16 %v6057_v39  ;;  %5500 = vmatprep.mubr.msk.f32.mxu1 %vm3303_vm2, %v4334_v12  ;;  %v6059_v30 = vunpack.i.h.bf16 %v6057_v39 }
 0x650   : > { %p6132_p3 = pnand %p6131_p2, %p6125_p13 }
 0x651   : > { %v4800_v8 = vsel %vm3435_vm6, %v4784_v52, %v6058_v4  ;;  %v4671_v63 = vpop.permute.xlu0 %4670  ;;  %v4801_v40 = vsel %vm3435_vm6, %v4785_v11, %v6059_v30 }
 0x652   : > { %v4607_v22 = vpop.permute.xlu1 %4606  ;;  %v4816_v29 = vsel %vm3501_vm8, %v4800_v8, %v6063_v46  ;;  %v4817_v33 = vsel %vm3501_vm8, %v4801_v40, %v6064_v47  ;;  %v5286_v40 = vadd.f32 %v9964_v43, %v9988_v15 }
 0x653   : > { %v4833_v35 = vsel %vm4818_vm10, %v4816_v29, %v4607_v22 }
 0x654   : > { %v4850_v27 = vsel %vm4835_vm11, %v4833_v35, %v4671_v63 }
 0x655   : > { %v4609_v18 = vpop.permute.xlu0 %4608 }
 0x656   : > { %v4735_v44 = vpop.permute.xlu1 %4734  ;;  %v4834_v21 = vsel %vm4818_vm10, %v4817_v33, %v4609_v18  ;;  %v5281_v18 = vadd.f32 %v9988_v15, %v9968_v23 }
 0x657   : > { %v4867_v3 = vsel %vm4852_vm12, %v4850_v27, %v4735_v44 }
 0x658   : > { %5077 = vmatmul.mubr.f32.gmra.mrb[28].mxu1 %v4867_v3 }
 0x659   : > { %5501 = vmatprep.mubr.msk.f32.mxu1 %vm3303_vm2, %v4335_v25  ;;  %v4737_v13 = vpop.permute.xlu0 %4736 }
 0x65a   : > { %v4673_v57 = vpop.permute.xlu1 %4672 }
 0x65b   : > { %v4851_v0 = vsel %vm4835_vm11, %v4834_v21, %v4673_v57  ;;  %v5008_v42 = vpop.f32.mrb[0].mxu1 }
 0x65c   : > { %v4868_v49 = vsel %vm4852_vm12, %v4851_v0, %v4737_v13  ;;  %v5009_v20 = vadd.f32 %v9996_v62, %v5008_v42  ;;  %v5010_v41 = vpop.f32.mrb[1].mxu1 }
 0x65d   : > { %5082 = vmatmul.mubr.f32.gmra.mrb[30].mxu1 %v4868_v49 }
 0x65e   : > { %5688 = vmatprep.mubr.msk.f32.mxu1 %vm444_vm0, %v5515_v2  ;;  %v5319_v10 = vadd.f32 %v5241_v1, %v5009_v20 }
 0x65f   : > { %v5013_v19 = vpop.f32.mrb[2].mxu1 }
 0x660   : > { %v5014_v50 = vadd.f32 %v9996_v62, %v5013_v19  ;;  %v5015_v58 = vpop.f32.mrb[3].mxu1  ;;  %5335 = vxpose.xlu1.b32.start [1/16] (narrow) %v5319_v10, 16 }
 0x661   : > { %5689 = vmatmul.mubr.msk.f32.vlgmr.msra.gmra.mrb[32].mxu1 %vm444_vm0, %v5516_v26 }
 0x662   : > { %v5320_v16 = vadd.f32 %v5246_v54, %v5014_v50 }
 0x664   : > { %5336 = vxpose.xlu1.b32.cont [2/16] (narrow) %v5320_v16, 16 }
 0x66a   : > { %v5018_v36 = vpop.f32.mrb[4].mxu1 }
 0x66b   : > { %v5019_v38 = vadd.f32 %v9996_v62, %v5018_v36  ;;  %v5020_v6 = vpop.f32.mrb[5].mxu1 }
 0x66d   : > { %v5321_v32 = vadd.f32 %v5251_v48, %v5019_v38 }
 0x66e   : > { %v5023_v59 = vpop.f32.mrb[6].mxu1 }
 0x66f   : > { %v5024_v55 = vadd.f32 %v9996_v62, %v5023_v59  ;;  %v5025_v45 = vpop.f32.mrb[7].mxu1  ;;  %5337 = vxpose.xlu1.b32.cont [3/16] (narrow) %v5321_v32, 16 }
 0x670   : > { %v5684_v34 = vpop.f32.mrb[42].mxu0 }
 0x671   : > { %v5322_v61 = vadd.f32 %v5256_v9, %v5024_v55  ;;  %v5290_v5 = vpop.f32.mrb[43].mxu0  ;;  %v5296_v1 = vadd.f32 %v5684_v34, %v9988_v15 }
 0x672   : > { %v5291_v21 = vadd.f32 %v9988_v15, %v5290_v5 }
 0x673   : > { %5338 = vxpose.xlu1.b32.cont [4/16] (narrow) %v5322_v61, 16 }
 0x681   : > { %v5028_v39 = vpop.f32.mrb[8].mxu1  ;;  %v5687_v8 = vpop.f32.mrb[44].mxu0 }
 0x682   : > { %v5029_v46 = vadd.f32 %v9996_v62, %v5028_v39  ;;  %v5030_v51 = vpop.f32.mrb[9].mxu1  ;;  %v5300_v63 = vpop.f32.mrb[45].mxu0  ;;  %v5306_v19 = vadd.f32 %v5687_v8, %v9988_v15 }
 0x683   : > { %v5301_v41 = vadd.f32 %v9988_v15, %v5300_v63 }
 0x684   : > { %v5323_v12 = vadd.f32 %v5261_v56, %v5029_v46 }
 0x685   : > { %v5033_v4 = vpop.f32.mrb[10].mxu1 }
 0x686   : > { %v5034_v28 = vadd.f32 %v9996_v62, %v5033_v4  ;;  %v5035_v52 = vpop.f32.mrb[11].mxu1  ;;  %5339 = vxpose.xlu1.b32.cont [5/16] (narrow) %v5323_v12, 16 }
 0x688   : > { %v5324_v7 = vadd.f32 %v5266_v31, %v5034_v28 }
 0x68a   : > { %5340 = vxpose.xlu1.b32.cont [6/16] (narrow) %v5324_v7, 16 }
 0x6a5   : > { %v5038_v14 = vpop.f32.mrb[12].mxu1 }
 0x6a6   : > { %v5039_v30 = vadd.f32 %v9996_v62, %v5038_v14  ;;  %v5040_v22 = vpop.f32.mrb[13].mxu1 }
 0x6a8   : > { %v5325_v29 = vadd.f32 %v5271_v53, %v5039_v30 }
 0x6a9   : > { %v5043_v35 = vpop.f32.mrb[14].mxu1 }
 0x6aa   : > { %v5044_v60 = vadd.f32 %v9996_v62, %v5043_v35  ;;  %v5045_v11 = vpop.f32.mrb[15].mxu1  ;;  %5341 = vxpose.xlu1.b32.cont [7/16] (narrow) %v5325_v29, 16 }
 0x6ac   : > { %v5326_v47 = vadd.f32 %v5276_v24, %v5044_v60 }
 0x6ae   : > { %5342 = vxpose.xlu1.b32.cont [8/16] (narrow) %v5326_v47, 16 }
 0x6cc   : > { %v5048_v27 = vpop.f32.mrb[16].mxu1 }
 0x6cd   : > { %v5049_v17 = vadd.f32 %v9996_v62, %v5048_v27  ;;  %v5050_v44 = vpop.f32.mrb[17].mxu1 }
 0x6cf   : > { %v5327_v25 = vadd.f32 %v5281_v18, %v5049_v17 }
 0x6d0   : > { %v5053_v37 = vpop.f32.mrb[18].mxu1 }
 0x6d1   : > { %v5054_v3 = vadd.f32 %v9996_v62, %v5053_v37  ;;  %v5055_v33 = vpop.f32.mrb[19].mxu1  ;;  %5343 = vxpose.xlu1.b32.cont [9/16] (narrow) %v5327_v25, 16 }
 0x6d3   : > { %v5328_v13 = vadd.f32 %v5286_v40, %v5054_v3 }
 0x6d5   : > { %5344 = vxpose.xlu1.b32.cont [10/16] (narrow) %v5328_v13, 16 }
 0x6f4   : > { %v5058_v57 = vpop.f32.mrb[20].mxu1 }
 0x6f5   : > { %v5059_v23 = vadd.f32 %v9996_v62, %v5058_v57  ;;  %v5060_v0 = vpop.f32.mrb[21].mxu1 }
 0x6f7   : > { %v5329_v2 = vadd.f32 %v5291_v21, %v5059_v23 }
 0x6f8   : > { %v5063_v42 = vpop.f32.mrb[22].mxu1 }
 0x6f9   : > { %v5064_v43 = vadd.f32 %v9996_v62, %v5063_v42  ;;  %v5065_v49 = vpop.f32.mrb[23].mxu1  ;;  %5345 = vxpose.xlu1.b32.cont [11/16] (narrow) %v5329_v2, 16 }
 0x6fb   : > { %v5330_v20 = vadd.f32 %v5296_v1, %v5064_v43 }
 0x6fd   : > { %5346 = vxpose.xlu1.b32.cont [12/16] (narrow) %v5330_v20, 16 }
 0x71d   : > { %v5068_v26 = vpop.f32.mrb[24].mxu1 }
 0x71e   : > { %v5069_v54 = vadd.f32 %v9996_v62, %v5068_v26  ;;  %v5070_v10 = vpop.f32.mrb[25].mxu1 }
 0x720   : > { %v5331_v50 = vadd.f32 %v5301_v41, %v5069_v54 }
 0x721   : > { %v5073_v58 = vpop.f32.mrb[26].mxu1 }
 0x722   : > { %v5074_v16 = vadd.f32 %v9996_v62, %v5073_v58  ;;  %v5075_v48 = vpop.f32.mrb[27].mxu1  ;;  %5347 = vxpose.xlu1.b32.cont [13/16] (narrow) %v5331_v50, 16 }
 0x724   : > { %v5332_v36 = vadd.f32 %v5306_v19, %v5074_v16 }
 0x726   : > { %5348 = vxpose.xlu1.b32.cont [14/16] (narrow) %v5332_v36, 16 }
 0x72b   : > { %v5078_v38 = vpop.f32.mrb[28].mxu1 }
 0x72c   : > { %v5080_v6 = vpop.f32.mrb[29].mxu1  ;;  %v5079_v34 = vadd.f32 %v9996_v62, %v5078_v38 }
 0x730   : > { %v5083_v9 = vpop.f32.mrb[30].mxu1 }
 0x731   : > { %v5085_v32 = vpop.f32.mrb[31].mxu1  ;;  %v5084_v55 = vadd.f32 %v9996_v62, %v5083_v9 }
 0x734   : > { %v5690_v59 = vpop.f32.mrb[32].mxu1 }
 0x735   : > { %v5316_v45 = vadd.f32 %v5690_v59, %v9988_v15  ;;  %v5310_v61 = vpop.f32.mrb[33].mxu1 }
 0x736   : > { %v5311_v5 = vadd.f32 %v9988_v15, %v5310_v61 }
 0x737   : > { %v5334_v56 = vadd.f32 %v5316_v45, %v5084_v55 }
 0x738   : > { %v5333_v39 = vadd.f32 %v5311_v5, %v5079_v34 }
 0x73a   : > { %5349 = vxpose.xlu1.b32.cont [15/16] (narrow) %v5333_v39, 16 }
 0x73e   : > { %5350 = vxpose.xlu1.b32.end [16/16] (narrow) %v5334_v56, 16 }
 0x782   : > { %v5351_v46 = vpop.trf.xlu1 }
 0x783   : > { %5367 = vst [vmem:[%s406_s28] sm:$0xff] %v5351_v46 }
 0x786   : > { %v5352_v15 = vpop.trf.xlu1 }
 0x787   : > { %5368 = vst [vmem:[%s406_s28 + $0x8] sm:$0xff] %v5352_v15 }
 0x788   : > { %6135 = shalt.err (!%p6132_p3)
}
 0x789   : > { %s6136_s19 = scalar_lea.hbm %s10053_s16, 256  ;;  %s6140_s26 = scalar_lea.hbm %s10109_s12, 512 }
 0x78a   : > { %p6137_p4 = scmp.ne.s32.totalorder %s10053_s16, %s6136_s19  ;;  %p6141_p9 = scmp.lt.u32.totalorder %s10053_s16, %s10109_s12 }
 0x78b   : > { %p6142_p10 = scmp.lt.u32.totalorder %s6140_s26, %s6136_s19  ;;  %p6144_p12 = scmp.lt.u32.totalorder %s6136_s19, %s10053_s16 }
 0x78c   : > { %p6138_p7 = pnand %p6137_p4, %p6308_p5 }
 0x78d   : > { %p6143_p11 = por %p6142_p10, %p6141_p9 }
 0x78e   : > { %p6139_p8 = pneg %p6138_p7 }
 0x78f   : > { %p6145_p13 = por %p6144_p12, %p6143_p11 }
 0x791   : > { %p6146_p0 = pnand %p6145_p13, %p6139_p8 }
 0x793   : > { %6149 = shalt.err (!%p6146_p0)
}
 0x794   : > { %s6204_s15 = smov 128   ;;  %s10670_s29 = smov 8  }
 0x795   : > { %5736 = dma.vmem_to_hbm [thread:$0]  (%p6308_p5), %s10048_s0, 256, %s10053_s16, %s10055_s30, %s6204_s15, %s6204_s15, %s10670_s29  }
 0x796 PF: > { %p5742_p1 = scmp.ge.s32.totalorder %s6184_s24, 2  ;;  %s5398_s17 = sand.u32 1, %s6172_s21  }
 0x797   : > { %s5399_s19 = scalar_lea.sflag [#allocation5], %s5398_s17 }
 0x798   : > { %p5739_p2 = pnand %p5742_p1, %p6312_p6 }
 0x79a   : > { %6167 = dma.done.wait (!%p5739_p2), %s5399_s19, 256  }
 0x79b   : > { %6169 = vsyncadd (!%p5739_p2), %s5399_s19, 4294967040  ;;  %s10671_s13 = sld [smem:[#allocation7_spill]]  ;;  %p22_p3 = scmp.ge.s32.totalorder %s6295_s27, 4  }
 0x79c   : > { %s10672_s21 = smov %s6176_s22  ;;  %s10673_s22 = smov %s6180_s23 }
 0x79d   : > { %s10675_s24 = smov %s6295_s27  ;;  %24 = sbr.rel (!%p22_p3) target bundleno = 5 (0x5), region = 172 }
 0x7a1   : > { %s10674_s23 = smov %s10671_s13 }
 0x7a4   :  { %5404 = vsyncpa [#allocation5], 1 }
 0x7a5   :  { %5406 = vsyncpa [#allocation5 + $0x1], 1 }

</bundles_post_ra>
